<compile_context>
chip_gen: v6e
topology: v6e:2x2x1
jax: 0.10.0
libtpu: 0.0.40
codegen_flags: <defaults>
</compile_context>

<pallas_src>
import functools

import numpy as np
import jax
import jax.numpy as jnp
from jax.experimental import pallas as pl
from jax.experimental.pallas import tpu as pltpu

EPS = 1e-5
K = 3        # conv kernel size
STRIDE = 2
PAD = 1


# ---------------------------------------------------------------------------
# Fused Pallas kernel: 4 x (conv3x3/s2/p1 + bias + ReLU + BatchNorm(train))
# Activation layout inside the kernel: (N*C, H*W)  -- channels on sublanes,
# spatial on lanes.  Everything stays in VMEM / vregs between layers.
# ---------------------------------------------------------------------------
def _fused_convnet_kernel(x_ref, bfold_ref,
                          s1_ref, w1_ref, p1_ref,
                          s2_ref, w2_ref, p2_ref,
                          s3_ref, w3_ref, p3_ref,
                          s4_ref, w4_ref, p4_ref,
                          o_ref, *, n_batch):
    x = x_ref[...]            # (N*C_in0, H0*W0)
    bfold = bfold_ref[...]    # (N*C, N*C): sums per-batch partial BN stats

    for s_ref, w_ref, p_ref in ((s1_ref, w1_ref, p1_ref),
                                (s2_ref, w2_ref, p2_ref),
                                (s3_ref, w3_ref, p3_ref),
                                (s4_ref, w4_ref, p4_ref)):
        n_taps, _, m_out = s_ref.shape          # (9, Hi*Wi, Ho*Wo)
        nc_out = w_ref.shape[1]                 # N*C_out
        bias = p_ref[:, 0:1]                    # (N*C_out, 1)
        gamma = p_ref[:, 1:2]
        beta = p_ref[:, 2:3]

        # Conv as 9-tap accumulation.  tap = (shift+downsample) of the input,
        # realized as a matmul with a constant 0/1 matrix (zero rows encode the
        # zero padding); then the per-tap weight, block-diagonal over batch.
        acc = jnp.zeros((nc_out, m_out), jnp.float32)
        for t in range(n_taps):
            tap = jnp.dot(x, s_ref[t], preferred_element_type=jnp.float32)
            acc = acc + jnp.dot(w_ref[t], tap,
                                preferred_element_type=jnp.float32)

        z = jnp.maximum(acc + bias, 0.0)        # bias + ReLU

        # BatchNorm (training): one-pass stats over all N*Ho*Wo positions,
        # then a single FMA.
        inv_cnt = 1.0 / float(n_batch * m_out)
        zsum = jnp.sum(z, axis=1, keepdims=True)          # (N*C, 1)
        z2sum = jnp.sum(z * z, axis=1, keepdims=True)     # (N*C, 1)
        mean = jnp.dot(bfold, zsum, preferred_element_type=jnp.float32) * inv_cnt
        ex2 = jnp.dot(bfold, z2sum, preferred_element_type=jnp.float32) * inv_cnt
        var = jnp.maximum(ex2 - mean * mean, 0.0)         # biased variance
        scale = gamma * jax.lax.rsqrt(var + EPS)
        shift = beta - mean * scale
        x = z * scale + shift                             # fused BN FMA

    o_ref[...] = x


# ---------------------------------------------------------------------------
# Host-side constant construction (done once per shape/params, outside jit).
# ---------------------------------------------------------------------------
def _out_size(h):
    return (h + 2 * PAD - K) // STRIDE + 1


def _tap_selectors(hi, wi):
    """(9, Hi*Wi, Ho*Wo) constant 0/1 matrices.

    Right-multiplying the (rows, Hi*Wi) activation by selector t = kh*3+kw
    yields x[..., STRIDE*i + kh - PAD, STRIDE*j + kw - PAD] at output column
    i*Wo + j, and zero where the window hangs over the border (the padding).
    """
    ho, wo = _out_size(hi), _out_size(wi)
    s = np.zeros((K * K, hi * wi, ho * wo), np.float32)
    for kh in range(K):
        for kw in range(K):
            t = kh * K + kw
            for i in range(ho):
                for j in range(wo):
                    h = STRIDE * i + kh - PAD
                    w = STRIDE * j + kw - PAD
                    if 0 <= h < hi and 0 <= w < wi:
                        s[t, h * wi + w, i * wo + j] = 1.0
    return jnp.asarray(s), ho, wo


def init_layer_params(key, c_in, c_out):
    """PyTorch-default-style init for Conv2d + BatchNorm2d (torch layouts)."""
    kw_, kb_ = jax.random.split(key)
    bound = 1.0 / float(np.sqrt(c_in * K * K))
    w = jax.random.uniform(kw_, (c_out, c_in, K, K), jnp.float32, -bound, bound)
    b = jax.random.uniform(kb_, (c_out,), jnp.float32, -bound, bound)
    gamma = jnp.ones((c_out,), jnp.float32)
    beta = jnp.zeros((c_out,), jnp.float32)
    return dict(w=w, b=b, gamma=gamma, beta=beta)


def prepare_conv_input_model(params, img_shape):
    """Precompute all constant kernel operands for a given input shape."""
    n, _, h, w = img_shape
    c_outs = [int(p["w"].shape[0]) for p in params]
    if len(set(c_outs)) != 1:
        raise ValueError("all layers must share C_out to share the BN fold matrix")

    operands = []
    hi, wi = h, w
    eye_n = jnp.eye(n, dtype=jnp.float32)
    for lp in params:
        c_out, c_in = int(lp["w"].shape[0]), int(lp["w"].shape[1])
        sel, ho, wo = _tap_selectors(hi, wi)
        # torch weight (C_out, C_in, kH, kW) -> per-tap (C_out, C_in), then
        # block-diagonal over the batch so one matmul handles all N samples.
        w_taps = jnp.transpose(lp["w"], (2, 3, 0, 1)).reshape(K * K, c_out, c_in)
        w_blk = jnp.stack([jnp.kron(eye_n, w_taps[t]) for t in range(K * K)])
        packed = jnp.stack([jnp.tile(lp["b"], n),
                            jnp.tile(lp["gamma"], n),
                            jnp.tile(lp["beta"], n)], axis=1)   # (N*C_out, 3)
        operands.extend([sel, w_blk, packed])
        hi, wi = ho, wo

    # (N*C, N*C) matrix summing the per-batch partial sums of each channel.
    bfold = jnp.kron(jnp.ones((n, n), jnp.float32),
                     jnp.eye(c_outs[0], dtype=jnp.float32))
    return dict(operands=operands, bfold=bfold, n=n,
                c_out=c_outs[-1], out_hw=(hi, wi))


# ---------------------------------------------------------------------------
# Forward pass: one pallas_call, pure reshapes on either side (no transposes).
# ---------------------------------------------------------------------------
def conv_input_model(img_nchw, prep):
    n, c, h, w = img_nchw.shape
    ho, wo = prep["out_hw"]
    c_out = prep["c_out"]

    x = img_nchw.reshape(n * c, h * w)   # NCHW is already (n,c)-row / (h,w)-lane major
    vmem = pl.BlockSpec(memory_space=pltpu.MemorySpace.VMEM)
    kernel = functools.partial(_fused_convnet_kernel, n_batch=n)

    out = pl.pallas_call(
        kernel,
        out_shape=jax.ShapeDtypeStruct((n * c_out, ho * wo), jnp.float32),
        in_specs=[vmem] * (2 + len(prep["operands"])),
        out_specs=vmem,
    )(x, prep["bfold"], *prep["operands"])

    return out.reshape(n, c_out, ho, wo)   # straight back to NCHW


# ---------------------------------------------------------------------------
# Pure-JAX reference (independent path) for a correctness sanity check.
# ---------------------------------------------------------------------------
def reference_forward(img, params):
    x = img
    for lp in params:
        x = jax.lax.conv_general_dilated(
            x, lp["w"], window_strides=(STRIDE, STRIDE),
            padding=((PAD, PAD), (PAD, PAD)),
            dimension_numbers=("NCHW", "OIHW", "NCHW"),
            precision=jax.lax.Precision.HIGHEST)
        x = x + lp["b"].reshape(1, -1, 1, 1)
        x = jnp.maximum(x, 0.0)
        mean = jnp.mean(x, axis=(0, 2, 3), keepdims=True)
        var = jnp.mean((x - mean) ** 2, axis=(0, 2, 3), keepdims=True)
        x = (x - mean) * jax.lax.rsqrt(var + EPS)
        x = x * lp["gamma"].reshape(1, -1, 1, 1) + lp["beta"].reshape(1, -1, 1, 1)
    return x


if __name__ == "__main__":
    key = jax.random.PRNGKey(0)
    k_img, k1, k2, k3, k4 = jax.random.split(key, 5)

    # Small input consistent with the module: batch=2, 3 channels, 16x16 image.
    img = jax.random.normal(k_img, (2, 3, 16, 16), jnp.float32)

    params = [
        init_layer_params(k1, 3, 24),
        init_layer_params(k2, 24, 24),
        init_layer_params(k3, 24, 24),
        init_layer_params(k4, 24, 24),
    ]

    prep = prepare_conv_input_model(params, img.shape)
    fwd = jax.jit(lambda x: conv_input_model(x, prep))
    out = jax.block_until_ready(fwd(img))

    # 16 -> 8 -> 4 -> 2 -> 1 spatially, 24 channels out.
    assert out.shape == (2, 24, 1, 1), out.shape
    assert bool(jnp.all(jnp.isfinite(out)))

    # Correctness check against an independent XLA reference (tolerance covers
    # MXU accumulation-order / one-pass-variance differences).
    ref = reference_forward(img, params)
    max_err = float(jnp.max(jnp.abs(out - ref)))
    assert max_err < 3e-2, f"max abs err {max_err}"

    print("KERNEL_OK")
</pallas_src>

<mosaic_0001>
module attributes {stable_mosaic.version = 11 : i64} {
  func.func @_fused_convnet_kernel(%arg0: memref<6x256xf32, #tpu.memory_space<vmem>>, %arg1: memref<48x48xf32, #tpu.memory_space<vmem>>, %arg2: memref<9x256x64xf32, #tpu.memory_space<vmem>>, %arg3: memref<9x48x6xf32, #tpu.memory_space<vmem>>, %arg4: memref<48x3xf32, #tpu.memory_space<vmem>>, %arg5: memref<9x64x16xf32, #tpu.memory_space<vmem>>, %arg6: memref<9x48x48xf32, #tpu.memory_space<vmem>>, %arg7: memref<48x3xf32, #tpu.memory_space<vmem>>, %arg8: memref<9x16x4xf32, #tpu.memory_space<vmem>>, %arg9: memref<9x48x48xf32, #tpu.memory_space<vmem>>, %arg10: memref<48x3xf32, #tpu.memory_space<vmem>>, %arg11: memref<9x4x1xf32, #tpu.memory_space<vmem>>, %arg12: memref<9x48x48xf32, #tpu.memory_space<vmem>>, %arg13: memref<48x3xf32, #tpu.memory_space<vmem>>, %arg14: memref<48x1xf32, #tpu.memory_space<vmem>>) attributes {dimension_semantics = [], scalar_prefetch = 0 : i64, scratch_operands = 0 : i64, tpu.core_type = #tpu.core_type<tc>} {
    %c0 = arith.constant 0 : index
    %c0_0 = arith.constant 0 : index
    %0 = vector.load %arg0[%c0, %c0_0] : memref<6x256xf32, #tpu.memory_space<vmem>>, vector<6x256xf32>
    %c0_1 = arith.constant 0 : index
    %c0_2 = arith.constant 0 : index
    %1 = vector.load %arg1[%c0_1, %c0_2] : memref<48x48xf32, #tpu.memory_space<vmem>>, vector<48x48xf32>
    %c0_3 = arith.constant 0 : index
    %c0_4 = arith.constant 0 : index
    %2 = vector.load %arg4[%c0_3, %c0_4] : memref<48x3xf32, #tpu.memory_space<vmem>>, vector<48x1xf32>
    %c0_5 = arith.constant 0 : index
    %c1 = arith.constant 1 : index
    %3 = vector.load %arg4[%c0_5, %c1] : memref<48x3xf32, #tpu.memory_space<vmem>>, vector<48x1xf32>
    %c0_6 = arith.constant 0 : index
    %c2 = arith.constant 2 : index
    %4 = vector.load %arg4[%c0_6, %c2] : memref<48x3xf32, #tpu.memory_space<vmem>>, vector<48x1xf32>
    %cst = arith.constant 0.000000e+00 : f32
    %5 = vector.broadcast %cst : f32 to vector<48x64xf32>
    %c0_7 = arith.constant 0 : index
    %c0_8 = arith.constant 0 : index
    %c0_9 = arith.constant 0 : index
    %6 = vector.load %arg2[%c0_7, %c0_8, %c0_9] : memref<9x256x64xf32, #tpu.memory_space<vmem>>, vector<1x256x64xf32>
    %7 = vector.shape_cast %6 : vector<1x256x64xf32> to vector<256x64xf32>
    %cst_10 = arith.constant dense<0.000000e+00> : vector<6x64xf32>
    %8 = tpu.matmul %0, %7, %cst_10 {dimension_numbers = #tpu.dot_dimension_numbers<[1], [0], [0], [1], [0, 0, 1, 1], [], []>} : vector<6x256xf32>, vector<256x64xf32>, vector<6x64xf32> -> vector<6x64xf32>
    %c0_11 = arith.constant 0 : index
    %c0_12 = arith.constant 0 : index
    %c0_13 = arith.constant 0 : index
    %9 = vector.load %arg3[%c0_11, %c0_12, %c0_13] : memref<9x48x6xf32, #tpu.memory_space<vmem>>, vector<1x48x6xf32>
    %10 = vector.shape_cast %9 : vector<1x48x6xf32> to vector<48x6xf32>
    %cst_14 = arith.constant dense<0.000000e+00> : vector<48x64xf32>
    %11 = tpu.matmul %10, %8, %cst_14 {dimension_numbers = #tpu.dot_dimension_numbers<[1], [0], [0], [1], [0, 0, 1, 1], [], []>} : vector<48x6xf32>, vector<6x64xf32>, vector<48x64xf32> -> vector<48x64xf32>
    %12 = arith.addf %5, %11 : vector<48x64xf32>
    %c1_15 = arith.constant 1 : index
    %c0_16 = arith.constant 0 : index
    %c0_17 = arith.constant 0 : index
    %13 = vector.load %arg2[%c1_15, %c0_16, %c0_17] : memref<9x256x64xf32, #tpu.memory_space<vmem>>, vector<1x256x64xf32>
    %14 = vector.shape_cast %13 : vector<1x256x64xf32> to vector<256x64xf32>
    %cst_18 = arith.constant dense<0.000000e+00> : vector<6x64xf32>
    %15 = tpu.matmul %0, %14, %cst_18 {dimension_numbers = #tpu.dot_dimension_numbers<[1], [0], [0], [1], [0, 0, 1, 1], [], []>} : vector<6x256xf32>, vector<256x64xf32>, vector<6x64xf32> -> vector<6x64xf32>
    %c1_19 = arith.constant 1 : index
    %c0_20 = arith.constant 0 : index
    %c0_21 = arith.constant 0 : index
    %16 = vector.load %arg3[%c1_19, %c0_20, %c0_21] : memref<9x48x6xf32, #tpu.memory_space<vmem>>, vector<1x48x6xf32>
    %17 = vector.shape_cast %16 : vector<1x48x6xf32> to vector<48x6xf32>
    %cst_22 = arith.constant dense<0.000000e+00> : vector<48x64xf32>
    %18 = tpu.matmul %17, %15, %cst_22 {dimension_numbers = #tpu.dot_dimension_numbers<[1], [0], [0], [1], [0, 0, 1, 1], [], []>} : vector<48x6xf32>, vector<6x64xf32>, vector<48x64xf32> -> vector<48x64xf32>
    %19 = arith.addf %12, %18 : vector<48x64xf32>
    %c2_23 = arith.constant 2 : index
    %c0_24 = arith.constant 0 : index
    %c0_25 = arith.constant 0 : index
    %20 = vector.load %arg2[%c2_23, %c0_24, %c0_25] : memref<9x256x64xf32, #tpu.memory_space<vmem>>, vector<1x256x64xf32>
    %21 = vector.shape_cast %20 : vector<1x256x64xf32> to vector<256x64xf32>
    %cst_26 = arith.constant dense<0.000000e+00> : vector<6x64xf32>
    %22 = tpu.matmul %0, %21, %cst_26 {dimension_numbers = #tpu.dot_dimension_numbers<[1], [0], [0], [1], [0, 0, 1, 1], [], []>} : vector<6x256xf32>, vector<256x64xf32>, vector<6x64xf32> -> vector<6x64xf32>
    %c2_27 = arith.constant 2 : index
    %c0_28 = arith.constant 0 : index
    %c0_29 = arith.constant 0 : index
    %23 = vector.load %arg3[%c2_27, %c0_28, %c0_29] : memref<9x48x6xf32, #tpu.memory_space<vmem>>, vector<1x48x6xf32>
    %24 = vector.shape_cast %23 : vector<1x48x6xf32> to vector<48x6xf32>
    %cst_30 = arith.constant dense<0.000000e+00> : vector<48x64xf32>
    %25 = tpu.matmul %24, %22, %cst_30 {dimension_numbers = #tpu.dot_dimension_numbers<[1], [0], [0], [1], [0, 0, 1, 1], [], []>} : vector<48x6xf32>, vector<6x64xf32>, vector<48x64xf32> -> vector<48x64xf32>
    %26 = arith.addf %19, %25 : vector<48x64xf32>
    %c3 = arith.constant 3 : index
    %c0_31 = arith.constant 0 : index
    %c0_32 = arith.constant 0 : index
    %27 = vector.load %arg2[%c3, %c0_31, %c0_32] : memref<9x256x64xf32, #tpu.memory_space<vmem>>, vector<1x256x64xf32>
    %28 = vector.shape_cast %27 : vector<1x256x64xf32> to vector<256x64xf32>
    %cst_33 = arith.constant dense<0.000000e+00> : vector<6x64xf32>
    %29 = tpu.matmul %0, %28, %cst_33 {dimension_numbers = #tpu.dot_dimension_numbers<[1], [0], [0], [1], [0, 0, 1, 1], [], []>} : vector<6x256xf32>, vector<256x64xf32>, vector<6x64xf32> -> vector<6x64xf32>
    %c3_34 = arith.constant 3 : index
    %c0_35 = arith.constant 0 : index
    %c0_36 = arith.constant 0 : index
    %30 = vector.load %arg3[%c3_34, %c0_35, %c0_36] : memref<9x48x6xf32, #tpu.memory_space<vmem>>, vector<1x48x6xf32>
    %31 = vector.shape_cast %30 : vector<1x48x6xf32> to vector<48x6xf32>
    %cst_37 = arith.constant dense<0.000000e+00> : vector<48x64xf32>
    %32 = tpu.matmul %31, %29, %cst_37 {dimension_numbers = #tpu.dot_dimension_numbers<[1], [0], [0], [1], [0, 0, 1, 1], [], []>} : vector<48x6xf32>, vector<6x64xf32>, vector<48x64xf32> -> vector<48x64xf32>
    %33 = arith.addf %26, %32 : vector<48x64xf32>
    %c4 = arith.constant 4 : index
    %c0_38 = arith.constant 0 : index
    %c0_39 = arith.constant 0 : index
    %34 = vector.load %arg2[%c4, %c0_38, %c0_39] : memref<9x256x64xf32, #tpu.memory_space<vmem>>, vector<1x256x64xf32>
    %35 = vector.shape_cast %34 : vector<1x256x64xf32> to vector<256x64xf32>
    %cst_40 = arith.constant dense<0.000000e+00> : vector<6x64xf32>
    %36 = tpu.matmul %0, %35, %cst_40 {dimension_numbers = #tpu.dot_dimension_numbers<[1], [0], [0], [1], [0, 0, 1, 1], [], []>} : vector<6x256xf32>, vector<256x64xf32>, vector<6x64xf32> -> vector<6x64xf32>
    %c4_41 = arith.constant 4 : index
    %c0_42 = arith.constant 0 : index
    %c0_43 = arith.constant 0 : index
    %37 = vector.load %arg3[%c4_41, %c0_42, %c0_43] : memref<9x48x6xf32, #tpu.memory_space<vmem>>, vector<1x48x6xf32>
    %38 = vector.shape_cast %37 : vector<1x48x6xf32> to vector<48x6xf32>
    %cst_44 = arith.constant dense<0.000000e+00> : vector<48x64xf32>
    %39 = tpu.matmul %38, %36, %cst_44 {dimension_numbers = #tpu.dot_dimension_numbers<[1], [0], [0], [1], [0, 0, 1, 1], [], []>} : vector<48x6xf32>, vector<6x64xf32>, vector<48x64xf32> -> vector<48x64xf32>
    %40 = arith.addf %33, %39 : vector<48x64xf32>
    %c5 = arith.constant 5 : index
    %c0_45 = arith.constant 0 : index
    %c0_46 = arith.constant 0 : index
    %41 = vector.load %arg2[%c5, %c0_45, %c0_46] : memref<9x256x64xf32, #tpu.memory_space<vmem>>, vector<1x256x64xf32>
    %42 = vector.shape_cast %41 : vector<1x256x64xf32> to vector<256x64xf32>
    %cst_47 = arith.constant dense<0.000000e+00> : vector<6x64xf32>
    %43 = tpu.matmul %0, %42, %cst_47 {dimension_numbers = #tpu.dot_dimension_numbers<[1], [0], [0], [1], [0, 0, 1, 1], [], []>} : vector<6x256xf32>, vector<256x64xf32>, vector<6x64xf32> -> vector<6x64xf32>
    %c5_48 = arith.constant 5 : index
    %c0_49 = arith.constant 0 : index
    %c0_50 = arith.constant 0 : index
    %44 = vector.load %arg3[%c5_48, %c0_49, %c0_50] : memref<9x48x6xf32, #tpu.memory_space<vmem>>, vector<1x48x6xf32>
    %45 = vector.shape_cast %44 : vector<1x48x6xf32> to vector<48x6xf32>
    %cst_51 = arith.constant dense<0.000000e+00> : vector<48x64xf32>
    %46 = tpu.matmul %45, %43, %cst_51 {dimension_numbers = #tpu.dot_dimension_numbers<[1], [0], [0], [1], [0, 0, 1, 1], [], []>} : vector<48x6xf32>, vector<6x64xf32>, vector<48x64xf32> -> vector<48x64xf32>
    %47 = arith.addf %40, %46 : vector<48x64xf32>
    %c6 = arith.constant 6 : index
    %c0_52 = arith.constant 0 : index
    %c0_53 = arith.constant 0 : index
    %48 = vector.load %arg2[%c6, %c0_52, %c0_53] : memref<9x256x64xf32, #tpu.memory_space<vmem>>, vector<1x256x64xf32>
    %49 = vector.shape_cast %48 : vector<1x256x64xf32> to vector<256x64xf32>
    %cst_54 = arith.constant dense<0.000000e+00> : vector<6x64xf32>
    %50 = tpu.matmul %0, %49, %cst_54 {dimension_numbers = #tpu.dot_dimension_numbers<[1], [0], [0], [1], [0, 0, 1, 1], [], []>} : vector<6x256xf32>, vector<256x64xf32>, vector<6x64xf32> -> vector<6x64xf32>
    %c6_55 = arith.constant 6 : index
    %c0_56 = arith.constant 0 : index
    %c0_57 = arith.constant 0 : index
    %51 = vector.load %arg3[%c6_55, %c0_56, %c0_57] : memref<9x48x6xf32, #tpu.memory_space<vmem>>, vector<1x48x6xf32>
    %52 = vector.shape_cast %51 : vector<1x48x6xf32> to vector<48x6xf32>
    %cst_58 = arith.constant dense<0.000000e+00> : vector<48x64xf32>
    %53 = tpu.matmul %52, %50, %cst_58 {dimension_numbers = #tpu.dot_dimension_numbers<[1], [0], [0], [1], [0, 0, 1, 1], [], []>} : vector<48x6xf32>, vector<6x64xf32>, vector<48x64xf32> -> vector<48x64xf32>
    %54 = arith.addf %47, %53 : vector<48x64xf32>
    %c7 = arith.constant 7 : index
    %c0_59 = arith.constant 0 : index
    %c0_60 = arith.constant 0 : index
    %55 = vector.load %arg2[%c7, %c0_59, %c0_60] : memref<9x256x64xf32, #tpu.memory_space<vmem>>, vector<1x256x64xf32>
    %56 = vector.shape_cast %55 : vector<1x256x64xf32> to vector<256x64xf32>
    %cst_61 = arith.constant dense<0.000000e+00> : vector<6x64xf32>
    %57 = tpu.matmul %0, %56, %cst_61 {dimension_numbers = #tpu.dot_dimension_numbers<[1], [0], [0], [1], [0, 0, 1, 1], [], []>} : vector<6x256xf32>, vector<256x64xf32>, vector<6x64xf32> -> vector<6x64xf32>
    %c7_62 = arith.constant 7 : index
    %c0_63 = arith.constant 0 : index
    %c0_64 = arith.constant 0 : index
    %58 = vector.load %arg3[%c7_62, %c0_63, %c0_64] : memref<9x48x6xf32, #tpu.memory_space<vmem>>, vector<1x48x6xf32>
    %59 = vector.shape_cast %58 : vector<1x48x6xf32> to vector<48x6xf32>
    %cst_65 = arith.constant dense<0.000000e+00> : vector<48x64xf32>
    %60 = tpu.matmul %59, %57, %cst_65 {dimension_numbers = #tpu.dot_dimension_numbers<[1], [0], [0], [1], [0, 0, 1, 1], [], []>} : vector<48x6xf32>, vector<6x64xf32>, vector<48x64xf32> -> vector<48x64xf32>
    %61 = arith.addf %54, %60 : vector<48x64xf32>
    %c8 = arith.constant 8 : index
    %c0_66 = arith.constant 0 : index
    %c0_67 = arith.constant 0 : index
    %62 = vector.load %arg2[%c8, %c0_66, %c0_67] : memref<9x256x64xf32, #tpu.memory_space<vmem>>, vector<1x256x64xf32>
    %63 = vector.shape_cast %62 : vector<1x256x64xf32> to vector<256x64xf32>
    %cst_68 = arith.constant dense<0.000000e+00> : vector<6x64xf32>
    %64 = tpu.matmul %0, %63, %cst_68 {dimension_numbers = #tpu.dot_dimension_numbers<[1], [0], [0], [1], [0, 0, 1, 1], [], []>} : vector<6x256xf32>, vector<256x64xf32>, vector<6x64xf32> -> vector<6x64xf32>
    %c8_69 = arith.constant 8 : index
    %c0_70 = arith.constant 0 : index
    %c0_71 = arith.constant 0 : index
    %65 = vector.load %arg3[%c8_69, %c0_70, %c0_71] : memref<9x48x6xf32, #tpu.memory_space<vmem>>, vector<1x48x6xf32>
    %66 = vector.shape_cast %65 : vector<1x48x6xf32> to vector<48x6xf32>
    %cst_72 = arith.constant dense<0.000000e+00> : vector<48x64xf32>
    %67 = tpu.matmul %66, %64, %cst_72 {dimension_numbers = #tpu.dot_dimension_numbers<[1], [0], [0], [1], [0, 0, 1, 1], [], []>} : vector<48x6xf32>, vector<6x64xf32>, vector<48x64xf32> -> vector<48x64xf32>
    %68 = arith.addf %61, %67 : vector<48x64xf32>
    %69 = vector.broadcast %2 : vector<48x1xf32> to vector<48x64xf32>
    %70 = arith.addf %68, %69 : vector<48x64xf32>
    %cst_73 = arith.constant 0.000000e+00 : f32
    %71 = vector.broadcast %cst_73 : f32 to vector<48x64xf32>
    %72 = arith.maximumf %70, %71 : vector<48x64xf32>
    %cst_74 = arith.constant dense<0.000000e+00> : vector<48xf32>
    %73 = vector.multi_reduction <add>, %72, %cst_74 [1] : vector<48x64xf32> to vector<48xf32>
    %74 = vector.shape_cast %73 : vector<48xf32> to vector<48x1xf32>
    %75 = arith.mulf %72, %72 : vector<48x64xf32>
    %cst_75 = arith.constant dense<0.000000e+00> : vector<48xf32>
    %76 = vector.multi_reduction <add>, %75, %cst_75 [1] : vector<48x64xf32> to vector<48xf32>
    %77 = vector.shape_cast %76 : vector<48xf32> to vector<48x1xf32>
    %cst_76 = arith.constant dense<0.000000e+00> : vector<48x1xf32>
    %78 = tpu.matmul %1, %74, %cst_76 {dimension_numbers = #tpu.dot_dimension_numbers<[1], [0], [0], [1], [0, 0, 1, 1], [], []>} : vector<48x48xf32>, vector<48x1xf32>, vector<48x1xf32> -> vector<48x1xf32>
    %cst_77 = arith.constant 7.812500e-03 : f32
    %79 = vector.broadcast %cst_77 : f32 to vector<48x1xf32>
    %80 = arith.mulf %78, %79 : vector<48x1xf32>
    %cst_78 = arith.constant dense<0.000000e+00> : vector<48x1xf32>
    %81 = tpu.matmul %1, %77, %cst_78 {dimension_numbers = #tpu.dot_dimension_numbers<[1], [0], [0], [1], [0, 0, 1, 1], [], []>} : vector<48x48xf32>, vector<48x1xf32>, vector<48x1xf32> -> vector<48x1xf32>
    %cst_79 = arith.constant 7.812500e-03 : f32
    %82 = vector.broadcast %cst_79 : f32 to vector<48x1xf32>
    %83 = arith.mulf %81, %82 : vector<48x1xf32>
    %84 = arith.mulf %80, %80 : vector<48x1xf32>
    %85 = arith.subf %83, %84 : vector<48x1xf32>
    %cst_80 = arith.constant 0.000000e+00 : f32
    %86 = vector.broadcast %cst_80 : f32 to vector<48x1xf32>
    %87 = arith.maximumf %85, %86 : vector<48x1xf32>
    %cst_81 = arith.constant 9.99999974E-6 : f32
    %88 = vector.broadcast %cst_81 : f32 to vector<48x1xf32>
    %89 = arith.addf %87, %88 : vector<48x1xf32>
    %90 = math.rsqrt %89 : vector<48x1xf32>
    %91 = arith.mulf %3, %90 : vector<48x1xf32>
    %92 = arith.mulf %80, %91 : vector<48x1xf32>
    %93 = arith.subf %4, %92 : vector<48x1xf32>
    %94 = vector.broadcast %91 : vector<48x1xf32> to vector<48x64xf32>
    %95 = arith.mulf %72, %94 : vector<48x64xf32>
    %96 = vector.broadcast %93 : vector<48x1xf32> to vector<48x64xf32>
    %97 = arith.addf %95, %96 : vector<48x64xf32>
    %c0_82 = arith.constant 0 : index
    %c0_83 = arith.constant 0 : index
    %98 = vector.load %arg7[%c0_82, %c0_83] : memref<48x3xf32, #tpu.memory_space<vmem>>, vector<48x1xf32>
    %c0_84 = arith.constant 0 : index
    %c1_85 = arith.constant 1 : index
    %99 = vector.load %arg7[%c0_84, %c1_85] : memref<48x3xf32, #tpu.memory_space<vmem>>, vector<48x1xf32>
    %c0_86 = arith.constant 0 : index
    %c2_87 = arith.constant 2 : index
    %100 = vector.load %arg7[%c0_86, %c2_87] : memref<48x3xf32, #tpu.memory_space<vmem>>, vector<48x1xf32>
    %cst_88 = arith.constant 0.000000e+00 : f32
    %101 = vector.broadcast %cst_88 : f32 to vector<48x16xf32>
    %c0_89 = arith.constant 0 : index
    %c0_90 = arith.constant 0 : index
    %c0_91 = arith.constant 0 : index
    %102 = vector.load %arg5[%c0_89, %c0_90, %c0_91] : memref<9x64x16xf32, #tpu.memory_space<vmem>>, vector<1x64x16xf32>
    %103 = vector.shape_cast %102 : vector<1x64x16xf32> to vector<64x16xf32>
    %cst_92 = arith.constant dense<0.000000e+00> : vector<48x16xf32>
    %104 = tpu.matmul %97, %103, %cst_92 {dimension_numbers = #tpu.dot_dimension_numbers<[1], [0], [0], [1], [0, 0, 1, 1], [], []>} : vector<48x64xf32>, vector<64x16xf32>, vector<48x16xf32> -> vector<48x16xf32>
    %c0_93 = arith.constant 0 : index
    %c0_94 = arith.constant 0 : index
    %c0_95 = arith.constant 0 : index
    %105 = vector.load %arg6[%c0_93, %c0_94, %c0_95] : memref<9x48x48xf32, #tpu.memory_space<vmem>>, vector<1x48x48xf32>
    %106 = vector.shape_cast %105 : vector<1x48x48xf32> to vector<48x48xf32>
    %cst_96 = arith.constant dense<0.000000e+00> : vector<48x16xf32>
    %107 = tpu.matmul %106, %104, %cst_96 {dimension_numbers = #tpu.dot_dimension_numbers<[1], [0], [0], [1], [0, 0, 1, 1], [], []>} : vector<48x48xf32>, vector<48x16xf32>, vector<48x16xf32> -> vector<48x16xf32>
    %108 = arith.addf %101, %107 : vector<48x16xf32>
    %c1_97 = arith.constant 1 : index
    %c0_98 = arith.constant 0 : index
    %c0_99 = arith.constant 0 : index
    %109 = vector.load %arg5[%c1_97, %c0_98, %c0_99] : memref<9x64x16xf32, #tpu.memory_space<vmem>>, vector<1x64x16xf32>
    %110 = vector.shape_cast %109 : vector<1x64x16xf32> to vector<64x16xf32>
    %cst_100 = arith.constant dense<0.000000e+00> : vector<48x16xf32>
    %111 = tpu.matmul %97, %110, %cst_100 {dimension_numbers = #tpu.dot_dimension_numbers<[1], [0], [0], [1], [0, 0, 1, 1], [], []>} : vector<48x64xf32>, vector<64x16xf32>, vector<48x16xf32> -> vector<48x16xf32>
    %c1_101 = arith.constant 1 : index
    %c0_102 = arith.constant 0 : index
    %c0_103 = arith.constant 0 : index
    %112 = vector.load %arg6[%c1_101, %c0_102, %c0_103] : memref<9x48x48xf32, #tpu.memory_space<vmem>>, vector<1x48x48xf32>
    %113 = vector.shape_cast %112 : vector<1x48x48xf32> to vector<48x48xf32>
    %cst_104 = arith.constant dense<0.000000e+00> : vector<48x16xf32>
    %114 = tpu.matmul %113, %111, %cst_104 {dimension_numbers = #tpu.dot_dimension_numbers<[1], [0], [0], [1], [0, 0, 1, 1], [], []>} : vector<48x48xf32>, vector<48x16xf32>, vector<48x16xf32> -> vector<48x16xf32>
    %115 = arith.addf %108, %114 : vector<48x16xf32>
    %c2_105 = arith.constant 2 : index
    %c0_106 = arith.constant 0 : index
    %c0_107 = arith.constant 0 : index
    %116 = vector.load %arg5[%c2_105, %c0_106, %c0_107] : memref<9x64x16xf32, #tpu.memory_space<vmem>>, vector<1x64x16xf32>
    %117 = vector.shape_cast %116 : vector<1x64x16xf32> to vector<64x16xf32>
    %cst_108 = arith.constant dense<0.000000e+00> : vector<48x16xf32>
    %118 = tpu.matmul %97, %117, %cst_108 {dimension_numbers = #tpu.dot_dimension_numbers<[1], [0], [0], [1], [0, 0, 1, 1], [], []>} : vector<48x64xf32>, vector<64x16xf32>, vector<48x16xf32> -> vector<48x16xf32>
    %c2_109 = arith.constant 2 : index
    %c0_110 = arith.constant 0 : index
    %c0_111 = arith.constant 0 : index
    %119 = vector.load %arg6[%c2_109, %c0_110, %c0_111] : memref<9x48x48xf32, #tpu.memory_space<vmem>>, vector<1x48x48xf32>
    %120 = vector.shape_cast %119 : vector<1x48x48xf32> to vector<48x48xf32>
    %cst_112 = arith.constant dense<0.000000e+00> : vector<48x16xf32>
    %121 = tpu.matmul %120, %118, %cst_112 {dimension_numbers = #tpu.dot_dimension_numbers<[1], [0], [0], [1], [0, 0, 1, 1], [], []>} : vector<48x48xf32>, vector<48x16xf32>, vector<48x16xf32> -> vector<48x16xf32>
    %122 = arith.addf %115, %121 : vector<48x16xf32>
    %c3_113 = arith.constant 3 : index
    %c0_114 = arith.constant 0 : index
    %c0_115 = arith.constant 0 : index
    %123 = vector.load %arg5[%c3_113, %c0_114, %c0_115] : memref<9x64x16xf32, #tpu.memory_space<vmem>>, vector<1x64x16xf32>
    %124 = vector.shape_cast %123 : vector<1x64x16xf32> to vector<64x16xf32>
    %cst_116 = arith.constant dense<0.000000e+00> : vector<48x16xf32>
    %125 = tpu.matmul %97, %124, %cst_116 {dimension_numbers = #tpu.dot_dimension_numbers<[1], [0], [0], [1], [0, 0, 1, 1], [], []>} : vector<48x64xf32>, vector<64x16xf32>, vector<48x16xf32> -> vector<48x16xf32>
    %c3_117 = arith.constant 3 : index
    %c0_118 = arith.constant 0 : index
    %c0_119 = arith.constant 0 : index
    %126 = vector.load %arg6[%c3_117, %c0_118, %c0_119] : memref<9x48x48xf32, #tpu.memory_space<vmem>>, vector<1x48x48xf32>
    %127 = vector.shape_cast %126 : vector<1x48x48xf32> to vector<48x48xf32>
    %cst_120 = arith.constant dense<0.000000e+00> : vector<48x16xf32>
    %128 = tpu.matmul %127, %125, %cst_120 {dimension_numbers = #tpu.dot_dimension_numbers<[1], [0], [0], [1], [0, 0, 1, 1], [], []>} : vector<48x48xf32>, vector<48x16xf32>, vector<48x16xf32> -> vector<48x16xf32>
    %129 = arith.addf %122, %128 : vector<48x16xf32>
    %c4_121 = arith.constant 4 : index
    %c0_122 = arith.constant 0 : index
    %c0_123 = arith.constant 0 : index
    %130 = vector.load %arg5[%c4_121, %c0_122, %c0_123] : memref<9x64x16xf32, #tpu.memory_space<vmem>>, vector<1x64x16xf32>
    %131 = vector.shape_cast %130 : vector<1x64x16xf32> to vector<64x16xf32>
    %cst_124 = arith.constant dense<0.000000e+00> : vector<48x16xf32>
    %132 = tpu.matmul %97, %131, %cst_124 {dimension_numbers = #tpu.dot_dimension_numbers<[1], [0], [0], [1], [0, 0, 1, 1], [], []>} : vector<48x64xf32>, vector<64x16xf32>, vector<48x16xf32> -> vector<48x16xf32>
    %c4_125 = arith.constant 4 : index
    %c0_126 = arith.constant 0 : index
    %c0_127 = arith.constant 0 : index
    %133 = vector.load %arg6[%c4_125, %c0_126, %c0_127] : memref<9x48x48xf32, #tpu.memory_space<vmem>>, vector<1x48x48xf32>
    %134 = vector.shape_cast %133 : vector<1x48x48xf32> to vector<48x48xf32>
    %cst_128 = arith.constant dense<0.000000e+00> : vector<48x16xf32>
    %135 = tpu.matmul %134, %132, %cst_128 {dimension_numbers = #tpu.dot_dimension_numbers<[1], [0], [0], [1], [0, 0, 1, 1], [], []>} : vector<48x48xf32>, vector<48x16xf32>, vector<48x16xf32> -> vector<48x16xf32>
    %136 = arith.addf %129, %135 : vector<48x16xf32>
    %c5_129 = arith.constant 5 : index
    %c0_130 = arith.constant 0 : index
    %c0_131 = arith.constant 0 : index
    %137 = vector.load %arg5[%c5_129, %c0_130, %c0_131] : memref<9x64x16xf32, #tpu.memory_space<vmem>>, vector<1x64x16xf32>
    %138 = vector.shape_cast %137 : vector<1x64x16xf32> to vector<64x16xf32>
    %cst_132 = arith.constant dense<0.000000e+00> : vector<48x16xf32>
    %139 = tpu.matmul %97, %138, %cst_132 {dimension_numbers = #tpu.dot_dimension_numbers<[1], [0], [0], [1], [0, 0, 1, 1], [], []>} : vector<48x64xf32>, vector<64x16xf32>, vector<48x16xf32> -> vector<48x16xf32>
    %c5_133 = arith.constant 5 : index
    %c0_134 = arith.constant 0 : index
    %c0_135 = arith.constant 0 : index
    %140 = vector.load %arg6[%c5_133, %c0_134, %c0_135] : memref<9x48x48xf32, #tpu.memory_space<vmem>>, vector<1x48x48xf32>
    %141 = vector.shape_cast %140 : vector<1x48x48xf32> to vector<48x48xf32>
    %cst_136 = arith.constant dense<0.000000e+00> : vector<48x16xf32>
    %142 = tpu.matmul %141, %139, %cst_136 {dimension_numbers = #tpu.dot_dimension_numbers<[1], [0], [0], [1], [0, 0, 1, 1], [], []>} : vector<48x48xf32>, vector<48x16xf32>, vector<48x16xf32> -> vector<48x16xf32>
    %143 = arith.addf %136, %142 : vector<48x16xf32>
    %c6_137 = arith.constant 6 : index
    %c0_138 = arith.constant 0 : index
    %c0_139 = arith.constant 0 : index
    %144 = vector.load %arg5[%c6_137, %c0_138, %c0_139] : memref<9x64x16xf32, #tpu.memory_space<vmem>>, vector<1x64x16xf32>
    %145 = vector.shape_cast %144 : vector<1x64x16xf32> to vector<64x16xf32>
    %cst_140 = arith.constant dense<0.000000e+00> : vector<48x16xf32>
    %146 = tpu.matmul %97, %145, %cst_140 {dimension_numbers = #tpu.dot_dimension_numbers<[1], [0], [0], [1], [0, 0, 1, 1], [], []>} : vector<48x64xf32>, vector<64x16xf32>, vector<48x16xf32> -> vector<48x16xf32>
    %c6_141 = arith.constant 6 : index
    %c0_142 = arith.constant 0 : index
    %c0_143 = arith.constant 0 : index
    %147 = vector.load %arg6[%c6_141, %c0_142, %c0_143] : memref<9x48x48xf32, #tpu.memory_space<vmem>>, vector<1x48x48xf32>
    %148 = vector.shape_cast %147 : vector<1x48x48xf32> to vector<48x48xf32>
    %cst_144 = arith.constant dense<0.000000e+00> : vector<48x16xf32>
    %149 = tpu.matmul %148, %146, %cst_144 {dimension_numbers = #tpu.dot_dimension_numbers<[1], [0], [0], [1], [0, 0, 1, 1], [], []>} : vector<48x48xf32>, vector<48x16xf32>, vector<48x16xf32> -> vector<48x16xf32>
    %150 = arith.addf %143, %149 : vector<48x16xf32>
    %c7_145 = arith.constant 7 : index
    %c0_146 = arith.constant 0 : index
    %c0_147 = arith.constant 0 : index
    %151 = vector.load %arg5[%c7_145, %c0_146, %c0_147] : memref<9x64x16xf32, #tpu.memory_space<vmem>>, vector<1x64x16xf32>
    %152 = vector.shape_cast %151 : vector<1x64x16xf32> to vector<64x16xf32>
    %cst_148 = arith.constant dense<0.000000e+00> : vector<48x16xf32>
    %153 = tpu.matmul %97, %152, %cst_148 {dimension_numbers = #tpu.dot_dimension_numbers<[1], [0], [0], [1], [0, 0, 1, 1], [], []>} : vector<48x64xf32>, vector<64x16xf32>, vector<48x16xf32> -> vector<48x16xf32>
    %c7_149 = arith.constant 7 : index
    %c0_150 = arith.constant 0 : index
    %c0_151 = arith.constant 0 : index
    %154 = vector.load %arg6[%c7_149, %c0_150, %c0_151] : memref<9x48x48xf32, #tpu.memory_space<vmem>>, vector<1x48x48xf32>
    %155 = vector.shape_cast %154 : vector<1x48x48xf32> to vector<48x48xf32>
    %cst_152 = arith.constant dense<0.000000e+00> : vector<48x16xf32>
    %156 = tpu.matmul %155, %153, %cst_152 {dimension_numbers = #tpu.dot_dimension_numbers<[1], [0], [0], [1], [0, 0, 1, 1], [], []>} : vector<48x48xf32>, vector<48x16xf32>, vector<48x16xf32> -> vector<48x16xf32>
    %157 = arith.addf %150, %156 : vector<48x16xf32>
    %c8_153 = arith.constant 8 : index
    %c0_154 = arith.constant 0 : index
    %c0_155 = arith.constant 0 : index
    %158 = vector.load %arg5[%c8_153, %c0_154, %c0_155] : memref<9x64x16xf32, #tpu.memory_space<vmem>>, vector<1x64x16xf32>
    %159 = vector.shape_cast %158 : vector<1x64x16xf32> to vector<64x16xf32>
    %cst_156 = arith.constant dense<0.000000e+00> : vector<48x16xf32>
    %160 = tpu.matmul %97, %159, %cst_156 {dimension_numbers = #tpu.dot_dimension_numbers<[1], [0], [0], [1], [0, 0, 1, 1], [], []>} : vector<48x64xf32>, vector<64x16xf32>, vector<48x16xf32> -> vector<48x16xf32>
    %c8_157 = arith.constant 8 : index
    %c0_158 = arith.constant 0 : index
    %c0_159 = arith.constant 0 : index
    %161 = vector.load %arg6[%c8_157, %c0_158, %c0_159] : memref<9x48x48xf32, #tpu.memory_space<vmem>>, vector<1x48x48xf32>
    %162 = vector.shape_cast %161 : vector<1x48x48xf32> to vector<48x48xf32>
    %cst_160 = arith.constant dense<0.000000e+00> : vector<48x16xf32>
    %163 = tpu.matmul %162, %160, %cst_160 {dimension_numbers = #tpu.dot_dimension_numbers<[1], [0], [0], [1], [0, 0, 1, 1], [], []>} : vector<48x48xf32>, vector<48x16xf32>, vector<48x16xf32> -> vector<48x16xf32>
    %164 = arith.addf %157, %163 : vector<48x16xf32>
    %165 = vector.broadcast %98 : vector<48x1xf32> to vector<48x16xf32>
    %166 = arith.addf %164, %165 : vector<48x16xf32>
    %cst_161 = arith.constant 0.000000e+00 : f32
    %167 = vector.broadcast %cst_161 : f32 to vector<48x16xf32>
    %168 = arith.maximumf %166, %167 : vector<48x16xf32>
    %cst_162 = arith.constant dense<0.000000e+00> : vector<48xf32>
    %169 = vector.multi_reduction <add>, %168, %cst_162 [1] : vector<48x16xf32> to vector<48xf32>
    %170 = vector.shape_cast %169 : vector<48xf32> to vector<48x1xf32>
    %171 = arith.mulf %168, %168 : vector<48x16xf32>
    %cst_163 = arith.constant dense<0.000000e+00> : vector<48xf32>
    %172 = vector.multi_reduction <add>, %171, %cst_163 [1] : vector<48x16xf32> to vector<48xf32>
    %173 = vector.shape_cast %172 : vector<48xf32> to vector<48x1xf32>
    %cst_164 = arith.constant dense<0.000000e+00> : vector<48x1xf32>
    %174 = tpu.matmul %1, %170, %cst_164 {dimension_numbers = #tpu.dot_dimension_numbers<[1], [0], [0], [1], [0, 0, 1, 1], [], []>} : vector<48x48xf32>, vector<48x1xf32>, vector<48x1xf32> -> vector<48x1xf32>
    %cst_165 = arith.constant 3.125000e-02 : f32
    %175 = vector.broadcast %cst_165 : f32 to vector<48x1xf32>
    %176 = arith.mulf %174, %175 : vector<48x1xf32>
    %cst_166 = arith.constant dense<0.000000e+00> : vector<48x1xf32>
    %177 = tpu.matmul %1, %173, %cst_166 {dimension_numbers = #tpu.dot_dimension_numbers<[1], [0], [0], [1], [0, 0, 1, 1], [], []>} : vector<48x48xf32>, vector<48x1xf32>, vector<48x1xf32> -> vector<48x1xf32>
    %cst_167 = arith.constant 3.125000e-02 : f32
    %178 = vector.broadcast %cst_167 : f32 to vector<48x1xf32>
    %179 = arith.mulf %177, %178 : vector<48x1xf32>
    %180 = arith.mulf %176, %176 : vector<48x1xf32>
    %181 = arith.subf %179, %180 : vector<48x1xf32>
    %cst_168 = arith.constant 0.000000e+00 : f32
    %182 = vector.broadcast %cst_168 : f32 to vector<48x1xf32>
    %183 = arith.maximumf %181, %182 : vector<48x1xf32>
    %cst_169 = arith.constant 9.99999974E-6 : f32
    %184 = vector.broadcast %cst_169 : f32 to vector<48x1xf32>
    %185 = arith.addf %183, %184 : vector<48x1xf32>
    %186 = math.rsqrt %185 : vector<48x1xf32>
    %187 = arith.mulf %99, %186 : vector<48x1xf32>
    %188 = arith.mulf %176, %187 : vector<48x1xf32>
    %189 = arith.subf %100, %188 : vector<48x1xf32>
    %190 = vector.broadcast %187 : vector<48x1xf32> to vector<48x16xf32>
    %191 = arith.mulf %168, %190 : vector<48x16xf32>
    %192 = vector.broadcast %189 : vector<48x1xf32> to vector<48x16xf32>
    %193 = arith.addf %191, %192 : vector<48x16xf32>
    %c0_170 = arith.constant 0 : index
    %c0_171 = arith.constant 0 : index
    %194 = vector.load %arg10[%c0_170, %c0_171] : memref<48x3xf32, #tpu.memory_space<vmem>>, vector<48x1xf32>
    %c0_172 = arith.constant 0 : index
    %c1_173 = arith.constant 1 : index
    %195 = vector.load %arg10[%c0_172, %c1_173] : memref<48x3xf32, #tpu.memory_space<vmem>>, vector<48x1xf32>
    %c0_174 = arith.constant 0 : index
    %c2_175 = arith.constant 2 : index
    %196 = vector.load %arg10[%c0_174, %c2_175] : memref<48x3xf32, #tpu.memory_space<vmem>>, vector<48x1xf32>
    %cst_176 = arith.constant 0.000000e+00 : f32
    %197 = vector.broadcast %cst_176 : f32 to vector<48x4xf32>
    %c0_177 = arith.constant 0 : index
    %c0_178 = arith.constant 0 : index
    %c0_179 = arith.constant 0 : index
    %198 = vector.load %arg8[%c0_177, %c0_178, %c0_179] : memref<9x16x4xf32, #tpu.memory_space<vmem>>, vector<1x16x4xf32>
    %199 = vector.shape_cast %198 : vector<1x16x4xf32> to vector<16x4xf32>
    %cst_180 = arith.constant dense<0.000000e+00> : vector<48x4xf32>
    %200 = tpu.matmul %193, %199, %cst_180 {dimension_numbers = #tpu.dot_dimension_numbers<[1], [0], [0], [1], [0, 0, 1, 1], [], []>} : vector<48x16xf32>, vector<16x4xf32>, vector<48x4xf32> -> vector<48x4xf32>
    %c0_181 = arith.constant 0 : index
    %c0_182 = arith.constant 0 : index
    %c0_183 = arith.constant 0 : index
    %201 = vector.load %arg9[%c0_181, %c0_182, %c0_183] : memref<9x48x48xf32, #tpu.memory_space<vmem>>, vector<1x48x48xf32>
    %202 = vector.shape_cast %201 : vector<1x48x48xf32> to vector<48x48xf32>
    %cst_184 = arith.constant dense<0.000000e+00> : vector<48x4xf32>
    %203 = tpu.matmul %202, %200, %cst_184 {dimension_numbers = #tpu.dot_dimension_numbers<[1], [0], [0], [1], [0, 0, 1, 1], [], []>} : vector<48x48xf32>, vector<48x4xf32>, vector<48x4xf32> -> vector<48x4xf32>
    %204 = arith.addf %197, %203 : vector<48x4xf32>
    %c1_185 = arith.constant 1 : index
    %c0_186 = arith.constant 0 : index
    %c0_187 = arith.constant 0 : index
    %205 = vector.load %arg8[%c1_185, %c0_186, %c0_187] : memref<9x16x4xf32, #tpu.memory_space<vmem>>, vector<1x16x4xf32>
    %206 = vector.shape_cast %205 : vector<1x16x4xf32> to vector<16x4xf32>
    %cst_188 = arith.constant dense<0.000000e+00> : vector<48x4xf32>
    %207 = tpu.matmul %193, %206, %cst_188 {dimension_numbers = #tpu.dot_dimension_numbers<[1], [0], [0], [1], [0, 0, 1, 1], [], []>} : vector<48x16xf32>, vector<16x4xf32>, vector<48x4xf32> -> vector<48x4xf32>
    %c1_189 = arith.constant 1 : index
    %c0_190 = arith.constant 0 : index
    %c0_191 = arith.constant 0 : index
    %208 = vector.load %arg9[%c1_189, %c0_190, %c0_191] : memref<9x48x48xf32, #tpu.memory_space<vmem>>, vector<1x48x48xf32>
    %209 = vector.shape_cast %208 : vector<1x48x48xf32> to vector<48x48xf32>
    %cst_192 = arith.constant dense<0.000000e+00> : vector<48x4xf32>
    %210 = tpu.matmul %209, %207, %cst_192 {dimension_numbers = #tpu.dot_dimension_numbers<[1], [0], [0], [1], [0, 0, 1, 1], [], []>} : vector<48x48xf32>, vector<48x4xf32>, vector<48x4xf32> -> vector<48x4xf32>
    %211 = arith.addf %204, %210 : vector<48x4xf32>
    %c2_193 = arith.constant 2 : index
    %c0_194 = arith.constant 0 : index
    %c0_195 = arith.constant 0 : index
    %212 = vector.load %arg8[%c2_193, %c0_194, %c0_195] : memref<9x16x4xf32, #tpu.memory_space<vmem>>, vector<1x16x4xf32>
    %213 = vector.shape_cast %212 : vector<1x16x4xf32> to vector<16x4xf32>
    %cst_196 = arith.constant dense<0.000000e+00> : vector<48x4xf32>
    %214 = tpu.matmul %193, %213, %cst_196 {dimension_numbers = #tpu.dot_dimension_numbers<[1], [0], [0], [1], [0, 0, 1, 1], [], []>} : vector<48x16xf32>, vector<16x4xf32>, vector<48x4xf32> -> vector<48x4xf32>
    %c2_197 = arith.constant 2 : index
    %c0_198 = arith.constant 0 : index
    %c0_199 = arith.constant 0 : index
    %215 = vector.load %arg9[%c2_197, %c0_198, %c0_199] : memref<9x48x48xf32, #tpu.memory_space<vmem>>, vector<1x48x48xf32>
    %216 = vector.shape_cast %215 : vector<1x48x48xf32> to vector<48x48xf32>
    %cst_200 = arith.constant dense<0.000000e+00> : vector<48x4xf32>
    %217 = tpu.matmul %216, %214, %cst_200 {dimension_numbers = #tpu.dot_dimension_numbers<[1], [0], [0], [1], [0, 0, 1, 1], [], []>} : vector<48x48xf32>, vector<48x4xf32>, vector<48x4xf32> -> vector<48x4xf32>
    %218 = arith.addf %211, %217 : vector<48x4xf32>
    %c3_201 = arith.constant 3 : index
    %c0_202 = arith.constant 0 : index
    %c0_203 = arith.constant 0 : index
    %219 = vector.load %arg8[%c3_201, %c0_202, %c0_203] : memref<9x16x4xf32, #tpu.memory_space<vmem>>, vector<1x16x4xf32>
    %220 = vector.shape_cast %219 : vector<1x16x4xf32> to vector<16x4xf32>
    %cst_204 = arith.constant dense<0.000000e+00> : vector<48x4xf32>
    %221 = tpu.matmul %193, %220, %cst_204 {dimension_numbers = #tpu.dot_dimension_numbers<[1], [0], [0], [1], [0, 0, 1, 1], [], []>} : vector<48x16xf32>, vector<16x4xf32>, vector<48x4xf32> -> vector<48x4xf32>
    %c3_205 = arith.constant 3 : index
    %c0_206 = arith.constant 0 : index
    %c0_207 = arith.constant 0 : index
    %222 = vector.load %arg9[%c3_205, %c0_206, %c0_207] : memref<9x48x48xf32, #tpu.memory_space<vmem>>, vector<1x48x48xf32>
    %223 = vector.shape_cast %222 : vector<1x48x48xf32> to vector<48x48xf32>
    %cst_208 = arith.constant dense<0.000000e+00> : vector<48x4xf32>
    %224 = tpu.matmul %223, %221, %cst_208 {dimension_numbers = #tpu.dot_dimension_numbers<[1], [0], [0], [1], [0, 0, 1, 1], [], []>} : vector<48x48xf32>, vector<48x4xf32>, vector<48x4xf32> -> vector<48x4xf32>
    %225 = arith.addf %218, %224 : vector<48x4xf32>
    %c4_209 = arith.constant 4 : index
    %c0_210 = arith.constant 0 : index
    %c0_211 = arith.constant 0 : index
    %226 = vector.load %arg8[%c4_209, %c0_210, %c0_211] : memref<9x16x4xf32, #tpu.memory_space<vmem>>, vector<1x16x4xf32>
    %227 = vector.shape_cast %226 : vector<1x16x4xf32> to vector<16x4xf32>
    %cst_212 = arith.constant dense<0.000000e+00> : vector<48x4xf32>
    %228 = tpu.matmul %193, %227, %cst_212 {dimension_numbers = #tpu.dot_dimension_numbers<[1], [0], [0], [1], [0, 0, 1, 1], [], []>} : vector<48x16xf32>, vector<16x4xf32>, vector<48x4xf32> -> vector<48x4xf32>
    %c4_213 = arith.constant 4 : index
    %c0_214 = arith.constant 0 : index
    %c0_215 = arith.constant 0 : index
    %229 = vector.load %arg9[%c4_213, %c0_214, %c0_215] : memref<9x48x48xf32, #tpu.memory_space<vmem>>, vector<1x48x48xf32>
    %230 = vector.shape_cast %229 : vector<1x48x48xf32> to vector<48x48xf32>
    %cst_216 = arith.constant dense<0.000000e+00> : vector<48x4xf32>
    %231 = tpu.matmul %230, %228, %cst_216 {dimension_numbers = #tpu.dot_dimension_numbers<[1], [0], [0], [1], [0, 0, 1, 1], [], []>} : vector<48x48xf32>, vector<48x4xf32>, vector<48x4xf32> -> vector<48x4xf32>
    %232 = arith.addf %225, %231 : vector<48x4xf32>
    %c5_217 = arith.constant 5 : index
    %c0_218 = arith.constant 0 : index
    %c0_219 = arith.constant 0 : index
    %233 = vector.load %arg8[%c5_217, %c0_218, %c0_219] : memref<9x16x4xf32, #tpu.memory_space<vmem>>, vector<1x16x4xf32>
    %234 = vector.shape_cast %233 : vector<1x16x4xf32> to vector<16x4xf32>
    %cst_220 = arith.constant dense<0.000000e+00> : vector<48x4xf32>
    %235 = tpu.matmul %193, %234, %cst_220 {dimension_numbers = #tpu.dot_dimension_numbers<[1], [0], [0], [1], [0, 0, 1, 1], [], []>} : vector<48x16xf32>, vector<16x4xf32>, vector<48x4xf32> -> vector<48x4xf32>
    %c5_221 = arith.constant 5 : index
    %c0_222 = arith.constant 0 : index
    %c0_223 = arith.constant 0 : index
    %236 = vector.load %arg9[%c5_221, %c0_222, %c0_223] : memref<9x48x48xf32, #tpu.memory_space<vmem>>, vector<1x48x48xf32>
    %237 = vector.shape_cast %236 : vector<1x48x48xf32> to vector<48x48xf32>
    %cst_224 = arith.constant dense<0.000000e+00> : vector<48x4xf32>
    %238 = tpu.matmul %237, %235, %cst_224 {dimension_numbers = #tpu.dot_dimension_numbers<[1], [0], [0], [1], [0, 0, 1, 1], [], []>} : vector<48x48xf32>, vector<48x4xf32>, vector<48x4xf32> -> vector<48x4xf32>
    %239 = arith.addf %232, %238 : vector<48x4xf32>
    %c6_225 = arith.constant 6 : index
    %c0_226 = arith.constant 0 : index
    %c0_227 = arith.constant 0 : index
    %240 = vector.load %arg8[%c6_225, %c0_226, %c0_227] : memref<9x16x4xf32, #tpu.memory_space<vmem>>, vector<1x16x4xf32>
    %241 = vector.shape_cast %240 : vector<1x16x4xf32> to vector<16x4xf32>
    %cst_228 = arith.constant dense<0.000000e+00> : vector<48x4xf32>
    %242 = tpu.matmul %193, %241, %cst_228 {dimension_numbers = #tpu.dot_dimension_numbers<[1], [0], [0], [1], [0, 0, 1, 1], [], []>} : vector<48x16xf32>, vector<16x4xf32>, vector<48x4xf32> -> vector<48x4xf32>
    %c6_229 = arith.constant 6 : index
    %c0_230 = arith.constant 0 : index
    %c0_231 = arith.constant 0 : index
    %243 = vector.load %arg9[%c6_229, %c0_230, %c0_231] : memref<9x48x48xf32, #tpu.memory_space<vmem>>, vector<1x48x48xf32>
    %244 = vector.shape_cast %243 : vector<1x48x48xf32> to vector<48x48xf32>
    %cst_232 = arith.constant dense<0.000000e+00> : vector<48x4xf32>
    %245 = tpu.matmul %244, %242, %cst_232 {dimension_numbers = #tpu.dot_dimension_numbers<[1], [0], [0], [1], [0, 0, 1, 1], [], []>} : vector<48x48xf32>, vector<48x4xf32>, vector<48x4xf32> -> vector<48x4xf32>
    %246 = arith.addf %239, %245 : vector<48x4xf32>
    %c7_233 = arith.constant 7 : index
    %c0_234 = arith.constant 0 : index
    %c0_235 = arith.constant 0 : index
    %247 = vector.load %arg8[%c7_233, %c0_234, %c0_235] : memref<9x16x4xf32, #tpu.memory_space<vmem>>, vector<1x16x4xf32>
    %248 = vector.shape_cast %247 : vector<1x16x4xf32> to vector<16x4xf32>
    %cst_236 = arith.constant dense<0.000000e+00> : vector<48x4xf32>
    %249 = tpu.matmul %193, %248, %cst_236 {dimension_numbers = #tpu.dot_dimension_numbers<[1], [0], [0], [1], [0, 0, 1, 1], [], []>} : vector<48x16xf32>, vector<16x4xf32>, vector<48x4xf32> -> vector<48x4xf32>
    %c7_237 = arith.constant 7 : index
    %c0_238 = arith.constant 0 : index
    %c0_239 = arith.constant 0 : index
    %250 = vector.load %arg9[%c7_237, %c0_238, %c0_239] : memref<9x48x48xf32, #tpu.memory_space<vmem>>, vector<1x48x48xf32>
    %251 = vector.shape_cast %250 : vector<1x48x48xf32> to vector<48x48xf32>
    %cst_240 = arith.constant dense<0.000000e+00> : vector<48x4xf32>
    %252 = tpu.matmul %251, %249, %cst_240 {dimension_numbers = #tpu.dot_dimension_numbers<[1], [0], [0], [1], [0, 0, 1, 1], [], []>} : vector<48x48xf32>, vector<48x4xf32>, vector<48x4xf32> -> vector<48x4xf32>
    %253 = arith.addf %246, %252 : vector<48x4xf32>
    %c8_241 = arith.constant 8 : index
    %c0_242 = arith.constant 0 : index
    %c0_243 = arith.constant 0 : index
    %254 = vector.load %arg8[%c8_241, %c0_242, %c0_243] : memref<9x16x4xf32, #tpu.memory_space<vmem>>, vector<1x16x4xf32>
    %255 = vector.shape_cast %254 : vector<1x16x4xf32> to vector<16x4xf32>
    %cst_244 = arith.constant dense<0.000000e+00> : vector<48x4xf32>
    %256 = tpu.matmul %193, %255, %cst_244 {dimension_numbers = #tpu.dot_dimension_numbers<[1], [0], [0], [1], [0, 0, 1, 1], [], []>} : vector<48x16xf32>, vector<16x4xf32>, vector<48x4xf32> -> vector<48x4xf32>
    %c8_245 = arith.constant 8 : index
    %c0_246 = arith.constant 0 : index
    %c0_247 = arith.constant 0 : index
    %257 = vector.load %arg9[%c8_245, %c0_246, %c0_247] : memref<9x48x48xf32, #tpu.memory_space<vmem>>, vector<1x48x48xf32>
    %258 = vector.shape_cast %257 : vector<1x48x48xf32> to vector<48x48xf32>
    %cst_248 = arith.constant dense<0.000000e+00> : vector<48x4xf32>
    %259 = tpu.matmul %258, %256, %cst_248 {dimension_numbers = #tpu.dot_dimension_numbers<[1], [0], [0], [1], [0, 0, 1, 1], [], []>} : vector<48x48xf32>, vector<48x4xf32>, vector<48x4xf32> -> vector<48x4xf32>
    %260 = arith.addf %253, %259 : vector<48x4xf32>
    %261 = vector.broadcast %194 : vector<48x1xf32> to vector<48x4xf32>
    %262 = arith.addf %260, %261 : vector<48x4xf32>
    %cst_249 = arith.constant 0.000000e+00 : f32
    %263 = vector.broadcast %cst_249 : f32 to vector<48x4xf32>
    %264 = arith.maximumf %262, %263 : vector<48x4xf32>
    %cst_250 = arith.constant dense<0.000000e+00> : vector<48xf32>
    %265 = vector.multi_reduction <add>, %264, %cst_250 [1] : vector<48x4xf32> to vector<48xf32>
    %266 = vector.shape_cast %265 : vector<48xf32> to vector<48x1xf32>
    %267 = arith.mulf %264, %264 : vector<48x4xf32>
    %cst_251 = arith.constant dense<0.000000e+00> : vector<48xf32>
    %268 = vector.multi_reduction <add>, %267, %cst_251 [1] : vector<48x4xf32> to vector<48xf32>
    %269 = vector.shape_cast %268 : vector<48xf32> to vector<48x1xf32>
    %cst_252 = arith.constant dense<0.000000e+00> : vector<48x1xf32>
    %270 = tpu.matmul %1, %266, %cst_252 {dimension_numbers = #tpu.dot_dimension_numbers<[1], [0], [0], [1], [0, 0, 1, 1], [], []>} : vector<48x48xf32>, vector<48x1xf32>, vector<48x1xf32> -> vector<48x1xf32>
    %cst_253 = arith.constant 1.250000e-01 : f32
    %271 = vector.broadcast %cst_253 : f32 to vector<48x1xf32>
    %272 = arith.mulf %270, %271 : vector<48x1xf32>
    %cst_254 = arith.constant dense<0.000000e+00> : vector<48x1xf32>
    %273 = tpu.matmul %1, %269, %cst_254 {dimension_numbers = #tpu.dot_dimension_numbers<[1], [0], [0], [1], [0, 0, 1, 1], [], []>} : vector<48x48xf32>, vector<48x1xf32>, vector<48x1xf32> -> vector<48x1xf32>
    %cst_255 = arith.constant 1.250000e-01 : f32
    %274 = vector.broadcast %cst_255 : f32 to vector<48x1xf32>
    %275 = arith.mulf %273, %274 : vector<48x1xf32>
    %276 = arith.mulf %272, %272 : vector<48x1xf32>
    %277 = arith.subf %275, %276 : vector<48x1xf32>
    %cst_256 = arith.constant 0.000000e+00 : f32
    %278 = vector.broadcast %cst_256 : f32 to vector<48x1xf32>
    %279 = arith.maximumf %277, %278 : vector<48x1xf32>
    %cst_257 = arith.constant 9.99999974E-6 : f32
    %280 = vector.broadcast %cst_257 : f32 to vector<48x1xf32>
    %281 = arith.addf %279, %280 : vector<48x1xf32>
    %282 = math.rsqrt %281 : vector<48x1xf32>
    %283 = arith.mulf %195, %282 : vector<48x1xf32>
    %284 = arith.mulf %272, %283 : vector<48x1xf32>
    %285 = arith.subf %196, %284 : vector<48x1xf32>
    %286 = vector.broadcast %283 : vector<48x1xf32> to vector<48x4xf32>
    %287 = arith.mulf %264, %286 : vector<48x4xf32>
    %288 = vector.broadcast %285 : vector<48x1xf32> to vector<48x4xf32>
    %289 = arith.addf %287, %288 : vector<48x4xf32>
    %c0_258 = arith.constant 0 : index
    %c0_259 = arith.constant 0 : index
    %290 = vector.load %arg13[%c0_258, %c0_259] : memref<48x3xf32, #tpu.memory_space<vmem>>, vector<48x1xf32>
    %c0_260 = arith.constant 0 : index
    %c1_261 = arith.constant 1 : index
    %291 = vector.load %arg13[%c0_260, %c1_261] : memref<48x3xf32, #tpu.memory_space<vmem>>, vector<48x1xf32>
    %c0_262 = arith.constant 0 : index
    %c2_263 = arith.constant 2 : index
    %292 = vector.load %arg13[%c0_262, %c2_263] : memref<48x3xf32, #tpu.memory_space<vmem>>, vector<48x1xf32>
    %cst_264 = arith.constant 0.000000e+00 : f32
    %293 = vector.broadcast %cst_264 : f32 to vector<48x1xf32>
    %c0_265 = arith.constant 0 : index
    %c0_266 = arith.constant 0 : index
    %c0_267 = arith.constant 0 : index
    %294 = vector.load %arg11[%c0_265, %c0_266, %c0_267] : memref<9x4x1xf32, #tpu.memory_space<vmem>>, vector<1x4x1xf32>
    %295 = vector.shape_cast %294 : vector<1x4x1xf32> to vector<4x1xf32>
    %cst_268 = arith.constant dense<0.000000e+00> : vector<48x1xf32>
    %296 = tpu.matmul %289, %295, %cst_268 {dimension_numbers = #tpu.dot_dimension_numbers<[1], [0], [0], [1], [0, 0, 1, 1], [], []>} : vector<48x4xf32>, vector<4x1xf32>, vector<48x1xf32> -> vector<48x1xf32>
    %c0_269 = arith.constant 0 : index
    %c0_270 = arith.constant 0 : index
    %c0_271 = arith.constant 0 : index
    %297 = vector.load %arg12[%c0_269, %c0_270, %c0_271] : memref<9x48x48xf32, #tpu.memory_space<vmem>>, vector<1x48x48xf32>
    %298 = vector.shape_cast %297 : vector<1x48x48xf32> to vector<48x48xf32>
    %cst_272 = arith.constant dense<0.000000e+00> : vector<48x1xf32>
    %299 = tpu.matmul %298, %296, %cst_272 {dimension_numbers = #tpu.dot_dimension_numbers<[1], [0], [0], [1], [0, 0, 1, 1], [], []>} : vector<48x48xf32>, vector<48x1xf32>, vector<48x1xf32> -> vector<48x1xf32>
    %300 = arith.addf %293, %299 : vector<48x1xf32>
    %c1_273 = arith.constant 1 : index
    %c0_274 = arith.constant 0 : index
    %c0_275 = arith.constant 0 : index
    %301 = vector.load %arg11[%c1_273, %c0_274, %c0_275] : memref<9x4x1xf32, #tpu.memory_space<vmem>>, vector<1x4x1xf32>
    %302 = vector.shape_cast %301 : vector<1x4x1xf32> to vector<4x1xf32>
    %cst_276 = arith.constant dense<0.000000e+00> : vector<48x1xf32>
    %303 = tpu.matmul %289, %302, %cst_276 {dimension_numbers = #tpu.dot_dimension_numbers<[1], [0], [0], [1], [0, 0, 1, 1], [], []>} : vector<48x4xf32>, vector<4x1xf32>, vector<48x1xf32> -> vector<48x1xf32>
    %c1_277 = arith.constant 1 : index
    %c0_278 = arith.constant 0 : index
    %c0_279 = arith.constant 0 : index
    %304 = vector.load %arg12[%c1_277, %c0_278, %c0_279] : memref<9x48x48xf32, #tpu.memory_space<vmem>>, vector<1x48x48xf32>
    %305 = vector.shape_cast %304 : vector<1x48x48xf32> to vector<48x48xf32>
    %cst_280 = arith.constant dense<0.000000e+00> : vector<48x1xf32>
    %306 = tpu.matmul %305, %303, %cst_280 {dimension_numbers = #tpu.dot_dimension_numbers<[1], [0], [0], [1], [0, 0, 1, 1], [], []>} : vector<48x48xf32>, vector<48x1xf32>, vector<48x1xf32> -> vector<48x1xf32>
    %307 = arith.addf %300, %306 : vector<48x1xf32>
    %c2_281 = arith.constant 2 : index
    %c0_282 = arith.constant 0 : index
    %c0_283 = arith.constant 0 : index
    %308 = vector.load %arg11[%c2_281, %c0_282, %c0_283] : memref<9x4x1xf32, #tpu.memory_space<vmem>>, vector<1x4x1xf32>
    %309 = vector.shape_cast %308 : vector<1x4x1xf32> to vector<4x1xf32>
    %cst_284 = arith.constant dense<0.000000e+00> : vector<48x1xf32>
    %310 = tpu.matmul %289, %309, %cst_284 {dimension_numbers = #tpu.dot_dimension_numbers<[1], [0], [0], [1], [0, 0, 1, 1], [], []>} : vector<48x4xf32>, vector<4x1xf32>, vector<48x1xf32> -> vector<48x1xf32>
    %c2_285 = arith.constant 2 : index
    %c0_286 = arith.constant 0 : index
    %c0_287 = arith.constant 0 : index
    %311 = vector.load %arg12[%c2_285, %c0_286, %c0_287] : memref<9x48x48xf32, #tpu.memory_space<vmem>>, vector<1x48x48xf32>
    %312 = vector.shape_cast %311 : vector<1x48x48xf32> to vector<48x48xf32>
    %cst_288 = arith.constant dense<0.000000e+00> : vector<48x1xf32>
    %313 = tpu.matmul %312, %310, %cst_288 {dimension_numbers = #tpu.dot_dimension_numbers<[1], [0], [0], [1], [0, 0, 1, 1], [], []>} : vector<48x48xf32>, vector<48x1xf32>, vector<48x1xf32> -> vector<48x1xf32>
    %314 = arith.addf %307, %313 : vector<48x1xf32>
    %c3_289 = arith.constant 3 : index
    %c0_290 = arith.constant 0 : index
    %c0_291 = arith.constant 0 : index
    %315 = vector.load %arg11[%c3_289, %c0_290, %c0_291] : memref<9x4x1xf32, #tpu.memory_space<vmem>>, vector<1x4x1xf32>
    %316 = vector.shape_cast %315 : vector<1x4x1xf32> to vector<4x1xf32>
    %cst_292 = arith.constant dense<0.000000e+00> : vector<48x1xf32>
    %317 = tpu.matmul %289, %316, %cst_292 {dimension_numbers = #tpu.dot_dimension_numbers<[1], [0], [0], [1], [0, 0, 1, 1], [], []>} : vector<48x4xf32>, vector<4x1xf32>, vector<48x1xf32> -> vector<48x1xf32>
    %c3_293 = arith.constant 3 : index
    %c0_294 = arith.constant 0 : index
    %c0_295 = arith.constant 0 : index
    %318 = vector.load %arg12[%c3_293, %c0_294, %c0_295] : memref<9x48x48xf32, #tpu.memory_space<vmem>>, vector<1x48x48xf32>
    %319 = vector.shape_cast %318 : vector<1x48x48xf32> to vector<48x48xf32>
    %cst_296 = arith.constant dense<0.000000e+00> : vector<48x1xf32>
    %320 = tpu.matmul %319, %317, %cst_296 {dimension_numbers = #tpu.dot_dimension_numbers<[1], [0], [0], [1], [0, 0, 1, 1], [], []>} : vector<48x48xf32>, vector<48x1xf32>, vector<48x1xf32> -> vector<48x1xf32>
    %321 = arith.addf %314, %320 : vector<48x1xf32>
    %c4_297 = arith.constant 4 : index
    %c0_298 = arith.constant 0 : index
    %c0_299 = arith.constant 0 : index
    %322 = vector.load %arg11[%c4_297, %c0_298, %c0_299] : memref<9x4x1xf32, #tpu.memory_space<vmem>>, vector<1x4x1xf32>
    %323 = vector.shape_cast %322 : vector<1x4x1xf32> to vector<4x1xf32>
    %cst_300 = arith.constant dense<0.000000e+00> : vector<48x1xf32>
    %324 = tpu.matmul %289, %323, %cst_300 {dimension_numbers = #tpu.dot_dimension_numbers<[1], [0], [0], [1], [0, 0, 1, 1], [], []>} : vector<48x4xf32>, vector<4x1xf32>, vector<48x1xf32> -> vector<48x1xf32>
    %c4_301 = arith.constant 4 : index
    %c0_302 = arith.constant 0 : index
    %c0_303 = arith.constant 0 : index
    %325 = vector.load %arg12[%c4_301, %c0_302, %c0_303] : memref<9x48x48xf32, #tpu.memory_space<vmem>>, vector<1x48x48xf32>
    %326 = vector.shape_cast %325 : vector<1x48x48xf32> to vector<48x48xf32>
    %cst_304 = arith.constant dense<0.000000e+00> : vector<48x1xf32>
    %327 = tpu.matmul %326, %324, %cst_304 {dimension_numbers = #tpu.dot_dimension_numbers<[1], [0], [0], [1], [0, 0, 1, 1], [], []>} : vector<48x48xf32>, vector<48x1xf32>, vector<48x1xf32> -> vector<48x1xf32>
    %328 = arith.addf %321, %327 : vector<48x1xf32>
    %c5_305 = arith.constant 5 : index
    %c0_306 = arith.constant 0 : index
    %c0_307 = arith.constant 0 : index
    %329 = vector.load %arg11[%c5_305, %c0_306, %c0_307] : memref<9x4x1xf32, #tpu.memory_space<vmem>>, vector<1x4x1xf32>
    %330 = vector.shape_cast %329 : vector<1x4x1xf32> to vector<4x1xf32>
    %cst_308 = arith.constant dense<0.000000e+00> : vector<48x1xf32>
    %331 = tpu.matmul %289, %330, %cst_308 {dimension_numbers = #tpu.dot_dimension_numbers<[1], [0], [0], [1], [0, 0, 1, 1], [], []>} : vector<48x4xf32>, vector<4x1xf32>, vector<48x1xf32> -> vector<48x1xf32>
    %c5_309 = arith.constant 5 : index
    %c0_310 = arith.constant 0 : index
    %c0_311 = arith.constant 0 : index
    %332 = vector.load %arg12[%c5_309, %c0_310, %c0_311] : memref<9x48x48xf32, #tpu.memory_space<vmem>>, vector<1x48x48xf32>
    %333 = vector.shape_cast %332 : vector<1x48x48xf32> to vector<48x48xf32>
    %cst_312 = arith.constant dense<0.000000e+00> : vector<48x1xf32>
    %334 = tpu.matmul %333, %331, %cst_312 {dimension_numbers = #tpu.dot_dimension_numbers<[1], [0], [0], [1], [0, 0, 1, 1], [], []>} : vector<48x48xf32>, vector<48x1xf32>, vector<48x1xf32> -> vector<48x1xf32>
    %335 = arith.addf %328, %334 : vector<48x1xf32>
    %c6_313 = arith.constant 6 : index
    %c0_314 = arith.constant 0 : index
    %c0_315 = arith.constant 0 : index
    %336 = vector.load %arg11[%c6_313, %c0_314, %c0_315] : memref<9x4x1xf32, #tpu.memory_space<vmem>>, vector<1x4x1xf32>
    %337 = vector.shape_cast %336 : vector<1x4x1xf32> to vector<4x1xf32>
    %cst_316 = arith.constant dense<0.000000e+00> : vector<48x1xf32>
    %338 = tpu.matmul %289, %337, %cst_316 {dimension_numbers = #tpu.dot_dimension_numbers<[1], [0], [0], [1], [0, 0, 1, 1], [], []>} : vector<48x4xf32>, vector<4x1xf32>, vector<48x1xf32> -> vector<48x1xf32>
    %c6_317 = arith.constant 6 : index
    %c0_318 = arith.constant 0 : index
    %c0_319 = arith.constant 0 : index
    %339 = vector.load %arg12[%c6_317, %c0_318, %c0_319] : memref<9x48x48xf32, #tpu.memory_space<vmem>>, vector<1x48x48xf32>
    %340 = vector.shape_cast %339 : vector<1x48x48xf32> to vector<48x48xf32>
    %cst_320 = arith.constant dense<0.000000e+00> : vector<48x1xf32>
    %341 = tpu.matmul %340, %338, %cst_320 {dimension_numbers = #tpu.dot_dimension_numbers<[1], [0], [0], [1], [0, 0, 1, 1], [], []>} : vector<48x48xf32>, vector<48x1xf32>, vector<48x1xf32> -> vector<48x1xf32>
    %342 = arith.addf %335, %341 : vector<48x1xf32>
    %c7_321 = arith.constant 7 : index
    %c0_322 = arith.constant 0 : index
    %c0_323 = arith.constant 0 : index
    %343 = vector.load %arg11[%c7_321, %c0_322, %c0_323] : memref<9x4x1xf32, #tpu.memory_space<vmem>>, vector<1x4x1xf32>
    %344 = vector.shape_cast %343 : vector<1x4x1xf32> to vector<4x1xf32>
    %cst_324 = arith.constant dense<0.000000e+00> : vector<48x1xf32>
    %345 = tpu.matmul %289, %344, %cst_324 {dimension_numbers = #tpu.dot_dimension_numbers<[1], [0], [0], [1], [0, 0, 1, 1], [], []>} : vector<48x4xf32>, vector<4x1xf32>, vector<48x1xf32> -> vector<48x1xf32>
    %c7_325 = arith.constant 7 : index
    %c0_326 = arith.constant 0 : index
    %c0_327 = arith.constant 0 : index
    %346 = vector.load %arg12[%c7_325, %c0_326, %c0_327] : memref<9x48x48xf32, #tpu.memory_space<vmem>>, vector<1x48x48xf32>
    %347 = vector.shape_cast %346 : vector<1x48x48xf32> to vector<48x48xf32>
    %cst_328 = arith.constant dense<0.000000e+00> : vector<48x1xf32>
    %348 = tpu.matmul %347, %345, %cst_328 {dimension_numbers = #tpu.dot_dimension_numbers<[1], [0], [0], [1], [0, 0, 1, 1], [], []>} : vector<48x48xf32>, vector<48x1xf32>, vector<48x1xf32> -> vector<48x1xf32>
    %349 = arith.addf %342, %348 : vector<48x1xf32>
    %c8_329 = arith.constant 8 : index
    %c0_330 = arith.constant 0 : index
    %c0_331 = arith.constant 0 : index
    %350 = vector.load %arg11[%c8_329, %c0_330, %c0_331] : memref<9x4x1xf32, #tpu.memory_space<vmem>>, vector<1x4x1xf32>
    %351 = vector.shape_cast %350 : vector<1x4x1xf32> to vector<4x1xf32>
    %cst_332 = arith.constant dense<0.000000e+00> : vector<48x1xf32>
    %352 = tpu.matmul %289, %351, %cst_332 {dimension_numbers = #tpu.dot_dimension_numbers<[1], [0], [0], [1], [0, 0, 1, 1], [], []>} : vector<48x4xf32>, vector<4x1xf32>, vector<48x1xf32> -> vector<48x1xf32>
    %c8_333 = arith.constant 8 : index
    %c0_334 = arith.constant 0 : index
    %c0_335 = arith.constant 0 : index
    %353 = vector.load %arg12[%c8_333, %c0_334, %c0_335] : memref<9x48x48xf32, #tpu.memory_space<vmem>>, vector<1x48x48xf32>
    %354 = vector.shape_cast %353 : vector<1x48x48xf32> to vector<48x48xf32>
    %cst_336 = arith.constant dense<0.000000e+00> : vector<48x1xf32>
    %355 = tpu.matmul %354, %352, %cst_336 {dimension_numbers = #tpu.dot_dimension_numbers<[1], [0], [0], [1], [0, 0, 1, 1], [], []>} : vector<48x48xf32>, vector<48x1xf32>, vector<48x1xf32> -> vector<48x1xf32>
    %356 = arith.addf %349, %355 : vector<48x1xf32>
    %357 = arith.addf %356, %290 : vector<48x1xf32>
    %cst_337 = arith.constant 0.000000e+00 : f32
    %358 = vector.broadcast %cst_337 : f32 to vector<48x1xf32>
    %359 = arith.maximumf %357, %358 : vector<48x1xf32>
    %cst_338 = arith.constant dense<0.000000e+00> : vector<48xf32>
    %360 = vector.multi_reduction <add>, %359, %cst_338 [1] : vector<48x1xf32> to vector<48xf32>
    %361 = vector.shape_cast %360 : vector<48xf32> to vector<48x1xf32>
    %362 = arith.mulf %359, %359 : vector<48x1xf32>
    %cst_339 = arith.constant dense<0.000000e+00> : vector<48xf32>
    %363 = vector.multi_reduction <add>, %362, %cst_339 [1] : vector<48x1xf32> to vector<48xf32>
    %364 = vector.shape_cast %363 : vector<48xf32> to vector<48x1xf32>
    %cst_340 = arith.constant dense<0.000000e+00> : vector<48x1xf32>
    %365 = tpu.matmul %1, %361, %cst_340 {dimension_numbers = #tpu.dot_dimension_numbers<[1], [0], [0], [1], [0, 0, 1, 1], [], []>} : vector<48x48xf32>, vector<48x1xf32>, vector<48x1xf32> -> vector<48x1xf32>
    %cst_341 = arith.constant 5.000000e-01 : f32
    %366 = vector.broadcast %cst_341 : f32 to vector<48x1xf32>
    %367 = arith.mulf %365, %366 : vector<48x1xf32>
    %cst_342 = arith.constant dense<0.000000e+00> : vector<48x1xf32>
    %368 = tpu.matmul %1, %364, %cst_342 {dimension_numbers = #tpu.dot_dimension_numbers<[1], [0], [0], [1], [0, 0, 1, 1], [], []>} : vector<48x48xf32>, vector<48x1xf32>, vector<48x1xf32> -> vector<48x1xf32>
    %cst_343 = arith.constant 5.000000e-01 : f32
    %369 = vector.broadcast %cst_343 : f32 to vector<48x1xf32>
    %370 = arith.mulf %368, %369 : vector<48x1xf32>
    %371 = arith.mulf %367, %367 : vector<48x1xf32>
    %372 = arith.subf %370, %371 : vector<48x1xf32>
    %cst_344 = arith.constant 0.000000e+00 : f32
    %373 = vector.broadcast %cst_344 : f32 to vector<48x1xf32>
    %374 = arith.maximumf %372, %373 : vector<48x1xf32>
    %cst_345 = arith.constant 9.99999974E-6 : f32
    %375 = vector.broadcast %cst_345 : f32 to vector<48x1xf32>
    %376 = arith.addf %374, %375 : vector<48x1xf32>
    %377 = math.rsqrt %376 : vector<48x1xf32>
    %378 = arith.mulf %291, %377 : vector<48x1xf32>
    %379 = arith.mulf %367, %378 : vector<48x1xf32>
    %380 = arith.subf %292, %379 : vector<48x1xf32>
    %381 = arith.mulf %359, %378 : vector<48x1xf32>
    %382 = arith.addf %381, %380 : vector<48x1xf32>
    %c0_346 = arith.constant 0 : index
    %c0_347 = arith.constant 0 : index
    %383 = vector.load %arg14[%c0_346, %c0_347] : memref<48x1xf32, #tpu.memory_space<vmem>>, vector<48x1xf32>
    tpu.vector_store %arg14[%c0_346, %c0_347], %382 {strides = array<i32>} : memref<48x1xf32, #tpu.memory_space<vmem>>, vector<48x1xf32>,
    return
  }
}

</mosaic_0001>

<bundles_post_ra>
// kernel: _lambda_.1
= control target key start
LH: loop header
LB: loop body
LE: loop exit
PB: predicated region body
PF: predicated region fallthrough
CT: control target
= control target key end

     0   :  { %19 = vsyncpa [#allocation3], 0  ;;  %s15186_s0 = inlined_call_operand.vmem [shape: f32[6,256], index: 0, kind: input, shape index: {}]   ;;  %s15187_s1 = inlined_call_operand.hbm [shape: f32[48,48], index: 1, kind: input, shape index: {}]   ;;  %s15188_s2 = inlined_call_operand.hbm [shape: f32[9,256,64], index: 2, kind: input, shape index: {}]   ;;  %s15189_s3 = inlined_call_operand.hbm [shape: f32[9,48,6], index: 3, kind: input, shape index: {}]   ;;  %s15190_s4 = inlined_call_operand.hbm [shape: f32[48,3], index: 4, kind: input, shape index: {}]   ;;  %s15191_s5 = inlined_call_operand.hbm [shape: f32[9,64,16], index: 5, kind: input, shape index: {}]   ;;  %s15192_s6 = inlined_call_operand.hbm [shape: f32[9,48,48], index: 6, kind: input, shape index: {}]   ;;  %s15193_s7 = inlined_call_operand.hbm [shape: f32[48,3], index: 7, kind: input, shape index: {}]   ;;  %s15194_s8 = inlined_call_operand.hbm [shape: f32[9,16,4], index: 8, kind: input, shape index: {}]   ;;  %s15195_s9 = inlined_call_operand.hbm [shape: f32[9,48,48], index: 9, kind: input, shape index: {}]   ;;  %s15196_s10 = inlined_call_operand.hbm [shape: f32[48,3], index: 10, kind: input, shape index: {}]   ;;  %s15197_s11 = inlined_call_operand.hbm [shape: f32[9,4,1], index: 11, kind: input, shape index: {}]   ;;  %s15198_s12 = inlined_call_operand.hbm [shape: f32[9,48,48], index: 12, kind: input, shape index: {}]   ;;  %s15199_s13 = inlined_call_operand.hbm [shape: f32[48,3], index: 13, kind: input, shape index: {}]   ;;  %s15200_s14 = inlined_call_operand.vmem [shape: f32[48,1], index: 14, kind: output, shape index: {}]  }
   0x1   :  { %20 = vsyncpa [#allocation5], 0 }
   0x2   :  { %21 = vsyncpa [#allocation8], 0 }
   0x3   :  { %22 = vsyncpa [#allocation11], 0 }
   0x4   :  { %23 = vsyncpa [#allocation14], 0 }
   0x5   :  { %24 = vsyncpa [#allocation17], 0 }
   0x6   :  { %25 = vsyncpa [#allocation20], 0  ;;  %s13483_s29 = smov [#allocation4]   ;;  %s13484_s15 = smov [#allocation7]  }
   0x7   :  { %s45_s30 = sshll.u32 %s13483_s29, 4  ;;  %s69_s16 = sshll.u32 %s13484_s15, 4  ;;  %s46_s30 = int_to_ptr.vmem [resolvable:$true] %s45_s30  ;;  %s70_s16 = int_to_ptr.vmem [resolvable:$true] %s69_s16 }
   0x8   :  { %s13217_s17 = scalar_lea.vmem %s46_s30, 36864  ;;  %p13222_p1 = scmp.lt.s32.totalorder %s46_s30, %s46_s30 }
   0x9   :  { %p13218_p0 = scmp.ne.s32.totalorder %s46_s30, %s13217_s17  ;;  %p13223_p2 = scmp.lt.s32.totalorder %s13217_s17, %s13217_s17 }
   0xb   :  { %p13224_p3 = por %p13223_p2, %p13222_p1 }
   0xd   :  { %p13225_p4 = pnand %p13224_p3, %p13218_p0 }
   0xf   :  { %13228 = shalt.err (!%p13225_p4)
}
  0x10   :  { %s13485_s18 = smov 128   ;;  %s13486_s19 = smov 8  }
  0x11   :  { %51 = dma.hbm_to_vmem [thread:$0]  %s15188_s2, 36864, %s46_s30, [#allocation5], %s13485_s18, %s13485_s18, %s13486_s19  }
  0x12   :  { %s13237_s22 = scalar_lea.vmem %s70_s16, 768  ;;  %p13242_p6 = scmp.lt.s32.totalorder %s70_s16, %s70_s16 }
  0x13   :  { %p13238_p5 = scmp.ne.s32.totalorder %s70_s16, %s13237_s22  ;;  %p13243_p7 = scmp.lt.s32.totalorder %s13237_s22, %s13237_s22 }
  0x15   :  { %p13244_p8 = por %p13243_p7, %p13242_p6 }
  0x17   :  { %p13245_p9 = pnand %p13244_p8, %p13238_p5 }
  0x19   :  { %13248 = shalt.err (!%p13245_p9)
}
  0x1a   :  { %75 = dma.hbm_to_vmem [thread:$0]  %s15190_s4, 768, %s70_s16, [#allocation8], %s13485_s18, %s13485_s18, %s13486_s19  }
  0x1b   :  { %s13487_s25 = smov [#allocation10]   ;;  %s13488_s27 = smov [#allocation13]  }
  0x1c   :  { %s93_s26 = sshll.u32 %s13487_s25, 4  ;;  %s117_s28 = sshll.u32 %s13488_s27, 4  ;;  %s94_s26 = int_to_ptr.vmem [resolvable:$true] %s93_s26  ;;  %s118_s28 = int_to_ptr.vmem [resolvable:$true] %s117_s28 }
  0x1d   :  { %s13257_s2 = scalar_lea.vmem %s94_s26, 6912  ;;  %p13262_p11 = scmp.lt.s32.totalorder %s94_s26, %s94_s26 }
  0x1e   :  { %p13258_p10 = scmp.ne.s32.totalorder %s94_s26, %s13257_s2  ;;  %p13263_p12 = scmp.lt.s32.totalorder %s13257_s2, %s13257_s2 }
  0x20   :  { %p13264_p13 = por %p13263_p12, %p13262_p11 }
  0x22   :  { %p13265_p0 = pnand %p13264_p13, %p13258_p10 }
  0x24   :  { %13268 = shalt.err (!%p13265_p0)
}
  0x25   :  { %99 = dma.hbm_to_vmem [thread:$0]  %s15192_s6, 6912, %s94_s26, [#allocation11], %s13485_s18, %s13485_s18, %s13486_s19  }
  0x26   :  { %s13277_s4 = scalar_lea.vmem %s118_s28, 2304  ;;  %p13282_p2 = scmp.lt.s32.totalorder %s118_s28, %s118_s28 }
  0x27   :  { %p13278_p1 = scmp.ne.s32.totalorder %s118_s28, %s13277_s4  ;;  %p13283_p3 = scmp.lt.s32.totalorder %s13277_s4, %s13277_s4 }
  0x29   :  { %p13284_p4 = por %p13283_p3, %p13282_p2 }
  0x2b   :  { %p13285_p5 = pnand %p13284_p4, %p13278_p1 }
  0x2d   :  { %13288 = shalt.err (!%p13285_p5)
}
  0x2e   :  { %123 = dma.hbm_to_vmem [thread:$0]  %s15194_s8, 2304, %s118_s28, [#allocation14], %s13485_s18, %s13485_s18, %s13486_s19  }
  0x2f   :  { %s13489_s17 = smov [#allocation16]   ;;  %s13490_s21 = smov [#allocation19]  }
  0x30   :  { %s141_s20 = sshll.u32 %s13489_s17, 4  ;;  %s165_s22 = sshll.u32 %s13490_s21, 4  ;;  %s142_s20 = int_to_ptr.vmem [resolvable:$true] %s141_s20  ;;  %s166_s22 = int_to_ptr.vmem [resolvable:$true] %s165_s22 }
  0x31   :  { %s13297_s6 = scalar_lea.vmem %s142_s20, 768  ;;  %p13302_p7 = scmp.lt.s32.totalorder %s142_s20, %s142_s20 }
  0x32   :  { %p13298_p6 = scmp.ne.s32.totalorder %s142_s20, %s13297_s6  ;;  %p13303_p8 = scmp.lt.s32.totalorder %s13297_s6, %s13297_s6 }
  0x34   :  { %p13304_p9 = por %p13303_p8, %p13302_p7 }
  0x36   :  { %p13305_p10 = pnand %p13304_p9, %p13298_p6 }
  0x38   :  { %13308 = shalt.err (!%p13305_p10)
}
  0x39   :  { %147 = dma.hbm_to_vmem [thread:$0]  %s15196_s10, 768, %s142_s20, [#allocation17], %s13485_s18, %s13485_s18, %s13486_s19  }
  0x3a   :  { %s13317_s8 = scalar_lea.vmem %s166_s22, 6912  ;;  %p13322_p12 = scmp.lt.s32.totalorder %s166_s22, %s166_s22 }
  0x3b   :  { %p13318_p11 = scmp.ne.s32.totalorder %s166_s22, %s13317_s8  ;;  %p13323_p13 = scmp.lt.s32.totalorder %s13317_s8, %s13317_s8 }
  0x3d   :  { %p13324_p0 = por %p13323_p13, %p13322_p12 }
  0x3f   :  { %p13325_p1 = pnand %p13324_p0, %p13318_p11 }
  0x41   :  { %13328 = shalt.err (!%p13325_p1)
}
  0x42   :  { %171 = dma.hbm_to_vmem [thread:$0]  %s15198_s12, 6912, %s166_s22, [#allocation20], %s13485_s18, %s13485_s18, %s13486_s19  }
  0x43   :  { %s13491_s27 = smov [#allocation2]   ;;  %s13492_s2 = smov [#allocation6]  }
  0x44   :  { %s33_s28 = sshll.u32 %s13491_s27, 4  ;;  %s57_s29 = sshll.u32 %s13492_s2, 4  ;;  %s34_s28 = int_to_ptr.vmem [resolvable:$true] %s33_s28  ;;  %s58_s29 = int_to_ptr.vmem [resolvable:$true] %s57_s29 }
  0x45   :  { %s13337_s10 = scalar_lea.vmem %s34_s28, 768  ;;  %p13342_p3 = scmp.lt.s32.totalorder %s34_s28, %s34_s28 }
  0x46   :  { %p13338_p2 = scmp.ne.s32.totalorder %s34_s28, %s13337_s10  ;;  %p13343_p4 = scmp.lt.s32.totalorder %s13337_s10, %s13337_s10 }
  0x48   :  { %p13344_p5 = por %p13343_p4, %p13342_p3 }
  0x4a   :  { %p13345_p6 = pnand %p13344_p5, %p13338_p2 }
  0x4c   :  { %13348 = shalt.err (!%p13345_p6)
}
  0x4d   :  { %39 = dma.hbm_to_vmem [thread:$0]  %s15187_s1, 768, %s34_s28, [#allocation3], %s13485_s18, %s13485_s18, %s13486_s19  }
  0x4e   :  { %s13357_s12 = scalar_lea.vmem %s58_s29, 6912  ;;  %p13362_p8 = scmp.lt.s32.totalorder %s58_s29, %s58_s29 }
  0x4f   :  { %p13358_p7 = scmp.ne.s32.totalorder %s58_s29, %s13357_s12  ;;  %p13363_p9 = scmp.lt.s32.totalorder %s13357_s12, %s13357_s12 }
  0x51   :  { %p13364_p10 = por %p13363_p9, %p13362_p8 }
  0x53   :  { %p13365_p11 = pnand %p13364_p10, %p13358_p7 }
  0x55   :  { %13368 = shalt.err (!%p13365_p11)
}
  0x56   :  { %63 = dma.hbm_to_vmem [thread:$0]  %s15189_s3, 6912, %s58_s29, [#allocation5], %s13485_s18, %s13485_s18, %s13486_s19  }
  0x57   :  { %s13493_s17 = smov [#allocation9]   ;;  %s13494_s21 = smov [#allocation12]  }
  0x58   :  { %s81_s20 = sshll.u32 %s13493_s17, 4  ;;  %s105_s22 = sshll.u32 %s13494_s21, 4  ;;  %s82_s20 = int_to_ptr.vmem [resolvable:$true] %s81_s20  ;;  %s106_s22 = int_to_ptr.vmem [resolvable:$true] %s105_s22 }
  0x59   :  { %s13377_s1 = scalar_lea.vmem %s82_s20, 9216  ;;  %p13382_p13 = scmp.lt.s32.totalorder %s82_s20, %s82_s20 }
  0x5a   :  { %p13378_p12 = scmp.ne.s32.totalorder %s82_s20, %s13377_s1  ;;  %p13383_p0 = scmp.lt.s32.totalorder %s13377_s1, %s13377_s1 }
  0x5c   :  { %p13384_p1 = por %p13383_p0, %p13382_p13 }
  0x5e   :  { %p13385_p2 = pnand %p13384_p1, %p13378_p12 }
  0x60   :  { %13388 = shalt.err (!%p13385_p2)
}
  0x61   :  { %87 = dma.hbm_to_vmem [thread:$0]  %s15191_s5, 9216, %s82_s20, [#allocation8], %s13485_s18, %s13485_s18, %s13486_s19  }
  0x62   :  { %s13397_s3 = scalar_lea.vmem %s106_s22, 768  ;;  %p13402_p4 = scmp.lt.s32.totalorder %s106_s22, %s106_s22 }
  0x63   :  { %p13398_p3 = scmp.ne.s32.totalorder %s106_s22, %s13397_s3  ;;  %p13403_p5 = scmp.lt.s32.totalorder %s13397_s3, %s13397_s3 }
  0x65   :  { %p13404_p6 = por %p13403_p5, %p13402_p4 }
  0x67   :  { %p13405_p7 = pnand %p13404_p6, %p13398_p3 }
  0x69   :  { %13408 = shalt.err (!%p13405_p7)
}
  0x6a   :  { %111 = dma.hbm_to_vmem [thread:$0]  %s15193_s7, 768, %s106_s22, [#allocation11], %s13485_s18, %s13485_s18, %s13486_s19  }
  0x6b   :  { %s13495_s25 = smov [#allocation15]   ;;  %s13496_s27 = smov [#allocation18]  }
  0x6c   :  { %s129_s26 = sshll.u32 %s13495_s25, 4  ;;  %s153_s28 = sshll.u32 %s13496_s27, 4  ;;  %s130_s26 = int_to_ptr.vmem [resolvable:$true] %s129_s26  ;;  %s154_s28 = int_to_ptr.vmem [resolvable:$true] %s153_s28 }
  0x6d   :  { %s13417_s5 = scalar_lea.vmem %s130_s26, 6912  ;;  %p13422_p9 = scmp.lt.s32.totalorder %s130_s26, %s130_s26 }
  0x6e   :  { %p13418_p8 = scmp.ne.s32.totalorder %s130_s26, %s13417_s5  ;;  %p13423_p10 = scmp.lt.s32.totalorder %s13417_s5, %s13417_s5 }
  0x70   :  { %p13424_p11 = por %p13423_p10, %p13422_p9 }
  0x72   :  { %p13425_p12 = pnand %p13424_p11, %p13418_p8 }
  0x74   :  { %13428 = shalt.err (!%p13425_p12)
}
  0x75   :  { %135 = dma.hbm_to_vmem [thread:$0]  %s15195_s9, 6912, %s130_s26, [#allocation14], %s13485_s18, %s13485_s18, %s13486_s19  }
  0x76   :  { %s13437_s7 = scalar_lea.vmem %s154_s28, 576  ;;  %p13442_p0 = scmp.lt.s32.totalorder %s154_s28, %s154_s28 }
  0x77   :  { %p13438_p13 = scmp.ne.s32.totalorder %s154_s28, %s13437_s7  ;;  %p13443_p1 = scmp.lt.s32.totalorder %s13437_s7, %s13437_s7 }
  0x79   :  { %p13444_p2 = por %p13443_p1, %p13442_p0 }
  0x7b   :  { %p13445_p3 = pnand %p13444_p2, %p13438_p13 }
  0x7d   :  { %13448 = shalt.err (!%p13445_p3)
}
  0x7e   :  { %s13497_s10 = smov 64   ;;  %s13498_s30 = smov 4  }
  0x7f   :  { %159 = dma.hbm_to_vmem [thread:$0]  %s15197_s11, 576, %s154_s28, [#allocation17], %s13497_s10, %s13497_s10, %s13498_s30  }
  0x80   :  { %s13499_s15 = smov [#allocation21]  }
  0x81   :  { %s177_s16 = sshll.u32 %s13499_s15, 4  ;;  %s178_s16 = int_to_ptr.vmem [resolvable:$true] %s177_s16 }
  0x82   :  { %s13457_s17 = scalar_lea.vmem %s178_s16, 768  ;;  %p13462_p5 = scmp.lt.s32.totalorder %s178_s16, %s178_s16 }
  0x83   :  { %p13458_p4 = scmp.ne.s32.totalorder %s178_s16, %s13457_s17  ;;  %p13463_p6 = scmp.lt.s32.totalorder %s13457_s17, %s13457_s17 }
  0x85   :  { %p13464_p7 = por %p13463_p6, %p13462_p5 }
  0x87   :  { %p13465_p8 = pnand %p13464_p7, %p13458_p4 }
  0x89   :  { %13468 = shalt.err (!%p13465_p8)
}
  0x8a   :  { %183 = dma.hbm_to_vmem [thread:$0]  %s15199_s13, 768, %s178_s16, [#allocation20], %s13485_s18, %s13485_s18, %s13486_s19  }
  0x8b   :  { %13469 = dma.done.wait [#allocation3], 768  }
  0x8c   :  { %13470 = vsyncadd [#allocation3], 4294966528 }
  0x8d   :  { %13471 = dma.done.wait [#allocation5], 43776  }
  0x8e   :  { %13472 = vsyncadd [#allocation5], 4294923520 }
  0x8f   :  { %13473 = dma.done.wait [#allocation8], 9984  }
  0x90   :  { %13474 = vsyncadd [#allocation8], 4294957312 }
  0x91   :  { %13475 = dma.done.wait [#allocation11], 7680  }
  0x92   :  { %13476 = vsyncadd [#allocation11], 4294959616 }
  0x93   :  { %13477 = dma.done.wait [#allocation14], 9216  }
  0x94   :  { %13478 = vsyncadd [#allocation14], 4294958080 }
  0x95   :  { %13479 = dma.done.wait [#allocation17], 1344  }
  0x96   :  { %13480 = vsyncadd [#allocation17], 4294965952 }
  0x97   :  { %13481 = dma.done.wait [#allocation20], 7680  }
  0x98   :  { %13482 = vsyncadd [#allocation20], 4294959616  ;;  %v268_v0 = vld [vmem:[#allocation4 + $0xf8] sm:$0xff]  ;;  %v267_v4 = vld [vmem:[#allocation4 + $0xf0] sm:$0xff]  ;;  %vm455_vm0 = vcmask 48128   ;;  %vm474_vm1 = vcmask 1045504  }
  0x99   :  { %v377_v1 = vld [vmem:[#allocation4 + $0x1f8] sm:$0xff]  ;;  %10752 = vmatprep.subr.mxu0 %v268_v0  ;;  %v376_v5 = vld [vmem:[#allocation4 + $0x1f0] sm:$0xff]  ;;  %v266_v8 = vld [vmem:[#allocation4 + $0xe8] sm:$0xff]  ;;  %vm2355_vm2 = vcmask 523264   ;;  %vm2398_vm3 = vcmask 392192   ;;  %s13502_s23 = smov 127  }
  0x9a   :  { %v252_v2 = vld [vmem:[#allocation4 + $0x78] sm:$0xff]  ;;  %10787 = vmatprep.subr.mxu1 %v377_v1  ;;  %v251_v6 = vld [vmem:[#allocation4 + $0x70] sm:$0xff]  ;;  %v375_v9 = vld [vmem:[#allocation4 + $0x1e8] sm:$0xff]  ;;  %s13504_s3 = smov 2   ;;  %vm4927_vm4 = vcmask 130048   ;;  %vm7426_vm5 = vcmask 31744  }
  0x9b   :  { %v361_v3 = vld [vmem:[#allocation4 + $0x178] sm:$0xff]  ;;  %10753 = vmatpush3.msra.mxu0 %v252_v2  ;;  %v360_v7 = vld [vmem:[#allocation4 + $0x170] sm:$0xff]  ;;  %v250_v10 = vld [vmem:[#allocation4 + $0x68] sm:$0xff]  ;;  %vm7882_vm6 = vcmask 1043456   ;;  %s13506_s24 = smov 126   ;;  %vm10290_vm7 = vcmask 7168  }
  0x9c   :  { %10788 = vmatpush3.msra.mxu1 %v361_v3  ;;  %10754 = vmatprep.subr.mxu0 %v267_v4  ;;  %v359_v11 = vld [vmem:[#allocation4 + $0x168] sm:$0xff]  ;;  %v265_v12 = vld [vmem:[#allocation4 + $0xe0] sm:$0xff]  ;;  %v264_v16 = vld [vmem:[#allocation4 + $0xd8] sm:$0xff] }
  0x9d   :  { %10789 = vmatprep.subr.mxu1 %v376_v5  ;;  %10755 = vmatpush3.msra.mxu0 %v251_v6  ;;  %v374_v13 = vld [vmem:[#allocation4 + $0x1e0] sm:$0xff]  ;;  %v373_v17 = vld [vmem:[#allocation4 + $0x1d8] sm:$0xff]  ;;  %v263_v20 = vld [vmem:[#allocation4 + $0xd0] sm:$0xff] }
  0x9e   :  { %10790 = vmatpush3.msra.mxu1 %v360_v7  ;;  %10756 = vmatprep.subr.mxu0 %v266_v8  ;;  %v249_v14 = vld [vmem:[#allocation4 + $0x60] sm:$0xff]  ;;  %v248_v18 = vld [vmem:[#allocation4 + $0x58] sm:$0xff]  ;;  %v372_v21 = vld [vmem:[#allocation4 + $0x1d0] sm:$0xff] }
  0x9f   :  { %10791 = vmatprep.subr.mxu1 %v375_v9  ;;  %v358_v15 = vld [vmem:[#allocation4 + $0x160] sm:$0xff]  ;;  %10757 = vmatpush3.msra.mxu0 %v250_v10  ;;  %v357_v19 = vld [vmem:[#allocation4 + $0x158] sm:$0xff]  ;;  %v247_v22 = vld [vmem:[#allocation4 + $0x50] sm:$0xff] }
  0xa0   :  { %10792 = vmatpush3.msra.mxu1 %v359_v11  ;;  %10758 = vmatprep.subr.mxu0 %v265_v12  ;;  %v356_v23 = vld [vmem:[#allocation4 + $0x150] sm:$0xff]  ;;  %v262_v24 = vld [vmem:[#allocation4 + $0xc8] sm:$0xff]  ;;  %v261_v28 = vld [vmem:[#allocation4 + $0xc0] sm:$0xff] }
  0xa1   :  { %10793 = vmatprep.subr.mxu1 %v374_v13  ;;  %10759 = vmatpush3.msra.mxu0 %v249_v14  ;;  %v371_v25 = vld [vmem:[#allocation4 + $0x1c8] sm:$0xff]  ;;  %v370_v29 = vld [vmem:[#allocation4 + $0x1c0] sm:$0xff]  ;;  %v260_v32 = vld [vmem:[#allocation4 + $0xb8] sm:$0xff] }
  0xa2   :  { %10794 = vmatpush3.msra.mxu1 %v358_v15  ;;  %10760 = vmatprep.subr.mxu0 %v264_v16  ;;  %v246_v26 = vld [vmem:[#allocation4 + $0x48] sm:$0xff]  ;;  %v245_v30 = vld [vmem:[#allocation4 + $0x40] sm:$0xff]  ;;  %v369_v33 = vld [vmem:[#allocation4 + $0x1b8] sm:$0xff] }
  0xa3   :  { %10795 = vmatprep.subr.mxu1 %v373_v17  ;;  %10761 = vmatpush3.msra.mxu0 %v248_v18  ;;  %v355_v27 = vld [vmem:[#allocation4 + $0x148] sm:$0xff]  ;;  %v354_v31 = vld [vmem:[#allocation4 + $0x140] sm:$0xff]  ;;  %v244_v34 = vld [vmem:[#allocation4 + $0x38] sm:$0xff] }
  0xa4   :  { %10796 = vmatpush3.msra.mxu1 %v357_v19  ;;  %10762 = vmatprep.subr.mxu0 %v263_v20  ;;  %v353_v35 = vld [vmem:[#allocation4 + $0x138] sm:$0xff]  ;;  %v259_v36 = vld [vmem:[#allocation4 + $0xb0] sm:$0xff]  ;;  %v258_v40 = vld [vmem:[#allocation4 + $0xa8] sm:$0xff] }
  0xa5   :  { %10797 = vmatprep.subr.mxu1 %v372_v21  ;;  %10763 = vmatpush3.msra.mxu0 %v247_v22  ;;  %v368_v37 = vld [vmem:[#allocation4 + $0x1b0] sm:$0xff]  ;;  %v367_v41 = vld [vmem:[#allocation4 + $0x1a8] sm:$0xff]  ;;  %v257_v44 = vld [vmem:[#allocation4 + $0xa0] sm:$0xff] }
  0xa6   :  { %10798 = vmatpush3.msra.mxu1 %v356_v23  ;;  %10764 = vmatprep.subr.mxu0 %v262_v24  ;;  %v243_v38 = vld [vmem:[#allocation4 + $0x30] sm:$0xff]  ;;  %v242_v42 = vld [vmem:[#allocation4 + $0x28] sm:$0xff]  ;;  %v366_v45 = vld [vmem:[#allocation4 + $0x1a0] sm:$0xff] }
  0xa7   :  { %10799 = vmatprep.subr.mxu1 %v371_v25  ;;  %10765 = vmatpush3.msra.mxu0 %v246_v26  ;;  %v352_v39 = vld [vmem:[#allocation4 + $0x130] sm:$0xff]  ;;  %v351_v43 = vld [vmem:[#allocation4 + $0x128] sm:$0xff]  ;;  %v241_v46 = vld [vmem:[#allocation4 + $0x20] sm:$0xff] }
  0xa8   :  { %10800 = vmatpush3.msra.mxu1 %v355_v27  ;;  %10766 = vmatprep.subr.mxu0 %v261_v28  ;;  %v350_v47 = vld [vmem:[#allocation4 + $0x120] sm:$0xff]  ;;  %v256_v48 = vld [vmem:[#allocation4 + $0x98] sm:$0xff]  ;;  %v255_v52 = vld [vmem:[#allocation4 + $0x90] sm:$0xff] }
  0xa9   :  { %10801 = vmatprep.subr.mxu1 %v370_v29  ;;  %10767 = vmatpush3.msra.mxu0 %v245_v30  ;;  %v365_v49 = vld [vmem:[#allocation4 + $0x198] sm:$0xff]  ;;  %v364_v53 = vld [vmem:[#allocation4 + $0x190] sm:$0xff]  ;;  %v254_v56 = vld [vmem:[#allocation4 + $0x88] sm:$0xff] }
  0xaa   :  { %10802 = vmatpush3.msra.mxu1 %v354_v31  ;;  %10768 = vmatprep.subr.mxu0 %v260_v32  ;;  %v240_v50 = vld [vmem:[#allocation4 + $0x18] sm:$0xff]  ;;  %v239_v54 = vld [vmem:[#allocation4 + $0x10] sm:$0xff]  ;;  %v363_v57 = vld [vmem:[#allocation4 + $0x188] sm:$0xff] }
  0xab   :  { %10803 = vmatprep.subr.mxu1 %v369_v33  ;;  %10769 = vmatpush3.msra.mxu0 %v244_v34  ;;  %v349_v51 = vld [vmem:[#allocation4 + $0x118] sm:$0xff]  ;;  %v348_v55 = vld [vmem:[#allocation4 + $0x110] sm:$0xff]  ;;  %v238_v58 = vld [vmem:[#allocation4 + $0x8] sm:$0xff] }
  0xac   :  { %10804 = vmatpush3.msra.mxu1 %v353_v35  ;;  %10770 = vmatprep.subr.mxu0 %v259_v36  ;;  %v347_v59 = vld [vmem:[#allocation4 + $0x108] sm:$0xff]  ;;  %v253_v60 = vld [vmem:[#allocation4 + $0x80] sm:$0xff]  ;;  %v13660_v63 = vld [vmem:[%s15186_s0 + $0x8] sm:$0x3f] }
  0xad   :  { %10805 = vmatprep.subr.mxu1 %v368_v37  ;;  %10771 = vmatpush3.msra.mxu0 %v243_v38  ;;  %v362_v61 = vld [vmem:[#allocation4 + $0x180] sm:$0xff]  ;;  %v13665_v1 = vld [vmem:[%s15186_s0] sm:$0x3f]  ;;  %v450_v10 = vld [vmem:[#allocation6 + $0x38] sm:$0xff] }
  0xae   :  { %10806 = vmatpush3.msra.mxu1 %v352_v39  ;;  %10772 = vmatprep.subr.mxu0 %v258_v40  ;;  %v237_v62 = vld [vmem:[#allocation4] sm:$0xff]  ;;  %v449_v2 = vld [vmem:[#allocation6 + $0x30] sm:$0xff]  ;;  %v340_v11 = vld [vmem:[#allocation6 + $0x8] sm:$0xff] }
  0xaf   :  { %10807 = vmatprep.subr.mxu1 %v367_v41  ;;  %10773 = vmatpush3.msra.mxu0 %v242_v42  ;;  %v346_v0 = vld [vmem:[#allocation4 + $0x100] sm:$0xff]  ;;  %v721_v12 = vld [vmem:[#allocation4 + $0x2f8] sm:$0xff]  ;;  %v341_v15 = vld [vmem:[#allocation6 + $0x10] sm:$0xff] }
  0xb0   :  { %10808 = vmatpush3.msra.mxu1 %v351_v43  ;;  %10774 = vmatprep.subr.mxu0 %v257_v44  ;;  %v339_v3 = vld [vmem:[#allocation6] sm:$0xff]  ;;  %v705_v14 = vld [vmem:[#allocation4 + $0x278] sm:$0xff]  ;;  %v720_v16 = vld [vmem:[#allocation4 + $0x2f0] sm:$0xff] }
  0xb1   :  { %10809 = vmatprep.subr.mxu1 %v366_v45  ;;  %10775 = vmatpush3.msra.mxu0 %v241_v46  ;;  %v451_v13 = vld [vmem:[#allocation6 + $0x40] sm:$0xff]  ;;  %v704_v17 = vld [vmem:[#allocation4 + $0x270] sm:$0xff]  ;;  %v342_v18 = vld [vmem:[#allocation6 + $0x18] sm:$0xff] }
  0xb2   :  { %10810 = vmatpush3.msra.mxu1 %v350_v47  ;;  %10776 = vmatprep.subr.mxu0 %v256_v48  ;;  %v719_v19 = vld [vmem:[#allocation4 + $0x2e8] sm:$0xff]  ;;  %v453_v22 = vld [vmem:[#allocation6 + $0x50] sm:$0xff]  ;;  %v718_v23 = vld [vmem:[#allocation4 + $0x2e0] sm:$0xff] }
  0xb3   :  { %10811 = vmatprep.subr.mxu1 %v365_v49  ;;  %10777 = vmatpush3.msra.mxu0 %v240_v50  ;;  %v452_v20 = vld [vmem:[#allocation6 + $0x48] sm:$0xff]  ;;  %v343_v24 = vld [vmem:[#allocation6 + $0x20] sm:$0xff]  ;;  %v717_v27 = vld [vmem:[#allocation4 + $0x2d8] sm:$0xff] }
  0xb4   :  { %10812 = vmatpush3.msra.mxu1 %v349_v51  ;;  %10778 = vmatprep.subr.mxu0 %v255_v52  ;;  %v703_v21 = vld [vmem:[#allocation4 + $0x268] sm:$0xff]  ;;  %v702_v25 = vld [vmem:[#allocation4 + $0x260] sm:$0xff]  ;;  %v454_v28 = vld [vmem:[#allocation6 + $0x58] sm:$0xff] }
  0xb5   :  { %10813 = vmatprep.subr.mxu1 %v364_v53  ;;  %10779 = vmatpush3.msra.mxu0 %v239_v54  ;;  %v344_v26 = vld [vmem:[#allocation6 + $0x28] sm:$0xff]  ;;  %v701_v29 = vld [vmem:[#allocation4 + $0x258] sm:$0xff]  ;;  %v716_v30 = vld [vmem:[#allocation4 + $0x2d0] sm:$0xff] }
  0xb6   :  { %10814 = vmatpush3.msra.mxu1 %v348_v55  ;;  %10780 = vmatprep.subr.mxu0 %v254_v56  ;;  %v700_v31 = vld [vmem:[#allocation4 + $0x250] sm:$0xff]  ;;  %v715_v32 = vld [vmem:[#allocation4 + $0x2c8] sm:$0xff]  ;;  %v714_v34 = vld [vmem:[#allocation4 + $0x2c0] sm:$0xff] }
  0xb7   :  { %10815 = vmatprep.subr.mxu1 %v363_v57  ;;  %10781 = vmatpush3.msra.mxu0 %v238_v58  ;;  %v699_v33 = vld [vmem:[#allocation4 + $0x248] sm:$0xff]  ;;  %v698_v35 = vld [vmem:[#allocation4 + $0x240] sm:$0xff]  ;;  %v713_v36 = vld [vmem:[#allocation4 + $0x2b8] sm:$0xff] }
  0xb8   :  { %10816 = vmatpush3.msra.mxu1 %v347_v59  ;;  %10782 = vmatprep.subr.mxu0 %v253_v60  ;;  %v697_v37 = vld [vmem:[#allocation4 + $0x238] sm:$0xff]  ;;  %v712_v38 = vld [vmem:[#allocation4 + $0x2b0] sm:$0xff]  ;;  %v711_v40 = vld [vmem:[#allocation4 + $0x2a8] sm:$0xff] }
  0xb9   :  { %10817 = vmatprep.subr.mxu1 %v362_v61  ;;  %10783 = vmatpush3.msra.mxu0 %v237_v62  ;;  %v696_v39 = vld [vmem:[#allocation4 + $0x230] sm:$0xff]  ;;  %v695_v41 = vld [vmem:[#allocation4 + $0x228] sm:$0xff]  ;;  %v710_v42 = vld [vmem:[#allocation4 + $0x2a0] sm:$0xff] }
  0xba   :  { %333 = vmatprep.mubr.f32.mxu0 %v13660_v63  ;;  %10818 = vmatpush3.msra.mxu1 %v346_v0  ;;  %v694_v43 = vld [vmem:[#allocation4 + $0x220] sm:$0xff]  ;;  %v709_v44 = vld [vmem:[#allocation4 + $0x298] sm:$0xff]  ;;  %v708_v46 = vld [vmem:[#allocation4 + $0x290] sm:$0xff] }
  0xbb   :  { %442 = vmatprep.mubr.f32.mxu1 %v13660_v63  ;;  %334 = vmatmul.mubr.f32.vlgmr.msra.gmra.mxu0 %v13665_v1  ;;  %v693_v45 = vld [vmem:[#allocation4 + $0x218] sm:$0xff]  ;;  %v692_v47 = vld [vmem:[#allocation4 + $0x210] sm:$0xff]  ;;  %v707_v48 = vld [vmem:[#allocation4 + $0x288] sm:$0xff] }
  0xbc   :  { %443 = vmatmul.mubr.f32.vlgmr.msra.gmra.mxu1 %v13665_v1  ;;  %11813 = vmatprep.mubr.msk.f32.mxu0 %vm455_vm0, %v449_v2  ;;  %v691_v49 = vld [vmem:[#allocation4 + $0x208] sm:$0xff]  ;;  %v706_v50 = vld [vmem:[#allocation4 + $0x280] sm:$0xff] }
  0xbd   :  { %11824 = vmatprep.mubr.msk.f32.mxu1 %vm455_vm0, %v339_v3  ;;  %v690_v51 = vld [vmem:[#allocation4 + $0x200] sm:$0xff] }
  0xbe   :  { %v793_v52 = vld [vmem:[#allocation6 + $0x60] sm:$0xff] }
 0x17b   :  { %v10784_v4 = vpop.f32.mrf.mxu0 }
 0x17c   :  { %v10819_v5 = vpop.f32.mrf.mxu1 }
 0x17d   :  { %v10785_v6 = vpop.f32.mrf.mxu0 }
 0x17e   :  { %v10820_v7 = vpop.f32.mrf.mxu1  ;;  %v10786_v8 = vadd.f32 %v10785_v6, %v10784_v4 }
 0x17f   :  { %v10821_v9 = vadd.f32 %v10820_v7, %v10819_v5 }
 0x180   :  { %11822 = vmatprep.subr.msk.mxu1 %vm474_vm1, %v10786_v8 }
 0x181   :  { %11811 = vmatprep.subr.msk.mxu0 %vm474_vm1, %v10821_v9  ;;  %11823 = vmatpush3.msk.msra.mxu1 %vm474_vm1, %v10786_v8  ;;  %v794_v8 = vld [vmem:[#allocation6 + $0x68] sm:$0xff] }
 0x182   :  { %11812 = vmatpush3.msk.msra.mxu0 %vm474_vm1, %v10821_v9  ;;  %11825 = vmatmul.mubr.msk.f32.vlgmr.msra.gmra.mxu1 %vm455_vm0, %v340_v11  ;;  %v953_v9 = vld [vmem:[#allocation4 + $0x3f8] sm:$0xff]  ;;  %v795_v11 = vld [vmem:[#allocation6 + $0x70] sm:$0xff] }
 0x183   :  { %11814 = vmatmul.mubr.msk.f32.vlgmr.msra.gmra.mxu0 %vm455_vm0, %v450_v10  ;;  %10836 = vmatprep.subr.mxu0 %v721_v12  ;;  %v937_v10 = vld [vmem:[#allocation4 + $0x378] sm:$0xff]  ;;  %v952_v12 = vld [vmem:[#allocation4 + $0x3f0] sm:$0xff] }
 0x184   :  { %11816 = vmatprep.mubr.msk.f32.mxu0 %vm455_vm0, %v451_v13  ;;  %10837 = vmatpush3.msra.mxu0 %v705_v14  ;;  %v936_v13 = vld [vmem:[#allocation4 + $0x370] sm:$0xff]  ;;  %v796_v14 = vld [vmem:[#allocation6 + $0x78] sm:$0xff] }
 0x185   :  { %11827 = vmatprep.mubr.msk.f32.mxu1 %vm455_vm0, %v341_v15  ;;  %10838 = vmatprep.subr.mxu0 %v720_v16  ;;  %v951_v15 = vld [vmem:[#allocation4 + $0x3e8] sm:$0xff] }
 0x186   :  { %10839 = vmatpush3.msra.mxu0 %v704_v17  ;;  %11828 = vmatmul.mubr.msk.f32.gmra.mxu1 %vm455_vm0, %v342_v18  ;;  %v935_v16 = vld [vmem:[#allocation4 + $0x368] sm:$0xff]  ;;  %v797_v17 = vld [vmem:[#allocation6 + $0x80] sm:$0xff] }
 0x187   :  { %10840 = vmatprep.subr.mxu0 %v719_v19  ;;  %11817 = vmatmul.mubr.msk.f32.gmra.mxu0 %vm455_vm0, %v452_v20  ;;  %v950_v18 = vld [vmem:[#allocation4 + $0x3e0] sm:$0xff]  ;;  %v798_v20 = vld [vmem:[#allocation6 + $0x88] sm:$0xff] }
 0x188   :  { %10841 = vmatpush3.msra.mxu0 %v703_v21  ;;  %11819 = vmatprep.mubr.msk.f32.mxu0 %vm455_vm0, %v453_v22  ;;  %v934_v19 = vld [vmem:[#allocation4 + $0x360] sm:$0xff]  ;;  %v949_v21 = vld [vmem:[#allocation4 + $0x3d8] sm:$0xff] }
 0x189   :  { %10842 = vmatprep.subr.mxu0 %v718_v23  ;;  %11830 = vmatprep.mubr.msk.f32.mxu1 %vm455_vm0, %v343_v24  ;;  %v933_v22 = vld [vmem:[#allocation4 + $0x358] sm:$0xff]  ;;  %v948_v23 = vld [vmem:[#allocation4 + $0x3d0] sm:$0xff] }
 0x18a   :  { %10843 = vmatpush3.msra.mxu0 %v702_v25  ;;  %11831 = vmatmul.mubr.msk.f32.gmra.mxu1 %vm455_vm0, %v344_v26  ;;  %v932_v24 = vld [vmem:[#allocation4 + $0x350] sm:$0xff]  ;;  %v947_v25 = vld [vmem:[#allocation4 + $0x3c8] sm:$0xff] }
 0x18b   :  { %10844 = vmatprep.subr.mxu0 %v717_v27  ;;  %11820 = vmatmul.mubr.msk.f32.gmra.mxu0 %vm455_vm0, %v454_v28  ;;  %v931_v26 = vld [vmem:[#allocation4 + $0x348] sm:$0xff]  ;;  %v946_v27 = vld [vmem:[#allocation4 + $0x3c0] sm:$0xff] }
 0x18c   :  { %10845 = vmatpush3.msra.mxu0 %v701_v29  ;;  %786 = vmatprep.mubr.f32.mxu0 %v13660_v63  ;;  %v930_v28 = vld [vmem:[#allocation4 + $0x340] sm:$0xff]  ;;  %v945_v29 = vld [vmem:[#allocation4 + $0x3b8] sm:$0xff] }
 0x18d   :  { %10846 = vmatprep.subr.mxu0 %v716_v30  ;;  %11835 = vmatprep.mubr.msk.f32.mxu1 %vm455_vm0, %v793_v52  ;;  %v929_v30 = vld [vmem:[#allocation4 + $0x338] sm:$0xff] }
 0x18e   :  { %10847 = vmatpush3.msra.mxu0 %v700_v31  ;;  %v944_v31 = vld [vmem:[#allocation4 + $0x3b0] sm:$0xff] }
 0x18f   :  { %10848 = vmatprep.subr.mxu0 %v715_v32  ;;  %v928_v32 = vld [vmem:[#allocation4 + $0x330] sm:$0xff] }
 0x190   :  { %10849 = vmatpush3.msra.mxu0 %v699_v33  ;;  %v943_v33 = vld [vmem:[#allocation4 + $0x3a8] sm:$0xff] }
 0x191   :  { %10850 = vmatprep.subr.mxu0 %v714_v34  ;;  %v927_v34 = vld [vmem:[#allocation4 + $0x328] sm:$0xff] }
 0x192   :  { %10851 = vmatpush3.msra.mxu0 %v698_v35  ;;  %v942_v35 = vld [vmem:[#allocation4 + $0x3a0] sm:$0xff] }
 0x193   :  { %10852 = vmatprep.subr.mxu0 %v713_v36  ;;  %v926_v36 = vld [vmem:[#allocation4 + $0x320] sm:$0xff] }
 0x194   :  { %10853 = vmatpush3.msra.mxu0 %v697_v37  ;;  %v941_v37 = vld [vmem:[#allocation4 + $0x398] sm:$0xff] }
 0x195   :  { %10854 = vmatprep.subr.mxu0 %v712_v38  ;;  %v925_v38 = vld [vmem:[#allocation4 + $0x318] sm:$0xff] }
 0x196   :  { %10855 = vmatpush3.msra.mxu0 %v696_v39  ;;  %v940_v39 = vld [vmem:[#allocation4 + $0x390] sm:$0xff] }
 0x197   :  { %10856 = vmatprep.subr.mxu0 %v711_v40  ;;  %v924_v40 = vld [vmem:[#allocation4 + $0x310] sm:$0xff] }
 0x198   :  { %10857 = vmatpush3.msra.mxu0 %v695_v41  ;;  %v939_v41 = vld [vmem:[#allocation4 + $0x388] sm:$0xff] }
 0x199   :  { %10858 = vmatprep.subr.mxu0 %v710_v42  ;;  %v923_v42 = vld [vmem:[#allocation4 + $0x308] sm:$0xff] }
 0x19a   :  { %10859 = vmatpush3.msra.mxu0 %v694_v43  ;;  %v938_v43 = vld [vmem:[#allocation4 + $0x380] sm:$0xff] }
 0x19b   :  { %10860 = vmatprep.subr.mxu0 %v709_v44  ;;  %v922_v44 = vld [vmem:[#allocation4 + $0x300] sm:$0xff] }
 0x19c   :  { %10861 = vmatpush3.msra.mxu0 %v693_v45  ;;  %v1025_v45 = vld [vmem:[#allocation6 + $0x90] sm:$0xff] }
 0x19d   :  { %10862 = vmatprep.subr.mxu0 %v708_v46 }
 0x19e   :  { %10863 = vmatpush3.msra.mxu0 %v692_v47 }
 0x19f   :  { %10864 = vmatprep.subr.mxu0 %v707_v48 }
 0x1a0   :  { %10865 = vmatpush3.msra.mxu0 %v691_v49 }
 0x1a1   :  { %10866 = vmatprep.subr.mxu0 %v706_v50 }
 0x1a2   :  { %10867 = vmatpush3.msra.mxu0 %v690_v51 }
 0x1a3   :  { %787 = vmatmul.mubr.f32.vlgmr.msra.gmra.mxu0 %v13665_v1 }
 0x1a4   :  { %11846 = vmatprep.mubr.msk.f32.mxu0 %vm455_vm0, %v1025_v45 }
 0x242   :  { %v11826_v54 = vpop.f32.mrf.mxu1 }
 0x243   :  { %v11815_v53 = vpop.f32.mrf.mxu0 }
 0x244   :  { %v13690_v55 = vadd.f32 %v11826_v54, %v11815_v53  ;;  %v13692_v56 = vpop.f32.mrf.mxu1 }
 0x245   :  { %v13694_v57 = vpop.f32.mrf.mxu0 }
 0x246   :  { %v11829_v58 = vpop.f32.mrf.mxu1 }
 0x247   :  { %v11818_v59 = vpop.f32.mrf.mxu0 }
 0x248   :  { %v13696_v60 = vadd.f32 %v11829_v58, %v11818_v59  ;;  %v13698_v61 = vpop.f32.mrf.mxu1 }
 0x249   :  { %v13700_v62 = vpop.f32.mrf.mxu0 }
 0x24a   :  { %v11832_v2 = vpop.f32.mrf.mxu1 }
 0x24b   :  { %v11821_v0 = vpop.f32.mrf.mxu0 }
 0x24c   :  { %v13702_v3 = vadd.f32 %v11832_v2, %v11821_v0  ;;  %v13716_v46 = vpop.f32.mrf.mxu1 }
 0x24d   :  { %v13704_v4 = vpop.f32.mrf.mxu0 }
 0x263   :  { %v10868_v5 = vpop.f32.mrf.mxu0 }
 0x265   :  { %v10869_v6 = vpop.f32.mrf.mxu0 }
 0x266   :  { %v10870_v7 = vadd.f32 %v10869_v6, %v10868_v5  ;;  %v1026_v5 = vld [vmem:[#allocation6 + $0x98] sm:$0xff] }
 0x267   :  { %v1169_v6 = vld [vmem:[#allocation4 + $0x478] sm:$0xff] }
 0x268   :  { %11833 = vmatprep.subr.msk.mxu1 %vm474_vm1, %v10870_v7 }
 0x269   :  { %11834 = vmatpush3.msk.msra.mxu1 %vm474_vm1, %v10870_v7  ;;  %v1027_v7 = vld [vmem:[#allocation6 + $0xa0] sm:$0xff] }
 0x26a   :  { %11836 = vmatmul.mubr.msk.f32.vlgmr.msra.gmra.mxu1 %vm455_vm0, %v794_v8  ;;  %10878 = vmatprep.subr.mxu1 %v953_v9  ;;  %v1168_v8 = vld [vmem:[#allocation4 + $0x470] sm:$0xff]  ;;  %v1183_v9 = vld [vmem:[#allocation4 + $0x4e8] sm:$0xff] }
 0x26b   :  { %10879 = vmatpush3.msra.mxu1 %v937_v10  ;;  %11838 = vmatprep.mubr.msk.f32.mxu1 %vm455_vm0, %v795_v11  ;;  %v1167_v10 = vld [vmem:[#allocation4 + $0x468] sm:$0xff]  ;;  %v1029_v11 = vld [vmem:[#allocation6 + $0xb0] sm:$0xff] }
 0x26c   :  { %10880 = vmatprep.subr.mxu1 %v952_v12  ;;  %v1182_v12 = vld [vmem:[#allocation4 + $0x4e0] sm:$0xff] }
 0x26d   :  { %10881 = vmatpush3.msra.mxu1 %v936_v13  ;;  %v1166_v13 = vld [vmem:[#allocation4 + $0x460] sm:$0xff] }
 0x26e   :  { %11839 = vmatmul.mubr.msk.f32.gmra.mxu1 %vm455_vm0, %v796_v14  ;;  %10882 = vmatprep.subr.mxu1 %v951_v15  ;;  %v1030_v14 = vld [vmem:[#allocation6 + $0xb8] sm:$0xff] }
 0x26f   :  { %10883 = vmatpush3.msra.mxu1 %v935_v16  ;;  %11841 = vmatprep.mubr.msk.f32.mxu1 %vm455_vm0, %v797_v17  ;;  %v1181_v15 = vld [vmem:[#allocation4 + $0x4d8] sm:$0xff]  ;;  %v1180_v17 = vld [vmem:[#allocation4 + $0x4d0] sm:$0xff] }
 0x270   :  { %10884 = vmatprep.subr.mxu1 %v950_v18  ;;  %v1165_v16 = vld [vmem:[#allocation4 + $0x458] sm:$0xff]  ;;  %v1164_v18 = vld [vmem:[#allocation4 + $0x450] sm:$0xff] }
 0x271   :  { %10885 = vmatpush3.msra.mxu1 %v934_v19  ;;  %v1179_v19 = vld [vmem:[#allocation4 + $0x4c8] sm:$0xff] }
 0x272   :  { %11842 = vmatmul.mubr.msk.f32.gmra.mxu1 %vm455_vm0, %v798_v20  ;;  %10886 = vmatprep.subr.mxu1 %v949_v21  ;;  %v1163_v20 = vld [vmem:[#allocation4 + $0x448] sm:$0xff]  ;;  %v1178_v21 = vld [vmem:[#allocation4 + $0x4c0] sm:$0xff] }
 0x273   :  { %10887 = vmatpush3.msra.mxu1 %v933_v22  ;;  %1018 = vmatprep.mubr.f32.mxu1 %v13660_v63  ;;  %v1162_v22 = vld [vmem:[#allocation4 + $0x440] sm:$0xff] }
 0x274   :  { %10888 = vmatprep.subr.mxu1 %v948_v23  ;;  %v1177_v23 = vld [vmem:[#allocation4 + $0x4b8] sm:$0xff] }
 0x275   :  { %10889 = vmatpush3.msra.mxu1 %v932_v24  ;;  %v1161_v24 = vld [vmem:[#allocation4 + $0x438] sm:$0xff] }
 0x276   :  { %10890 = vmatprep.subr.mxu1 %v947_v25  ;;  %v1176_v25 = vld [vmem:[#allocation4 + $0x4b0] sm:$0xff] }
 0x277   :  { %10891 = vmatpush3.msra.mxu1 %v931_v26  ;;  %v1160_v26 = vld [vmem:[#allocation4 + $0x430] sm:$0xff] }
 0x278   :  { %10892 = vmatprep.subr.mxu1 %v946_v27  ;;  %v1175_v27 = vld [vmem:[#allocation4 + $0x4a8] sm:$0xff] }
 0x279   :  { %10893 = vmatpush3.msra.mxu1 %v930_v28  ;;  %v1159_v28 = vld [vmem:[#allocation4 + $0x428] sm:$0xff] }
 0x27a   :  { %10894 = vmatprep.subr.mxu1 %v945_v29  ;;  %v1174_v29 = vld [vmem:[#allocation4 + $0x4a0] sm:$0xff] }
 0x27b   :  { %10895 = vmatpush3.msra.mxu1 %v929_v30  ;;  %v1158_v30 = vld [vmem:[#allocation4 + $0x420] sm:$0xff] }
 0x27c   :  { %10896 = vmatprep.subr.mxu1 %v944_v31  ;;  %v1173_v31 = vld [vmem:[#allocation4 + $0x498] sm:$0xff] }
 0x27d   :  { %10897 = vmatpush3.msra.mxu1 %v928_v32  ;;  %v1157_v32 = vld [vmem:[#allocation4 + $0x418] sm:$0xff] }
 0x27e   :  { %10898 = vmatprep.subr.mxu1 %v943_v33  ;;  %v1172_v33 = vld [vmem:[#allocation4 + $0x490] sm:$0xff] }
 0x27f   :  { %10899 = vmatpush3.msra.mxu1 %v927_v34  ;;  %v1156_v34 = vld [vmem:[#allocation4 + $0x410] sm:$0xff] }
 0x280   :  { %10900 = vmatprep.subr.mxu1 %v942_v35  ;;  %v1171_v35 = vld [vmem:[#allocation4 + $0x488] sm:$0xff] }
 0x281   :  { %10901 = vmatpush3.msra.mxu1 %v926_v36  ;;  %v1155_v36 = vld [vmem:[#allocation4 + $0x408] sm:$0xff] }
 0x282   :  { %10902 = vmatprep.subr.mxu1 %v941_v37  ;;  %v1170_v37 = vld [vmem:[#allocation4 + $0x480] sm:$0xff] }
 0x283   :  { %10903 = vmatpush3.msra.mxu1 %v925_v38  ;;  %v1154_v38 = vld [vmem:[#allocation4 + $0x400] sm:$0xff] }
 0x284   :  { %10904 = vmatprep.subr.mxu1 %v940_v39  ;;  %v1257_v39 = vld [vmem:[#allocation6 + $0xc0] sm:$0xff] }
 0x285   :  { %10905 = vmatpush3.msra.mxu1 %v924_v40 }
 0x286   :  { %10906 = vmatprep.subr.mxu1 %v939_v41 }
 0x287   :  { %10907 = vmatpush3.msra.mxu1 %v923_v42 }
 0x288   :  { %10908 = vmatprep.subr.mxu1 %v938_v43 }
 0x289   :  { %10909 = vmatpush3.msra.mxu1 %v922_v44 }
 0x28a   :  { %1019 = vmatmul.mubr.f32.vlgmr.msra.gmra.mxu1 %v13665_v1 }
 0x28b   :  { %11857 = vmatprep.mubr.msk.f32.mxu1 %vm455_vm0, %v1257_v39 }
 0x32a   :  { %v11837_v47 = vpop.f32.mrf.mxu1 }
 0x32b   :  { %v13719_v48 = vadd.f32 %v11837_v47, %v13690_v55  ;;  %v1185_v55 = vld [vmem:[#allocation4 + $0x4f8] sm:$0xff] }
 0x32c   :  { %v13721_v49 = vpop.f32.mrf.mxu1 }
 0x32e   :  { %v11840_v50 = vpop.f32.mrf.mxu1 }
 0x32f   :  { %v13724_v51 = vadd.f32 %v11840_v50, %v13696_v60  ;;  %v1184_v60 = vld [vmem:[#allocation4 + $0x4f0] sm:$0xff] }
 0x330   :  { %v13726_v52 = vpop.f32.mrf.mxu1 }
 0x332   :  { %v11843_v53 = vpop.f32.mrf.mxu1 }
 0x333   :  { %v13729_v54 = vadd.f32 %v11843_v53, %v13702_v3  ;;  %v1028_v3 = vld [vmem:[#allocation6 + $0xa8] sm:$0xff] }
 0x334   :  { %v13731_v58 = vpop.f32.mrf.mxu1 }
 0x34a   :  { %v10910_v59 = vpop.f32.mrf.mxu1 }
 0x34c   :  { %v10911_v0 = vpop.f32.mrf.mxu1 }
 0x34d   :  { %v10912_v2 = vadd.f32 %v10911_v0, %v10910_v59 }
 0x34f   :  { %11844 = vmatprep.subr.msk.mxu0 %vm474_vm1, %v10912_v2 }
 0x350   :  { %11845 = vmatpush3.msk.msra.mxu0 %vm474_vm1, %v10912_v2 }
 0x351   :  { %11847 = vmatmul.mubr.msk.f32.vlgmr.msra.gmra.mxu0 %vm455_vm0, %v1026_v5  ;;  %10920 = vmatprep.subr.mxu0 %v1185_v55  ;;  %v1258_v5 = vld [vmem:[#allocation6 + $0xc8] sm:$0xff]  ;;  %v1401_v55 = vld [vmem:[#allocation4 + $0x578] sm:$0xff] }
 0x352   :  { %10921 = vmatpush3.msra.mxu0 %v1169_v6  ;;  %11849 = vmatprep.mubr.msk.f32.mxu0 %vm455_vm0, %v1027_v7  ;;  %v1259_v6 = vld [vmem:[#allocation6 + $0xd0] sm:$0xff] }
 0x353   :  { %10922 = vmatprep.subr.mxu0 %v1184_v60  ;;  %v1400_v7 = vld [vmem:[#allocation4 + $0x570] sm:$0xff]  ;;  %v1415_v60 = vld [vmem:[#allocation4 + $0x5e8] sm:$0xff] }
 0x354   :  { %10923 = vmatpush3.msra.mxu0 %v1168_v8  ;;  %v1399_v8 = vld [vmem:[#allocation4 + $0x568] sm:$0xff] }
 0x355   :  { %11850 = vmatmul.mubr.msk.f32.gmra.mxu0 %vm455_vm0, %v1028_v3  ;;  %10924 = vmatprep.subr.mxu0 %v1183_v9  ;;  %v1261_v3 = vld [vmem:[#allocation6 + $0xe0] sm:$0xff] }
 0x356   :  { %10925 = vmatpush3.msra.mxu0 %v1167_v10  ;;  %11852 = vmatprep.mubr.msk.f32.mxu0 %vm455_vm0, %v1029_v11  ;;  %v1414_v9 = vld [vmem:[#allocation4 + $0x5e0] sm:$0xff]  ;;  %v1262_v11 = vld [vmem:[#allocation6 + $0xe8] sm:$0xff] }
 0x357   :  { %10926 = vmatprep.subr.mxu0 %v1182_v12  ;;  %v1398_v10 = vld [vmem:[#allocation4 + $0x560] sm:$0xff]  ;;  %v1413_v12 = vld [vmem:[#allocation4 + $0x5d8] sm:$0xff] }
 0x358   :  { %10927 = vmatpush3.msra.mxu0 %v1166_v13  ;;  %v1397_v13 = vld [vmem:[#allocation4 + $0x558] sm:$0xff] }
 0x359   :  { %11853 = vmatmul.mubr.msk.f32.gmra.mxu0 %vm455_vm0, %v1030_v14  ;;  %10928 = vmatprep.subr.mxu0 %v1181_v15  ;;  %v1412_v14 = vld [vmem:[#allocation4 + $0x5d0] sm:$0xff] }
 0x35a   :  { %10929 = vmatpush3.msra.mxu0 %v1165_v16  ;;  %1250 = vmatprep.mubr.f32.mxu0 %v13660_v63  ;;  %v1396_v15 = vld [vmem:[#allocation4 + $0x550] sm:$0xff]  ;;  %v1411_v16 = vld [vmem:[#allocation4 + $0x5c8] sm:$0xff] }
 0x35b   :  { %10930 = vmatprep.subr.mxu0 %v1180_v17  ;;  %v1395_v17 = vld [vmem:[#allocation4 + $0x548] sm:$0xff] }
 0x35c   :  { %10931 = vmatpush3.msra.mxu0 %v1164_v18  ;;  %v1410_v18 = vld [vmem:[#allocation4 + $0x5c0] sm:$0xff] }
 0x35d   :  { %10932 = vmatprep.subr.mxu0 %v1179_v19  ;;  %v1394_v19 = vld [vmem:[#allocation4 + $0x540] sm:$0xff] }
 0x35e   :  { %10933 = vmatpush3.msra.mxu0 %v1163_v20  ;;  %v1409_v20 = vld [vmem:[#allocation4 + $0x5b8] sm:$0xff] }
 0x35f   :  { %10934 = vmatprep.subr.mxu0 %v1178_v21  ;;  %v1393_v21 = vld [vmem:[#allocation4 + $0x538] sm:$0xff] }
 0x360   :  { %10935 = vmatpush3.msra.mxu0 %v1162_v22  ;;  %v1408_v22 = vld [vmem:[#allocation4 + $0x5b0] sm:$0xff] }
 0x361   :  { %10936 = vmatprep.subr.mxu0 %v1177_v23  ;;  %v1392_v23 = vld [vmem:[#allocation4 + $0x530] sm:$0xff] }
 0x362   :  { %10937 = vmatpush3.msra.mxu0 %v1161_v24  ;;  %v1407_v24 = vld [vmem:[#allocation4 + $0x5a8] sm:$0xff] }
 0x363   :  { %10938 = vmatprep.subr.mxu0 %v1176_v25  ;;  %v1391_v25 = vld [vmem:[#allocation4 + $0x528] sm:$0xff] }
 0x364   :  { %10939 = vmatpush3.msra.mxu0 %v1160_v26  ;;  %v1406_v26 = vld [vmem:[#allocation4 + $0x5a0] sm:$0xff] }
 0x365   :  { %10940 = vmatprep.subr.mxu0 %v1175_v27  ;;  %v1390_v27 = vld [vmem:[#allocation4 + $0x520] sm:$0xff] }
 0x366   :  { %10941 = vmatpush3.msra.mxu0 %v1159_v28  ;;  %v1405_v28 = vld [vmem:[#allocation4 + $0x598] sm:$0xff] }
 0x367   :  { %10942 = vmatprep.subr.mxu0 %v1174_v29  ;;  %v1389_v29 = vld [vmem:[#allocation4 + $0x518] sm:$0xff] }
 0x368   :  { %10943 = vmatpush3.msra.mxu0 %v1158_v30  ;;  %v1404_v30 = vld [vmem:[#allocation4 + $0x590] sm:$0xff] }
 0x369   :  { %10944 = vmatprep.subr.mxu0 %v1173_v31  ;;  %v1388_v31 = vld [vmem:[#allocation4 + $0x510] sm:$0xff] }
 0x36a   :  { %10945 = vmatpush3.msra.mxu0 %v1157_v32  ;;  %v1403_v32 = vld [vmem:[#allocation4 + $0x588] sm:$0xff] }
 0x36b   :  { %10946 = vmatprep.subr.mxu0 %v1172_v33  ;;  %v1387_v33 = vld [vmem:[#allocation4 + $0x508] sm:$0xff] }
 0x36c   :  { %10947 = vmatpush3.msra.mxu0 %v1156_v34  ;;  %v1402_v34 = vld [vmem:[#allocation4 + $0x580] sm:$0xff] }
 0x36d   :  { %10948 = vmatprep.subr.mxu0 %v1171_v35  ;;  %v1386_v35 = vld [vmem:[#allocation4 + $0x500] sm:$0xff] }
 0x36e   :  { %10949 = vmatpush3.msra.mxu0 %v1155_v36  ;;  %v1489_v36 = vld [vmem:[#allocation6 + $0xf0] sm:$0xff] }
 0x36f   :  { %10950 = vmatprep.subr.mxu0 %v1170_v37 }
 0x370   :  { %10951 = vmatpush3.msra.mxu0 %v1154_v38 }
 0x371   :  { %1251 = vmatmul.mubr.f32.vlgmr.msra.gmra.mxu0 %v13665_v1 }
 0x372   :  { %11868 = vmatprep.mubr.msk.f32.mxu0 %vm455_vm0, %v1489_v36 }
 0x411   :  { %v11848_v40 = vpop.f32.mrf.mxu0 }
 0x412   :  { %v13744_v41 = vadd.f32 %v11848_v40, %v13719_v48  ;;  %v1417_v48 = vld [vmem:[#allocation4 + $0x5f8] sm:$0xff] }
 0x413   :  { %v13746_v42 = vpop.f32.mrf.mxu0 }
 0x415   :  { %v11851_v43 = vpop.f32.mrf.mxu0 }
 0x416   :  { %v13749_v44 = vadd.f32 %v11851_v43, %v13724_v51  ;;  %v1416_v51 = vld [vmem:[#allocation4 + $0x5f0] sm:$0xff] }
 0x417   :  { %v13751_v45 = vpop.f32.mrf.mxu0 }
 0x419   :  { %v11854_v47 = vpop.f32.mrf.mxu0 }
 0x41a   :  { %v13754_v50 = vadd.f32 %v11854_v47, %v13729_v54  ;;  %v1260_v54 = vld [vmem:[#allocation6 + $0xd8] sm:$0xff] }
 0x41b   :  { %v13756_v53 = vpop.f32.mrf.mxu0 }
 0x431   :  { %v10952_v59 = vpop.f32.mrf.mxu0 }
 0x433   :  { %v10953_v0 = vpop.f32.mrf.mxu0 }
 0x434   :  { %v10954_v2 = vadd.f32 %v10953_v0, %v10952_v59 }
 0x436   :  { %11855 = vmatprep.subr.msk.mxu1 %vm474_vm1, %v10954_v2 }
 0x437   :  { %11856 = vmatpush3.msk.msra.mxu1 %vm474_vm1, %v10954_v2 }
 0x438   :  { %11858 = vmatmul.mubr.msk.f32.vlgmr.msra.gmra.mxu1 %vm455_vm0, %v1258_v5  ;;  %10962 = vmatprep.subr.mxu1 %v1417_v48 }
 0x439   :  { %10963 = vmatpush3.msra.mxu1 %v1401_v55  ;;  %11860 = vmatprep.mubr.msk.f32.mxu1 %vm455_vm0, %v1259_v6  ;;  %v1490_v6 = vld [vmem:[#allocation6 + $0xf8] sm:$0xff] }
 0x43a   :  { %10964 = vmatprep.subr.mxu1 %v1416_v51  ;;  %v1633_v51 = vld [vmem:[#allocation4 + $0x678] sm:$0xff] }
 0x43b   :  { %10965 = vmatpush3.msra.mxu1 %v1400_v7  ;;  %v1491_v7 = vld [vmem:[#allocation6 + $0x100] sm:$0xff] }
 0x43c   :  { %11861 = vmatmul.mubr.msk.f32.gmra.mxu1 %vm455_vm0, %v1260_v54  ;;  %10966 = vmatprep.subr.mxu1 %v1415_v60  ;;  %v1632_v54 = vld [vmem:[#allocation4 + $0x670] sm:$0xff]  ;;  %v1647_v60 = vld [vmem:[#allocation4 + $0x6e8] sm:$0xff] }
 0x43d   :  { %10967 = vmatpush3.msra.mxu1 %v1399_v8  ;;  %11863 = vmatprep.mubr.msk.f32.mxu1 %vm455_vm0, %v1261_v3  ;;  %v1631_v8 = vld [vmem:[#allocation4 + $0x668] sm:$0xff]  ;;  %v1493_v3 = vld [vmem:[#allocation6 + $0x110] sm:$0xff] }
 0x43e   :  { %10968 = vmatprep.subr.mxu1 %v1414_v9  ;;  %v1646_v9 = vld [vmem:[#allocation4 + $0x6e0] sm:$0xff] }
 0x43f   :  { %10969 = vmatpush3.msra.mxu1 %v1398_v10  ;;  %v1630_v10 = vld [vmem:[#allocation4 + $0x660] sm:$0xff] }
 0x440   :  { %11864 = vmatmul.mubr.msk.f32.gmra.mxu1 %vm455_vm0, %v1262_v11  ;;  %10970 = vmatprep.subr.mxu1 %v1413_v12  ;;  %v1494_v11 = vld [vmem:[#allocation6 + $0x118] sm:$0xff] }
 0x441   :  { %10971 = vmatpush3.msra.mxu1 %v1397_v13  ;;  %1482 = vmatprep.mubr.f32.mxu1 %v13660_v63  ;;  %v1645_v12 = vld [vmem:[#allocation4 + $0x6d8] sm:$0xff] }
 0x442   :  { %10972 = vmatprep.subr.mxu1 %v1412_v14  ;;  %v1629_v13 = vld [vmem:[#allocation4 + $0x658] sm:$0xff]  ;;  %v1644_v14 = vld [vmem:[#allocation4 + $0x6d0] sm:$0xff] }
 0x443   :  { %10973 = vmatpush3.msra.mxu1 %v1396_v15  ;;  %v1628_v15 = vld [vmem:[#allocation4 + $0x650] sm:$0xff] }
 0x444   :  { %10974 = vmatprep.subr.mxu1 %v1411_v16  ;;  %v1643_v16 = vld [vmem:[#allocation4 + $0x6c8] sm:$0xff] }
 0x445   :  { %10975 = vmatpush3.msra.mxu1 %v1395_v17  ;;  %v1627_v17 = vld [vmem:[#allocation4 + $0x648] sm:$0xff] }
 0x446   :  { %10976 = vmatprep.subr.mxu1 %v1410_v18  ;;  %v1642_v18 = vld [vmem:[#allocation4 + $0x6c0] sm:$0xff] }
 0x447   :  { %10977 = vmatpush3.msra.mxu1 %v1394_v19  ;;  %v1626_v19 = vld [vmem:[#allocation4 + $0x640] sm:$0xff] }
 0x448   :  { %10978 = vmatprep.subr.mxu1 %v1409_v20  ;;  %v1641_v20 = vld [vmem:[#allocation4 + $0x6b8] sm:$0xff] }
 0x449   :  { %10979 = vmatpush3.msra.mxu1 %v1393_v21  ;;  %v1625_v21 = vld [vmem:[#allocation4 + $0x638] sm:$0xff] }
 0x44a   :  { %10980 = vmatprep.subr.mxu1 %v1408_v22  ;;  %v1640_v22 = vld [vmem:[#allocation4 + $0x6b0] sm:$0xff] }
 0x44b   :  { %10981 = vmatpush3.msra.mxu1 %v1392_v23  ;;  %v1624_v23 = vld [vmem:[#allocation4 + $0x630] sm:$0xff] }
 0x44c   :  { %10982 = vmatprep.subr.mxu1 %v1407_v24  ;;  %v1639_v24 = vld [vmem:[#allocation4 + $0x6a8] sm:$0xff] }
 0x44d   :  { %10983 = vmatpush3.msra.mxu1 %v1391_v25  ;;  %v1623_v25 = vld [vmem:[#allocation4 + $0x628] sm:$0xff] }
 0x44e   :  { %10984 = vmatprep.subr.mxu1 %v1406_v26  ;;  %v1622_v26 = vld [vmem:[#allocation4 + $0x620] sm:$0xff] }
 0x44f   :  { %10985 = vmatpush3.msra.mxu1 %v1390_v27  ;;  %v1637_v27 = vld [vmem:[#allocation4 + $0x698] sm:$0xff] }
 0x450   :  { %10986 = vmatprep.subr.mxu1 %v1405_v28  ;;  %v1621_v28 = vld [vmem:[#allocation4 + $0x618] sm:$0xff] }
 0x451   :  { %10987 = vmatpush3.msra.mxu1 %v1389_v29  ;;  %v1636_v29 = vld [vmem:[#allocation4 + $0x690] sm:$0xff] }
 0x452   :  { %10988 = vmatprep.subr.mxu1 %v1404_v30  ;;  %v1620_v30 = vld [vmem:[#allocation4 + $0x610] sm:$0xff] }
 0x453   :  { %10989 = vmatpush3.msra.mxu1 %v1388_v31  ;;  %v1635_v31 = vld [vmem:[#allocation4 + $0x688] sm:$0xff] }
 0x454   :  { %10990 = vmatprep.subr.mxu1 %v1403_v32  ;;  %v1619_v32 = vld [vmem:[#allocation4 + $0x608] sm:$0xff] }
 0x455   :  { %10991 = vmatpush3.msra.mxu1 %v1387_v33  ;;  %v1634_v33 = vld [vmem:[#allocation4 + $0x680] sm:$0xff] }
 0x456   :  { %10992 = vmatprep.subr.mxu1 %v1402_v34  ;;  %v1618_v34 = vld [vmem:[#allocation4 + $0x600] sm:$0xff] }
 0x457   :  { %10993 = vmatpush3.msra.mxu1 %v1386_v35  ;;  %v1721_v35 = vld [vmem:[#allocation6 + $0x120] sm:$0xff] }
 0x458   :  { %1483 = vmatmul.mubr.f32.vlgmr.msra.gmra.mxu1 %v13665_v1 }
 0x459   :  { %11879 = vmatprep.mubr.msk.f32.mxu1 %vm455_vm0, %v1721_v35  ;;  %v1866_v35 = vld [vmem:[#allocation4 + $0x780] sm:$0xff] }
 0x4f8   :  { %v11859_v37 = vpop.f32.mrf.mxu1 }
 0x4f9   :  { %v13769_v38 = vadd.f32 %v11859_v37, %v13744_v41  ;;  %v1649_v41 = vld [vmem:[#allocation4 + $0x6f8] sm:$0xff] }
 0x4fa   :  { %v13771_v39 = vpop.f32.mrf.mxu1 }
 0x4fc   :  { %v11862_v40 = vpop.f32.mrf.mxu1 }
 0x4fd   :  { %v13774_v43 = vadd.f32 %v11862_v40, %v13749_v44  ;;  %v1648_v44 = vld [vmem:[#allocation4 + $0x6f0] sm:$0xff] }
 0x4fe   :  { %v13776_v47 = vpop.f32.mrf.mxu1 }
 0x500   :  { %v11865_v59 = vpop.f32.mrf.mxu1 }
 0x501   :  { %v13779_v0 = vadd.f32 %v11865_v59, %v13754_v50  ;;  %v1492_v50 = vld [vmem:[#allocation6 + $0x108] sm:$0xff] }
 0x502   :  { %v13781_v2 = vpop.f32.mrf.mxu1 }
 0x518   :  { %v10994_v5 = vpop.f32.mrf.mxu1 }
 0x51a   :  { %v10995_v48 = vpop.f32.mrf.mxu1 }
 0x51b   :  { %v10996_v55 = vadd.f32 %v10995_v48, %v10994_v5 }
 0x51d   :  { %11866 = vmatprep.subr.msk.mxu0 %vm474_vm1, %v10996_v55 }
 0x51e   :  { %11867 = vmatpush3.msk.msra.mxu0 %vm474_vm1, %v10996_v55 }
 0x51f   :  { %11869 = vmatmul.mubr.msk.f32.vlgmr.msra.gmra.mxu0 %vm455_vm0, %v1490_v6  ;;  %11004 = vmatprep.subr.mxu0 %v1649_v41 }
 0x520   :  { %11005 = vmatpush3.msra.mxu0 %v1633_v51  ;;  %11871 = vmatprep.mubr.msk.f32.mxu0 %vm455_vm0, %v1491_v7 }
 0x521   :  { %11006 = vmatprep.subr.mxu0 %v1648_v44  ;;  %v1722_v44 = vld [vmem:[#allocation6 + $0x128] sm:$0xff] }
 0x522   :  { %11007 = vmatpush3.msra.mxu0 %v1632_v54  ;;  %v1865_v54 = vld [vmem:[#allocation4 + $0x778] sm:$0xff] }
 0x523   :  { %11872 = vmatmul.mubr.msk.f32.gmra.mxu0 %vm455_vm0, %v1492_v50  ;;  %11008 = vmatprep.subr.mxu0 %v1647_v60  ;;  %v1723_v50 = vld [vmem:[#allocation6 + $0x130] sm:$0xff] }
 0x524   :  { %11009 = vmatpush3.msra.mxu0 %v1631_v8  ;;  %11874 = vmatprep.mubr.msk.f32.mxu0 %vm455_vm0, %v1493_v3  ;;  %v1864_v60 = vld [vmem:[#allocation4 + $0x770] sm:$0xff]  ;;  %v1879_v8 = vld [vmem:[#allocation4 + $0x7e8] sm:$0xff] }
 0x525   :  { %11010 = vmatprep.subr.mxu0 %v1646_v9  ;;  %v1863_v3 = vld [vmem:[#allocation4 + $0x768] sm:$0xff]  ;;  %v1725_v9 = vld [vmem:[#allocation6 + $0x140] sm:$0xff] }
 0x526   :  { %11011 = vmatpush3.msra.mxu0 %v1630_v10  ;;  %v1878_v10 = vld [vmem:[#allocation4 + $0x7e0] sm:$0xff] }
 0x527   :  { %11875 = vmatmul.mubr.msk.f32.gmra.mxu0 %vm455_vm0, %v1494_v11  ;;  %11012 = vmatprep.subr.mxu0 %v1645_v12  ;;  %v1862_v11 = vld [vmem:[#allocation4 + $0x760] sm:$0xff]  ;;  %v1726_v12 = vld [vmem:[#allocation6 + $0x148] sm:$0xff] }
 0x528   :  { %11013 = vmatpush3.msra.mxu0 %v1629_v13  ;;  %1714 = vmatprep.mubr.f32.mxu0 %v13660_v63  ;;  %v1638_v63 = vld [vmem:[#allocation4 + $0x6a0] sm:$0xff]  ;;  %v1877_v13 = vld [vmem:[#allocation4 + $0x7d8] sm:$0xff] }
 0x529   :  { %11014 = vmatprep.subr.mxu0 %v1644_v14  ;;  %v1861_v14 = vld [vmem:[#allocation4 + $0x758] sm:$0xff] }
 0x52a   :  { %11015 = vmatpush3.msra.mxu0 %v1628_v15  ;;  %v1876_v15 = vld [vmem:[#allocation4 + $0x7d0] sm:$0xff] }
 0x52b   :  { %11016 = vmatprep.subr.mxu0 %v1643_v16  ;;  %v1860_v16 = vld [vmem:[#allocation4 + $0x750] sm:$0xff] }
 0x52c   :  { %11017 = vmatpush3.msra.mxu0 %v1627_v17  ;;  %v1875_v17 = vld [vmem:[#allocation4 + $0x7c8] sm:$0xff] }
 0x52d   :  { %11018 = vmatprep.subr.mxu0 %v1642_v18  ;;  %v13818_v18 = vld [vmem:[%s15186_s0 + $0x8] sm:$0x3f] }
 0x52e   :  { %11019 = vmatpush3.msra.mxu0 %v1626_v19  ;;  %v1859_v19 = vld [vmem:[#allocation4 + $0x748] sm:$0xff] }
 0x52f   :  { %11020 = vmatprep.subr.mxu0 %v1641_v20  ;;  %v1874_v20 = vld [vmem:[#allocation4 + $0x7c0] sm:$0xff] }
 0x530   :  { %11021 = vmatpush3.msra.mxu0 %v1625_v21  ;;  %v1858_v21 = vld [vmem:[#allocation4 + $0x740] sm:$0xff] }
 0x531   :  { %11022 = vmatprep.subr.mxu0 %v1640_v22  ;;  %v1873_v22 = vld [vmem:[#allocation4 + $0x7b8] sm:$0xff] }
 0x532   :  { %11023 = vmatpush3.msra.mxu0 %v1624_v23  ;;  %v1857_v23 = vld [vmem:[#allocation4 + $0x738] sm:$0xff] }
 0x533   :  { %11024 = vmatprep.subr.mxu0 %v1639_v24  ;;  %v1872_v24 = vld [vmem:[#allocation4 + $0x7b0] sm:$0xff] }
 0x534   :  { %11025 = vmatpush3.msra.mxu0 %v1623_v25  ;;  %v1856_v25 = vld [vmem:[#allocation4 + $0x730] sm:$0xff] }
 0x535   :  { %11026 = vmatprep.subr.mxu0 %v1638_v63  ;;  %v1871_v63 = vld [vmem:[#allocation4 + $0x7a8] sm:$0xff] }
 0x536   :  { %11027 = vmatpush3.msra.mxu0 %v1622_v26  ;;  %v1855_v26 = vld [vmem:[#allocation4 + $0x728] sm:$0xff] }
 0x537   :  { %11028 = vmatprep.subr.mxu0 %v1637_v27  ;;  %v1870_v27 = vld [vmem:[#allocation4 + $0x7a0] sm:$0xff] }
 0x538   :  { %11029 = vmatpush3.msra.mxu0 %v1621_v28  ;;  %v1854_v28 = vld [vmem:[#allocation4 + $0x720] sm:$0xff] }
 0x539   :  { %11030 = vmatprep.subr.mxu0 %v1636_v29  ;;  %v1869_v29 = vld [vmem:[#allocation4 + $0x798] sm:$0xff] }
 0x53a   :  { %11031 = vmatpush3.msra.mxu0 %v1620_v30  ;;  %v1853_v30 = vld [vmem:[#allocation4 + $0x718] sm:$0xff] }
 0x53b   :  { %11032 = vmatprep.subr.mxu0 %v1635_v31  ;;  %v1868_v31 = vld [vmem:[#allocation4 + $0x790] sm:$0xff] }
 0x53c   :  { %11033 = vmatpush3.msra.mxu0 %v1619_v32  ;;  %v1852_v32 = vld [vmem:[#allocation4 + $0x710] sm:$0xff] }
 0x53d   :  { %11034 = vmatprep.subr.mxu0 %v1634_v33  ;;  %v1867_v33 = vld [vmem:[#allocation4 + $0x788] sm:$0xff] }
 0x53e   :  { %11035 = vmatpush3.msra.mxu0 %v1618_v34  ;;  %v1851_v34 = vld [vmem:[#allocation4 + $0x708] sm:$0xff] }
 0x53f   :  { %1715 = vmatmul.mubr.f32.vlgmr.msra.gmra.mxu0 %v13665_v1 }
 0x5df   :  { %v11870_v36 = vpop.f32.mrf.mxu0 }
 0x5e0   :  { %v13794_v37 = vadd.f32 %v11870_v36, %v13769_v38  ;;  %v1881_v38 = vld [vmem:[#allocation4 + $0x7f8] sm:$0xff]  ;;  %v1850_v36 = vld [vmem:[#allocation4 + $0x700] sm:$0xff] }
 0x5e1   :  { %v13796_v40 = vpop.f32.mrf.mxu0 }
 0x5e3   :  { %v11873_v59 = vpop.f32.mrf.mxu0 }
 0x5e4   :  { %v13799_v5 = vadd.f32 %v11873_v59, %v13774_v43  ;;  %v1880_v43 = vld [vmem:[#allocation4 + $0x7f0] sm:$0xff] }
 0x5e5   :  { %v13801_v48 = vpop.f32.mrf.mxu0  ;;  %v13824_v59 = vld [vmem:[%s15186_s0] sm:$0x3f]  ;;  %s13501_s0 = smov 1  }
 0x5e7   :  { %v11876_v55 = vpop.f32.mrf.mxu0 }
 0x5e8   :  { %v13804_v6 = vadd.f32 %v11876_v55, %v13779_v0  ;;  %v1724_v0 = vld [vmem:[#allocation6 + $0x138] sm:$0xff]  ;;  %v1953_v55 = vld [vmem:[#allocation6 + $0x150] sm:$0xff] }
 0x5e9   :  { %v13806_v1 = vpop.f32.mrf.mxu0  ;;  %11890 = vmatprep.mubr.msk.f32.mxu0 %vm455_vm0, %v1953_v55  ;;  %v2084_v55 = vld [vmem:[#allocation4 + $0x810] sm:$0xff] }
 0x5ff   :  { %v11036_v41 = vpop.f32.mrf.mxu0 }
 0x601   :  { %v11037_v51 = vpop.f32.mrf.mxu0 }
 0x602   :  { %v11038_v7 = vadd.f32 %v11037_v51, %v11036_v41 }
 0x604   :  { %11877 = vmatprep.subr.msk.mxu1 %vm474_vm1, %v11038_v7 }
 0x605   :  { %11878 = vmatpush3.msk.msra.mxu1 %vm474_vm1, %v11038_v7 }
 0x606   :  { %11880 = vmatmul.mubr.msk.f32.vlgmr.msra.gmra.mxu1 %vm455_vm0, %v1722_v44  ;;  %11046 = vmatprep.subr.mxu1 %v1881_v38 }
 0x607   :  { %11047 = vmatpush3.msra.mxu1 %v1865_v54  ;;  %11882 = vmatprep.mubr.msk.f32.mxu1 %vm455_vm0, %v1723_v50 }
 0x608   :  { %11048 = vmatprep.subr.mxu1 %v1880_v43 }
 0x609   :  { %11049 = vmatpush3.msra.mxu1 %v1864_v60 }
 0x60a   :  { %11883 = vmatmul.mubr.msk.f32.gmra.mxu1 %vm455_vm0, %v1724_v0  ;;  %11050 = vmatprep.subr.mxu1 %v1879_v8 }
 0x60b   :  { %11051 = vmatpush3.msra.mxu1 %v1863_v3  ;;  %11885 = vmatprep.mubr.msk.f32.mxu1 %vm455_vm0, %v1725_v9  ;;  %v1954_v9 = vld [vmem:[#allocation6 + $0x158] sm:$0xff] }
 0x60c   :  { %11052 = vmatprep.subr.mxu1 %v1878_v10  ;;  %v2097_v10 = vld [vmem:[#allocation4 + $0x878] sm:$0xff] }
 0x60d   :  { %11053 = vmatpush3.msra.mxu1 %v1862_v11  ;;  %v1955_v11 = vld [vmem:[#allocation6 + $0x160] sm:$0xff] }
 0x60e   :  { %11886 = vmatmul.mubr.msk.f32.gmra.mxu1 %vm455_vm0, %v1726_v12  ;;  %11054 = vmatprep.subr.mxu1 %v1877_v13  ;;  %v2096_v12 = vld [vmem:[#allocation4 + $0x870] sm:$0xff]  ;;  %v2111_v13 = vld [vmem:[#allocation4 + $0x8e8] sm:$0xff] }
 0x60f   :  { %11055 = vmatpush3.msra.mxu1 %v1861_v14  ;;  %1946 = vmatprep.mubr.f32.mxu1 %v13818_v18  ;;  %v2095_v14 = vld [vmem:[#allocation4 + $0x868] sm:$0xff] }
 0x610   :  { %11056 = vmatprep.subr.mxu1 %v1876_v15  ;;  %v1957_v15 = vld [vmem:[#allocation6 + $0x170] sm:$0xff] }
 0x611   :  { %11057 = vmatpush3.msra.mxu1 %v1860_v16  ;;  %v2110_v16 = vld [vmem:[#allocation4 + $0x8e0] sm:$0xff] }
 0x612   :  { %11058 = vmatprep.subr.mxu1 %v1875_v17  ;;  %v2094_v17 = vld [vmem:[#allocation4 + $0x860] sm:$0xff] }
 0x613   :  { %11059 = vmatpush3.msra.mxu1 %v1859_v19  ;;  %v1958_v19 = vld [vmem:[#allocation6 + $0x178] sm:$0xff] }
 0x614   :  { %11060 = vmatprep.subr.mxu1 %v1874_v20  ;;  %v2109_v20 = vld [vmem:[#allocation4 + $0x8d8] sm:$0xff] }
 0x615   :  { %11061 = vmatpush3.msra.mxu1 %v1858_v21  ;;  %v2093_v21 = vld [vmem:[#allocation4 + $0x858] sm:$0xff] }
 0x616   :  { %11062 = vmatprep.subr.mxu1 %v1873_v22  ;;  %v2108_v22 = vld [vmem:[#allocation4 + $0x8d0] sm:$0xff] }
 0x617   :  { %11063 = vmatpush3.msra.mxu1 %v1857_v23  ;;  %v2092_v23 = vld [vmem:[#allocation4 + $0x850] sm:$0xff] }
 0x618   :  { %11064 = vmatprep.subr.mxu1 %v1872_v24  ;;  %v2107_v24 = vld [vmem:[#allocation4 + $0x8c8] sm:$0xff] }
 0x619   :  { %11065 = vmatpush3.msra.mxu1 %v1856_v25  ;;  %v2091_v25 = vld [vmem:[#allocation4 + $0x848] sm:$0xff] }
 0x61a   :  { %11066 = vmatprep.subr.mxu1 %v1871_v63  ;;  %v2106_v63 = vld [vmem:[#allocation4 + $0x8c0] sm:$0xff] }
 0x61b   :  { %11067 = vmatpush3.msra.mxu1 %v1855_v26  ;;  %v2090_v26 = vld [vmem:[#allocation4 + $0x840] sm:$0xff] }
 0x61c   :  { %11068 = vmatprep.subr.mxu1 %v1870_v27  ;;  %v2105_v27 = vld [vmem:[#allocation4 + $0x8b8] sm:$0xff] }
 0x61d   :  { %11069 = vmatpush3.msra.mxu1 %v1854_v28  ;;  %v2089_v28 = vld [vmem:[#allocation4 + $0x838] sm:$0xff] }
 0x61e   :  { %11070 = vmatprep.subr.mxu1 %v1869_v29  ;;  %v2104_v29 = vld [vmem:[#allocation4 + $0x8b0] sm:$0xff] }
 0x61f   :  { %11071 = vmatpush3.msra.mxu1 %v1853_v30  ;;  %v2088_v30 = vld [vmem:[#allocation4 + $0x830] sm:$0xff] }
 0x620   :  { %11072 = vmatprep.subr.mxu1 %v1868_v31  ;;  %v2103_v31 = vld [vmem:[#allocation4 + $0x8a8] sm:$0xff] }
 0x621   :  { %11073 = vmatpush3.msra.mxu1 %v1852_v32  ;;  %v2087_v32 = vld [vmem:[#allocation4 + $0x828] sm:$0xff] }
 0x622   :  { %11074 = vmatprep.subr.mxu1 %v1867_v33  ;;  %v2086_v33 = vld [vmem:[#allocation4 + $0x820] sm:$0xff] }
 0x623   :  { %11075 = vmatpush3.msra.mxu1 %v1851_v34  ;;  %v2101_v34 = vld [vmem:[#allocation4 + $0x898] sm:$0xff] }
 0x624   :  { %11076 = vmatprep.subr.mxu1 %v1866_v35  ;;  %v2085_v35 = vld [vmem:[#allocation4 + $0x818] sm:$0xff] }
 0x625   :  { %11077 = vmatpush3.msra.mxu1 %v1850_v36  ;;  %v2100_v36 = vld [vmem:[#allocation4 + $0x890] sm:$0xff] }
 0x626   :  { %1947 = vmatmul.mubr.f32.vlgmr.msra.gmra.mxu1 %v13824_v59 }
 0x6c6   :  { %v11881_v41 = vpop.f32.mrf.mxu1 }
 0x6c7   :  { %v13829_v51 = vadd.f32 %v11881_v41, %v13794_v37  ;;  %v2113_v37 = vld [vmem:[#allocation4 + $0x8f8] sm:$0xff]  ;;  %v2099_v41 = vld [vmem:[#allocation4 + $0x888] sm:$0xff] }
 0x6c8   :  { %v13831_v7 = vpop.f32.mrf.mxu1 }
 0x6ca   :  { %v11884_v44 = vpop.f32.mrf.mxu1 }
 0x6cb   :  { %v13834_v38 = vadd.f32 %v11884_v44, %v13799_v5  ;;  %v2112_v5 = vld [vmem:[#allocation4 + $0x8f0] sm:$0xff]  ;;  %v2083_v44 = vld [vmem:[#allocation4 + $0x808] sm:$0xff] }
 0x6cc   :  { %v13836_v54 = vpop.f32.mrf.mxu1 }
 0x6ce   :  { %v11887_v50 = vpop.f32.mrf.mxu1 }
 0x6cf   :  { %v13839_v43 = vadd.f32 %v11887_v50, %v13804_v6  ;;  %v1956_v6 = vld [vmem:[#allocation6 + $0x168] sm:$0xff]  ;;  %v2098_v50 = vld [vmem:[#allocation4 + $0x880] sm:$0xff] }
 0x6d0   :  { %v13841_v60 = vpop.f32.mrf.mxu1 }
 0x6e6   :  { %v11078_v0 = vpop.f32.mrf.mxu1 }
 0x6e8   :  { %v11079_v8 = vpop.f32.mrf.mxu1 }
 0x6e9   :  { %v11080_v3 = vadd.f32 %v11079_v8, %v11078_v0  ;;  %v2082_v0 = vld [vmem:[#allocation4 + $0x800] sm:$0xff] }
 0x6ea   :  { %v2185_v8 = vld [vmem:[#allocation6 + $0x180] sm:$0xff] }
 0x6eb   :  { %11888 = vmatprep.subr.msk.mxu0 %vm474_vm1, %v11080_v3  ;;  %11901 = vmatprep.mubr.msk.f32.mxu1 %vm455_vm0, %v2185_v8 }
 0x6ec   :  { %11889 = vmatpush3.msk.msra.mxu0 %vm474_vm1, %v11080_v3  ;;  %v13853_v3 = vld [vmem:[#allocation7 + $0x28] sm:$0xff] }
 0x6ed   :  { %11891 = vmatmul.mubr.msk.f32.vlgmr.msra.gmra.mxu0 %vm455_vm0, %v1954_v9  ;;  %11088 = vmatprep.subr.mxu0 %v2113_v37  ;;  %v13855_v9 = vld [vmem:[#allocation7 + $0x18] sm:$0xff]  ;;  %v13500_v37 = vmov 0  }
 0x6ee   :  { %11089 = vmatpush3.msra.mxu0 %v2097_v10  ;;  %11893 = vmatprep.mubr.msk.f32.mxu0 %vm455_vm0, %v1955_v11  ;;  %v13861_v10 = vld [vmem:[#allocation7 + $0x20] sm:$0xff]  ;;  %v13863_v11 = vld [vmem:[#allocation7 + $0x10] sm:$0xff] }
 0x6ef   :  { %11090 = vmatprep.subr.mxu0 %v2112_v5  ;;  %13110 = vset.pattern.permute.xlu0 %v13500_v37  ;;  %v13869_v5 = vld [vmem:[#allocation7] sm:$0xff] }
 0x6f0   :  { %11091 = vmatpush3.msra.mxu0 %v2096_v12  ;;  %13111 = vset.pattern.permute.xlu1 %v13500_v37 }
 0x6f1   :  { %11894 = vmatmul.mubr.msk.f32.gmra.mxu0 %vm455_vm0, %v1956_v6  ;;  %11092 = vmatprep.subr.mxu0 %v2111_v13 }
 0x6f2   :  { %11093 = vmatpush3.msra.mxu0 %v2095_v14  ;;  %11896 = vmatprep.mubr.msk.f32.mxu0 %vm455_vm0, %v1957_v15 }
 0x6f3   :  { %11094 = vmatprep.subr.mxu0 %v2110_v16  ;;  %2340 = vperm.xlu0 %13110, %v13853_v3  }
 0x6f4   :  { %11095 = vmatpush3.msra.mxu0 %v2094_v17  ;;  %2330 = vperm.xlu1 %13111, %v13855_v9  }
 0x6f5   :  { %11897 = vmatmul.mubr.msk.f32.gmra.mxu0 %vm455_vm0, %v1958_v19  ;;  %11096 = vmatprep.subr.mxu0 %v2109_v20 }
 0x6f6   :  { %11097 = vmatpush3.msra.mxu0 %v2093_v21  ;;  %2178 = vmatprep.mubr.f32.mxu0 %v13818_v18  ;;  %v2102_v18 = vld [vmem:[#allocation4 + $0x8a0] sm:$0xff] }
 0x6f7   :  { %11098 = vmatprep.subr.mxu0 %v2108_v22  ;;  %2335 = vperm.xlu0 %13110, %v13861_v10  }
 0x6f8   :  { %11099 = vmatpush3.msra.mxu0 %v2092_v23  ;;  %2325 = vperm.xlu1 %13111, %v13863_v11  }
 0x6f9   :  { %11100 = vmatprep.subr.mxu0 %v2107_v24  ;;  %v2186_v24 = vld [vmem:[#allocation6 + $0x188] sm:$0xff] }
 0x6fa   :  { %11101 = vmatpush3.msra.mxu0 %v2091_v25  ;;  %v2187_v25 = vld [vmem:[#allocation6 + $0x190] sm:$0xff] }
 0x6fb   :  { %11102 = vmatprep.subr.mxu0 %v2106_v63  ;;  %v671_v63 = vadd.f32 %v13698_v61, %v13700_v62 }
 0x6fc   :  { %11103 = vmatpush3.msra.mxu0 %v2090_v26  ;;  %2315 = vperm.xlu1 %13111, %v13869_v5   ;;  %v681_v26 = vadd.f32 %v13716_v46, %v13704_v4 }
 0x6fd   :  { %11104 = vmatprep.subr.mxu0 %v2105_v27 }
 0x6fe   :  { %11105 = vmatpush3.msra.mxu0 %v2089_v28  ;;  %v917_v28 = vadd.f32 %v13726_v52, %v671_v63 }
 0x6ff   :  { %11106 = vmatprep.subr.mxu0 %v2104_v29  ;;  %v919_v29 = vadd.f32 %v13731_v58, %v681_v26 }
 0x700   :  { %11107 = vmatpush3.msra.mxu0 %v2088_v30  ;;  %v661_v30 = vadd.f32 %v13692_v56, %v13694_v57 }
 0x701   :  { %11108 = vmatprep.subr.mxu0 %v2103_v31 }
 0x702   :  { %11109 = vmatpush3.msra.mxu0 %v2087_v32  ;;  %v1149_v32 = vadd.f32 %v13751_v45, %v917_v28 }
 0x703   :  { %11110 = vmatprep.subr.mxu0 %v2102_v18  ;;  %v1151_v18 = vadd.f32 %v13756_v53, %v919_v29 }
 0x704   :  { %11111 = vmatpush3.msra.mxu0 %v2086_v33  ;;  %v915_v33 = vadd.f32 %v13721_v49, %v661_v30  ;;  %v1381_v61 = vadd.f32 %v13776_v47, %v1149_v32 }
 0x705   :  { %11112 = vmatprep.subr.mxu0 %v2101_v34  ;;  %v1383_v62 = vadd.f32 %v13781_v2, %v1151_v18 }
 0x706   :  { %11113 = vmatpush3.msra.mxu0 %v2085_v35  ;;  %v1147_v46 = vadd.f32 %v13746_v42, %v915_v33  ;;  %v1613_v35 = vadd.f32 %v13801_v48, %v1381_v61  ;;  %v225_v61 = vld [vmem:[#allocation2] sm:$0xff] }
 0x707   :  { %11114 = vmatprep.subr.mxu0 %v2100_v36  ;;  %v1615_v56 = vadd.f32 %v13806_v1, %v1383_v62 }
 0x708   :  { %11115 = vmatpush3.msra.mxu0 %v2084_v55  ;;  %v1379_v57 = vadd.f32 %v13771_v39, %v1147_v46  ;;  %v1845_v53 = vadd.f32 %v13836_v54, %v1613_v35 }
 0x709   :  { %11116 = vmatprep.subr.mxu0 %v2099_v41  ;;  %v1847_v49 = vadd.f32 %v13841_v60, %v1615_v56 }
 0x70a   :  { %11117 = vmatpush3.msra.mxu0 %v2083_v44  ;;  %v1611_v47 = vadd.f32 %v13796_v40, %v1379_v57 }
 0x70b   :  { %11118 = vmatprep.subr.mxu0 %v2098_v50 }
 0x70c   :  { %11119 = vmatpush3.msra.mxu0 %v2082_v0  ;;  %v1843_v48 = vadd.f32 %v13831_v7, %v1611_v47  ;;  %v228_v47 = vld [vmem:[#allocation2 + $0x18] sm:$0xff] }
 0x70d   :  { %2179 = vmatmul.mubr.f32.vlgmr.msra.gmra.mxu0 %v13824_v59  ;;  %v13867_v59 = vld [vmem:[#allocation7 + $0x8] sm:$0xff] }
 0x70e   :  { %2320 = vperm.xlu0 %13110, %v13867_v59  }
 0x76e   :  { %v2341_v27 = vpop.permute.xlu0 %2340 }
 0x76f   :  { %v2331_v4 = vpop.permute.xlu1 %2330 }
 0x772   :  { %v2336_v52 = vpop.permute.xlu0 %2335 }
 0x773   :  { %v2326_v42 = vpop.permute.xlu1 %2325 }
 0x789   :  { %v2321_v0 = vpop.permute.xlu0 %2320 }
 0x7ad   :  { %v11892_v12 = vpop.f32.mrf.mxu0 }
 0x7ae   :  { %v2076_v6 = vadd.f32 %v11892_v12, %v13829_v51  ;;  %v2188_v51 = vld [vmem:[#allocation6 + $0x198] sm:$0xff] }
 0x7af   :  { %v2046_v13 = vpop.f32.mrf.mxu0 }
 0x7b0   :  { %v2075_v54 = vadd.f32 %v2046_v13, %v1843_v48 }
 0x7b1   :  { %v11895_v14 = vpop.f32.mrf.mxu0 }
 0x7b2   :  { %v2078_v15 = vadd.f32 %v11895_v14, %v13834_v38  ;;  %v2189_v38 = vld [vmem:[#allocation6 + $0x1a0] sm:$0xff] }
 0x7b3   :  { %v2056_v16 = vpop.f32.mrf.mxu0 }
 0x7b4   :  { %v2077_v55 = vadd.f32 %v2056_v16, %v1845_v53  ;;  %v227_v53 = vld [vmem:[#allocation2 + $0x10] sm:$0xff] }
 0x7b5   :  { %v11898_v17 = vpop.f32.mrf.mxu0 }
 0x7b6   :  { %v2080_v19 = vadd.f32 %v11898_v17, %v13839_v43  ;;  %v2190_v43 = vld [vmem:[#allocation6 + $0x1a8] sm:$0xff] }
 0x7b7   :  { %v2066_v20 = vpop.f32.mrf.mxu0 }
 0x7b8   :  { %v2079_v41 = vadd.f32 %v2066_v20, %v1847_v49 }
 0x7cd   :  { %v11120_v21 = vpop.f32.mrf.mxu0 }
 0x7cf   :  { %v11121_v22 = vpop.f32.mrf.mxu0 }
 0x7d0   :  { %v11122_v23 = vadd.f32 %v11121_v22, %v11120_v21 }
 0x7d2   :  { %11899 = vmatprep.subr.msk.mxu1 %vm474_vm1, %v11122_v23 }
 0x7d3   :  { %11900 = vmatpush3.msk.msra.mxu1 %vm474_vm1, %v11122_v23 }
 0x7d4   :  { %11902 = vmatmul.mubr.msk.f32.vlgmr.msra.gmra.mxu1 %vm455_vm0, %v2186_v24 }
 0x7d5   :  { %11904 = vmatprep.mubr.msk.f32.mxu1 %vm455_vm0, %v2187_v25 }
 0x7d8   :  { %11905 = vmatmul.mubr.msk.f32.gmra.mxu1 %vm455_vm0, %v2188_v51 }
 0x7d9   :  { %11907 = vmatprep.mubr.msk.f32.mxu1 %vm455_vm0, %v2189_v38 }
 0x7dc   :  { %11908 = vmatmul.mubr.msk.f32.gmra.mxu1 %vm455_vm0, %v2190_v43 }
 0x7dd   :  { %11922 = vmatprep.mubr.msk.f32.mxu1 %vm2398_vm3, %v225_v61 }
 0x894   :  { %v11903_v31 = vpop.f32.mrf.mxu1 }
 0x895   :  { %v2308_v44 = vadd.f32 %v11903_v31, %v2076_v6 }
 0x896   :  { %v2278_v34 = vpop.f32.mrf.mxu1 }
 0x897   :  { %v2344_v17 = vadd.f32 %v2321_v0, %v2308_v44  ;;  %v2307_v40 = vadd.f32 %v2278_v34, %v2075_v54 }
 0x898   :  { %v11906_v58 = vpop.f32.mrf.mxu1 }
 0x899   :  { %v2310_v36 = vadd.f32 %v11906_v58, %v2078_v15  ;;  %v13912_v21 = vmax.f32 %v2344_v17, 0.0 }
 0x89a   :  { %v2288_v45 = vpop.f32.mrf.mxu1 }
 0x89b   :  { %v2346_v8 = vadd.f32 %v2331_v4, %v2310_v36  ;;  %v2309_v39 = vadd.f32 %v2288_v45, %v2077_v55  ;;  %v2359_v25 = vsel %vm2355_vm2, %v13912_v21, 0.0  ;;  %v2375_v30 = vmul.f32 %v13912_v21, %v13912_v21  ;;  %v226_v45 = vld [vmem:[#allocation2 + $0x8] sm:$0xff] }
 0x89c   :  { %v11909_v2 = vpop.f32.mrf.mxu1 }
 0x89d   :  { %v2312_v50 = vadd.f32 %v11909_v2, %v2080_v19  ;;  %v13906_v16 = vmax.f32 %v2346_v8, 0.0  ;;  %v2345_v20 = vadd.f32 %v2326_v42, %v2309_v39  ;;  %v2316_v19 = vpop.permute.xlu1 %2315  ;;  %v2383_v18 = vsel %vm2355_vm2, %v2375_v30, 0.0  ;;  %v229_v2 = vld [vmem:[#allocation2 + $0x20] sm:$0xff] }
 0x89e   :  { %v2298_v1 = vpop.f32.mrf.mxu1  ;;  %v2343_v22 = vadd.f32 %v2316_v19, %v2307_v40 }
 0x89f   :  { %v2348_v12 = vadd.f32 %v2341_v27, %v2312_v50  ;;  %v2311_v14 = vadd.f32 %v2298_v1, %v2079_v41  ;;  %v13916_v23 = vmax.f32 %v2345_v20, 0.0  ;;  %v2365_v24 = vsel %vm2355_vm2, %v13906_v16, 0.0  ;;  %v230_v41 = vld [vmem:[#allocation2 + $0x28] sm:$0xff] }
 0x8a0   :  { %v13924_v38 = vmax.f32 %v2343_v22, 0.0  ;;  %v2377_v26 = vmul.f32 %v13906_v16, %v13906_v16 }
 0x8a1   :  { %v13904_v60 = vmax.f32 %v2348_v12, 0.0  ;;  %v2347_v15 = vadd.f32 %v2336_v52, %v2311_v14  ;;  %v2362_v43 = vsel %vm2355_vm2, %v13916_v23, 0.0  ;;  %v2376_v32 = vmul.f32 %v13916_v23, %v13916_v23 }
 0x8a2   :  { %v2356_v27 = vsel %vm2355_vm2, %v13924_v38, 0.0  ;;  %v2389_v29 = vsel %vm2355_vm2, %v2377_v26, 0.0  ;;  %v2374_v34 = vmul.f32 %v13924_v38, %v13924_v38 }
 0x8a3   :  { %v13908_v6 = vmax.f32 %v2347_v15, 0.0  ;;  %v2371_v7 = vsel %vm2355_vm2, %v13904_v60, 0.0  ;;  %v2379_v51 = vmul.f32 %v13904_v60, %v13904_v60  ;;  %v2386_v33 = vsel %vm2355_vm2, %v2376_v32, 0.0 }
 0x8a4   :  { %2372 = vadd.xlane.f32.xlu0 %v2371_v7  ;;  %v2380_v62 = vsel %vm2355_vm2, %v2374_v34, 0.0 }
 0x8a5   :  { %v2368_v13 = vsel %vm2355_vm2, %v13908_v6, 0.0  ;;  %v2395_v63 = vsel %vm2355_vm2, %v2379_v51, 0.0  ;;  %v2378_v28 = vmul.f32 %v13908_v6, %v13908_v6 }
 0x8a6   :  { %2369 = vadd.xlane.f32.xlu1 %v2368_v13 }
 0x8a7   :  { %v2392_v31 = vsel %vm2355_vm2, %v2378_v28, 0.0 }
 0x8a8   :  { %2366 = vadd.xlane.f32.xlu0 %v2365_v24 }
 0x8aa   :  { %2360 = vadd.xlane.f32.xlu1 %v2359_v25 }
 0x8ac   :  { %2363 = vadd.xlane.f32.xlu0 %v2362_v43 }
 0x8ae   :  { %2396 = vadd.xlane.f32.xlu1 %v2395_v63 }
 0x8b0   :  { %2357 = vadd.xlane.f32.xlu0 %v2356_v27 }
 0x8b2   :  { %2390 = vadd.xlane.f32.xlu1 %v2389_v29 }
 0x8b4   :  { %2393 = vadd.xlane.f32.xlu0 %v2392_v31 }
 0x8b6   :  { %2384 = vadd.xlane.f32.xlu1 %v2383_v18 }
 0x8b8   :  { %2387 = vadd.xlane.f32.xlu0 %v2386_v33 }
 0x8bc   :  { %2381 = vadd.xlane.f32.xlu0 %v2380_v62 }
 0x92d   :  { %v2373_v4 = vpop.xlane.xlu0 %2372 }
 0x92e   :  { %11910 = vmatprep.subr.mxu1 %v2373_v4 }
 0x92f   :  { %11911 = vmatpush3.msra.mxu1 %v2373_v4  ;;  %v2370_v46 = vpop.xlane.xlu1 %2369 }
 0x930   :  { %11912 = vmatprep.subr.mxu1 %v2370_v46 }
 0x931   :  { %v2367_v52 = vpop.xlane.xlu0 %2366  ;;  %11913 = vmatpush3.msra.mxu1 %v2370_v46 }
 0x932   :  { %11914 = vmatprep.subr.mxu1 %v2367_v52 }
 0x933   :  { %11915 = vmatpush3.msra.mxu1 %v2367_v52  ;;  %v2361_v58 = vpop.xlane.xlu1 %2360 }
 0x935   :  { %v2364_v35 = vpop.xlane.xlu0 %2363 }
 0x936   :  { %11916 = vmatprep.subr.mxu1 %v2364_v35 }
 0x937   :  { %v2397_v56 = vpop.xlane.xlu1 %2396  ;;  %11917 = vmatpush3.msra.mxu1 %v2364_v35 }
 0x938   :  { %11918 = vmatprep.subr.mxu1 %v2361_v58 }
 0x939   :  { %11919 = vmatpush3.msra.mxu1 %v2361_v58  ;;  %v2358_v57 = vpop.xlane.xlu0 %2357 }
 0x93a   :  { %11920 = vmatprep.subr.mxu1 %v2358_v57 }
 0x93b   :  { %11921 = vmatpush3.msra.mxu1 %v2358_v57  ;;  %v2391_v49 = vpop.xlane.xlu1 %2390 }
 0x93c   :  { %11923 = vmatmul.mubr.msk.f32.vlgmr.msra.gmra.mxu1 %vm2398_vm3, %v226_v45  ;;  %11931 = vmatprep.subr.mxu1 %v2397_v56 }
 0x93d   :  { %11932 = vmatpush3.msra.mxu1 %v2397_v56  ;;  %v2394_v36 = vpop.xlane.xlu0 %2393  ;;  %11925 = vmatprep.mubr.msk.f32.mxu1 %vm2398_vm3, %v227_v53 }
 0x93e   :  { %11933 = vmatprep.subr.mxu1 %v2394_v36 }
 0x93f   :  { %11934 = vmatpush3.msra.mxu1 %v2394_v36  ;;  %v2385_v42 = vpop.xlane.xlu1 %2384 }
 0x940   :  { %11926 = vmatmul.mubr.msk.f32.gmra.mxu1 %vm2398_vm3, %v228_v47  ;;  %11935 = vmatprep.subr.mxu1 %v2391_v49 }
 0x941   :  { %11936 = vmatpush3.msra.mxu1 %v2391_v49  ;;  %v2388_v55 = vpop.xlane.xlu0 %2387  ;;  %11928 = vmatprep.mubr.msk.f32.mxu1 %vm2398_vm3, %v229_v2 }
 0x942   :  { %11937 = vmatprep.subr.mxu1 %v2388_v55 }
 0x943   :  { %11938 = vmatpush3.msra.mxu1 %v2388_v55 }
 0x944   :  { %11929 = vmatmul.mubr.msk.f32.gmra.mxu1 %vm2398_vm3, %v230_v41  ;;  %11939 = vmatprep.subr.mxu1 %v2385_v42 }
 0x945   :  { %11940 = vmatpush3.msra.mxu1 %v2385_v42  ;;  %v2382_v44 = vpop.xlane.xlu0 %2381  ;;  %11943 = vmatprep.mubr.msk.f32.mxu1 %vm2398_vm3, %v225_v61 }
 0x946   :  { %11941 = vmatprep.subr.mxu1 %v2382_v44 }
 0x947   :  { %11942 = vmatpush3.msra.mxu1 %v2382_v44 }
 0x948   :  { %11944 = vmatmul.mubr.msk.f32.vlgmr.msra.gmra.mxu1 %vm2398_vm3, %v226_v45 }
 0x949   :  { %11946 = vmatprep.mubr.msk.f32.mxu1 %vm2398_vm3, %v227_v53 }
 0x94c   :  { %11947 = vmatmul.mubr.msk.f32.gmra.mxu1 %vm2398_vm3, %v228_v47 }
 0x94d   :  { %11949 = vmatprep.mubr.msk.f32.mxu1 %vm2398_vm3, %v229_v2 }
 0x950   :  { %11950 = vmatmul.mubr.msk.f32.gmra.mxu1 %vm2398_vm3, %v230_v41 }
 0x9fc   :  { %v11924_v50 = vpop.f32.mrf.mxu1 }
 0x9fd   :  { %v13958_v39 = vmul.f32 0.0078125, %v11924_v50 }
 0x9fe   :  { %v2483_v48 = vpop.f32.mrf.mxu1 }
 0x9ff   :  { %v13960_v14 = vmul.f32 0.0078125, %v2483_v48  ;;  %v2620_v17 = vmul.f32 %v13958_v39, %v13958_v39 }
 0xa00   :  { %v11927_v0 = vpop.f32.mrf.mxu1 }
 0xa01   :  { %v13964_v15 = vmul.f32 0.0078125, %v11927_v0  ;;  %v2619_v19 = vmul.f32 %v13960_v14, %v13960_v14 }
 0xa02   :  { %v2493_v1 = vpop.f32.mrf.mxu1 }
 0xa03   :  { %v13966_v20 = vmul.f32 0.0078125, %v2493_v1  ;;  %v2622_v25 = vmul.f32 %v13964_v15, %v13964_v15 }
 0xa04   :  { %v11930_v8 = vpop.f32.mrf.mxu1 }
 0xa05   :  { %v2621_v26 = vmul.f32 %v13966_v20, %v13966_v20  ;;  %v13974_v27 = vmul.f32 0.0078125, %v11930_v8 }
 0xa06   :  { %v2503_v12 = vpop.f32.mrf.mxu1 }
 0xa07   :  { %v13976_v28 = vmul.f32 0.0078125, %v2503_v12  ;;  %v2624_v62 = vmul.f32 %v13974_v27, %v13974_v27 }
 0xa08   :  { %v11945_v54 = vpop.f32.mrf.mxu1 }
 0xa09   :  { %v2614_v40 = vmul.f32 0.0078125, %v11945_v54  ;;  %v2623_v58 = vmul.f32 %v13976_v28, %v13976_v28 }
 0xa0a   :  { %v2584_v7 = vpop.f32.mrf.mxu1 }
 0xa0b   :  { %v2626_v13 = vsub.f32 %v2614_v40, %v2620_v17  ;;  %v2613_v22 = vmul.f32 0.0078125, %v2584_v7  ;;  %v13503_v17 = vmov 1  }
 0xa0c   :  { %v11948_v24 = vpop.f32.mrf.mxu1  ;;  %13113 = vset.pattern.permute.xlu1 %v13503_v17  ;;  %13112 = vset.pattern.permute.xlu0 %v13503_v17 }
 0xa0d   :  { %v2632_v51 = vmax.f32 %v2626_v13, 0.0  ;;  %v2625_v43 = vsub.f32 %v2613_v22, %v2619_v19  ;;  %v2616_v63 = vmul.f32 0.0078125, %v11948_v24 }
 0xa0e   :  { %v2594_v29 = vpop.f32.mrf.mxu1 }
 0xa0f   :  { %v2638_v30 = vadd.f32 1e-05, %v2632_v51  ;;  %v2631_v31 = vmax.f32 %v2625_v43, 0.0  ;;  %v2628_v32 = vsub.f32 %v2616_v63, %v2622_v25  ;;  %v2615_v18 = vmul.f32 0.0078125, %v2594_v29 }
 0xa10   :  { %v11951_v33 = vpop.f32.mrf.mxu1 }
 0xa11   :  { %13135 = vrsqrt.f32 %v2638_v30  ;;  %v2637_v34 = vadd.f32 1e-05, %v2631_v31  ;;  %v2627_v61 = vsub.f32 %v2615_v18, %v2621_v26  ;;  %v2634_v4 = vmax.f32 %v2628_v32, 0.0 }
 0xa12   :  { %v2618_v46 = vmul.f32 0.0078125, %v11951_v33  ;;  %v2604_v52 = vpop.f32.mrf.mxu1 }
 0xa13   :  { %13137 = vrsqrt.f32 %v2637_v34  ;;  %v2633_v35 = vmax.f32 %v2627_v61, 0.0  ;;  %v2617_v56 = vmul.f32 0.0078125, %v2604_v52  ;;  %v2640_v49 = vadd.f32 1e-05, %v2634_v4  ;;  %v2818_v61 = vld [vmem:[#allocation9 + $0x38] sm:$0xff]  ;;  %v2816_v4 = vld [vmem:[#allocation9 + $0x28] sm:$0xff] }
 0xa14   :  { %v2630_v57 = vsub.f32 %v2618_v46, %v2624_v62  ;;  %v2946_v62 = vld [vmem:[#allocation9 + $0x78] sm:$0xff]  ;;  %11952 = vmatprep.subr.mxu0 %v2818_v61  ;;  %v2815_v46 = vld [vmem:[#allocation9 + $0x20] sm:$0xff] }
 0xa15   :  { %v2639_v45 = vadd.f32 1e-05, %v2633_v35  ;;  %v2629_v53 = vsub.f32 %v2617_v56, %v2623_v58  ;;  %11977 = vmatprep.subr.mxu1 %v2946_v62  ;;  %11953 = vmatpush3.msra.mxu0 %v2818_v61  ;;  %v2943_v52 = vld [vmem:[#allocation9 + $0x60] sm:$0xff]  ;;  %v2814_v58 = vld [vmem:[#allocation9 + $0x18] sm:$0xff]  ;;  %v2813_v56 = vld [vmem:[#allocation9 + $0x10] sm:$0xff] }
 0xa16   :  { %v2636_v36 = vmax.f32 %v2630_v57, 0.0  ;;  %11978 = vmatpush3.msra.mxu1 %v2946_v62  ;;  %v2942_v35 = vld [vmem:[#allocation9 + $0x58] sm:$0xff]  ;;  %v2941_v57 = vld [vmem:[#allocation9 + $0x50] sm:$0xff] }
 0xa17   :  { %13139 = vrsqrt.f32 %v2639_v45  ;;  %v2635_v47 = vmax.f32 %v2629_v53, 0.0  ;;  %v2812_v45 = vld [vmem:[#allocation9 + $0x8] sm:$0xff] }
 0xa18   :  { %13141 = vrsqrt.f32 %v2640_v49  ;;  %v2642_v55 = vadd.f32 1e-05, %v2636_v36  ;;  %v2940_v53 = vld [vmem:[#allocation9 + $0x48] sm:$0xff] }
 0xa19   :  { %v2641_v2 = vadd.f32 1e-05, %v2635_v47  ;;  %v2811_v47 = vld [vmem:[#allocation9] sm:$0xff] }
 0xa1b   :  { %13143 = vrsqrt.f32 %v2641_v2  ;;  %v2939_v2 = vld [vmem:[#allocation9 + $0x40] sm:$0xff] }
 0xa1c   :  { %13145 = vrsqrt.f32 %v2642_v55 }
 0xa1e   :  { %v13136_v41 = vpop.eup %13135 }
 0xa1f   :  { %2657 = vrot.lane.b32.xlu0 %v13136_v41, %s13501_s0 }
 0xa20   :  { %v13138_v42 = vpop.eup %13137 }
 0xa21   :  { %2655 = vrot.lane.b32.xlu1 %v13138_v42, %s13501_s0 }
 0xa24   :  { %v13140_v44 = vpop.eup %13139 }
 0xa25   :  { %2659 = vrot.lane.b32.xlu1 %v13140_v44, %s13501_s0  ;;  %v13142_v50 = vpop.eup %13141 }
 0xa28   :  { %v13144_v48 = vpop.eup %13143 }
 0xa29   :  { %2661 = vrot.lane.b32.xlu1 %v13142_v50, %s13501_s0  ;;  %2663 = vrot.lane.b32.xlu0 %v13144_v48, %s13501_s0  ;;  %v13146_v0 = vpop.eup %13145 }
 0xa2d   :  { %2665 = vrot.lane.b32.xlu1 %v13146_v0, %s13501_s0 }
 0xa91   :  { %v2658_v1 = vpop.permute.xlu0 %2657 }
 0xa92   :  { %v2674_v8 = vmul.f32 %v2658_v1, %v13867_v59 }
 0xa93   :  { %v2656_v12 = vpop.permute.xlu1 %2655 }
 0xa94   :  { %v2673_v54 = vmul.f32 %v2656_v12, %v13869_v5  ;;  %2687 = vrot.lane.b32.xlu1 %v2674_v8, %s13502_s23 }
 0xa96   :  { %2685 = vrot.lane.b32.xlu0 %v2673_v54, %s13502_s23 }
 0xa97   :  { %v2660_v40 = vpop.permute.xlu1 %2659 }
 0xa98   :  { %v2675_v7 = vmul.f32 %v2660_v40, %v13863_v11 }
 0xa9a   :  { %2689 = vrot.lane.b32.xlu0 %v2675_v7, %s13502_s23 }
 0xa9b   :  { %v2662_v19 = vpop.permute.xlu1 %2661  ;;  %v2664_v13 = vpop.permute.xlu0 %2663 }
 0xa9c   :  { %v2676_v22 = vmul.f32 %v2662_v19, %v13855_v9  ;;  %v13998_v24 = vmul.f32 %v2664_v13, %v13861_v10 }
 0xa9e   :  { %2691 = vrot.lane.b32.xlu1 %v2676_v22, %s13502_s23  ;;  %2693 = vrot.lane.b32.xlu0 %v13998_v24, %s13502_s23 }
 0xa9f   :  { %v2666_v25 = vpop.permute.xlu1 %2665 }
 0xaa0   :  { %v14004_v51 = vmul.f32 %v2666_v25, %v13853_v3 }
 0xaa2   :  { %2695 = vrot.lane.b32.xlu1 %v14004_v51, %s13502_s23 }
 0xb06   :  { %v2688_v43 = vpop.permute.xlu1 %2687 }
 0xb07   :  { %v2704_v63 = vmul.f32 %v2688_v43, %v13958_v39 }
 0xb08   :  { %v2686_v26 = vpop.permute.xlu0 %2685 }
 0xb09   :  { %v2703_v29 = vmul.f32 %v2686_v26, %v13960_v14  ;;  %2717 = vrot.lane.b32.xlu1 %v2704_v63, %s13504_s3 }
 0xb0b   :  { %2715 = vrot.lane.b32.xlu0 %v2703_v29, %s13504_s3 }
 0xb0c   :  { %v2690_v30 = vpop.permute.xlu0 %2689 }
 0xb0d   :  { %v2705_v31 = vmul.f32 %v2690_v30, %v13966_v20  ;;  %v13505_v20 = vmov 2  }
 0xb0f   :  { %2719 = vrot.lane.b32.xlu0 %v2705_v31, %s13504_s3 }
 0xb10   :  { %v2692_v32 = vpop.permute.xlu1 %2691  ;;  %v2694_v18 = vpop.permute.xlu0 %2693 }
 0xb11   :  { %v2706_v33 = vmul.f32 %v2692_v32, %v13964_v15  ;;  %v2707_v34 = vmul.f32 %v2694_v18, %v13976_v28  ;;  %v2817_v15 = vld [vmem:[#allocation9 + $0x30] sm:$0xff] }
 0xb12   :  { %v2945_v28 = vld [vmem:[#allocation9 + $0x70] sm:$0xff]  ;;  %11954 = vmatprep.subr.mxu0 %v2817_v15 }
 0xb13   :  { %2721 = vrot.lane.b32.xlu1 %v2706_v33, %s13504_s3  ;;  %2723 = vrot.lane.b32.xlu0 %v2707_v34, %s13504_s3 }
 0xb14   :  { %v2696_v39 = vpop.permute.xlu1 %2695  ;;  %11979 = vmatprep.subr.mxu1 %v2945_v28  ;;  %11955 = vmatpush3.msra.mxu0 %v2817_v15 }
 0xb15   :  { %v2708_v14 = vmul.f32 %v2696_v39, %v13974_v27  ;;  %v2944_v27 = vld [vmem:[#allocation9 + $0x68] sm:$0xff]  ;;  %11980 = vmatpush3.msra.mxu1 %v2945_v28  ;;  %11956 = vmatprep.subr.mxu0 %v2816_v4 }
 0xb16   :  { %11981 = vmatprep.subr.mxu1 %v2944_v27  ;;  %11957 = vmatpush3.msra.mxu0 %v2816_v4 }
 0xb17   :  { %2725 = vrot.lane.b32.xlu1 %v2708_v14, %s13504_s3  ;;  %2740 = vperm.xlu0 %13112, %v2673_v54  }
 0xb18   :  { %11982 = vmatpush3.msra.mxu1 %v2944_v27  ;;  %11958 = vmatprep.subr.mxu0 %v2815_v46  ;;  %v3044_v27 = vld [vmem:[#allocation10 + $0x38] sm:$0xff] }
 0xb19   :  { %11983 = vmatprep.subr.mxu1 %v2943_v52  ;;  %11959 = vmatpush3.msra.mxu0 %v2815_v46  ;;  %v3283_v46 = vld [vmem:[#allocation9 + $0xb8] sm:$0xff] }
 0xb1a   :  { %11984 = vmatpush3.msra.mxu1 %v2943_v52  ;;  %11960 = vmatprep.subr.mxu0 %v2814_v58  ;;  %v3045_v52 = vld [vmem:[#allocation10 + $0x40] sm:$0xff] }
 0xb1b   :  { %2744 = vperm.xlu1 %13113, %v2674_v8   ;;  %13114 = vset.pattern.permute.xlu0 %v13505_v20 }
 0xb1c   :  { %11985 = vmatprep.subr.mxu1 %v2942_v35  ;;  %11961 = vmatpush3.msra.mxu0 %v2814_v58  ;;  %v3282_v58 = vld [vmem:[#allocation9 + $0xb0] sm:$0xff] }
 0xb1d   :  { %11986 = vmatpush3.msra.mxu1 %v2942_v35  ;;  %11962 = vmatprep.subr.mxu0 %v2813_v56  ;;  %v2933_v35 = vld [vmem:[#allocation10 + $0x8] sm:$0xff] }
 0xb1e   :  { %11987 = vmatprep.subr.mxu1 %v2941_v57  ;;  %11963 = vmatpush3.msra.mxu0 %v2813_v56  ;;  %v2934_v56 = vld [vmem:[#allocation10 + $0x10] sm:$0xff] }
 0xb1f   :  { %2748 = vperm.xlu1 %13113, %v2675_v7   ;;  %11988 = vmatpush3.msra.mxu1 %v2941_v57  ;;  %v3046_v57 = vld [vmem:[#allocation10 + $0x48] sm:$0xff] }
 0xb20   :  { %11964 = vmatprep.subr.mxu0 %v2812_v45  ;;  %11989 = vmatprep.subr.mxu1 %v2940_v53 }
 0xb21   :  { %11965 = vmatpush3.msra.mxu0 %v2812_v45  ;;  %11990 = vmatpush3.msra.mxu1 %v2940_v53  ;;  %v3281_v45 = vld [vmem:[#allocation9 + $0xa8] sm:$0xff]  ;;  %v3047_v53 = vld [vmem:[#allocation10 + $0x50] sm:$0xff] }
 0xb22   :  { %11966 = vmatprep.subr.mxu0 %v2811_v47  ;;  %11991 = vmatprep.subr.mxu1 %v2939_v2 }
 0xb23   :  { %2752 = vperm.xlu1 %13113, %v2676_v22   ;;  %11967 = vmatpush3.msra.mxu0 %v2811_v47  ;;  %v2936_v47 = vld [vmem:[#allocation10 + $0x20] sm:$0xff] }
 0xb24   :  { %11992 = vmatpush3.msra.mxu1 %v2939_v2  ;;  %v3048_v2 = vld [vmem:[#allocation10 + $0x58] sm:$0xff] }
 0xb27   :  { %13115 = vset.pattern.permute.xlu1 %v13505_v20 }
 0xb7b   :  { %v2718_v49 = vpop.permute.xlu1 %2717 }
 0xb7c   :  { %v2734_v36 = vsub.f32 %v13867_v59, %v2718_v49  ;;  %v3280_v49 = vld [vmem:[#allocation9 + $0xa0] sm:$0xff] }
 0xb7d   :  { %v2716_v55 = vpop.permute.xlu0 %2715 }
 0xb7e   :  { %v2733_v41 = vsub.f32 %v13869_v5, %v2716_v55  ;;  %2776 = vperm.xlu0 %13114, %v2734_v36   ;;  %v2935_v36 = vld [vmem:[#allocation10 + $0x18] sm:$0xff] }
 0xb7f   :  { %v3279_v55 = vld [vmem:[#allocation9 + $0x98] sm:$0xff] }
 0xb80   :  { %2771 = vperm.xlu1 %13115, %v2733_v41   ;;  %v3278_v41 = vld [vmem:[#allocation9 + $0x90] sm:$0xff] }
 0xb81   :  { %v2720_v42 = vpop.permute.xlu0 %2719 }
 0xb82   :  { %v2735_v44 = vsub.f32 %v13863_v11, %v2720_v42  ;;  %v2937_v42 = vld [vmem:[#allocation10 + $0x28] sm:$0xff] }
 0xb84   :  { %2781 = vperm.xlu0 %13114, %v2735_v44   ;;  %v3277_v44 = vld [vmem:[#allocation9 + $0x88] sm:$0xff] }
 0xb85   :  { %v2722_v50 = vpop.permute.xlu1 %2721  ;;  %v2724_v5 = vpop.permute.xlu0 %2723 }
 0xb86   :  { %v2736_v59 = vsub.f32 %v13855_v9, %v2722_v50  ;;  %v2737_v11 = vsub.f32 %v13861_v10, %v2724_v5  ;;  %v3276_v50 = vld [vmem:[#allocation9 + $0x80] sm:$0xff] }
 0xb87   :  { %v3510_v5 = vld [vmem:[#allocation9 + $0xe0] sm:$0xff] }
 0xb88   :  { %2786 = vperm.xlu1 %13115, %v2736_v59   ;;  %13116 = vset.pattern.permute.xlu0 %v13503_v17  ;;  %v3513_v59 = vld [vmem:[#allocation9 + $0xf8] sm:$0xff] }
 0xb89   :  { %v2726_v48 = vpop.permute.xlu1 %2725  ;;  %2756 = vperm.xlu0 %13116, %v13998_v24  }
 0xb8a   :  { %v2738_v0 = vsub.f32 %v13853_v3, %v2726_v48  ;;  %v3512_v48 = vld [vmem:[#allocation9 + $0xf0] sm:$0xff] }
 0xb8c   :  { %13117 = vset.pattern.permute.xlu1 %v13503_v17 }
 0xb8d   :  { %2760 = vperm.xlu1 %13117, %v14004_v51   ;;  %13119 = vset.pattern.permute.xlu0 %v13505_v20 }
 0xb8e   :  { %2796 = vperm.xlu0 %13119, %v2738_v0   ;;  %v3511_v0 = vld [vmem:[#allocation9 + $0xe8] sm:$0xff] }
 0xb91   :  { %13118 = vset.pattern.permute.xlu1 %v13505_v20 }
 0xb92   :  { %2791 = vperm.xlu1 %13118, %v2737_v11   ;;  %13121 = vset.pattern.permute.xlu0 %v13500_v37  ;;  %v2741_v3 = vpop.permute.xlu0 %2740  ;;  %v3509_v11 = vld [vmem:[#allocation9 + $0xd8] sm:$0xff] }
 0xb93   :  { %v2763_v12 = vmul.f32 %v2741_v3, %v13924_v38  ;;  %v3506_v3 = vld [vmem:[#allocation9 + $0xc0] sm:$0xff] }
 0xb96   :  { %13120 = vset.pattern.permute.xlu1 %v13500_v37  ;;  %v2745_v9 = vpop.permute.xlu1 %2744 }
 0xb97   :  { %v2764_v40 = vmul.f32 %v2745_v9, %v13912_v21  ;;  %v3508_v9 = vld [vmem:[#allocation9 + $0xd0] sm:$0xff] }
 0xb9a   :  { %v2749_v1 = vpop.permute.xlu1 %2748 }
 0xb9b   :  { %v2765_v13 = vmul.f32 %v2749_v1, %v13916_v23  ;;  %v3507_v1 = vld [vmem:[#allocation9 + $0xc8] sm:$0xff] }
 0xb9e   :  { %v2753_v8 = vpop.permute.xlu1 %2752 }
 0xb9f   :  { %v2766_v22 = vmul.f32 %v2753_v8, %v13906_v16  ;;  %v3380_v8 = vld [vmem:[#allocation10 + $0x60] sm:$0xff] }
 0xbf9   :  { %v2777_v54 = vpop.permute.xlu0 %2776 }
 0xbfa   :  { %v14040_v10 = vadd.f32 %v2777_v54, %v2764_v40 }
 0xbfb   :  { %v2772_v7 = vpop.permute.xlu1 %2771 }
 0xbfc   :  { %v14038_v19 = vadd.f32 %v2772_v7, %v2763_v12 }
 0xbfe   :  { %11968 = vmatprep.mubr.msk.f32.mxu0 %vm2355_vm2, %v14038_v19  ;;  %11993 = vmatprep.mubr.msk.f32.mxu1 %vm2355_vm2, %v14038_v19 }
 0xbff   :  { %11969 = vmatmul.mubr.msk.f32.vlgmr.msra.gmra.mxu0 %vm2355_vm2, %v14040_v10  ;;  %11994 = vmatmul.mubr.msk.f32.vlgmr.msra.gmra.mxu1 %vm2355_vm2, %v14040_v10  ;;  %v2782_v21 = vpop.permute.xlu0 %2781 }
 0xc00   :  { %v14051_v38 = vadd.f32 %v2782_v21, %v2765_v13 }
 0xc02   :  { %11971 = vmatprep.mubr.msk.f32.mxu0 %vm2355_vm2, %v14051_v38  ;;  %11996 = vmatprep.mubr.msk.f32.mxu1 %vm2355_vm2, %v14051_v38 }
 0xc03   :  { %v2787_v23 = vpop.permute.xlu1 %2786 }
 0xc04   :  { %v14058_v24 = vadd.f32 %v2787_v23, %v2766_v22  ;;  %v2757_v25 = vpop.permute.xlu0 %2756 }
 0xc05   :  { %v2767_v16 = vmul.f32 %v2757_v25, %v13908_v6  ;;  %v2932_v6 = vld [vmem:[#allocation10] sm:$0xff] }
 0xc06   :  { %11972 = vmatmul.mubr.msk.f32.gmra.mxu0 %vm2355_vm2, %v14058_v24  ;;  %11997 = vmatmul.mubr.msk.f32.gmra.mxu1 %vm2355_vm2, %v14058_v24 }
 0xc08   :  { %v2761_v51 = vpop.permute.xlu1 %2760 }
 0xc09   :  { %v2768_v43 = vmul.f32 %v2761_v51, %v13904_v60  ;;  %v2797_v63 = vpop.permute.xlu0 %2796  ;;  %v3043_v60 = vld [vmem:[#allocation10 + $0x30] sm:$0xff] }
 0xc0b   :  { %v14068_v30 = vadd.f32 %v2797_v63, %v2768_v43 }
 0xc0d   :  { %v2792_v26 = vpop.permute.xlu1 %2791 }
 0xc0e   :  { %v14066_v29 = vadd.f32 %v2792_v26, %v2767_v16 }
 0xc10   :  { %11974 = vmatprep.mubr.msk.f32.mxu0 %vm2355_vm2, %v14066_v29  ;;  %11999 = vmatprep.mubr.msk.f32.mxu1 %vm2355_vm2, %v14066_v29 }
 0xc11   :  { %11975 = vmatmul.mubr.msk.f32.gmra.mxu0 %vm2355_vm2, %v14068_v30  ;;  %12000 = vmatmul.mubr.msk.f32.gmra.mxu1 %vm2355_vm2, %v14068_v30 }
 0xc12   :  { %12014 = vmatprep.mubr.msk.f32.mxu0 %vm2398_vm3, %v3043_v60  ;;  %12035 = vmatprep.mubr.msk.f32.mxu1 %vm2398_vm3, %v2932_v6 }
 0xcbf   :  { %v11970_v31 = vpop.f32.mrf.mxu0  ;;  %v11995_v32 = vpop.f32.mrf.mxu1 }
 0xcc1   :  { %v2903_v18 = vpop.f32.mrf.mxu0  ;;  %v3013_v33 = vpop.f32.mrf.mxu1 }
 0xcc6   :  { %v11973_v34 = vpop.f32.mrf.mxu0  ;;  %v11998_v39 = vpop.f32.mrf.mxu1 }
 0xcc8   :  { %v2913_v14 = vpop.f32.mrf.mxu0  ;;  %v3023_v61 = vpop.f32.mrf.mxu1 }
 0xcd1   :  { %v11976_v62 = vpop.f32.mrf.mxu0  ;;  %v12001_v15 = vpop.f32.mrf.mxu1 }
 0xcd2   :  { %12002 = vmatprep.subr.mxu0 %v12001_v15  ;;  %12023 = vmatprep.subr.mxu1 %v11976_v62 }
 0xcd3   :  { %v2923_v28 = vpop.f32.mrf.mxu0  ;;  %v3033_v4 = vpop.f32.mrf.mxu1  ;;  %12003 = vmatpush3.msra.mxu0 %v12001_v15  ;;  %12024 = vmatpush3.msra.mxu1 %v11976_v62 }
 0xcd4   :  { %12004 = vmatprep.subr.mxu0 %v3033_v4  ;;  %12025 = vmatprep.subr.mxu1 %v2923_v28 }
 0xcd5   :  { %12005 = vmatpush3.msra.mxu0 %v3033_v4  ;;  %12026 = vmatpush3.msra.mxu1 %v2923_v28  ;;  %v3383_v28 = vld [vmem:[#allocation10 + $0x78] sm:$0xff]  ;;  %v3384_v4 = vld [vmem:[#allocation10 + $0x80] sm:$0xff] }
 0xcd6   :  { %12006 = vmatprep.subr.mxu0 %v11998_v39  ;;  %12027 = vmatprep.subr.mxu1 %v11973_v34 }
 0xcd7   :  { %12007 = vmatpush3.msra.mxu0 %v11998_v39  ;;  %12028 = vmatpush3.msra.mxu1 %v11973_v34 }
 0xcd8   :  { %12008 = vmatprep.subr.mxu0 %v3023_v61  ;;  %12029 = vmatprep.subr.mxu1 %v2913_v14 }
 0xcd9   :  { %12009 = vmatpush3.msra.mxu0 %v3023_v61  ;;  %12030 = vmatpush3.msra.mxu1 %v2913_v14  ;;  %v3381_v14 = vld [vmem:[#allocation10 + $0x68] sm:$0xff]  ;;  %v3382_v61 = vld [vmem:[#allocation10 + $0x70] sm:$0xff] }
 0xcda   :  { %12010 = vmatprep.subr.mxu0 %v11995_v32  ;;  %12031 = vmatprep.subr.mxu1 %v11970_v31 }
 0xcdb   :  { %12011 = vmatpush3.msra.mxu0 %v11995_v32  ;;  %12032 = vmatpush3.msra.mxu1 %v11970_v31 }
 0xcdc   :  { %12012 = vmatprep.subr.mxu0 %v3013_v33  ;;  %12033 = vmatprep.subr.mxu1 %v2903_v18 }
 0xcdd   :  { %12013 = vmatpush3.msra.mxu0 %v3013_v33  ;;  %12034 = vmatpush3.msra.mxu1 %v2903_v18 }
 0xcde   :  { %12015 = vmatmul.mubr.msk.f32.vlgmr.msra.gmra.mxu0 %vm2398_vm3, %v3044_v27  ;;  %12044 = vmatprep.subr.mxu0 %v3283_v46 }
 0xcdf   :  { %12045 = vmatpush3.msra.mxu0 %v3283_v46  ;;  %12017 = vmatprep.mubr.msk.f32.mxu0 %vm2398_vm3, %v3045_v52  ;;  %v3385_v52 = vld [vmem:[#allocation10 + $0x88] sm:$0xff] }
 0xce0   :  { %12046 = vmatprep.subr.mxu0 %v3282_v58  ;;  %12036 = vmatmul.mubr.msk.f32.vlgmr.msra.gmra.mxu1 %vm2398_vm3, %v2933_v35  ;;  %v3611_v35 = vld [vmem:[#allocation10 + $0x98] sm:$0xff] }
 0xce1   :  { %12047 = vmatpush3.msra.mxu0 %v3282_v58  ;;  %12038 = vmatprep.mubr.msk.f32.mxu1 %vm2398_vm3, %v2934_v56  ;;  %v3610_v58 = vld [vmem:[#allocation10 + $0x90] sm:$0xff]  ;;  %v3743_v56 = vld [vmem:[#allocation9 + $0x138] sm:$0xff] }
 0xce2   :  { %12018 = vmatmul.mubr.msk.f32.gmra.mxu0 %vm2398_vm3, %v3046_v57  ;;  %12048 = vmatprep.subr.mxu0 %v3281_v45  ;;  %v3612_v57 = vld [vmem:[#allocation10 + $0xa0] sm:$0xff] }
 0xce3   :  { %12049 = vmatpush3.msra.mxu0 %v3281_v45  ;;  %12020 = vmatprep.mubr.msk.f32.mxu0 %vm2398_vm3, %v3047_v53  ;;  %v3742_v45 = vld [vmem:[#allocation9 + $0x130] sm:$0xff]  ;;  %v3613_v53 = vld [vmem:[#allocation10 + $0xa8] sm:$0xff] }
 0xce4   :  { %12050 = vmatprep.subr.mxu0 %v3280_v49  ;;  %12039 = vmatmul.mubr.msk.f32.gmra.mxu1 %vm2398_vm3, %v2935_v36  ;;  %v3614_v36 = vld [vmem:[#allocation10 + $0xb0] sm:$0xff] }
 0xce5   :  { %12051 = vmatpush3.msra.mxu0 %v3280_v49  ;;  %12041 = vmatprep.mubr.msk.f32.mxu1 %vm2398_vm3, %v2936_v47  ;;  %v3741_v49 = vld [vmem:[#allocation9 + $0x128] sm:$0xff]  ;;  %v3740_v47 = vld [vmem:[#allocation9 + $0x120] sm:$0xff] }
 0xce6   :  { %12021 = vmatmul.mubr.msk.f32.gmra.mxu0 %vm2398_vm3, %v3048_v2  ;;  %12052 = vmatprep.subr.mxu0 %v3279_v55  ;;  %v3615_v2 = vld [vmem:[#allocation10 + $0xb8] sm:$0xff] }
 0xce7   :  { %12053 = vmatpush3.msra.mxu0 %v3279_v55  ;;  %12060 = vmatprep.mubr.msk.f32.mxu0 %vm2355_vm2, %v14038_v19  ;;  %v3739_v55 = vld [vmem:[#allocation9 + $0x118] sm:$0xff] }
 0xce8   :  { %12054 = vmatprep.subr.mxu0 %v3278_v41  ;;  %12042 = vmatmul.mubr.msk.f32.gmra.mxu1 %vm2398_vm3, %v2937_v42  ;;  %v3737_v42 = vld [vmem:[#allocation9 + $0x108] sm:$0xff] }
 0xce9   :  { %12055 = vmatpush3.msra.mxu0 %v3278_v41  ;;  %12081 = vmatprep.mubr.msk.f32.mxu1 %vm2398_vm3, %v3380_v8  ;;  %v3738_v41 = vld [vmem:[#allocation9 + $0x110] sm:$0xff] }
 0xcea   :  { %12056 = vmatprep.subr.mxu0 %v3277_v44 }
 0xceb   :  { %12057 = vmatpush3.msra.mxu0 %v3277_v44  ;;  %v3736_v44 = vld [vmem:[#allocation9 + $0x100] sm:$0xff] }
 0xcec   :  { %12058 = vmatprep.subr.mxu0 %v3276_v50 }
 0xced   :  { %12059 = vmatpush3.msra.mxu0 %v3276_v50  ;;  %v3840_v50 = vld [vmem:[#allocation10 + $0xc0] sm:$0xff] }
 0xcee   :  { %12061 = vmatmul.mubr.msk.f32.vlgmr.msra.gmra.mxu0 %vm2355_vm2, %v14040_v10  ;;  %12090 = vmatprep.subr.mxu0 %v3513_v59 }
 0xcef   :  { %12063 = vmatprep.mubr.msk.f32.mxu0 %vm2355_vm2, %v14051_v38  ;;  %12091 = vmatpush3.msra.mxu0 %v3513_v59 }
 0xcf0   :  { %12092 = vmatprep.subr.mxu0 %v3512_v48 }
 0xcf1   :  { %12093 = vmatpush3.msra.mxu0 %v3512_v48 }
 0xcf2   :  { %12064 = vmatmul.mubr.msk.f32.gmra.mxu0 %vm2355_vm2, %v14058_v24  ;;  %12094 = vmatprep.subr.mxu0 %v3511_v0 }
 0xcf3   :  { %12066 = vmatprep.mubr.msk.f32.mxu0 %vm2355_vm2, %v14066_v29  ;;  %12095 = vmatpush3.msra.mxu0 %v3511_v0 }
 0xcf4   :  { %12096 = vmatprep.subr.mxu0 %v3510_v5 }
 0xcf5   :  { %12097 = vmatpush3.msra.mxu0 %v3510_v5 }
 0xcf6   :  { %12067 = vmatmul.mubr.msk.f32.gmra.mxu0 %vm2355_vm2, %v14068_v30  ;;  %12098 = vmatprep.subr.mxu0 %v3509_v11 }
 0xcf7   :  { %12099 = vmatpush3.msra.mxu0 %v3509_v11  ;;  %12106 = vmatprep.mubr.msk.f32.mxu0 %vm2355_vm2, %v14038_v19 }
 0xcf8   :  { %12100 = vmatprep.subr.mxu0 %v3508_v9 }
 0xcf9   :  { %12101 = vmatpush3.msra.mxu0 %v3508_v9 }
 0xcfa   :  { %12102 = vmatprep.subr.mxu0 %v3507_v1 }
 0xcfb   :  { %12103 = vmatpush3.msra.mxu0 %v3507_v1 }
 0xcfc   :  { %12104 = vmatprep.subr.mxu0 %v3506_v3 }
 0xcfd   :  { %12105 = vmatpush3.msra.mxu0 %v3506_v3 }
 0xcfe   :  { %12107 = vmatmul.mubr.msk.f32.vlgmr.msra.gmra.mxu0 %vm2355_vm2, %v14040_v10 }
 0xcff   :  { %12109 = vmatprep.mubr.msk.f32.mxu0 %vm2355_vm2, %v14051_v38 }
 0xd02   :  { %12110 = vmatmul.mubr.msk.f32.gmra.mxu0 %vm2355_vm2, %v14058_v24 }
 0xd03   :  { %12112 = vmatprep.mubr.msk.f32.mxu0 %vm2355_vm2, %v14066_v29 }
 0xd06   :  { %12113 = vmatmul.mubr.msk.f32.gmra.mxu0 %vm2355_vm2, %v14068_v30 }
 0xd07   :  { %12173 = vmatprep.mubr.msk.f32.mxu0 %vm2398_vm3, %v3840_v50 }
 0xd9e   :  { %v12016_v12 = vpop.f32.mrf.mxu0 }
 0xda0   :  { %v14115_v54 = vpop.f32.mrf.mxu0  ;;  %v12037_v40 = vpop.f32.mrf.mxu1 }
 0xda1   :  { %v14117_v7 = vadd.f32 %v12037_v40, %v12016_v12 }
 0xda2   :  { %v12019_v13 = vpop.f32.mrf.mxu0  ;;  %v14119_v21 = vpop.f32.mrf.mxu1 }
 0xda4   :  { %v14121_v22 = vpop.f32.mrf.mxu0  ;;  %v12040_v23 = vpop.f32.mrf.mxu1 }
 0xda5   :  { %v14123_v25 = vadd.f32 %v12040_v23, %v12019_v13 }
 0xda6   :  { %v12022_v51 = vpop.f32.mrf.mxu0  ;;  %v14125_v43 = vpop.f32.mrf.mxu1 }
 0xda8   :  { %v12043_v16 = vpop.f32.mrf.mxu1  ;;  %v14129_v26 = vpop.f32.mrf.mxu0 }
 0xda9   :  { %v14127_v63 = vadd.f32 %v12043_v16, %v12022_v51 }
 0xdaa   :  { %v14155_v59 = vpop.f32.mrf.mxu1 }
 0xdae   :  { %v12062_v60 = vpop.f32.mrf.mxu0 }
 0xdb0   :  { %v3350_v6 = vpop.f32.mrf.mxu0 }
 0xdb2   :  { %v12065_v31 = vpop.f32.mrf.mxu0 }
 0xdb4   :  { %v3360_v32 = vpop.f32.mrf.mxu0 }
 0xdb6   :  { %v12068_v18 = vpop.f32.mrf.mxu0 }
 0xdb7   :  { %12069 = vmatprep.subr.mxu1 %v12068_v18 }
 0xdb8   :  { %v3370_v33 = vpop.f32.mrf.mxu0  ;;  %12070 = vmatpush3.msra.mxu1 %v12068_v18 }
 0xdb9   :  { %12071 = vmatprep.subr.mxu1 %v3370_v33 }
 0xdba   :  { %12072 = vmatpush3.msra.mxu1 %v3370_v33 }
 0xdbb   :  { %12073 = vmatprep.subr.mxu1 %v12065_v31 }
 0xdbc   :  { %12074 = vmatpush3.msra.mxu1 %v12065_v31 }
 0xdbd   :  { %12075 = vmatprep.subr.mxu1 %v3360_v32 }
 0xdbe   :  { %12076 = vmatpush3.msra.mxu1 %v3360_v32  ;;  %v12108_v34 = vpop.f32.mrf.mxu0 }
 0xdbf   :  { %12077 = vmatprep.subr.mxu1 %v12062_v60 }
 0xdc0   :  { %12078 = vmatpush3.msra.mxu1 %v12062_v60  ;;  %v3580_v39 = vpop.f32.mrf.mxu0 }
 0xdc1   :  { %12079 = vmatprep.subr.mxu1 %v3350_v6 }
 0xdc2   :  { %12080 = vmatpush3.msra.mxu1 %v3350_v6  ;;  %v12111_v62 = vpop.f32.mrf.mxu0 }
 0xdc3   :  { %12082 = vmatmul.mubr.msk.f32.vlgmr.msra.gmra.mxu1 %vm2398_vm3, %v3381_v14  ;;  %v3973_v14 = vld [vmem:[#allocation9 + $0x178] sm:$0xff] }
 0xdc4   :  { %v3590_v15 = vpop.f32.mrf.mxu0  ;;  %12084 = vmatprep.mubr.msk.f32.mxu1 %vm2398_vm3, %v3382_v61  ;;  %v3842_v61 = vld [vmem:[#allocation10 + $0xd0] sm:$0xff] }
 0xdc6   :  { %v12114_v27 = vpop.f32.mrf.mxu0 }
 0xdc7   :  { %12085 = vmatmul.mubr.msk.f32.gmra.mxu1 %vm2398_vm3, %v3383_v28  ;;  %12115 = vmatprep.subr.mxu1 %v12114_v27  ;;  %v3971_v28 = vld [vmem:[#allocation9 + $0x168] sm:$0xff] }
 0xdc8   :  { %v3600_v46 = vpop.f32.mrf.mxu0  ;;  %12116 = vmatpush3.msra.mxu1 %v12114_v27  ;;  %12087 = vmatprep.mubr.msk.f32.mxu1 %vm2398_vm3, %v3384_v4  ;;  %v3844_v4 = vld [vmem:[#allocation10 + $0xe0] sm:$0xff] }
 0xdc9   :  { %12117 = vmatprep.subr.mxu1 %v3600_v46  ;;  %v3970_v27 = vld [vmem:[#allocation9 + $0x160] sm:$0xff] }
 0xdca   :  { %12118 = vmatpush3.msra.mxu1 %v3600_v46  ;;  %v3845_v46 = vld [vmem:[#allocation10 + $0xe8] sm:$0xff] }
 0xdcb   :  { %12088 = vmatmul.mubr.msk.f32.gmra.mxu1 %vm2398_vm3, %v3385_v52  ;;  %12119 = vmatprep.subr.mxu1 %v12111_v62  ;;  %v3969_v52 = vld [vmem:[#allocation9 + $0x158] sm:$0xff] }
 0xdcc   :  { %12120 = vmatpush3.msra.mxu1 %v12111_v62  ;;  %12127 = vmatprep.mubr.msk.f32.mxu1 %vm2398_vm3, %v3610_v58  ;;  %v3972_v62 = vld [vmem:[#allocation9 + $0x170] sm:$0xff] }
 0xdcd   :  { %12121 = vmatprep.subr.mxu1 %v3590_v15  ;;  %v3968_v58 = vld [vmem:[#allocation9 + $0x150] sm:$0xff] }
 0xdce   :  { %12122 = vmatpush3.msra.mxu1 %v3590_v15  ;;  %v3843_v15 = vld [vmem:[#allocation10 + $0xd8] sm:$0xff] }
 0xdcf   :  { %12123 = vmatprep.subr.mxu1 %v12108_v34 }
 0xdd0   :  { %12124 = vmatpush3.msra.mxu1 %v12108_v34 }
 0xdd1   :  { %12125 = vmatprep.subr.mxu1 %v3580_v39 }
 0xdd2   :  { %12126 = vmatpush3.msra.mxu1 %v3580_v39  ;;  %v3841_v39 = vld [vmem:[#allocation10 + $0xc8] sm:$0xff] }
 0xdd3   :  { %12128 = vmatmul.mubr.msk.f32.vlgmr.msra.gmra.mxu1 %vm2398_vm3, %v3611_v35  ;;  %12136 = vmatprep.subr.mxu1 %v3743_v56  ;;  %v3967_v35 = vld [vmem:[#allocation9 + $0x148] sm:$0xff] }
 0xdd4   :  { %12137 = vmatpush3.msra.mxu1 %v3743_v56  ;;  %12130 = vmatprep.mubr.msk.f32.mxu1 %vm2398_vm3, %v3612_v57  ;;  %v3966_v56 = vld [vmem:[#allocation9 + $0x140] sm:$0xff]  ;;  %v4070_v57 = vld [vmem:[#allocation10 + $0xf0] sm:$0xff] }
 0xdd5   :  { %12138 = vmatprep.subr.mxu1 %v3742_v45 }
 0xdd6   :  { %12139 = vmatpush3.msra.mxu1 %v3742_v45 }
 0xdd7   :  { %12131 = vmatmul.mubr.msk.f32.gmra.mxu1 %vm2398_vm3, %v3613_v53  ;;  %12140 = vmatprep.subr.mxu1 %v3741_v49 }
 0xdd8   :  { %12141 = vmatpush3.msra.mxu1 %v3741_v49  ;;  %12133 = vmatprep.mubr.msk.f32.mxu1 %vm2398_vm3, %v3614_v36 }
 0xdd9   :  { %12142 = vmatprep.subr.mxu1 %v3740_v47 }
 0xdda   :  { %12143 = vmatpush3.msra.mxu1 %v3740_v47 }
 0xddb   :  { %12134 = vmatmul.mubr.msk.f32.gmra.mxu1 %vm2398_vm3, %v3615_v2  ;;  %12144 = vmatprep.subr.mxu1 %v3739_v55 }
 0xddc   :  { %12145 = vmatpush3.msra.mxu1 %v3739_v55  ;;  %12152 = vmatprep.mubr.msk.f32.mxu1 %vm2355_vm2, %v14038_v19 }
 0xddd   :  { %12146 = vmatprep.subr.mxu1 %v3738_v41 }
 0xdde   :  { %12147 = vmatpush3.msra.mxu1 %v3738_v41 }
 0xddf   :  { %12148 = vmatprep.subr.mxu1 %v3737_v42 }
 0xde0   :  { %12149 = vmatpush3.msra.mxu1 %v3737_v42 }
 0xde1   :  { %12150 = vmatprep.subr.mxu1 %v3736_v44 }
 0xde2   :  { %12151 = vmatpush3.msra.mxu1 %v3736_v44 }
 0xde3   :  { %12153 = vmatmul.mubr.msk.f32.vlgmr.msra.gmra.mxu1 %vm2355_vm2, %v14040_v10 }
 0xde4   :  { %12155 = vmatprep.mubr.msk.f32.mxu1 %vm2355_vm2, %v14051_v38 }
 0xde7   :  { %12156 = vmatmul.mubr.msk.f32.gmra.mxu1 %vm2355_vm2, %v14058_v24 }
 0xde8   :  { %12158 = vmatprep.mubr.msk.f32.mxu1 %vm2355_vm2, %v14066_v29 }
 0xdeb   :  { %12159 = vmatmul.mubr.msk.f32.gmra.mxu1 %vm2355_vm2, %v14068_v30 }
 0xdec   :  { %12219 = vmatprep.mubr.msk.f32.mxu1 %vm2398_vm3, %v4070_v57 }
 0xe83   :  { %v12083_v48 = vpop.f32.mrf.mxu1 }
 0xe84   :  { %v3500_v0 = vadd.f32 %v12083_v48, %v14117_v7 }
 0xe85   :  { %v14158_v5 = vpop.f32.mrf.mxu1 }
 0xe87   :  { %v12086_v11 = vpop.f32.mrf.mxu1 }
 0xe88   :  { %v3502_v9 = vadd.f32 %v12086_v11, %v14123_v25 }
 0xe89   :  { %v14161_v1 = vpop.f32.mrf.mxu1 }
 0xe8b   :  { %v12089_v3 = vpop.f32.mrf.mxu1 }
 0xe8c   :  { %v3504_v8 = vadd.f32 %v12089_v3, %v14127_v63  ;;  %v4071_v3 = vld [vmem:[#allocation10 + $0xf8] sm:$0xff] }
 0xe8d   :  { %v14164_v12 = vpop.f32.mrf.mxu1 }
 0xe93   :  { %v12129_v40 = vpop.f32.mrf.mxu1 }
 0xe94   :  { %v14166_v13 = vadd.f32 %v12129_v40, %v3500_v0  ;;  %v4072_v40 = vld [vmem:[#allocation10 + $0x100] sm:$0xff] }
 0xe95   :  { %v14168_v23 = vpop.f32.mrf.mxu1 }
 0xe97   :  { %v12132_v51 = vpop.f32.mrf.mxu1 }
 0xe98   :  { %v14170_v16 = vadd.f32 %v12132_v51, %v3502_v9  ;;  %v4073_v51 = vld [vmem:[#allocation10 + $0x108] sm:$0xff] }
 0xe99   :  { %v14172_v7 = vpop.f32.mrf.mxu1 }
 0xe9b   :  { %v12135_v60 = vpop.f32.mrf.mxu1 }
 0xe9c   :  { %v14174_v6 = vadd.f32 %v12135_v60, %v3504_v8  ;;  %v4203_v8 = vld [vmem:[#allocation9 + $0x1b8] sm:$0xff]  ;;  %v4074_v60 = vld [vmem:[#allocation10 + $0x110] sm:$0xff] }
 0xe9d   :  { %v14176_v25 = vpop.f32.mrf.mxu1 }
 0xea3   :  { %v12154_v31 = vpop.f32.mrf.mxu1 }
 0xea5   :  { %v3810_v32 = vpop.f32.mrf.mxu1 }
 0xea7   :  { %v12157_v63 = vpop.f32.mrf.mxu1 }
 0xea9   :  { %v3820_v18 = vpop.f32.mrf.mxu1 }
 0xeab   :  { %v12160_v33 = vpop.f32.mrf.mxu1 }
 0xeac   :  { %12161 = vmatprep.subr.mxu0 %v12160_v33 }
 0xead   :  { %v3830_v34 = vpop.f32.mrf.mxu1  ;;  %12162 = vmatpush3.msra.mxu0 %v12160_v33  ;;  %v4196_v33 = vld [vmem:[#allocation9 + $0x180] sm:$0xff] }
 0xeae   :  { %12163 = vmatprep.subr.mxu0 %v3830_v34 }
 0xeaf   :  { %12164 = vmatpush3.msra.mxu0 %v3830_v34  ;;  %v4300_v34 = vld [vmem:[#allocation10 + $0x120] sm:$0xff] }
 0xeb0   :  { %12165 = vmatprep.subr.mxu0 %v12157_v63 }
 0xeb1   :  { %12166 = vmatpush3.msra.mxu0 %v12157_v63  ;;  %v4198_v63 = vld [vmem:[#allocation9 + $0x190] sm:$0xff] }
 0xeb2   :  { %12167 = vmatprep.subr.mxu0 %v3820_v18 }
 0xeb3   :  { %12168 = vmatpush3.msra.mxu0 %v3820_v18  ;;  %v4197_v18 = vld [vmem:[#allocation9 + $0x188] sm:$0xff] }
 0xeb4   :  { %12169 = vmatprep.subr.mxu0 %v12154_v31 }
 0xeb5   :  { %12170 = vmatpush3.msra.mxu0 %v12154_v31  ;;  %v4075_v31 = vld [vmem:[#allocation10 + $0x118] sm:$0xff] }
 0xeb6   :  { %12171 = vmatprep.subr.mxu0 %v3810_v32 }
 0xeb7   :  { %12172 = vmatpush3.msra.mxu0 %v3810_v32  ;;  %v4199_v32 = vld [vmem:[#allocation9 + $0x198] sm:$0xff] }
 0xeb8   :  { %12174 = vmatmul.mubr.msk.f32.vlgmr.msra.gmra.mxu0 %vm2398_vm3, %v3841_v39  ;;  %12182 = vmatprep.subr.mxu0 %v3973_v14 }
 0xeb9   :  { %12183 = vmatpush3.msra.mxu0 %v3973_v14  ;;  %12176 = vmatprep.mubr.msk.f32.mxu0 %vm2398_vm3, %v3842_v61 }
 0xeba   :  { %12184 = vmatprep.subr.mxu0 %v3972_v62 }
 0xebb   :  { %12185 = vmatpush3.msra.mxu0 %v3972_v62 }
 0xebc   :  { %12177 = vmatmul.mubr.msk.f32.gmra.mxu0 %vm2398_vm3, %v3843_v15  ;;  %12186 = vmatprep.subr.mxu0 %v3971_v28 }
 0xebd   :  { %12187 = vmatpush3.msra.mxu0 %v3971_v28  ;;  %12179 = vmatprep.mubr.msk.f32.mxu0 %vm2398_vm3, %v3844_v4 }
 0xebe   :  { %12188 = vmatprep.subr.mxu0 %v3970_v27 }
 0xebf   :  { %12189 = vmatpush3.msra.mxu0 %v3970_v27 }
 0xec0   :  { %12180 = vmatmul.mubr.msk.f32.gmra.mxu0 %vm2398_vm3, %v3845_v46  ;;  %12190 = vmatprep.subr.mxu0 %v3969_v52 }
 0xec1   :  { %12191 = vmatpush3.msra.mxu0 %v3969_v52  ;;  %12198 = vmatprep.mubr.msk.f32.mxu0 %vm2355_vm2, %v14038_v19 }
 0xec2   :  { %12192 = vmatprep.subr.mxu0 %v3968_v58 }
 0xec3   :  { %12193 = vmatpush3.msra.mxu0 %v3968_v58 }
 0xec4   :  { %12194 = vmatprep.subr.mxu0 %v3967_v35 }
 0xec5   :  { %12195 = vmatpush3.msra.mxu0 %v3967_v35 }
 0xec6   :  { %12196 = vmatprep.subr.mxu0 %v3966_v56 }
 0xec7   :  { %12197 = vmatpush3.msra.mxu0 %v3966_v56 }
 0xec8   :  { %12199 = vmatmul.mubr.msk.f32.vlgmr.msra.gmra.mxu0 %vm2355_vm2, %v14040_v10 }
 0xec9   :  { %12201 = vmatprep.mubr.msk.f32.mxu0 %vm2355_vm2, %v14051_v38 }
 0xecc   :  { %12202 = vmatmul.mubr.msk.f32.gmra.mxu0 %vm2355_vm2, %v14058_v24 }
 0xecd   :  { %12204 = vmatprep.mubr.msk.f32.mxu0 %vm2355_vm2, %v14066_v29 }
 0xed0   :  { %12205 = vmatmul.mubr.msk.f32.gmra.mxu0 %vm2355_vm2, %v14068_v30 }
 0xed1   :  { %12265 = vmatprep.mubr.msk.f32.mxu0 %vm2398_vm3, %v4300_v34 }
 0xf78   :  { %v12175_v45 = vpop.f32.mrf.mxu0 }
 0xf79   :  { %v14197_v53 = vadd.f32 %v12175_v45, %v14166_v13  ;;  %v4202_v13 = vld [vmem:[#allocation9 + $0x1b0] sm:$0xff] }
 0xf7a   :  { %v14199_v49 = vpop.f32.mrf.mxu0 }
 0xf7c   :  { %v12178_v36 = vpop.f32.mrf.mxu0 }
 0xf7d   :  { %v14202_v47 = vadd.f32 %v12178_v36, %v14170_v16  ;;  %v4201_v16 = vld [vmem:[#allocation9 + $0x1a8] sm:$0xff]  ;;  %v4433_v36 = vld [vmem:[#allocation9 + $0x1f8] sm:$0xff] }
 0xf7e   :  { %v14204_v2 = vpop.f32.mrf.mxu0 }
 0xf80   :  { %v12181_v55 = vpop.f32.mrf.mxu0 }
 0xf81   :  { %v14207_v41 = vadd.f32 %v12181_v55, %v14174_v6  ;;  %v4200_v6 = vld [vmem:[#allocation9 + $0x1a0] sm:$0xff]  ;;  %v4432_v55 = vld [vmem:[#allocation9 + $0x1f0] sm:$0xff] }
 0xf82   :  { %v14209_v42 = vpop.f32.mrf.mxu0 }
 0xf88   :  { %v12200_v44 = vpop.f32.mrf.mxu0 }
 0xf8a   :  { %v4040_v50 = vpop.f32.mrf.mxu0 }
 0xf8c   :  { %v12203_v48 = vpop.f32.mrf.mxu0 }
 0xf8e   :  { %v4050_v0 = vpop.f32.mrf.mxu0 }
 0xf90   :  { %v12206_v11 = vpop.f32.mrf.mxu0 }
 0xf91   :  { %12207 = vmatprep.subr.mxu1 %v12206_v11 }
 0xf92   :  { %v4060_v9 = vpop.f32.mrf.mxu0  ;;  %12208 = vmatpush3.msra.mxu1 %v12206_v11  ;;  %v4429_v11 = vld [vmem:[#allocation9 + $0x1d8] sm:$0xff] }
 0xf93   :  { %12209 = vmatprep.subr.mxu1 %v4060_v9 }
 0xf94   :  { %12210 = vmatpush3.msra.mxu1 %v4060_v9  ;;  %v4428_v9 = vld [vmem:[#allocation9 + $0x1d0] sm:$0xff] }
 0xf95   :  { %12211 = vmatprep.subr.mxu1 %v12203_v48 }
 0xf96   :  { %12212 = vmatpush3.msra.mxu1 %v12203_v48  ;;  %v4430_v48 = vld [vmem:[#allocation9 + $0x1e0] sm:$0xff] }
 0xf97   :  { %12213 = vmatprep.subr.mxu1 %v4050_v0 }
 0xf98   :  { %12214 = vmatpush3.msra.mxu1 %v4050_v0  ;;  %v4305_v0 = vld [vmem:[#allocation10 + $0x148] sm:$0xff] }
 0xf99   :  { %12215 = vmatprep.subr.mxu1 %v12200_v44 }
 0xf9a   :  { %12216 = vmatpush3.msra.mxu1 %v12200_v44  ;;  %v4431_v44 = vld [vmem:[#allocation9 + $0x1e8] sm:$0xff] }
 0xf9b   :  { %12217 = vmatprep.subr.mxu1 %v4040_v50 }
 0xf9c   :  { %12218 = vmatpush3.msra.mxu1 %v4040_v50  ;;  %v4304_v50 = vld [vmem:[#allocation10 + $0x140] sm:$0xff] }
 0xf9d   :  { %12220 = vmatmul.mubr.msk.f32.vlgmr.msra.gmra.mxu1 %vm2398_vm3, %v4071_v3  ;;  %12228 = vmatprep.subr.mxu1 %v4203_v8  ;;  %v4427_v3 = vld [vmem:[#allocation9 + $0x1c8] sm:$0xff] }
 0xf9e   :  { %12229 = vmatpush3.msra.mxu1 %v4203_v8  ;;  %12222 = vmatprep.mubr.msk.f32.mxu1 %vm2398_vm3, %v4072_v40  ;;  %v4426_v8 = vld [vmem:[#allocation9 + $0x1c0] sm:$0xff]  ;;  %v4530_v40 = vld [vmem:[#allocation10 + $0x150] sm:$0xff] }
 0xf9f   :  { %12230 = vmatprep.subr.mxu1 %v4202_v13 }
 0xfa0   :  { %12231 = vmatpush3.msra.mxu1 %v4202_v13 }
 0xfa1   :  { %12223 = vmatmul.mubr.msk.f32.gmra.mxu1 %vm2398_vm3, %v4073_v51  ;;  %12232 = vmatprep.subr.mxu1 %v4201_v16 }
 0xfa2   :  { %12233 = vmatpush3.msra.mxu1 %v4201_v16  ;;  %12225 = vmatprep.mubr.msk.f32.mxu1 %vm2398_vm3, %v4074_v60 }
 0xfa3   :  { %12234 = vmatprep.subr.mxu1 %v4200_v6 }
 0xfa4   :  { %12235 = vmatpush3.msra.mxu1 %v4200_v6 }
 0xfa5   :  { %12226 = vmatmul.mubr.msk.f32.gmra.mxu1 %vm2398_vm3, %v4075_v31  ;;  %12236 = vmatprep.subr.mxu1 %v4199_v32 }
 0xfa6   :  { %12237 = vmatpush3.msra.mxu1 %v4199_v32  ;;  %12244 = vmatprep.mubr.msk.f32.mxu1 %vm2355_vm2, %v14038_v19 }
 0xfa7   :  { %12238 = vmatprep.subr.mxu1 %v4198_v63 }
 0xfa8   :  { %12239 = vmatpush3.msra.mxu1 %v4198_v63 }
 0xfa9   :  { %12240 = vmatprep.subr.mxu1 %v4197_v18 }
 0xfaa   :  { %12241 = vmatpush3.msra.mxu1 %v4197_v18 }
 0xfab   :  { %12242 = vmatprep.subr.mxu1 %v4196_v33 }
 0xfac   :  { %12243 = vmatpush3.msra.mxu1 %v4196_v33 }
 0xfad   :  { %12245 = vmatmul.mubr.msk.f32.vlgmr.msra.gmra.mxu1 %vm2355_vm2, %v14040_v10 }
 0xfae   :  { %12247 = vmatprep.mubr.msk.f32.mxu1 %vm2355_vm2, %v14051_v38 }
 0xfb1   :  { %12248 = vmatmul.mubr.msk.f32.gmra.mxu1 %vm2355_vm2, %v14058_v24 }
 0xfb2   :  { %12250 = vmatprep.mubr.msk.f32.mxu1 %vm2355_vm2, %v14066_v29 }
 0xfb5   :  { %12251 = vmatmul.mubr.msk.f32.gmra.mxu1 %vm2355_vm2, %v14068_v30 }
 0xfb6   :  { %12311 = vmatprep.mubr.msk.f32.mxu1 %vm2398_vm3, %v4530_v40 }
0x105d   :  { %v12221_v39 = vpop.f32.mrf.mxu1 }
0x105e   :  { %v14230_v14 = vadd.f32 %v12221_v39, %v14197_v53  ;;  %v4301_v53 = vld [vmem:[#allocation10 + $0x128] sm:$0xff] }
0x105f   :  { %v14232_v61 = vpop.f32.mrf.mxu1 }
0x1061   :  { %v12224_v62 = vpop.f32.mrf.mxu1 }
0x1062   :  { %v14235_v15 = vadd.f32 %v12224_v62, %v14202_v47  ;;  %v4302_v47 = vld [vmem:[#allocation10 + $0x130] sm:$0xff] }
0x1063   :  { %v14237_v28 = vpop.f32.mrf.mxu1 }
0x1065   :  { %v12227_v4 = vpop.f32.mrf.mxu1 }
0x1066   :  { %v14240_v27 = vadd.f32 %v12227_v4, %v14207_v41  ;;  %v4303_v41 = vld [vmem:[#allocation10 + $0x138] sm:$0xff] }
0x1067   :  { %v14242_v46 = vpop.f32.mrf.mxu1 }
0x106d   :  { %v12246_v52 = vpop.f32.mrf.mxu1 }
0x106f   :  { %v4270_v58 = vpop.f32.mrf.mxu1 }
0x1071   :  { %v12249_v35 = vpop.f32.mrf.mxu1 }
0x1073   :  { %v4280_v56 = vpop.f32.mrf.mxu1 }
0x1075   :  { %v12252_v57 = vpop.f32.mrf.mxu1 }
0x1076   :  { %12253 = vmatprep.subr.mxu0 %v12252_v57 }
0x1077   :  { %v4290_v45 = vpop.f32.mrf.mxu1  ;;  %12254 = vmatpush3.msra.mxu0 %v12252_v57  ;;  %v4534_v57 = vld [vmem:[#allocation10 + $0x170] sm:$0xff] }
0x1078   :  { %12255 = vmatprep.subr.mxu0 %v4290_v45 }
0x1079   :  { %12256 = vmatpush3.msra.mxu0 %v4290_v45  ;;  %v4660_v45 = vld [vmem:[#allocation9 + $0x220] sm:$0xff] }
0x107a   :  { %12257 = vmatprep.subr.mxu0 %v12249_v35 }
0x107b   :  { %12258 = vmatpush3.msra.mxu0 %v12249_v35  ;;  %v4533_v35 = vld [vmem:[#allocation10 + $0x168] sm:$0xff] }
0x107c   :  { %12259 = vmatprep.subr.mxu0 %v4280_v56 }
0x107d   :  { %12260 = vmatpush3.msra.mxu0 %v4280_v56  ;;  %v4661_v56 = vld [vmem:[#allocation9 + $0x228] sm:$0xff] }
0x107e   :  { %12261 = vmatprep.subr.mxu0 %v12246_v52 }
0x107f   :  { %12262 = vmatpush3.msra.mxu0 %v12246_v52  ;;  %v4532_v52 = vld [vmem:[#allocation10 + $0x160] sm:$0xff] }
0x1080   :  { %12263 = vmatprep.subr.mxu0 %v4270_v58 }
0x1081   :  { %12264 = vmatpush3.msra.mxu0 %v4270_v58  ;;  %v4662_v58 = vld [vmem:[#allocation9 + $0x230] sm:$0xff] }
0x1082   :  { %12266 = vmatmul.mubr.msk.f32.vlgmr.msra.gmra.mxu0 %vm2398_vm3, %v4301_v53  ;;  %12274 = vmatprep.subr.mxu0 %v4433_v36  ;;  %v4535_v53 = vld [vmem:[#allocation10 + $0x178] sm:$0xff] }
0x1083   :  { %12275 = vmatpush3.msra.mxu0 %v4433_v36  ;;  %12268 = vmatprep.mubr.msk.f32.mxu0 %vm2398_vm3, %v4302_v47  ;;  %v4659_v36 = vld [vmem:[#allocation9 + $0x218] sm:$0xff]  ;;  %v4658_v47 = vld [vmem:[#allocation9 + $0x210] sm:$0xff] }
0x1084   :  { %12276 = vmatprep.subr.mxu0 %v4432_v55 }
0x1085   :  { %12277 = vmatpush3.msra.mxu0 %v4432_v55  ;;  %v4657_v55 = vld [vmem:[#allocation9 + $0x208] sm:$0xff] }
0x1086   :  { %12269 = vmatmul.mubr.msk.f32.gmra.mxu0 %vm2398_vm3, %v4303_v41  ;;  %12278 = vmatprep.subr.mxu0 %v4431_v44  ;;  %v4656_v41 = vld [vmem:[#allocation9 + $0x200] sm:$0xff] }
0x1087   :  { %12279 = vmatpush3.msra.mxu0 %v4431_v44  ;;  %12271 = vmatprep.mubr.msk.f32.mxu0 %vm2398_vm3, %v4304_v50  ;;  %v4760_v44 = vld [vmem:[#allocation10 + $0x180] sm:$0xff]  ;;  %v14314_v50 = vld [vmem:[#allocation12 + $0x8] sm:$0xff] }
0x1088   :  { %12280 = vmatprep.subr.mxu0 %v4430_v48 }
0x1089   :  { %12281 = vmatpush3.msra.mxu0 %v4430_v48 }
0x108a   :  { %12272 = vmatmul.mubr.msk.f32.gmra.mxu0 %vm2398_vm3, %v4305_v0  ;;  %12282 = vmatprep.subr.mxu0 %v4429_v11 }
0x108b   :  { %12283 = vmatpush3.msra.mxu0 %v4429_v11  ;;  %12290 = vmatprep.mubr.msk.f32.mxu0 %vm2355_vm2, %v14038_v19 }
0x108c   :  { %12284 = vmatprep.subr.mxu0 %v4428_v9 }
0x108d   :  { %12285 = vmatpush3.msra.mxu0 %v4428_v9 }
0x108e   :  { %12286 = vmatprep.subr.mxu0 %v4427_v3 }
0x108f   :  { %12287 = vmatpush3.msra.mxu0 %v4427_v3 }
0x1090   :  { %12288 = vmatprep.subr.mxu0 %v4426_v8 }
0x1091   :  { %12289 = vmatpush3.msra.mxu0 %v4426_v8 }
0x1092   :  { %12291 = vmatmul.mubr.msk.f32.vlgmr.msra.gmra.mxu0 %vm2355_vm2, %v14040_v10 }
0x1093   :  { %12293 = vmatprep.mubr.msk.f32.mxu0 %vm2355_vm2, %v14051_v38 }
0x1096   :  { %12294 = vmatmul.mubr.msk.f32.gmra.mxu0 %vm2355_vm2, %v14058_v24 }
0x1097   :  { %12296 = vmatprep.mubr.msk.f32.mxu0 %vm2355_vm2, %v14066_v29 }
0x109a   :  { %12297 = vmatmul.mubr.msk.f32.gmra.mxu0 %vm2355_vm2, %v14068_v30 }
0x109b   :  { %12357 = vmatprep.mubr.msk.f32.mxu0 %vm2398_vm3, %v4760_v44 }
0x1142   :  { %v12267_v13 = vpop.f32.mrf.mxu0 }
0x1143   :  { %v14263_v51 = vadd.f32 %v12267_v13, %v14230_v14 }
0x1144   :  { %v14265_v16 = vpop.f32.mrf.mxu0 }
0x1146   :  { %v12270_v60 = vpop.f32.mrf.mxu0 }
0x1147   :  { %v14268_v6 = vadd.f32 %v12270_v60, %v14235_v15  ;;  %v4531_v15 = vld [vmem:[#allocation10 + $0x158] sm:$0xff] }
0x1148   :  { %v14270_v31 = vpop.f32.mrf.mxu0 }
0x114a   :  { %v12273_v32 = vpop.f32.mrf.mxu0 }
0x114b   :  { %v14273_v63 = vadd.f32 %v12273_v32, %v14240_v27  ;;  %v4663_v27 = vld [vmem:[#allocation9 + $0x238] sm:$0xff] }
0x114c   :  { %v14275_v18 = vpop.f32.mrf.mxu0 }
0x1152   :  { %v12292_v33 = vpop.f32.mrf.mxu0 }
0x1154   :  { %v4500_v34 = vpop.f32.mrf.mxu0 }
0x1156   :  { %v12295_v39 = vpop.f32.mrf.mxu0 }
0x1158   :  { %v4510_v62 = vpop.f32.mrf.mxu0 }
0x115a   :  { %v12298_v14 = vpop.f32.mrf.mxu0 }
0x115b   :  { %12299 = vmatprep.subr.mxu1 %v12298_v14 }
0x115c   :  { %v4520_v4 = vpop.f32.mrf.mxu0  ;;  %12300 = vmatpush3.msra.mxu1 %v12298_v14 }
0x115d   :  { %12301 = vmatprep.subr.mxu1 %v4520_v4 }
0x115e   :  { %12302 = vmatpush3.msra.mxu1 %v4520_v4  ;;  %v4764_v4 = vld [vmem:[#allocation10 + $0x1a0] sm:$0xff] }
0x115f   :  { %12303 = vmatprep.subr.mxu1 %v12295_v39 }
0x1160   :  { %12304 = vmatpush3.msra.mxu1 %v12295_v39 }
0x1161   :  { %12305 = vmatprep.subr.mxu1 %v4510_v62 }
0x1162   :  { %12306 = vmatpush3.msra.mxu1 %v4510_v62 }
0x1163   :  { %12307 = vmatprep.subr.mxu1 %v12292_v33 }
0x1164   :  { %12308 = vmatpush3.msra.mxu1 %v12292_v33 }
0x1165   :  { %12309 = vmatprep.subr.mxu1 %v4500_v34 }
0x1166   :  { %12310 = vmatpush3.msra.mxu1 %v4500_v34 }
0x1167   :  { %12312 = vmatmul.mubr.msk.f32.vlgmr.msra.gmra.mxu1 %vm2398_vm3, %v4531_v15  ;;  %12320 = vmatprep.subr.mxu1 %v4663_v27  ;;  %v4765_v15 = vld [vmem:[#allocation10 + $0x1a8] sm:$0xff] }
0x1168   :  { %12321 = vmatpush3.msra.mxu1 %v4663_v27  ;;  %12314 = vmatprep.mubr.msk.f32.mxu1 %vm2398_vm3, %v4532_v52  ;;  %v3257_v27 = vadd.f32 %v14125_v43, %v14121_v22 }
0x1169   :  { %12322 = vmatprep.subr.mxu1 %v4662_v58 }
0x116a   :  { %12323 = vmatpush3.msra.mxu1 %v4662_v58  ;;  %v3501_v58 = vadd.f32 %v14161_v1, %v3257_v27 }
0x116b   :  { %12315 = vmatmul.mubr.msk.f32.gmra.mxu1 %vm2398_vm3, %v4533_v35  ;;  %12324 = vmatprep.subr.mxu1 %v4661_v56  ;;  %v3267_v35 = vadd.f32 %v14155_v59, %v14129_v26 }
0x116c   :  { %12325 = vmatpush3.msra.mxu1 %v4661_v56  ;;  %12317 = vmatprep.mubr.msk.f32.mxu1 %vm2398_vm3, %v4534_v57  ;;  %v3731_v56 = vadd.f32 %v14172_v7, %v3501_v58 }
0x116d   :  { %12326 = vmatprep.subr.mxu1 %v4660_v45  ;;  %v3503_v57 = vadd.f32 %v14164_v12, %v3267_v35 }
0x116e   :  { %12327 = vmatpush3.msra.mxu1 %v4660_v45  ;;  %v3961_v45 = vadd.f32 %v14204_v2, %v3731_v56 }
0x116f   :  { %12318 = vmatmul.mubr.msk.f32.gmra.mxu1 %vm2398_vm3, %v4535_v53  ;;  %12328 = vmatprep.subr.mxu1 %v4659_v36 }
0x1170   :  { %12329 = vmatpush3.msra.mxu1 %v4659_v36  ;;  %12336 = vmatprep.mubr.msk.f32.mxu1 %vm2355_vm2, %v14038_v19  ;;  %v14294_v19 = vld [vmem:[#allocation2] sm:$0xff]  ;;  %v3247_v36 = vadd.f32 %v14119_v21, %v14115_v54  ;;  %v4191_v22 = vadd.f32 %v14237_v28, %v3961_v45 }
0x1171   :  { %12330 = vmatprep.subr.mxu1 %v4658_v47 }
0x1172   :  { %12331 = vmatpush3.msra.mxu1 %v4658_v47  ;;  %v3499_v43 = vadd.f32 %v14158_v5, %v3247_v36  ;;  %v4421_v59 = vadd.f32 %v14270_v31, %v4191_v22 }
0x1173   :  { %12332 = vmatprep.subr.mxu1 %v4657_v55 }
0x1174   :  { %12333 = vmatpush3.msra.mxu1 %v4657_v55  ;;  %v3733_v55 = vadd.f32 %v14176_v25, %v3503_v57  ;;  %v3729_v12 = vadd.f32 %v14168_v23, %v3499_v43 }
0x1175   :  { %12334 = vmatprep.subr.mxu1 %v4656_v41 }
0x1176   :  { %12335 = vmatpush3.msra.mxu1 %v4656_v41  ;;  %v3963_v26 = vadd.f32 %v14209_v42, %v3733_v55  ;;  %v3959_v21 = vadd.f32 %v14199_v49, %v3729_v12 }
0x1177   :  { %12337 = vmatmul.mubr.msk.f32.vlgmr.msra.gmra.mxu1 %vm2355_vm2, %v14040_v10  ;;  %v14299_v10 = vld [vmem:[#allocation12 + $0x28] sm:$0xff] }
0x1178   :  { %12339 = vmatprep.mubr.msk.f32.mxu1 %vm2355_vm2, %v14051_v38  ;;  %4912 = vperm.xlu1 %13120, %v14299_v10   ;;  %v14302_v38 = vld [vmem:[#allocation12 + $0x18] sm:$0xff]  ;;  %v4193_v2 = vadd.f32 %v14242_v46, %v3963_v26  ;;  %v4189_v42 = vadd.f32 %v14232_v61, %v3959_v21 }
0x1179   :  { %4902 = vperm.xlu0 %13121, %v14302_v38  }
0x117a   :  { %v4423_v28 = vadd.f32 %v14275_v18, %v4193_v2 }
0x117b   :  { %12340 = vmatmul.mubr.msk.f32.gmra.mxu1 %vm2355_vm2, %v14058_v24  ;;  %v14304_v24 = vld [vmem:[#allocation12 + $0x20] sm:$0xff] }
0x117c   :  { %12342 = vmatprep.mubr.msk.f32.mxu1 %vm2355_vm2, %v14066_v29  ;;  %v14307_v29 = vld [vmem:[#allocation12] sm:$0xff]  ;;  %4907 = vperm.xlu1 %13120, %v14304_v24  }
0x117d   :  { %4887 = vperm.xlu0 %13121, %v14307_v29  }
0x117f   :  { %12343 = vmatmul.mubr.msk.f32.gmra.mxu1 %vm2355_vm2, %v14068_v30  ;;  %v14310_v30 = vld [vmem:[#allocation12 + $0x10] sm:$0xff] }
0x1180   :  { %12399 = vmatprep.mubr.msk.f32.mxu1 %vm2398_vm3, %v14294_v19  ;;  %4897 = vperm.xlu1 %13120, %v14310_v30  }
0x1181   :  { %13123 = vset.pattern.permute.xlu0 %v13503_v17 }
0x1184   :  { %4892 = vperm.xlu1 %13120, %v14314_v50  }
0x1188   :  { %13122 = vset.pattern.permute.xlu1 %v13503_v17 }
0x11f3   :  { %v4913_v52 = vpop.permute.xlu1 %4912 }
0x11f4   :  { %v4903_v25 = vpop.permute.xlu0 %4902 }
0x11f7   :  { %v4908_v53 = vpop.permute.xlu1 %4907 }
0x11fb   :  { %v4898_v44 = vpop.permute.xlu1 %4897 }
0x1227   :  { %v12313_v48 = vpop.f32.mrf.mxu1 }
0x1228   :  { %v14320_v0 = vadd.f32 %v12313_v48, %v14263_v51  ;;  %v4761_v51 = vld [vmem:[#allocation10 + $0x188] sm:$0xff] }
0x1229   :  { %v14322_v11 = vpop.f32.mrf.mxu1 }
0x122b   :  { %v12316_v9 = vpop.f32.mrf.mxu1 }
0x122c   :  { %v4652_v3 = vadd.f32 %v12316_v9, %v14268_v6  ;;  %v4762_v6 = vld [vmem:[#allocation10 + $0x190] sm:$0xff] }
0x122d   :  { %v4630_v8 = vpop.f32.mrf.mxu1 }
0x122e   :  { %v4651_v41 = vadd.f32 %v4630_v8, %v4421_v59  ;;  %v4419_v8 = vadd.f32 %v14265_v16, %v4189_v42 }
0x122f   :  { %v12319_v40 = vpop.f32.mrf.mxu1 }
0x1230   :  { %v14326_v13 = vadd.f32 %v12319_v40, %v14273_v63  ;;  %v4763_v63 = vld [vmem:[#allocation10 + $0x198] sm:$0xff] }
0x1231   :  { %v4640_v60 = vpop.f32.mrf.mxu1 }
0x1232   :  { %v4653_v31 = vadd.f32 %v4640_v60, %v4423_v28  ;;  %v13186_v28 = vld [vmem:[#allocation2 + $0x8] sm:$0xff] }
0x1237   :  { %v12338_v32 = vpop.f32.mrf.mxu1 }
0x1239   :  { %v4730_v33 = vpop.f32.mrf.mxu1 }
0x123b   :  { %v12341_v34 = vpop.f32.mrf.mxu1 }
0x123d   :  { %v4740_v39 = vpop.f32.mrf.mxu1 }
0x123f   :  { %v12344_v62 = vpop.f32.mrf.mxu1 }
0x1240   :  { %12345 = vmatprep.subr.mxu0 %v12344_v62 }
0x1241   :  { %v4750_v14 = vpop.f32.mrf.mxu1  ;;  %12346 = vmatpush3.msra.mxu0 %v12344_v62 }
0x1242   :  { %12347 = vmatprep.subr.mxu0 %v4750_v14 }
0x1243   :  { %12348 = vmatpush3.msra.mxu0 %v4750_v14 }
0x1244   :  { %12349 = vmatprep.subr.mxu0 %v12341_v34 }
0x1245   :  { %12350 = vmatpush3.msra.mxu0 %v12341_v34 }
0x1246   :  { %12351 = vmatprep.subr.mxu0 %v4740_v39 }
0x1247   :  { %12352 = vmatpush3.msra.mxu0 %v4740_v39  ;;  %v4893_v39 = vpop.permute.xlu1 %4892 }
0x1248   :  { %12353 = vmatprep.subr.mxu0 %v12338_v32 }
0x1249   :  { %12354 = vmatpush3.msra.mxu0 %v12338_v32 }
0x124a   :  { %12355 = vmatprep.subr.mxu0 %v4730_v33 }
0x124b   :  { %12356 = vmatpush3.msra.mxu0 %v4730_v33 }
0x124c   :  { %12358 = vmatmul.mubr.msk.f32.vlgmr.msra.gmra.mxu0 %vm2398_vm3, %v4761_v51 }
0x124d   :  { %12360 = vmatprep.mubr.msk.f32.mxu0 %vm2398_vm3, %v4762_v6 }
0x1250   :  { %12361 = vmatmul.mubr.msk.f32.gmra.mxu0 %vm2398_vm3, %v4763_v63 }
0x1251   :  { %12363 = vmatprep.mubr.msk.f32.mxu0 %vm2398_vm3, %v4764_v4  ;;  %v4888_v4 = vpop.permute.xlu0 %4887 }
0x1254   :  { %12364 = vmatmul.mubr.msk.f32.gmra.mxu0 %vm2398_vm3, %v4765_v15 }
0x1255   :  { %12378 = vmatprep.mubr.msk.f32.mxu0 %vm2398_vm3, %v14294_v19 }
0x130c   :  { %v12359_v47 = vpop.f32.mrf.mxu0 }
0x130e   :  { %v4850_v1 = vpop.f32.mrf.mxu0 }
0x1310   :  { %v12362_v7 = vpop.f32.mrf.mxu0 }
0x1311   :  { %v4882_v54 = vadd.f32 %v12362_v7, %v4652_v3  ;;  %v4880_v3 = vadd.f32 %v12359_v47, %v14320_v0 }
0x1312   :  { %v4860_v48 = vpop.f32.mrf.mxu0 }
0x1313   :  { %v4918_v5 = vadd.f32 %v4903_v25, %v4882_v54  ;;  %v4881_v9 = vadd.f32 %v4860_v48, %v4651_v41  ;;  %v4916_v14 = vadd.f32 %v4893_v39, %v4880_v3 }
0x1314   :  { %v12365_v40 = vpop.f32.mrf.mxu0 }
0x1315   :  { %v14355_v32 = vmax.f32 %v4918_v5, 0.0  ;;  %v4917_v23 = vadd.f32 %v4898_v44, %v4881_v9  ;;  %v4884_v46 = vadd.f32 %v12365_v40, %v14326_v13  ;;  %v4649_v13 = vadd.f32 %v14322_v11, %v4419_v8  ;;  %v13187_v5 = vld [vmem:[#allocation2 + $0x10] sm:$0xff]  ;;  %v13188_v40 = vld [vmem:[#allocation2 + $0x18] sm:$0xff] }
0x1316   :  { %v4870_v49 = vpop.f32.mrf.mxu0  ;;  %v14378_v27 = vmax.f32 %v4916_v14, 0.0 }
0x1317   :  { %v14360_v33 = vmax.f32 %v4917_v23, 0.0  ;;  %v4920_v18 = vadd.f32 %v4913_v52, %v4884_v46  ;;  %v4883_v34 = vadd.f32 %v4870_v49, %v4653_v31  ;;  %v4937_v61 = vsel %vm4927_vm4, %v14355_v32, 0.0  ;;  %v13189_v31 = vld [vmem:[#allocation2 + $0x20] sm:$0xff]  ;;  %v13190_v23 = vld [vmem:[#allocation2 + $0x28] sm:$0xff] }
0x1318   :  { %4938 = vadd.xlane.f32.xlu1 %v4937_v61  ;;  %v4949_v60 = vmul.f32 %v14355_v32, %v14355_v32  ;;  %v4879_v51 = vadd.f32 %v4850_v1, %v4649_v13  ;;  %v4931_v45 = vsel %vm4927_vm4, %v14378_v27, 0.0  ;;  %v4947_v43 = vmul.f32 %v14378_v27, %v14378_v27 }
0x1319   :  { %v4919_v62 = vadd.f32 %v4908_v53, %v4883_v34  ;;  %v14367_v16 = vmax.f32 %v4920_v18, 0.0  ;;  %v4934_v63 = vsel %vm4927_vm4, %v14360_v33, 0.0  ;;  %v4948_v36 = vmul.f32 %v14360_v33, %v14360_v33 }
0x131a   :  { %v4961_v0 = vsel %vm4927_vm4, %v4949_v60, 0.0  ;;  %v4915_v52 = vadd.f32 %v4888_v4, %v4879_v51  ;;  %v4955_v26 = vsel %vm4927_vm4, %v4947_v43, 0.0 }
0x131b   :  { %v14370_v6 = vmax.f32 %v4919_v62, 0.0  ;;  %4962 = vadd.xlane.f32.xlu0 %v4961_v0  ;;  %v4951_v11 = vmul.f32 %v14367_v16, %v14367_v16  ;;  %v4943_v58 = vsel %vm4927_vm4, %v14367_v16, 0.0  ;;  %v4958_v22 = vsel %vm4927_vm4, %v4948_v36, 0.0 }
0x131c   :  { %4935 = vadd.xlane.f32.xlu1 %v4934_v63  ;;  %v14385_v57 = vmax.f32 %v4915_v52, 0.0 }
0x131d   :  { %v4940_v15 = vsel %vm4927_vm4, %v14370_v6, 0.0  ;;  %v4967_v35 = vsel %vm4927_vm4, %v4951_v11, 0.0  ;;  %v4950_v56 = vmul.f32 %v14370_v6, %v14370_v6 }
0x131e   :  { %v4928_v47 = vsel %vm4927_vm4, %v14385_v57, 0.0  ;;  %v4946_v55 = vmul.f32 %v14385_v57, %v14385_v57 }
0x131f   :  { %4941 = vadd.xlane.f32.xlu0 %v4940_v15  ;;  %v4964_v53 = vsel %vm4927_vm4, %v4950_v56, 0.0 }
0x1320   :  { %4944 = vadd.xlane.f32.xlu1 %v4943_v58  ;;  %v4952_v1 = vsel %vm4927_vm4, %v4946_v55, 0.0 }
0x1323   :  { %4968 = vadd.xlane.f32.xlu0 %v4967_v35 }
0x1324   :  { %4932 = vadd.xlane.f32.xlu1 %v4931_v45 }
0x1327   :  { %4965 = vadd.xlane.f32.xlu0 %v4964_v53 }
0x1328   :  { %4929 = vadd.xlane.f32.xlu1 %v4928_v47 }
0x132b   :  { %4959 = vadd.xlane.f32.xlu0 %v4958_v22 }
0x132c   :  { %4953 = vadd.xlane.f32.xlu1 %v4952_v1 }
0x132f   :  { %4956 = vadd.xlane.f32.xlu0 %v4955_v26 }
0x13a1   :  { %v4939_v59 = vpop.xlane.xlu1 %4938 }
0x13a4   :  { %v4963_v12 = vpop.xlane.xlu0 %4962 }
0x13a5   :  { %v4936_v7 = vpop.xlane.xlu1 %4935 }
0x13a8   :  { %v4942_v2 = vpop.xlane.xlu0 %4941 }
0x13a9   :  { %v4945_v41 = vpop.xlane.xlu1 %4944 }
0x13aa   :  { %12366 = vmatprep.subr.mxu0 %v4945_v41 }
0x13ab   :  { %12367 = vmatpush3.msra.mxu0 %v4945_v41 }
0x13ac   :  { %v4969_v44 = vpop.xlane.xlu0 %4968  ;;  %12368 = vmatprep.subr.mxu0 %v4942_v2 }
0x13ad   :  { %12387 = vmatprep.subr.mxu1 %v4969_v44  ;;  %v4933_v54 = vpop.xlane.xlu1 %4932  ;;  %12369 = vmatpush3.msra.mxu0 %v4942_v2 }
0x13ae   :  { %12388 = vmatpush3.msra.mxu1 %v4969_v44  ;;  %12370 = vmatprep.subr.mxu0 %v4939_v59 }
0x13af   :  { %12371 = vmatpush3.msra.mxu0 %v4939_v59 }
0x13b0   :  { %v4966_v21 = vpop.xlane.xlu0 %4965  ;;  %12372 = vmatprep.subr.mxu0 %v4936_v7 }
0x13b1   :  { %12389 = vmatprep.subr.mxu1 %v4966_v21  ;;  %12373 = vmatpush3.msra.mxu0 %v4936_v7  ;;  %v4930_v25 = vpop.xlane.xlu1 %4929 }
0x13b2   :  { %12390 = vmatpush3.msra.mxu1 %v4966_v21  ;;  %12374 = vmatprep.subr.mxu0 %v4933_v54 }
0x13b3   :  { %12391 = vmatprep.subr.mxu1 %v4963_v12  ;;  %12375 = vmatpush3.msra.mxu0 %v4933_v54 }
0x13b4   :  { %12392 = vmatpush3.msra.mxu1 %v4963_v12  ;;  %v4960_v48 = vpop.xlane.xlu0 %4959  ;;  %12376 = vmatprep.subr.mxu0 %v4930_v25 }
0x13b5   :  { %12393 = vmatprep.subr.mxu1 %v4960_v48  ;;  %12377 = vmatpush3.msra.mxu0 %v4930_v25  ;;  %v4954_v42 = vpop.xlane.xlu1 %4953 }
0x13b6   :  { %12394 = vmatpush3.msra.mxu1 %v4960_v48  ;;  %12379 = vmatmul.mubr.msk.f32.vlgmr.msra.gmra.mxu0 %vm2398_vm3, %v13186_v28 }
0x13b7   :  { %12381 = vmatprep.mubr.msk.f32.mxu0 %vm2398_vm3, %v13187_v5 }
0x13b8   :  { %v4957_v9 = vpop.xlane.xlu0 %4956 }
0x13b9   :  { %12395 = vmatprep.subr.mxu1 %v4957_v9 }
0x13ba   :  { %12396 = vmatpush3.msra.mxu1 %v4957_v9  ;;  %12382 = vmatmul.mubr.msk.f32.gmra.mxu0 %vm2398_vm3, %v13188_v40 }
0x13bb   :  { %12397 = vmatprep.subr.mxu1 %v4954_v42  ;;  %12384 = vmatprep.mubr.msk.f32.mxu0 %vm2398_vm3, %v13189_v31 }
0x13bc   :  { %12398 = vmatpush3.msra.mxu1 %v4954_v42 }
0x13bd   :  { %12400 = vmatmul.mubr.msk.f32.vlgmr.msra.gmra.mxu1 %vm2398_vm3, %v13186_v28 }
0x13be   :  { %12402 = vmatprep.mubr.msk.f32.mxu1 %vm2398_vm3, %v13187_v5  ;;  %12385 = vmatmul.mubr.msk.f32.gmra.mxu0 %vm2398_vm3, %v13190_v23 }
0x13c1   :  { %12403 = vmatmul.mubr.msk.f32.gmra.mxu1 %vm2398_vm3, %v13188_v40 }
0x13c2   :  { %12405 = vmatprep.mubr.msk.f32.mxu1 %vm2398_vm3, %v13189_v31 }
0x13c5   :  { %12406 = vmatmul.mubr.msk.f32.gmra.mxu1 %vm2398_vm3, %v13190_v23 }
0x1476   :  { %v12380_v46 = vpop.f32.mrf.mxu0 }
0x1477   :  { %v14411_v8 = vmul.f32 0.03125, %v12380_v46 }
0x1478   :  { %v5036_v3 = vpop.f32.mrf.mxu0 }
0x1479   :  { %v5173_v18 = vmul.f32 %v14411_v8, %v14411_v8  ;;  %v14415_v34 = vmul.f32 0.03125, %v5036_v3 }
0x147a   :  { %v12383_v49 = vpop.f32.mrf.mxu0 }
0x147b   :  { %v14417_v61 = vmul.f32 0.03125, %v12383_v49  ;;  %v5172_v51 = vmul.f32 %v14415_v34, %v14415_v34 }
0x147c   :  { %v5046_v39 = vpop.f32.mrf.mxu0 }
0x147d   :  { %v12401_v60 = vpop.f32.mrf.mxu1  ;;  %v14419_v62 = vmul.f32 0.03125, %v5046_v39  ;;  %v5175_v4 = vmul.f32 %v14417_v61, %v14417_v61 }
0x147e   :  { %v5167_v13 = vmul.f32 0.03125, %v12401_v60  ;;  %v12386_v0 = vpop.f32.mrf.mxu0 }
0x147f   :  { %v5137_v14 = vpop.f32.mrf.mxu1  ;;  %v14425_v58 = vmul.f32 0.03125, %v12386_v0  ;;  %v5174_v53 = vmul.f32 %v14419_v62, %v14419_v62 }
0x1480   :  { %v5179_v63 = vsub.f32 %v5167_v13, %v5173_v18  ;;  %v5166_v15 = vmul.f32 0.03125, %v5137_v14  ;;  %v5056_v11 = vpop.f32.mrf.mxu0 }
0x1481   :  { %v12404_v52 = vpop.f32.mrf.mxu1  ;;  %v14427_v35 = vmul.f32 0.03125, %v5056_v11  ;;  %v5177_v26 = vmul.f32 %v14425_v58, %v14425_v58 }
0x1482   :  { %v5185_v56 = vmax.f32 %v5179_v63, 0.0  ;;  %v5178_v45 = vsub.f32 %v5166_v15, %v5172_v51  ;;  %v5169_v36 = vmul.f32 0.03125, %v12404_v52 }
0x1483   :  { %v5147_v47 = vpop.f32.mrf.mxu1  ;;  %v5176_v59 = vmul.f32 %v14427_v35, %v14427_v35 }
0x1484   :  { %v5191_v55 = vadd.f32 1e-05, %v5185_v56  ;;  %v5184_v22 = vmax.f32 %v5178_v45, 0.0  ;;  %v5181_v43 = vsub.f32 %v5169_v36, %v5175_v4  ;;  %v5168_v1 = vmul.f32 0.03125, %v5147_v47 }
0x1485   :  { %v12407_v12 = vpop.f32.mrf.mxu1 }
0x1486   :  { %13147 = vrsqrt.f32 %v5191_v55  ;;  %v5190_v7 = vadd.f32 1e-05, %v5184_v22  ;;  %v5187_v2 = vmax.f32 %v5181_v43, 0.0  ;;  %v5180_v41 = vsub.f32 %v5168_v1, %v5174_v53 }
0x1487   :  { %v5171_v44 = vmul.f32 0.03125, %v12407_v12  ;;  %v5157_v54 = vpop.f32.mrf.mxu1 }
0x1488   :  { %13149 = vrsqrt.f32 %v5190_v7  ;;  %v5193_v21 = vadd.f32 1e-05, %v5187_v2  ;;  %v5186_v25 = vmax.f32 %v5180_v41, 0.0  ;;  %v5170_v48 = vmul.f32 0.03125, %v5157_v54  ;;  %v5364_v41 = vld [vmem:[#allocation13] sm:$0xff] }
0x1489   :  { %v5183_v28 = vsub.f32 %v5171_v44, %v5177_v26  ;;  %v5486_v44 = vld [vmem:[#allocation13 + $0x10] sm:$0xff] }
0x148a   :  { %13151 = vrsqrt.f32 %v5193_v21  ;;  %v5192_v5 = vadd.f32 1e-05, %v5186_v25  ;;  %v5182_v9 = vsub.f32 %v5170_v48, %v5176_v59 }
0x148b   :  { %v5189_v42 = vmax.f32 %v5183_v28, 0.0 }
0x148c   :  { %13153 = vrsqrt.f32 %v5192_v5  ;;  %v5188_v40 = vmax.f32 %v5182_v9, 0.0 }
0x148d   :  { %v5195_v31 = vadd.f32 1e-05, %v5189_v42 }
0x148e   :  { %v5194_v23 = vadd.f32 1e-05, %v5188_v40 }
0x148f   :  { %13155 = vrsqrt.f32 %v5195_v31 }
0x1490   :  { %13157 = vrsqrt.f32 %v5194_v23 }
0x1493   :  { %v13148_v46 = vpop.eup %13147 }
0x1494   :  { %5210 = vrot.lane.b32.xlu1 %v13148_v46, %s13501_s0 }
0x1495   :  { %v13150_v3 = vpop.eup %13149 }
0x1496   :  { %5208 = vrot.lane.b32.xlu0 %v13150_v3, %s13501_s0 }
0x1497   :  { %v13152_v49 = vpop.eup %13151 }
0x1499   :  { %v13154_v18 = vpop.eup %13153 }
0x149a   :  { %5214 = vrot.lane.b32.xlu0 %v13152_v49, %s13501_s0  ;;  %5212 = vrot.lane.b32.xlu1 %v13154_v18, %s13501_s0 }
0x149c   :  { %v13156_v39 = vpop.eup %13155 }
0x149d   :  { %v13158_v60 = vpop.eup %13157 }
0x149e   :  { %5218 = vrot.lane.b32.xlu0 %v13156_v39, %s13501_s0  ;;  %5216 = vrot.lane.b32.xlu1 %v13158_v60, %s13501_s0 }
0x1506   :  { %v5211_v13 = vpop.permute.xlu1 %5210 }
0x1507   :  { %v5227_v0 = vmul.f32 %v5211_v13, %v14314_v50 }
0x1508   :  { %v5209_v14 = vpop.permute.xlu0 %5208 }
0x1509   :  { %v5226_v51 = vmul.f32 %v5209_v14, %v14307_v29  ;;  %5240 = vrot.lane.b32.xlu0 %v5227_v0, %s13502_s23 }
0x150b   :  { %5238 = vrot.lane.b32.xlu1 %v5226_v51, %s13502_s23 }
0x150c   :  { %v5215_v63 = vpop.permute.xlu0 %5214  ;;  %v5213_v4 = vpop.permute.xlu1 %5212 }
0x150d   :  { %v5229_v15 = vmul.f32 %v5215_v63, %v14302_v38  ;;  %v5228_v11 = vmul.f32 %v5213_v4, %v14310_v30  ;;  %v5584_v63 = vld [vmem:[#allocation15 + $0x30] sm:$0xff]  ;;  %v5479_v4 = vld [vmem:[#allocation15] sm:$0xff] }
0x150f   :  { %5244 = vrot.lane.b32.xlu0 %v5229_v15, %s13502_s23  ;;  %5242 = vrot.lane.b32.xlu1 %v5228_v11, %s13502_s23 }
0x1510   :  { %v5219_v52 = vpop.permute.xlu0 %5218  ;;  %v5217_v56 = vpop.permute.xlu1 %5216 }
0x1511   :  { %v5231_v45 = vmul.f32 %v5219_v52, %v14299_v10  ;;  %v5230_v53 = vmul.f32 %v5217_v56, %v14304_v24 }
0x1513   :  { %5248 = vrot.lane.b32.xlu0 %v5231_v45, %s13502_s23  ;;  %5246 = vrot.lane.b32.xlu1 %v5230_v53, %s13502_s23 }
0x157b   :  { %v5241_v36 = vpop.permute.xlu0 %5240 }
0x157c   :  { %v5257_v47 = vmul.f32 %v5241_v36, %v14411_v8 }
0x157d   :  { %v5239_v55 = vpop.permute.xlu1 %5238 }
0x157e   :  { %v5256_v22 = vmul.f32 %v5239_v55, %v14415_v34  ;;  %5270 = vrot.lane.b32.xlu0 %v5257_v47, %s13504_s3 }
0x1580   :  { %5268 = vrot.lane.b32.xlu1 %v5256_v22, %s13504_s3 }
0x1581   :  { %v5245_v43 = vpop.permute.xlu0 %5244  ;;  %v5243_v1 = vpop.permute.xlu1 %5242 }
0x1582   :  { %v5259_v26 = vmul.f32 %v5245_v43, %v14417_v61  ;;  %v5258_v59 = vmul.f32 %v5243_v1, %v14419_v62  ;;  %v5365_v61 = vld [vmem:[#allocation13 + $0x8] sm:$0xff]  ;;  %v5487_v62 = vld [vmem:[#allocation13 + $0x18] sm:$0xff] }
0x1583   :  { %12408 = vmatprep.subr.mxu0 %v5365_v61  ;;  %12421 = vmatprep.subr.mxu1 %v5487_v62  ;;  %v5585_v1 = vld [vmem:[#allocation15 + $0x38] sm:$0xff] }
0x1584   :  { %5274 = vrot.lane.b32.xlu0 %v5259_v26, %s13504_s3  ;;  %5272 = vrot.lane.b32.xlu1 %v5258_v59, %s13504_s3  ;;  %v5480_v26 = vld [vmem:[#allocation15 + $0x8] sm:$0xff]  ;;  %v5586_v59 = vld [vmem:[#allocation15 + $0x40] sm:$0xff] }
0x1585   :  { %v5249_v12 = vpop.permute.xlu0 %5248  ;;  %v5247_v7 = vpop.permute.xlu1 %5246  ;;  %12409 = vmatpush3.msra.mxu0 %v5365_v61  ;;  %12422 = vmatpush3.msra.mxu1 %v5487_v62  ;;  %v5482_v61 = vld [vmem:[#allocation15 + $0x18] sm:$0xff]  ;;  %v5588_v62 = vld [vmem:[#allocation15 + $0x50] sm:$0xff] }
0x1586   :  { %v5261_v8 = vmul.f32 %v5249_v12, %v14425_v58  ;;  %v5260_v34 = vmul.f32 %v5247_v7, %v14427_v35  ;;  %12410 = vmatprep.subr.mxu0 %v5364_v41  ;;  %12423 = vmatprep.subr.mxu1 %v5486_v44  ;;  %v5818_v12 = vld [vmem:[#allocation13 + $0x28] sm:$0xff]  ;;  %v5481_v7 = vld [vmem:[#allocation15 + $0x10] sm:$0xff] }
0x1587   :  { %12411 = vmatpush3.msra.mxu0 %v5364_v41  ;;  %12424 = vmatpush3.msra.mxu1 %v5486_v44  ;;  %v5484_v41 = vld [vmem:[#allocation15 + $0x28] sm:$0xff]  ;;  %v6041_v44 = vld [vmem:[#allocation13 + $0x30] sm:$0xff] }
0x1588   :  { %5278 = vrot.lane.b32.xlu0 %v5261_v8, %s13504_s3  ;;  %5276 = vrot.lane.b32.xlu1 %v5260_v34, %s13504_s3  ;;  %v5817_v8 = vld [vmem:[#allocation13 + $0x20] sm:$0xff]  ;;  %v5587_v34 = vld [vmem:[#allocation15 + $0x48] sm:$0xff] }
0x158c   :  { %5297 = vperm.xlu0 %13123, %v5227_v0   ;;  %5293 = vperm.xlu1 %13122, %v5226_v51  }
0x1590   :  { %5301 = vperm.xlu0 %13123, %v5228_v11   ;;  %5305 = vperm.xlu1 %13122, %v5229_v15  }
0x1594   :  { %5309 = vperm.xlu1 %13122, %v5230_v53   ;;  %13125 = vset.pattern.permute.xlu0 %v13505_v20 }
0x1598   :  { %13124 = vset.pattern.permute.xlu1 %v13505_v20 }
0x15f0   :  { %v5271_v2 = vpop.permute.xlu0 %5270 }
0x15f1   :  { %v5287_v58 = vsub.f32 %v14314_v50, %v5271_v2  ;;  %v5483_v2 = vld [vmem:[#allocation15 + $0x20] sm:$0xff] }
0x15f2   :  { %v5269_v35 = vpop.permute.xlu1 %5268 }
0x15f3   :  { %5329 = vperm.xlu1 %13124, %v5287_v58   ;;  %v5286_v54 = vsub.f32 %v14307_v29, %v5269_v35  ;;  %v6042_v58 = vld [vmem:[#allocation13 + $0x38] sm:$0xff]  ;;  %v5589_v35 = vld [vmem:[#allocation15 + $0x58] sm:$0xff] }
0x15f6   :  { %v5275_v21 = vpop.permute.xlu0 %5274  ;;  %v5273_v25 = vpop.permute.xlu1 %5272 }
0x15f7   :  { %v5288_v48 = vsub.f32 %v14310_v30, %v5273_v25  ;;  %5324 = vperm.xlu1 %13124, %v5286_v54   ;;  %v5289_v28 = vsub.f32 %v14302_v38, %v5275_v21  ;;  %v6266_v54 = vld [vmem:[#allocation13 + $0x48] sm:$0xff]  ;;  %v6265_v21 = vld [vmem:[#allocation13 + $0x40] sm:$0xff]  ;;  %v6490_v25 = vld [vmem:[#allocation13 + $0x58] sm:$0xff] }
0x15f9   :  { %5334 = vperm.xlu0 %13125, %v5288_v48   ;;  %v6489_v48 = vld [vmem:[#allocation13 + $0x50] sm:$0xff] }
0x15fa   :  { %v5277_v50 = vpop.permute.xlu1 %5276  ;;  %v5279_v9 = vpop.permute.xlu0 %5278 }
0x15fb   :  { %5339 = vperm.xlu1 %13124, %v5289_v28   ;;  %v5290_v5 = vsub.f32 %v14304_v24, %v5277_v50  ;;  %v5291_v29 = vsub.f32 %v14299_v10, %v5279_v9  ;;  %v6714_v28 = vld [vmem:[#allocation13 + $0x68] sm:$0xff]  ;;  %v6713_v50 = vld [vmem:[#allocation13 + $0x60] sm:$0xff]  ;;  %v6937_v9 = vld [vmem:[#allocation13 + $0x70] sm:$0xff] }
0x15fd   :  { %13126 = vset.pattern.permute.xlu0 %v13503_v17 }
0x15fe   :  { %5313 = vperm.xlu0 %13126, %v5231_v45  }
0x15ff   :  { %5344 = vperm.xlu1 %13124, %v5290_v5   ;;  %v6938_v5 = vld [vmem:[#allocation13 + $0x78] sm:$0xff] }
0x1602   :  { %13127 = vset.pattern.permute.xlu0 %v13500_v37 }
0x1603   :  { %5349 = vperm.xlu1 %13124, %v5291_v29   ;;  %v7162_v29 = vld [vmem:[#allocation13 + $0x88] sm:$0xff] }
0x1607   :  { %13128 = vset.pattern.permute.xlu1 %v13500_v37  ;;  %v5294_v30 = vpop.permute.xlu1 %5293  ;;  %v5298_v38 = vpop.permute.xlu0 %5297 }
0x1608   :  { %v5316_v24 = vmul.f32 %v5294_v30, %v14385_v57  ;;  %v5317_v46 = vmul.f32 %v5298_v38, %v14378_v27  ;;  %v7161_v30 = vld [vmem:[#allocation13 + $0x80] sm:$0xff] }
0x1609   :  { %v14617_v38 = vld [vmem:[#allocation16 + $0x20] sm:$0xff] }
0x160a   :  { %7406 = vperm.xlu1 %13128, %v14617_v38  }
0x160b   :  { %v5306_v42 = vpop.permute.xlu1 %5305  ;;  %v5302_v23 = vpop.permute.xlu0 %5301 }
0x160c   :  { %v5318_v49 = vmul.f32 %v5302_v23, %v14360_v33  ;;  %v5319_v37 = vmul.f32 %v5306_v42, %v14355_v32  ;;  %v5915_v42 = vld [vmem:[#allocation15 + $0x60] sm:$0xff] }
0x160d   :  { %v14625_v23 = vld [vmem:[#allocation16 + $0x10] sm:$0xff] }
0x160f   :  { %v5310_v40 = vpop.permute.xlu1 %5309 }
0x1610   :  { %v5320_v32 = vmul.f32 %v5310_v40, %v14370_v6  ;;  %v14619_v40 = vld [vmem:[#allocation16 + $0x28] sm:$0xff] }
0x1611   :  { %7411 = vperm.xlu0 %13127, %v14619_v40  }
0x1615   :  { %7396 = vperm.xlu0 %13127, %v14625_v23  }
0x166e   :  { %v5330_v31 = vpop.permute.xlu1 %5329 }
0x166f   :  { %v14481_v10 = vadd.f32 %v5330_v31, %v5317_v46  ;;  %v14623_v31 = vld [vmem:[#allocation16 + $0x18] sm:$0xff] }
0x1670   :  { %7401 = vperm.xlu1 %13128, %v14623_v31  }
0x1672   :  { %v5325_v3 = vpop.permute.xlu1 %5324 }
0x1673   :  { %v14479_v18 = vadd.f32 %v5325_v3, %v5316_v24  ;;  %v14631_v24 = vld [vmem:[#allocation16] sm:$0xff] }
0x1674   :  { %v5335_v39 = vpop.permute.xlu0 %5334  ;;  %7386 = vperm.xlu0 %13127, %v14631_v24  }
0x1675   :  { %v14484_v60 = vadd.f32 %v5335_v39, %v5318_v49  ;;  %12412 = vmatprep.mubr.msk.f32.mxu0 %vm4927_vm4, %v14479_v18  ;;  %12425 = vmatprep.mubr.msk.f32.mxu1 %vm4927_vm4, %v14479_v18 }
0x1676   :  { %12413 = vmatmul.mubr.msk.f32.vlgmr.msra.gmra.mxu0 %vm4927_vm4, %v14481_v10  ;;  %12426 = vmatmul.mubr.msk.f32.vlgmr.msra.gmra.mxu1 %vm4927_vm4, %v14481_v10  ;;  %v5340_v33 = vpop.permute.xlu1 %5339 }
0x1677   :  { %v14494_v27 = vadd.f32 %v5340_v33, %v5319_v37  ;;  %12415 = vmatprep.mubr.msk.f32.mxu0 %vm4927_vm4, %v14484_v60  ;;  %12428 = vmatprep.mubr.msk.f32.mxu1 %vm4927_vm4, %v14484_v60 }
0x1678   :  { %13130 = vset.pattern.permute.xlu0 %v13503_v17 }
0x1679   :  { %v5314_v57 = vpop.permute.xlu0 %5313 }
0x167a   :  { %12416 = vmatmul.mubr.msk.f32.gmra.mxu0 %vm4927_vm4, %v14494_v27  ;;  %12429 = vmatmul.mubr.msk.f32.gmra.mxu1 %vm4927_vm4, %v14494_v27  ;;  %v5345_v13 = vpop.permute.xlu1 %5344  ;;  %v5321_v14 = vmul.f32 %v5314_v57, %v14367_v16 }
0x167b   :  { %v14505_v0 = vadd.f32 %v5345_v13, %v5320_v32 }
0x167d   :  { %12418 = vmatprep.mubr.msk.f32.mxu0 %vm4927_vm4, %v14505_v0  ;;  %12431 = vmatprep.mubr.msk.f32.mxu1 %vm4927_vm4, %v14505_v0 }
0x167e   :  { %v5350_v51 = vpop.permute.xlu1 %5349 }
0x167f   :  { %v14512_v6 = vadd.f32 %v5350_v51, %v5321_v14 }
0x1681   :  { %12419 = vmatmul.mubr.msk.f32.gmra.mxu0 %vm4927_vm4, %v14512_v6  ;;  %12432 = vmatmul.mubr.msk.f32.gmra.mxu1 %vm4927_vm4, %v14512_v6 }
0x1682   :  { %12446 = vmatprep.mubr.msk.f32.mxu0 %vm2398_vm3, %v5584_v63  ;;  %12467 = vmatprep.mubr.msk.f32.mxu1 %vm2398_vm3, %v5479_v4 }
0x1736   :  { %v12414_v16 = vpop.f32.mrf.mxu0  ;;  %v12427_v15 = vpop.f32.mrf.mxu1 }
0x1738   :  { %v5450_v11 = vpop.f32.mrf.mxu0  ;;  %v5554_v52 = vpop.f32.mrf.mxu1 }
0x173a   :  { %v12417_v56 = vpop.f32.mrf.mxu0  ;;  %v12430_v45 = vpop.f32.mrf.mxu1 }
0x173c   :  { %v5460_v53 = vpop.f32.mrf.mxu0  ;;  %v5564_v36 = vpop.f32.mrf.mxu1 }
0x1741   :  { %v12420_v47 = vpop.f32.mrf.mxu0  ;;  %v12433_v55 = vpop.f32.mrf.mxu1 }
0x1742   :  { %12434 = vmatprep.subr.mxu0 %v12433_v55  ;;  %12455 = vmatprep.subr.mxu1 %v12420_v47 }
0x1743   :  { %v5470_v22 = vpop.f32.mrf.mxu0  ;;  %v5574_v43 = vpop.f32.mrf.mxu1  ;;  %12435 = vmatpush3.msra.mxu0 %v12433_v55  ;;  %12456 = vmatpush3.msra.mxu1 %v12420_v47 }
0x1744   :  { %12436 = vmatprep.subr.mxu0 %v5574_v43  ;;  %12457 = vmatprep.subr.mxu1 %v5470_v22 }
0x1745   :  { %12437 = vmatpush3.msra.mxu0 %v5574_v43  ;;  %12458 = vmatpush3.msra.mxu1 %v5470_v22  ;;  %v5918_v22 = vld [vmem:[#allocation15 + $0x78] sm:$0xff]  ;;  %v5919_v43 = vld [vmem:[#allocation15 + $0x80] sm:$0xff] }
0x1746   :  { %12438 = vmatprep.subr.mxu0 %v12430_v45  ;;  %12459 = vmatprep.subr.mxu1 %v12417_v56 }
0x1747   :  { %12439 = vmatpush3.msra.mxu0 %v12430_v45  ;;  %12460 = vmatpush3.msra.mxu1 %v12417_v56 }
0x1748   :  { %12440 = vmatprep.subr.mxu0 %v5564_v36  ;;  %12461 = vmatprep.subr.mxu1 %v5460_v53 }
0x1749   :  { %12441 = vmatpush3.msra.mxu0 %v5564_v36  ;;  %12462 = vmatpush3.msra.mxu1 %v5460_v53  ;;  %v5916_v53 = vld [vmem:[#allocation15 + $0x68] sm:$0xff]  ;;  %v5917_v36 = vld [vmem:[#allocation15 + $0x70] sm:$0xff] }
0x174a   :  { %12442 = vmatprep.subr.mxu0 %v12427_v15  ;;  %12463 = vmatprep.subr.mxu1 %v12414_v16 }
0x174b   :  { %12443 = vmatpush3.msra.mxu0 %v12427_v15  ;;  %12464 = vmatpush3.msra.mxu1 %v12414_v16 }
0x174c   :  { %12444 = vmatprep.subr.mxu0 %v5554_v52  ;;  %12465 = vmatprep.subr.mxu1 %v5450_v11 }
0x174d   :  { %12445 = vmatpush3.msra.mxu0 %v5554_v52  ;;  %12466 = vmatpush3.msra.mxu1 %v5450_v11 }
0x174e   :  { %12447 = vmatmul.mubr.msk.f32.vlgmr.msra.gmra.mxu0 %vm2398_vm3, %v5585_v1  ;;  %12468 = vmatmul.mubr.msk.f32.vlgmr.msra.gmra.mxu1 %vm2398_vm3, %v5480_v26 }
0x174f   :  { %12449 = vmatprep.mubr.msk.f32.mxu0 %vm2398_vm3, %v5586_v59  ;;  %12476 = vmatprep.subr.mxu0 %v5818_v12  ;;  %v5920_v59 = vld [vmem:[#allocation15 + $0x88] sm:$0xff] }
0x1750   :  { %12477 = vmatpush3.msra.mxu0 %v5818_v12  ;;  %12470 = vmatprep.mubr.msk.f32.mxu1 %vm2398_vm3, %v5481_v7  ;;  %v6139_v12 = vld [vmem:[#allocation15 + $0x90] sm:$0xff] }
0x1751   :  { %12478 = vmatprep.subr.mxu0 %v5817_v8 }
0x1752   :  { %12450 = vmatmul.mubr.msk.f32.gmra.mxu0 %vm2398_vm3, %v5587_v34  ;;  %12471 = vmatmul.mubr.msk.f32.gmra.mxu1 %vm2398_vm3, %v5482_v61  ;;  %v6140_v34 = vld [vmem:[#allocation15 + $0x98] sm:$0xff]  ;;  %v6141_v61 = vld [vmem:[#allocation15 + $0xa0] sm:$0xff] }
0x1753   :  { %12452 = vmatprep.mubr.msk.f32.mxu0 %vm2398_vm3, %v5588_v62  ;;  %12479 = vmatpush3.msra.mxu0 %v5817_v8 }
0x1754   :  { %12473 = vmatprep.mubr.msk.f32.mxu1 %vm2398_vm3, %v5483_v2  ;;  %12510 = vmatprep.subr.mxu0 %v6042_v58 }
0x1756   :  { %12453 = vmatmul.mubr.msk.f32.gmra.mxu0 %vm2398_vm3, %v5589_v35  ;;  %12474 = vmatmul.mubr.msk.f32.gmra.mxu1 %vm2398_vm3, %v5484_v41  ;;  %v6143_v35 = vld [vmem:[#allocation15 + $0xb0] sm:$0xff] }
0x1757   :  { %12480 = vmatprep.mubr.msk.f32.mxu0 %vm4927_vm4, %v14479_v18  ;;  %12501 = vmatprep.mubr.msk.f32.mxu1 %vm2398_vm3, %v5915_v42 }
0x175a   :  { %12481 = vmatmul.mubr.msk.f32.vlgmr.msra.gmra.mxu0 %vm4927_vm4, %v14481_v10 }
0x175b   :  { %12483 = vmatprep.mubr.msk.f32.mxu0 %vm4927_vm4, %v14484_v60  ;;  %12511 = vmatpush3.msra.mxu0 %v6042_v58  ;;  %v6142_v58 = vld [vmem:[#allocation15 + $0xa8] sm:$0xff] }
0x175c   :  { %12512 = vmatprep.subr.mxu0 %v6041_v44 }
0x175d   :  { %12513 = vmatpush3.msra.mxu0 %v6041_v44 }
0x175e   :  { %12484 = vmatmul.mubr.msk.f32.gmra.mxu0 %vm4927_vm4, %v14494_v27  ;;  %12544 = vmatprep.subr.mxu0 %v6266_v54 }
0x175f   :  { %12486 = vmatprep.mubr.msk.f32.mxu0 %vm4927_vm4, %v14505_v0 }
0x1762   :  { %12487 = vmatmul.mubr.msk.f32.gmra.mxu0 %vm4927_vm4, %v14512_v6 }
0x1763   :  { %12514 = vmatprep.mubr.msk.f32.mxu0 %vm4927_vm4, %v14479_v18 }
0x1766   :  { %12515 = vmatmul.mubr.msk.f32.vlgmr.msra.gmra.mxu0 %vm4927_vm4, %v14481_v10 }
0x1767   :  { %12517 = vmatprep.mubr.msk.f32.mxu0 %vm4927_vm4, %v14484_v60  ;;  %12545 = vmatpush3.msra.mxu0 %v6266_v54  ;;  %v6144_v54 = vld [vmem:[#allocation15 + $0xb8] sm:$0xff] }
0x1768   :  { %12546 = vmatprep.subr.mxu0 %v6265_v21 }
0x1769   :  { %12547 = vmatpush3.msra.mxu0 %v6265_v21  ;;  %v6363_v21 = vld [vmem:[#allocation15 + $0xc0] sm:$0xff] }
0x176a   :  { %12518 = vmatmul.mubr.msk.f32.gmra.mxu0 %vm4927_vm4, %v14494_v27  ;;  %12578 = vmatprep.subr.mxu0 %v6490_v25 }
0x176b   :  { %12520 = vmatprep.mubr.msk.f32.mxu0 %vm4927_vm4, %v14505_v0 }
0x176e   :  { %12521 = vmatmul.mubr.msk.f32.gmra.mxu0 %vm4927_vm4, %v14512_v6 }
0x176f   :  { %12548 = vmatprep.mubr.msk.f32.mxu0 %vm4927_vm4, %v14479_v18 }
0x1772   :  { %12549 = vmatmul.mubr.msk.f32.vlgmr.msra.gmra.mxu0 %vm4927_vm4, %v14481_v10 }
0x1773   :  { %12551 = vmatprep.mubr.msk.f32.mxu0 %vm4927_vm4, %v14484_v60  ;;  %12579 = vmatpush3.msra.mxu0 %v6490_v25 }
0x1774   :  { %12580 = vmatprep.subr.mxu0 %v6489_v48 }
0x1775   :  { %12581 = vmatpush3.msra.mxu0 %v6489_v48 }
0x1776   :  { %12552 = vmatmul.mubr.msk.f32.gmra.mxu0 %vm4927_vm4, %v14494_v27  ;;  %12612 = vmatprep.subr.mxu0 %v6714_v28 }
0x1777   :  { %12554 = vmatprep.mubr.msk.f32.mxu0 %vm4927_vm4, %v14505_v0 }
0x177a   :  { %12555 = vmatmul.mubr.msk.f32.gmra.mxu0 %vm4927_vm4, %v14512_v6 }
0x177b   :  { %12582 = vmatprep.mubr.msk.f32.mxu0 %vm4927_vm4, %v14479_v18 }
0x177e   :  { %12583 = vmatmul.mubr.msk.f32.vlgmr.msra.gmra.mxu0 %vm4927_vm4, %v14481_v10 }
0x177f   :  { %12585 = vmatprep.mubr.msk.f32.mxu0 %vm4927_vm4, %v14484_v60  ;;  %12613 = vmatpush3.msra.mxu0 %v6714_v28  ;;  %v6364_v28 = vld [vmem:[#allocation15 + $0xc8] sm:$0xff] }
0x1780   :  { %12614 = vmatprep.subr.mxu0 %v6713_v50 }
0x1781   :  { %12615 = vmatpush3.msra.mxu0 %v6713_v50  ;;  %v6365_v50 = vld [vmem:[#allocation15 + $0xd0] sm:$0xff] }
0x1782   :  { %12586 = vmatmul.mubr.msk.f32.gmra.mxu0 %vm4927_vm4, %v14494_v27  ;;  %12646 = vmatprep.subr.mxu0 %v6938_v5 }
0x1783   :  { %12588 = vmatprep.mubr.msk.f32.mxu0 %vm4927_vm4, %v14505_v0 }
0x1786   :  { %12589 = vmatmul.mubr.msk.f32.gmra.mxu0 %vm4927_vm4, %v14512_v6 }
0x1787   :  { %12616 = vmatprep.mubr.msk.f32.mxu0 %vm4927_vm4, %v14479_v18 }
0x178a   :  { %12617 = vmatmul.mubr.msk.f32.vlgmr.msra.gmra.mxu0 %vm4927_vm4, %v14481_v10 }
0x178b   :  { %12619 = vmatprep.mubr.msk.f32.mxu0 %vm4927_vm4, %v14484_v60  ;;  %12647 = vmatpush3.msra.mxu0 %v6938_v5 }
0x178c   :  { %12648 = vmatprep.subr.mxu0 %v6937_v9 }
0x178d   :  { %12649 = vmatpush3.msra.mxu0 %v6937_v9 }
0x178e   :  { %12620 = vmatmul.mubr.msk.f32.gmra.mxu0 %vm4927_vm4, %v14494_v27  ;;  %12680 = vmatprep.subr.mxu0 %v7162_v29 }
0x178f   :  { %12622 = vmatprep.mubr.msk.f32.mxu0 %vm4927_vm4, %v14505_v0 }
0x1792   :  { %12623 = vmatmul.mubr.msk.f32.gmra.mxu0 %vm4927_vm4, %v14512_v6 }
0x1793   :  { %12650 = vmatprep.mubr.msk.f32.mxu0 %vm4927_vm4, %v14479_v18 }
0x1796   :  { %12651 = vmatmul.mubr.msk.f32.vlgmr.msra.gmra.mxu0 %vm4927_vm4, %v14481_v10 }
0x1797   :  { %12653 = vmatprep.mubr.msk.f32.mxu0 %vm4927_vm4, %v14484_v60  ;;  %12681 = vmatpush3.msra.mxu0 %v7162_v29  ;;  %v6366_v29 = vld [vmem:[#allocation15 + $0xd8] sm:$0xff] }
0x1798   :  { %12682 = vmatprep.subr.mxu0 %v7161_v30 }
0x1799   :  { %12683 = vmatpush3.msra.mxu0 %v7161_v30  ;;  %v6367_v30 = vld [vmem:[#allocation15 + $0xe0] sm:$0xff] }
0x179a   :  { %12654 = vmatmul.mubr.msk.f32.gmra.mxu0 %vm4927_vm4, %v14494_v27 }
0x179b   :  { %12656 = vmatprep.mubr.msk.f32.mxu0 %vm4927_vm4, %v14505_v0 }
0x179e   :  { %12657 = vmatmul.mubr.msk.f32.gmra.mxu0 %vm4927_vm4, %v14512_v6 }
0x179f   :  { %12684 = vmatprep.mubr.msk.f32.mxu0 %vm4927_vm4, %v14479_v18 }
0x17a2   :  { %12685 = vmatmul.mubr.msk.f32.vlgmr.msra.gmra.mxu0 %vm4927_vm4, %v14481_v10 }
0x17a3   :  { %12687 = vmatprep.mubr.msk.f32.mxu0 %vm4927_vm4, %v14484_v60 }
0x17a6   :  { %12688 = vmatmul.mubr.msk.f32.gmra.mxu0 %vm4927_vm4, %v14494_v27 }
0x17a7   :  { %12690 = vmatprep.mubr.msk.f32.mxu0 %vm4927_vm4, %v14505_v0 }
0x17aa   :  { %12691 = vmatmul.mubr.msk.f32.gmra.mxu0 %vm4927_vm4, %v14512_v6 }
0x17ab   :  { %12726 = vmatprep.mubr.msk.f32.mxu0 %vm2398_vm3, %v14294_v19  ;;  %v14629_v19 = vld [vmem:[#allocation16 + $0x8] sm:$0xff] }
0x17ac   :  { %7391 = vperm.xlu1 %13128, %v14629_v19  }
0x17b0   :  { %13129 = vset.pattern.permute.xlu1 %v13503_v17 }
0x180e   :  { %v12448_v46 = vpop.f32.mrf.mxu0  ;;  %v12469_v3 = vpop.f32.mrf.mxu1 }
0x180f   :  { %v14637_v49 = vadd.f32 %v12469_v3, %v12448_v46  ;;  %v6368_v3 = vld [vmem:[#allocation15 + $0xe8] sm:$0xff] }
0x1810   :  { %v14639_v18 = vpop.f32.mrf.mxu0  ;;  %v14641_v10 = vpop.f32.mrf.mxu1 }
0x1812   :  { %v12451_v39 = vpop.f32.mrf.mxu0  ;;  %v12472_v37 = vpop.f32.mrf.mxu1 }
0x1813   :  { %v14643_v60 = vadd.f32 %v12472_v37, %v12451_v39  ;;  %v6587_v39 = vld [vmem:[#allocation15 + $0xf0] sm:$0xff] }
0x1814   :  { %v5684_v33 = vpop.f32.mrf.mxu0  ;;  %v5797_v27 = vpop.f32.mrf.mxu1 }
0x1815   :  { %v14645_v32 = vadd.f32 %v5797_v27, %v5684_v33  ;;  %v6588_v27 = vld [vmem:[#allocation15 + $0xf8] sm:$0xff] }
0x1816   :  { %v12454_v57 = vpop.f32.mrf.mxu0  ;;  %v12475_v13 = vpop.f32.mrf.mxu1 }
0x1817   :  { %v14647_v0 = vadd.f32 %v12475_v13, %v12454_v57  ;;  %v6589_v57 = vld [vmem:[#allocation15 + $0x100] sm:$0xff] }
0x1818   :  { %v14649_v14 = vpop.f32.mrf.mxu0 }
0x181a   :  { %v12482_v51 = vpop.f32.mrf.mxu0 }
0x181c   :  { %v5885_v6 = vpop.f32.mrf.mxu0 }
0x181e   :  { %v12485_v63 = vpop.f32.mrf.mxu0 }
0x1820   :  { %v5895_v4 = vpop.f32.mrf.mxu0 }
0x1822   :  { %v12488_v16 = vpop.f32.mrf.mxu0 }
0x1823   :  { %12489 = vmatprep.subr.mxu1 %v12488_v16 }
0x1824   :  { %v5905_v15 = vpop.f32.mrf.mxu0  ;;  %12490 = vmatpush3.msra.mxu1 %v12488_v16 }
0x1825   :  { %12491 = vmatprep.subr.mxu1 %v5905_v15 }
0x1826   :  { %12492 = vmatpush3.msra.mxu1 %v5905_v15  ;;  %v12516_v11 = vpop.f32.mrf.mxu0  ;;  %v6592_v15 = vld [vmem:[#allocation15 + $0x118] sm:$0xff] }
0x1827   :  { %12493 = vmatprep.subr.mxu1 %v12485_v63 }
0x1828   :  { %12494 = vmatpush3.msra.mxu1 %v12485_v63  ;;  %v6109_v52 = vpop.f32.mrf.mxu0  ;;  %v6591_v63 = vld [vmem:[#allocation15 + $0x110] sm:$0xff] }
0x1829   :  { %12495 = vmatprep.subr.mxu1 %v5895_v4 }
0x182a   :  { %12496 = vmatpush3.msra.mxu1 %v5895_v4  ;;  %v12519_v56 = vpop.f32.mrf.mxu0 }
0x182b   :  { %12497 = vmatprep.subr.mxu1 %v12482_v51 }
0x182c   :  { %12498 = vmatpush3.msra.mxu1 %v12482_v51  ;;  %v6119_v45 = vpop.f32.mrf.mxu0 }
0x182d   :  { %12499 = vmatprep.subr.mxu1 %v5885_v6 }
0x182e   :  { %12500 = vmatpush3.msra.mxu1 %v5885_v6  ;;  %v12522_v47 = vpop.f32.mrf.mxu0  ;;  %v6590_v6 = vld [vmem:[#allocation15 + $0x108] sm:$0xff] }
0x182f   :  { %12502 = vmatmul.mubr.msk.f32.vlgmr.msra.gmra.mxu1 %vm2398_vm3, %v5916_v53  ;;  %12523 = vmatprep.subr.mxu1 %v12522_v47  ;;  %v6813_v53 = vld [vmem:[#allocation15 + $0x130] sm:$0xff] }
0x1830   :  { %v6129_v55 = vpop.f32.mrf.mxu0  ;;  %12524 = vmatpush3.msra.mxu1 %v12522_v47  ;;  %12504 = vmatprep.mubr.msk.f32.mxu1 %vm2398_vm3, %v5917_v36 }
0x1831   :  { %12525 = vmatprep.subr.mxu1 %v6129_v55 }
0x1832   :  { %12526 = vmatpush3.msra.mxu1 %v6129_v55  ;;  %v12550_v1 = vpop.f32.mrf.mxu0  ;;  %v6814_v55 = vld [vmem:[#allocation15 + $0x138] sm:$0xff] }
0x1833   :  { %12505 = vmatmul.mubr.msk.f32.gmra.mxu1 %vm2398_vm3, %v5918_v22  ;;  %12527 = vmatprep.subr.mxu1 %v12519_v56  ;;  %v6815_v22 = vld [vmem:[#allocation15 + $0x140] sm:$0xff] }
0x1834   :  { %12528 = vmatpush3.msra.mxu1 %v12519_v56  ;;  %v6333_v26 = vpop.f32.mrf.mxu0  ;;  %12507 = vmatprep.mubr.msk.f32.mxu1 %vm2398_vm3, %v5919_v43 }
0x1835   :  { %12529 = vmatprep.subr.mxu1 %v6119_v45 }
0x1836   :  { %12530 = vmatpush3.msra.mxu1 %v6119_v45  ;;  %v12553_v7 = vpop.f32.mrf.mxu0  ;;  %v6812_v45 = vld [vmem:[#allocation15 + $0x128] sm:$0xff] }
0x1837   :  { %12508 = vmatmul.mubr.msk.f32.gmra.mxu1 %vm2398_vm3, %v5920_v59  ;;  %12531 = vmatprep.subr.mxu1 %v12516_v11  ;;  %v7035_v59 = vld [vmem:[#allocation15 + $0x150] sm:$0xff] }
0x1838   :  { %12532 = vmatpush3.msra.mxu1 %v12516_v11  ;;  %v6343_v8 = vpop.f32.mrf.mxu0  ;;  %12535 = vmatprep.mubr.msk.f32.mxu1 %vm2398_vm3, %v6139_v12  ;;  %v6811_v11 = vld [vmem:[#allocation15 + $0x120] sm:$0xff] }
0x1839   :  { %12533 = vmatprep.subr.mxu1 %v6109_v52 }
0x183a   :  { %12534 = vmatpush3.msra.mxu1 %v6109_v52  ;;  %v12556_v62 = vpop.f32.mrf.mxu0 }
0x183b   :  { %12536 = vmatmul.mubr.msk.f32.vlgmr.msra.gmra.mxu1 %vm2398_vm3, %v6140_v34  ;;  %12557 = vmatprep.subr.mxu1 %v12556_v62  ;;  %v7037_v34 = vld [vmem:[#allocation15 + $0x160] sm:$0xff] }
0x183c   :  { %v6353_v2 = vpop.f32.mrf.mxu0  ;;  %12558 = vmatpush3.msra.mxu1 %v12556_v62  ;;  %12538 = vmatprep.mubr.msk.f32.mxu1 %vm2398_vm3, %v6141_v61 }
0x183d   :  { %12559 = vmatprep.subr.mxu1 %v6353_v2 }
0x183e   :  { %12560 = vmatpush3.msra.mxu1 %v6353_v2  ;;  %v12584_v41 = vpop.f32.mrf.mxu0  ;;  %v7038_v2 = vld [vmem:[#allocation15 + $0x168] sm:$0xff] }
0x183f   :  { %12539 = vmatmul.mubr.msk.f32.gmra.mxu1 %vm2398_vm3, %v6142_v58  ;;  %12561 = vmatprep.subr.mxu1 %v12553_v7  ;;  %v7039_v58 = vld [vmem:[#allocation15 + $0x170] sm:$0xff] }
0x1840   :  { %12562 = vmatpush3.msra.mxu1 %v12553_v7  ;;  %v6557_v44 = vpop.f32.mrf.mxu0  ;;  %12541 = vmatprep.mubr.msk.f32.mxu1 %vm2398_vm3, %v6143_v35  ;;  %v7040_v35 = vld [vmem:[#allocation15 + $0x178] sm:$0xff] }
0x1841   :  { %12563 = vmatprep.subr.mxu1 %v6343_v8 }
0x1842   :  { %12564 = vmatpush3.msra.mxu1 %v6343_v8  ;;  %v12587_v25 = vpop.f32.mrf.mxu0  ;;  %v7036_v8 = vld [vmem:[#allocation15 + $0x158] sm:$0xff] }
0x1843   :  { %12542 = vmatmul.mubr.msk.f32.gmra.mxu1 %vm2398_vm3, %v6144_v54  ;;  %12565 = vmatprep.subr.mxu1 %v12550_v1  ;;  %v7261_v54 = vld [vmem:[#allocation15 + $0x190] sm:$0xff] }
0x1844   :  { %12566 = vmatpush3.msra.mxu1 %v12550_v1  ;;  %v6567_v48 = vpop.f32.mrf.mxu0  ;;  %12569 = vmatprep.mubr.msk.f32.mxu1 %vm2398_vm3, %v6363_v21  ;;  %v7262_v21 = vld [vmem:[#allocation15 + $0x198] sm:$0xff] }
0x1845   :  { %12567 = vmatprep.subr.mxu1 %v6333_v26 }
0x1846   :  { %12568 = vmatpush3.msra.mxu1 %v6333_v26  ;;  %v12590_v5 = vpop.f32.mrf.mxu0  ;;  %v6816_v26 = vld [vmem:[#allocation15 + $0x148] sm:$0xff] }
0x1847   :  { %12570 = vmatmul.mubr.msk.f32.vlgmr.msra.gmra.mxu1 %vm2398_vm3, %v6364_v28  ;;  %12591 = vmatprep.subr.mxu1 %v12590_v5  ;;  %v14692_v28 = vld [vmem:[#allocation2] sm:$0xff] }
0x1848   :  { %v6577_v9 = vpop.f32.mrf.mxu0  ;;  %12592 = vmatpush3.msra.mxu1 %v12590_v5  ;;  %12572 = vmatprep.mubr.msk.f32.mxu1 %vm2398_vm3, %v6365_v50  ;;  %v5807_v50 = vpop.f32.mrf.mxu1 }
0x1849   :  { %12593 = vmatprep.subr.mxu1 %v6577_v9 }
0x184a   :  { %12594 = vmatpush3.msra.mxu1 %v6577_v9  ;;  %v12618_v42 = vpop.f32.mrf.mxu0 }
0x184b   :  { %12573 = vmatmul.mubr.msk.f32.gmra.mxu1 %vm2398_vm3, %v6366_v29  ;;  %12595 = vmatprep.subr.mxu1 %v12587_v25 }
0x184c   :  { %12596 = vmatpush3.msra.mxu1 %v12587_v25  ;;  %v6781_v46 = vpop.f32.mrf.mxu0  ;;  %12575 = vmatprep.mubr.msk.f32.mxu1 %vm2398_vm3, %v6367_v30  ;;  %v7263_v25 = vld [vmem:[#allocation15 + $0x1a0] sm:$0xff] }
0x184d   :  { %12597 = vmatprep.subr.mxu1 %v6567_v48 }
0x184e   :  { %12598 = vmatpush3.msra.mxu1 %v6567_v48  ;;  %v12621_v37 = vpop.f32.mrf.mxu0  ;;  %v7264_v48 = vld [vmem:[#allocation15 + $0x1a8] sm:$0xff] }
0x184f   :  { %12576 = vmatmul.mubr.msk.f32.gmra.mxu1 %vm2398_vm3, %v6368_v3  ;;  %12599 = vmatprep.subr.mxu1 %v12584_v41 }
0x1850   :  { %12600 = vmatpush3.msra.mxu1 %v12584_v41  ;;  %v6791_v33 = vpop.f32.mrf.mxu0  ;;  %12603 = vmatprep.mubr.msk.f32.mxu1 %vm2398_vm3, %v6587_v39  ;;  %v7259_v41 = vld [vmem:[#allocation15 + $0x180] sm:$0xff] }
0x1851   :  { %12601 = vmatprep.subr.mxu1 %v6557_v44 }
0x1852   :  { %12602 = vmatpush3.msra.mxu1 %v6557_v44  ;;  %v12624_v13 = vpop.f32.mrf.mxu0  ;;  %v7260_v44 = vld [vmem:[#allocation15 + $0x188] sm:$0xff] }
0x1853   :  { %12604 = vmatmul.mubr.msk.f32.vlgmr.msra.gmra.mxu1 %vm2398_vm3, %v6588_v27  ;;  %12625 = vmatprep.subr.mxu1 %v12624_v13 }
0x1854   :  { %v6801_v51 = vpop.f32.mrf.mxu0  ;;  %12626 = vmatpush3.msra.mxu1 %v12624_v13  ;;  %12606 = vmatprep.mubr.msk.f32.mxu1 %vm2398_vm3, %v6589_v57 }
0x1855   :  { %12627 = vmatprep.subr.mxu1 %v6801_v51 }
0x1856   :  { %12628 = vmatpush3.msra.mxu1 %v6801_v51  ;;  %v12652_v4 = vpop.f32.mrf.mxu0 }
0x1857   :  { %12607 = vmatmul.mubr.msk.f32.gmra.mxu1 %vm2398_vm3, %v6590_v6  ;;  %12629 = vmatprep.subr.mxu1 %v12621_v37 }
0x1858   :  { %12630 = vmatpush3.msra.mxu1 %v12621_v37  ;;  %v7005_v16 = vpop.f32.mrf.mxu0  ;;  %12609 = vmatprep.mubr.msk.f32.mxu1 %vm2398_vm3, %v6591_v63  ;;  %v5788_v37 = vadd.f32 %v14641_v10, %v14639_v18 }
0x1859   :  { %12631 = vmatprep.subr.mxu1 %v6791_v33 }
0x185a   :  { %12632 = vmatpush3.msra.mxu1 %v6791_v33  ;;  %v12655_v52 = vpop.f32.mrf.mxu0 }
0x185b   :  { %12610 = vmatmul.mubr.msk.f32.gmra.mxu1 %vm2398_vm3, %v6592_v15  ;;  %12633 = vmatprep.subr.mxu1 %v12618_v42 }
0x185c   :  { %12634 = vmatpush3.msra.mxu1 %v12618_v42  ;;  %v7015_v56 = vpop.f32.mrf.mxu0  ;;  %12637 = vmatprep.mubr.msk.f32.mxu1 %vm2398_vm3, %v6811_v11 }
0x185d   :  { %12635 = vmatprep.subr.mxu1 %v6781_v46 }
0x185e   :  { %12636 = vmatpush3.msra.mxu1 %v6781_v46  ;;  %v12658_v36 = vpop.f32.mrf.mxu0 }
0x185f   :  { %12638 = vmatmul.mubr.msk.f32.vlgmr.msra.gmra.mxu1 %vm2398_vm3, %v6812_v45  ;;  %12659 = vmatprep.subr.mxu1 %v12658_v36 }
0x1860   :  { %v7025_v47 = vpop.f32.mrf.mxu0  ;;  %12660 = vmatpush3.msra.mxu1 %v12658_v36  ;;  %12640 = vmatprep.mubr.msk.f32.mxu1 %vm2398_vm3, %v6813_v53 }
0x1861   :  { %12661 = vmatprep.subr.mxu1 %v7025_v47 }
0x1862   :  { %12662 = vmatpush3.msra.mxu1 %v7025_v47  ;;  %v12686_v43 = vpop.f32.mrf.mxu0 }
0x1863   :  { %12641 = vmatmul.mubr.msk.f32.gmra.mxu1 %vm2398_vm3, %v6814_v55  ;;  %12663 = vmatprep.subr.mxu1 %v12655_v52 }
0x1864   :  { %12664 = vmatpush3.msra.mxu1 %v12655_v52  ;;  %v7229_v1 = vpop.f32.mrf.mxu0  ;;  %12643 = vmatprep.mubr.msk.f32.mxu1 %vm2398_vm3, %v6815_v22 }
0x1865   :  { %12665 = vmatprep.subr.mxu1 %v7015_v56 }
0x1866   :  { %12666 = vmatpush3.msra.mxu1 %v7015_v56  ;;  %v12689_v12 = vpop.f32.mrf.mxu0 }
0x1867   :  { %12644 = vmatmul.mubr.msk.f32.gmra.mxu1 %vm2398_vm3, %v6816_v26  ;;  %12667 = vmatprep.subr.mxu1 %v12652_v4 }
0x1868   :  { %12668 = vmatpush3.msra.mxu1 %v12652_v4  ;;  %v7239_v7 = vpop.f32.mrf.mxu0  ;;  %12671 = vmatprep.mubr.msk.f32.mxu1 %vm2398_vm3, %v7035_v59 }
0x1869   :  { %12669 = vmatprep.subr.mxu1 %v7005_v16 }
0x186a   :  { %12670 = vmatpush3.msra.mxu1 %v7005_v16  ;;  %v12692_v61 = vpop.f32.mrf.mxu0 }
0x186b   :  { %12672 = vmatmul.mubr.msk.f32.vlgmr.msra.gmra.mxu1 %vm2398_vm3, %v7036_v8  ;;  %12693 = vmatprep.subr.mxu1 %v12692_v61 }
0x186c   :  { %v7249_v62 = vpop.f32.mrf.mxu0  ;;  %12694 = vmatpush3.msra.mxu1 %v12692_v61  ;;  %12674 = vmatprep.mubr.msk.f32.mxu1 %vm2398_vm3, %v7037_v34 }
0x186d   :  { %12695 = vmatprep.subr.mxu1 %v7249_v62 }
0x186e   :  { %12696 = vmatpush3.msra.mxu1 %v7249_v62 }
0x186f   :  { %12675 = vmatmul.mubr.msk.f32.gmra.mxu1 %vm2398_vm3, %v7038_v2  ;;  %12697 = vmatprep.subr.mxu1 %v12689_v12 }
0x1870   :  { %12698 = vmatpush3.msra.mxu1 %v12689_v12  ;;  %12677 = vmatprep.mubr.msk.f32.mxu1 %vm2398_vm3, %v7039_v58 }
0x1871   :  { %12699 = vmatprep.subr.mxu1 %v7239_v7 }
0x1872   :  { %12700 = vmatpush3.msra.mxu1 %v7239_v7 }
0x1873   :  { %12678 = vmatmul.mubr.msk.f32.gmra.mxu1 %vm2398_vm3, %v7040_v35  ;;  %12701 = vmatprep.subr.mxu1 %v12686_v43  ;;  %v5808_v35 = vadd.f32 %v5807_v50, %v14649_v14 }
0x1874   :  { %12702 = vmatpush3.msra.mxu1 %v12686_v43  ;;  %12705 = vmatprep.mubr.msk.f32.mxu1 %vm2398_vm3, %v7259_v41 }
0x1875   :  { %12703 = vmatprep.subr.mxu1 %v7229_v1 }
0x1876   :  { %12704 = vmatpush3.msra.mxu1 %v7229_v1 }
0x1877   :  { %12706 = vmatmul.mubr.msk.f32.vlgmr.msra.gmra.mxu1 %vm2398_vm3, %v7260_v44 }
0x1878   :  { %12708 = vmatprep.mubr.msk.f32.mxu1 %vm2398_vm3, %v7261_v54 }
0x187b   :  { %12709 = vmatmul.mubr.msk.f32.gmra.mxu1 %vm2398_vm3, %v7262_v21 }
0x187c   :  { %12711 = vmatprep.mubr.msk.f32.mxu1 %vm2398_vm3, %v7263_v25 }
0x187f   :  { %12712 = vmatmul.mubr.msk.f32.gmra.mxu1 %vm2398_vm3, %v7264_v48 }
0x1880   :  { %12747 = vmatprep.mubr.msk.f32.mxu1 %vm2398_vm3, %v14692_v28 }
0x18ef   :  { %v12503_v5 = vpop.f32.mrf.mxu1 }
0x18f0   :  { %v6035_v9 = vadd.f32 %v12503_v5, %v14637_v49 }
0x18f1   :  { %v6005_v29 = vpop.f32.mrf.mxu1 }
0x18f2   :  { %v6034_v27 = vadd.f32 %v6005_v29, %v5788_v37 }
0x18f3   :  { %v12506_v30 = vpop.f32.mrf.mxu1 }
0x18f4   :  { %v6037_v34 = vadd.f32 %v12506_v30, %v14643_v60 }
0x18f5   :  { %v6015_v42 = vpop.f32.mrf.mxu1 }
0x18f6   :  { %v6036_v62 = vadd.f32 %v6015_v42, %v14645_v32 }
0x18f7   :  { %v12509_v46 = vpop.f32.mrf.mxu1 }
0x18f8   :  { %v6039_v3 = vadd.f32 %v12509_v46, %v14647_v0 }
0x18f9   :  { %v6025_v39 = vpop.f32.mrf.mxu1 }
0x18fa   :  { %v6038_v21 = vadd.f32 %v6025_v39, %v5808_v35 }
0x18fb   :  { %v12537_v33 = vpop.f32.mrf.mxu1 }
0x18fc   :  { %v6259_v57 = vadd.f32 %v12537_v33, %v6035_v9  ;;  %v7407_v9 = vpop.permute.xlu1 %7406 }
0x18fd   :  { %v6229_v13 = vpop.f32.mrf.mxu1 }
0x18fe   :  { %v6258_v51 = vadd.f32 %v6229_v13, %v6034_v27  ;;  %v7412_v27 = vpop.permute.xlu0 %7411 }
0x18ff   :  { %v12540_v6 = vpop.f32.mrf.mxu1 }
0x1900   :  { %v6261_v2 = vadd.f32 %v12540_v6, %v6037_v34  ;;  %v7402_v34 = vpop.permute.xlu1 %7401 }
0x1901   :  { %v6239_v63 = vpop.f32.mrf.mxu1 }
0x1902   :  { %v6260_v41 = vadd.f32 %v6239_v63, %v6036_v62 }
0x1903   :  { %v12543_v4 = vpop.f32.mrf.mxu1 }
0x1904   :  { %v6263_v25 = vadd.f32 %v12543_v4, %v6039_v3 }
0x1905   :  { %v6249_v16 = vpop.f32.mrf.mxu1 }
0x1906   :  { %v6262_v46 = vadd.f32 %v6249_v16, %v6038_v21 }
0x1907   :  { %v12571_v49 = vpop.f32.mrf.mxu1 }
0x1908   :  { %v6483_v30 = vadd.f32 %v12571_v49, %v6259_v57 }
0x1909   :  { %v6453_v15 = vpop.f32.mrf.mxu1 }
0x190b   :  { %v12574_v11 = vpop.f32.mrf.mxu1 }
0x190c   :  { %v6485_v44 = vadd.f32 %v12574_v11, %v6261_v2 }
0x190d   :  { %v6463_v52 = vpop.f32.mrf.mxu1 }
0x190e   :  { %v6484_v48 = vadd.f32 %v6463_v52, %v6260_v41  ;;  %v6482_v52 = vadd.f32 %v6453_v15, %v6258_v51 }
0x190f   :  { %v12577_v56 = vpop.f32.mrf.mxu1 }
0x1910   :  { %v6487_v37 = vadd.f32 %v12577_v56, %v6263_v25 }
0x1911   :  { %v6473_v45 = vpop.f32.mrf.mxu1 }
0x1912   :  { %v6486_v42 = vadd.f32 %v6473_v45, %v6262_v46  ;;  %v7397_v45 = vpop.permute.xlu0 %7396 }
0x1913   :  { %v12605_v0 = vpop.f32.mrf.mxu1 }
0x1914   :  { %v6707_v50 = vadd.f32 %v12605_v0, %v6483_v30 }
0x1915   :  { %v6677_v53 = vpop.f32.mrf.mxu1 }
0x1916   :  { %v6706_v49 = vadd.f32 %v6677_v53, %v6482_v52  ;;  %v7392_v53 = vpop.permute.xlu1 %7391 }
0x1917   :  { %v12608_v36 = vpop.f32.mrf.mxu1 }
0x1918   :  { %v6709_v5 = vadd.f32 %v12608_v36, %v6485_v44 }
0x1919   :  { %v6687_v47 = vpop.f32.mrf.mxu1 }
0x191a   :  { %v6708_v33 = vadd.f32 %v6687_v47, %v6484_v48  ;;  %v7387_v48 = vpop.permute.xlu0 %7386 }
0x191b   :  { %v12611_v18 = vpop.f32.mrf.mxu1 }
0x191c   :  { %v6711_v13 = vadd.f32 %v12611_v18, %v6487_v37 }
0x191d   :  { %v6697_v10 = vpop.f32.mrf.mxu1 }
0x191e   :  { %v6710_v11 = vadd.f32 %v6697_v10, %v6486_v42 }
0x191f   :  { %v12639_v55 = vpop.f32.mrf.mxu1 }
0x1920   :  { %v6931_v36 = vadd.f32 %v12639_v55, %v6707_v50 }
0x1921   :  { %v6901_v22 = vpop.f32.mrf.mxu1 }
0x1923   :  { %v12642_v43 = vpop.f32.mrf.mxu1 }
0x1924   :  { %v6933_v60 = vadd.f32 %v12642_v43, %v6709_v5 }
0x1925   :  { %v6911_v1 = vpop.f32.mrf.mxu1 }
0x1926   :  { %v6932_v6 = vadd.f32 %v6911_v1, %v6708_v33 }
0x1927   :  { %v12645_v26 = vpop.f32.mrf.mxu1 }
0x1928   :  { %v6935_v39 = vadd.f32 %v12645_v26, %v6711_v13  ;;  %v6930_v26 = vadd.f32 %v6901_v22, %v6706_v49 }
0x1929   :  { %v6921_v59 = vpop.f32.mrf.mxu1 }
0x192a   :  { %v6934_v56 = vadd.f32 %v6921_v59, %v6710_v11 }
0x192b   :  { %v12673_v12 = vpop.f32.mrf.mxu1 }
0x192c   :  { %v7155_v62 = vadd.f32 %v12673_v12, %v6931_v36 }
0x192d   :  { %v7125_v7 = vpop.f32.mrf.mxu1 }
0x192f   :  { %v12676_v8 = vpop.f32.mrf.mxu1 }
0x1930   :  { %v7157_v14 = vadd.f32 %v12676_v8, %v6933_v60 }
0x1931   :  { %v7135_v61 = vpop.f32.mrf.mxu1 }
0x1932   :  { %v7156_v3 = vadd.f32 %v7135_v61, %v6932_v6 }
0x1933   :  { %v12679_v58 = vpop.f32.mrf.mxu1 }
0x1934   :  { %v7159_v47 = vadd.f32 %v12679_v58, %v6935_v39  ;;  %v7154_v58 = vadd.f32 %v7125_v7, %v6930_v26 }
0x1935   :  { %v7145_v54 = vpop.f32.mrf.mxu1 }
0x1936   :  { %v7158_v1 = vadd.f32 %v7145_v54, %v6934_v56 }
0x1937   :  { %v12707_v29 = vpop.f32.mrf.mxu1 }
0x1938   :  { %v7379_v61 = vadd.f32 %v12707_v29, %v7155_v62 }
0x1939   :  { %v7349_v32 = vpop.f32.mrf.mxu1 }
0x193a   :  { %v7378_v44 = vadd.f32 %v7349_v32, %v7154_v58  ;;  %v7415_v54 = vadd.f32 %v7392_v53, %v7379_v61 }
0x193b   :  { %v12710_v63 = vpop.f32.mrf.mxu1 }
0x193c   :  { %v7381_v4 = vadd.f32 %v12710_v63, %v7157_v14  ;;  %v7414_v29 = vadd.f32 %v7387_v48, %v7378_v44 }
0x193d   :  { %v7359_v16 = vpop.f32.mrf.mxu1 }
0x193e   :  { %v7417_v43 = vadd.f32 %v7402_v34, %v7381_v4  ;;  %v7380_v57 = vadd.f32 %v7359_v16, %v7156_v3  ;;  %v14729_v60 = vmax.f32 %v7414_v29, 0.0 }
0x193f   :  { %v12713_v18 = vpop.f32.mrf.mxu1 }
0x1940   :  { %v14703_v8 = vmax.f32 %v7417_v43, 0.0  ;;  %v7416_v0 = vadd.f32 %v7397_v45, %v7380_v57  ;;  %v7383_v10 = vadd.f32 %v12713_v18, %v7159_v47  ;;  %v7427_v42 = vsel %vm7426_vm5, %v14729_v60, 0.0  ;;  %v13192_v43 = vld [vmem:[#allocation2 + $0x8] sm:$0xff]  ;;  %v13193_v57 = vld [vmem:[#allocation2 + $0x10] sm:$0xff]  ;;  %v13194_v45 = vld [vmem:[#allocation2 + $0x18] sm:$0xff] }
0x1941   :  { %v7369_v2 = vpop.f32.mrf.mxu1  ;;  %v7445_v13 = vmul.f32 %v14729_v60, %v14729_v60  ;;  %v13195_v18 = vld [vmem:[#allocation2 + $0x20] sm:$0xff] }
0x1942   :  { %v14705_v51 = vmax.f32 %v7416_v0, 0.0  ;;  %v7419_v15 = vadd.f32 %v7412_v27, %v7383_v10  ;;  %v7382_v55 = vadd.f32 %v7369_v2, %v7158_v1  ;;  %v7436_v59 = vsel %vm7426_vm5, %v14703_v8, 0.0  ;;  %v13196_v1 = vld [vmem:[#allocation2 + $0x28] sm:$0xff] }
0x1943   :  { %7437 = vadd.xlane.f32.xlu1 %v7436_v59  ;;  %v7448_v12 = vmul.f32 %v14703_v8, %v14703_v8  ;;  %v7451_v50 = vsel %vm7426_vm5, %v7445_v13, 0.0 }
0x1944   :  { %v7418_v35 = vadd.f32 %v7407_v9, %v7382_v55  ;;  %v14711_v41 = vmax.f32 %v7419_v15, 0.0  ;;  %v7433_v25 = vsel %vm7426_vm5, %v14705_v51, 0.0  ;;  %v14722_v9 = vmax.f32 %v7415_v54, 0.0 }
0x1945   :  { %v7460_v22 = vsel %vm7426_vm5, %v7448_v12, 0.0  ;;  %v7447_v32 = vmul.f32 %v14705_v51, %v14705_v51 }
0x1946   :  { %v14714_v21 = vmax.f32 %v7418_v35, 0.0  ;;  %7461 = vadd.xlane.f32.xlu0 %v7460_v22  ;;  %v7450_v7 = vmul.f32 %v14711_v41, %v14711_v41  ;;  %v7442_v46 = vsel %vm7426_vm5, %v14711_v41, 0.0  ;;  %v7430_v30 = vsel %vm7426_vm5, %v14722_v9, 0.0 }
0x1947   :  { %7434 = vadd.xlane.f32.xlu1 %v7433_v25  ;;  %v7457_v6 = vsel %vm7426_vm5, %v7447_v32, 0.0  ;;  %v7446_v14 = vmul.f32 %v14722_v9, %v14722_v9 }
0x1948   :  { %v7439_v5 = vsel %vm7426_vm5, %v14714_v21, 0.0  ;;  %v7466_v37 = vsel %vm7426_vm5, %v7450_v7, 0.0  ;;  %v7449_v33 = vmul.f32 %v14714_v21, %v14714_v21 }
0x1949   :  { %v7454_v63 = vsel %vm7426_vm5, %v7446_v14, 0.0 }
0x194a   :  { %7440 = vadd.xlane.f32.xlu0 %v7439_v5  ;;  %v7463_v27 = vsel %vm7426_vm5, %v7449_v33, 0.0 }
0x194b   :  { %7443 = vadd.xlane.f32.xlu1 %v7442_v46 }
0x194e   :  { %7467 = vadd.xlane.f32.xlu0 %v7466_v37 }
0x194f   :  { %7431 = vadd.xlane.f32.xlu1 %v7430_v30 }
0x1952   :  { %7464 = vadd.xlane.f32.xlu0 %v7463_v27 }
0x1953   :  { %7428 = vadd.xlane.f32.xlu1 %v7427_v42 }
0x1956   :  { %7458 = vadd.xlane.f32.xlu0 %v7457_v6 }
0x1957   :  { %7452 = vadd.xlane.f32.xlu1 %v7451_v50 }
0x195a   :  { %7455 = vadd.xlane.f32.xlu0 %v7454_v63 }
0x19cc   :  { %v7438_v11 = vpop.xlane.xlu1 %7437 }
0x19cf   :  { %v7462_v39 = vpop.xlane.xlu0 %7461 }
0x19d0   :  { %v7435_v3 = vpop.xlane.xlu1 %7434 }
0x19d3   :  { %v7441_v4 = vpop.xlane.xlu0 %7440 }
0x19d4   :  { %v7444_v52 = vpop.xlane.xlu1 %7443 }
0x19d5   :  { %12714 = vmatprep.subr.mxu0 %v7444_v52 }
0x19d6   :  { %12715 = vmatpush3.msra.mxu0 %v7444_v52 }
0x19d7   :  { %v7468_v36 = vpop.xlane.xlu0 %7467  ;;  %12716 = vmatprep.subr.mxu0 %v7441_v4 }
0x19d8   :  { %12735 = vmatprep.subr.mxu1 %v7468_v36  ;;  %12717 = vmatpush3.msra.mxu0 %v7441_v4  ;;  %v7432_v34 = vpop.xlane.xlu1 %7431 }
0x19d9   :  { %12736 = vmatpush3.msra.mxu1 %v7468_v36  ;;  %12718 = vmatprep.subr.mxu0 %v7438_v11 }
0x19da   :  { %12719 = vmatpush3.msra.mxu0 %v7438_v11 }
0x19db   :  { %v7465_v16 = vpop.xlane.xlu0 %7464  ;;  %12720 = vmatprep.subr.mxu0 %v7435_v3 }
0x19dc   :  { %12737 = vmatprep.subr.mxu1 %v7465_v16  ;;  %12721 = vmatpush3.msra.mxu0 %v7435_v3  ;;  %v7429_v56 = vpop.xlane.xlu1 %7428 }
0x19dd   :  { %12738 = vmatpush3.msra.mxu1 %v7465_v16  ;;  %12722 = vmatprep.subr.mxu0 %v7432_v34 }
0x19de   :  { %12739 = vmatprep.subr.mxu1 %v7462_v39  ;;  %12723 = vmatpush3.msra.mxu0 %v7432_v34 }
0x19df   :  { %12740 = vmatpush3.msra.mxu1 %v7462_v39  ;;  %v7459_v47 = vpop.xlane.xlu0 %7458  ;;  %12724 = vmatprep.subr.mxu0 %v7429_v56 }
0x19e0   :  { %12741 = vmatprep.subr.mxu1 %v7459_v47  ;;  %12725 = vmatpush3.msra.mxu0 %v7429_v56  ;;  %v7453_v62 = vpop.xlane.xlu1 %7452 }
0x19e1   :  { %12742 = vmatpush3.msra.mxu1 %v7459_v47  ;;  %12727 = vmatmul.mubr.msk.f32.vlgmr.msra.gmra.mxu0 %vm2398_vm3, %v13192_v43 }
0x19e2   :  { %12729 = vmatprep.mubr.msk.f32.mxu0 %vm2398_vm3, %v13193_v57 }
0x19e3   :  { %v7456_v49 = vpop.xlane.xlu0 %7455 }
0x19e4   :  { %12743 = vmatprep.subr.mxu1 %v7456_v49 }
0x19e5   :  { %12744 = vmatpush3.msra.mxu1 %v7456_v49  ;;  %12730 = vmatmul.mubr.msk.f32.gmra.mxu0 %vm2398_vm3, %v13194_v45 }
0x19e6   :  { %12745 = vmatprep.subr.mxu1 %v7453_v62  ;;  %12732 = vmatprep.mubr.msk.f32.mxu0 %vm2398_vm3, %v13195_v18 }
0x19e7   :  { %12746 = vmatpush3.msra.mxu1 %v7453_v62 }
0x19e8   :  { %12748 = vmatmul.mubr.msk.f32.vlgmr.msra.gmra.mxu1 %vm2398_vm3, %v13192_v43 }
0x19e9   :  { %12750 = vmatprep.mubr.msk.f32.mxu1 %vm2398_vm3, %v13193_v57  ;;  %12733 = vmatmul.mubr.msk.f32.gmra.mxu0 %vm2398_vm3, %v13196_v1 }
0x19ec   :  { %12751 = vmatmul.mubr.msk.f32.gmra.mxu1 %vm2398_vm3, %v13194_v45 }
0x19ed   :  { %12753 = vmatprep.mubr.msk.f32.mxu1 %vm2398_vm3, %v13195_v18 }
0x19f0   :  { %12754 = vmatmul.mubr.msk.f32.gmra.mxu1 %vm2398_vm3, %v13196_v1 }
0x1aa1   :  { %v12728_v0 = vpop.f32.mrf.mxu0 }
0x1aa2   :  { %v14755_v10 = vmul.f32 0.125, %v12728_v0 }
0x1aa3   :  { %v7535_v26 = vpop.f32.mrf.mxu0 }
0x1aa4   :  { %v7672_v2 = vmul.f32 %v14755_v10, %v14755_v10  ;;  %v14759_v15 = vmul.f32 0.125, %v7535_v26 }
0x1aa5   :  { %v12731_v61 = vpop.f32.mrf.mxu0 }
0x1aa6   :  { %v14761_v55 = vmul.f32 0.125, %v12731_v61  ;;  %v7671_v44 = vmul.f32 %v14759_v15, %v14759_v15 }
0x1aa7   :  { %v7545_v59 = vpop.f32.mrf.mxu0 }
0x1aa8   :  { %v12749_v53 = vpop.f32.mrf.mxu1  ;;  %v14763_v58 = vmul.f32 0.125, %v7545_v59  ;;  %v7674_v25 = vmul.f32 %v14761_v55, %v14761_v55 }
0x1aa9   :  { %v7666_v12 = vmul.f32 0.125, %v12749_v53  ;;  %v12734_v35 = vpop.f32.mrf.mxu0 }
0x1aaa   :  { %v7636_v22 = vpop.f32.mrf.mxu1  ;;  %v14769_v29 = vmul.f32 0.125, %v12734_v35  ;;  %v7673_v30 = vmul.f32 %v14763_v58, %v14763_v58 }
0x1aab   :  { %v7678_v54 = vsub.f32 %v7666_v12, %v7672_v2  ;;  %v7665_v48 = vmul.f32 0.125, %v7636_v22  ;;  %v7555_v5 = vpop.f32.mrf.mxu0 }
0x1aac   :  { %v12752_v7 = vpop.f32.mrf.mxu1  ;;  %v14771_v46 = vmul.f32 0.125, %v7555_v5  ;;  %v7676_v50 = vmul.f32 %v14769_v29, %v14769_v29 }
0x1aad   :  { %v7684_v37 = vmax.f32 %v7678_v54, 0.0  ;;  %v7677_v33 = vsub.f32 %v7665_v48, %v7671_v44  ;;  %v7668_v27 = vmul.f32 0.125, %v12752_v7 }
0x1aae   :  { %v7646_v32 = vpop.f32.mrf.mxu1  ;;  %v7675_v63 = vmul.f32 %v14771_v46, %v14771_v46 }
0x1aaf   :  { %v7690_v42 = vadd.f32 1e-05, %v7684_v37  ;;  %v7683_v13 = vmax.f32 %v7677_v33, 0.0  ;;  %v7680_v6 = vsub.f32 %v7668_v27, %v7674_v25  ;;  %v7667_v14 = vmul.f32 0.125, %v7646_v32 }
0x1ab0   :  { %v12755_v11 = vpop.f32.mrf.mxu1 }
0x1ab1   :  { %13159 = vrsqrt.f32 %v7690_v42  ;;  %v7689_v39 = vadd.f32 1e-05, %v7683_v13  ;;  %v7686_v3 = vmax.f32 %v7680_v6, 0.0  ;;  %v7679_v4 = vsub.f32 %v7667_v14, %v7673_v30  ;;  %v13198_v14 = vld [vmem:[#allocation16] sm:$0xff] }
0x1ab2   :  { %v7670_v52 = vmul.f32 0.125, %v12755_v11  ;;  %v7656_v36 = vpop.f32.mrf.mxu1 }
0x1ab3   :  { %13161 = vrsqrt.f32 %v7689_v39  ;;  %v7692_v34 = vadd.f32 1e-05, %v7686_v3  ;;  %v7685_v16 = vmax.f32 %v7679_v4, 0.0  ;;  %v7669_v56 = vmul.f32 0.125, %v7656_v36  ;;  %v13199_v39 = vld [vmem:[#allocation16 + $0x10] sm:$0xff]  ;;  %v13200_v4 = vld [vmem:[#allocation16 + $0x18] sm:$0xff] }
0x1ab4   :  { %v7682_v47 = vsub.f32 %v7670_v52, %v7676_v50 }
0x1ab5   :  { %13163 = vrsqrt.f32 %v7692_v34  ;;  %v7691_v43 = vadd.f32 1e-05, %v7685_v16  ;;  %v7681_v57 = vsub.f32 %v7669_v56, %v7675_v63  ;;  %v13201_v34 = vld [vmem:[#allocation16 + $0x20] sm:$0xff] }
0x1ab6   :  { %v7688_v49 = vmax.f32 %v7682_v47, 0.0  ;;  %v13202_v47 = vld [vmem:[#allocation16 + $0x28] sm:$0xff] }
0x1ab7   :  { %13165 = vrsqrt.f32 %v7691_v43  ;;  %v7687_v62 = vmax.f32 %v7681_v57, 0.0 }
0x1ab8   :  { %v7694_v45 = vadd.f32 1e-05, %v7688_v49 }
0x1ab9   :  { %v7693_v18 = vadd.f32 1e-05, %v7687_v62 }
0x1aba   :  { %13167 = vrsqrt.f32 %v7694_v45 }
0x1abb   :  { %13169 = vrsqrt.f32 %v7693_v18 }
0x1abe   :  { %v13160_v1 = vpop.eup %13159 }
0x1abf   :  { %7709 = vrot.lane.b32.xlu1 %v13160_v1, %s13501_s0 }
0x1ac0   :  { %v13162_v0 = vpop.eup %13161 }
0x1ac1   :  { %7707 = vrot.lane.b32.xlu0 %v13162_v0, %s13501_s0 }
0x1ac2   :  { %v13164_v26 = vpop.eup %13163 }
0x1ac4   :  { %v13166_v61 = vpop.eup %13165 }
0x1ac5   :  { %7713 = vrot.lane.b32.xlu0 %v13164_v26, %s13501_s0  ;;  %7711 = vrot.lane.b32.xlu1 %v13166_v61, %s13501_s0 }
0x1ac7   :  { %v13168_v2 = vpop.eup %13167 }
0x1ac8   :  { %v13170_v59 = vpop.eup %13169 }
0x1ac9   :  { %7717 = vrot.lane.b32.xlu0 %v13168_v2, %s13501_s0  ;;  %7715 = vrot.lane.b32.xlu1 %v13170_v59, %s13501_s0 }
0x1b31   :  { %v7710_v53 = vpop.permute.xlu1 %7709 }
0x1b32   :  { %v7726_v12 = vmul.f32 %v7710_v53, %v14629_v19 }
0x1b33   :  { %v7708_v35 = vpop.permute.xlu0 %7707 }
0x1b34   :  { %v7725_v22 = vmul.f32 %v7708_v35, %v14631_v24  ;;  %7739 = vrot.lane.b32.xlu0 %v7726_v12, %s13502_s23 }
0x1b36   :  { %7737 = vrot.lane.b32.xlu1 %v7725_v22, %s13502_s23 }
0x1b37   :  { %v7714_v44 = vpop.permute.xlu0 %7713  ;;  %v7712_v54 = vpop.permute.xlu1 %7711 }
0x1b38   :  { %v7728_v25 = vmul.f32 %v7714_v44, %v14623_v31  ;;  %v7727_v48 = vmul.f32 %v7712_v54, %v14625_v23 }
0x1b3a   :  { %7743 = vrot.lane.b32.xlu0 %v7728_v25, %s13502_s23  ;;  %7741 = vrot.lane.b32.xlu1 %v7727_v48, %s13502_s23 }
0x1b3b   :  { %v7718_v5 = vpop.permute.xlu0 %7717  ;;  %v7716_v7 = vpop.permute.xlu1 %7715 }
0x1b3c   :  { %v7730_v19 = vmul.f32 %v7718_v5, %v14619_v40  ;;  %v7729_v24 = vmul.f32 %v7716_v7, %v14617_v38 }
0x1b3e   :  { %7747 = vrot.lane.b32.xlu0 %v7730_v19, %s13502_s23  ;;  %7745 = vrot.lane.b32.xlu1 %v7729_v24, %s13502_s23 }
0x1ba6   :  { %v7740_v37 = vpop.permute.xlu0 %7739 }
0x1ba7   :  { %v7756_v33 = vmul.f32 %v7740_v37, %v14755_v10 }
0x1ba8   :  { %v7738_v31 = vpop.permute.xlu1 %7737 }
0x1ba9   :  { %v7755_v23 = vmul.f32 %v7738_v31, %v14759_v15  ;;  %7769 = vrot.lane.b32.xlu0 %v7756_v33, %s13504_s3 }
0x1bab   :  { %7767 = vrot.lane.b32.xlu1 %v7755_v23, %s13504_s3 }
0x1bac   :  { %v7744_v30 = vpop.permute.xlu0 %7743  ;;  %v7742_v27 = vpop.permute.xlu1 %7741 }
0x1bad   :  { %v7758_v40 = vmul.f32 %v7744_v30, %v14761_v55  ;;  %v7757_v38 = vmul.f32 %v7742_v27, %v14763_v58  ;;  %v13197_v58 = vld [vmem:[#allocation16 + $0x8] sm:$0xff] }
0x1baf   :  { %7773 = vrot.lane.b32.xlu0 %v7758_v40, %s13504_s3  ;;  %7771 = vrot.lane.b32.xlu1 %v7757_v38, %s13504_s3  ;;  %v8089_v38 = vld [vmem:[#allocation19 + $0x38] sm:$0xff] }
0x1bb0   :  { %v7748_v32 = vpop.permute.xlu0 %7747  ;;  %v7746_v42 = vpop.permute.xlu1 %7745 }
0x1bb1   :  { %v7760_v10 = vmul.f32 %v7748_v32, %v14769_v29  ;;  %v7759_v15 = vmul.f32 %v7746_v42, %v14771_v46  ;;  %v7863_v29 = vld [vmem:[#allocation18] sm:$0xf]  ;;  %v7988_v46 = vld [vmem:[#allocation18 + $0x4] sm:$0xf]  ;;  %v7982_v32 = vld [vmem:[#allocation19 + $0x8] sm:$0xff] }
0x1bb2   :  { %12756 = vmatprep.subr.msk.mxu0 %vm7882_vm6, %v7863_v29  ;;  %12767 = vmatprep.subr.msk.mxu1 %vm7882_vm6, %v7988_v46  ;;  %v8090_v42 = vld [vmem:[#allocation19 + $0x40] sm:$0xff] }
0x1bb3   :  { %7777 = vrot.lane.b32.xlu0 %v7760_v10, %s13504_s3  ;;  %7775 = vrot.lane.b32.xlu1 %v7759_v15, %s13504_s3  ;;  %v8321_v10 = vld [vmem:[#allocation18 + $0x8] sm:$0xf]  ;;  %v7983_v15 = vld [vmem:[#allocation19 + $0x10] sm:$0xff] }
0x1bb4   :  { %12757 = vmatpush3.msk.msra.mxu0 %vm7882_vm6, %v7863_v29  ;;  %12768 = vmatpush3.msk.msra.mxu1 %vm7882_vm6, %v7988_v46  ;;  %v7985_v29 = vld [vmem:[#allocation19 + $0x20] sm:$0xff]  ;;  %v8093_v46 = vld [vmem:[#allocation19 + $0x58] sm:$0xff] }
0x1bb7   :  { %7796 = vperm.xlu0 %13130, %v7726_v12   ;;  %7792 = vperm.xlu1 %13129, %v7725_v22  }
0x1bbb   :  { %7800 = vperm.xlu0 %13130, %v7727_v48   ;;  %7804 = vperm.xlu1 %13129, %v7728_v25   ;;  %v8088_v25 = vld [vmem:[#allocation19 + $0x30] sm:$0xff]  ;;  %v7981_v48 = vld [vmem:[#allocation19] sm:$0xff] }
0x1bbf   :  { %7808 = vperm.xlu1 %13129, %v7729_v24   ;;  %13132 = vset.pattern.permute.xlu0 %v13505_v20 }
0x1bc3   :  { %13131 = vset.pattern.permute.xlu1 %v13505_v20 }
0x1c1b   :  { %v7770_v55 = vpop.permute.xlu0 %7769 }
0x1c1c   :  { %v7786_v13 = vsub.f32 %v13197_v58, %v7770_v55  ;;  %v8547_v55 = vld [vmem:[#allocation18 + $0xc] sm:$0xf] }
0x1c1d   :  { %v7768_v6 = vpop.permute.xlu1 %7767  ;;  %v8091_v58 = vld [vmem:[#allocation19 + $0x48] sm:$0xff] }
0x1c1e   :  { %7828 = vperm.xlu1 %13131, %v7786_v13   ;;  %v7785_v50 = vsub.f32 %v13198_v14, %v7768_v6  ;;  %v7984_v13 = vld [vmem:[#allocation19 + $0x18] sm:$0xff]  ;;  %v8092_v6 = vld [vmem:[#allocation19 + $0x50] sm:$0xff]  ;;  %v7986_v14 = vld [vmem:[#allocation19 + $0x28] sm:$0xff] }
0x1c21   :  { %v7774_v63 = vpop.permute.xlu0 %7773  ;;  %v7772_v11 = vpop.permute.xlu1 %7771 }
0x1c22   :  { %v7787_v3 = vsub.f32 %v13199_v39, %v7772_v11  ;;  %7823 = vperm.xlu1 %13131, %v7785_v50   ;;  %v7788_v52 = vsub.f32 %v13200_v4, %v7774_v63  ;;  %v8773_v50 = vld [vmem:[#allocation18 + $0x10] sm:$0xf]  ;;  %v8999_v63 = vld [vmem:[#allocation18 + $0x14] sm:$0xf]  ;;  %v9225_v11 = vld [vmem:[#allocation18 + $0x18] sm:$0xf] }
0x1c23   :  { %v9451_v39 = vld [vmem:[#allocation18 + $0x1c] sm:$0xf]  ;;  %v8421_v4 = vld [vmem:[#allocation19 + $0x60] sm:$0xff] }
0x1c24   :  { %7833 = vperm.xlu0 %13132, %v7787_v3   ;;  %v9677_v3 = vld [vmem:[#allocation18 + $0x20] sm:$0xf] }
0x1c25   :  { %v7776_v36 = vpop.permute.xlu1 %7775  ;;  %v7778_v56 = vpop.permute.xlu0 %7777 }
0x1c26   :  { %7838 = vperm.xlu1 %13131, %v7788_v52   ;;  %v7789_v16 = vsub.f32 %v13201_v34, %v7776_v36  ;;  %v7790_v43 = vsub.f32 %v13202_v47, %v7778_v56 }
0x1c28   :  { %13133 = vset.pattern.permute.xlu0 %v13503_v17 }
0x1c29   :  { %7812 = vperm.xlu0 %13133, %v7730_v19  }
0x1c2a   :  { %7843 = vperm.xlu1 %13131, %v7789_v16  }
0x1c2d   :  { %13134 = vset.pattern.permute.xlu0 %v13505_v20 }
0x1c2e   :  { %7848 = vperm.xlu1 %13131, %v7790_v43  }
0x1c32   :  { %v7793_v57 = vpop.permute.xlu1 %7792  ;;  %v7797_v62 = vpop.permute.xlu0 %7796 }
0x1c33   :  { %v7815_v0 = vmul.f32 %v7793_v57, %v14729_v60  ;;  %v7816_v26 = vmul.f32 %v7797_v62, %v14722_v9 }
0x1c36   :  { %v7805_v49 = vpop.permute.xlu1 %7804  ;;  %v7801_v1 = vpop.permute.xlu0 %7800 }
0x1c37   :  { %v7817_v17 = vmul.f32 %v7801_v1, %v14705_v51  ;;  %v7818_v20 = vmul.f32 %v7805_v49, %v14703_v8 }
0x1c3a   :  { %v7809_v45 = vpop.permute.xlu1 %7808 }
0x1c3b   :  { %v7819_v8 = vmul.f32 %v7809_v45, %v14714_v21 }
0x1c99   :  { %v7829_v18 = vpop.permute.xlu1 %7828 }
0x1c9a   :  { %v14822_v59 = vadd.f32 %v7829_v18, %v7816_v26 }
0x1c9d   :  { %v7824_v61 = vpop.permute.xlu1 %7823 }
0x1c9e   :  { %v14820_v2 = vadd.f32 %v7824_v61, %v7815_v0 }
0x1c9f   :  { %v7834_v53 = vpop.permute.xlu0 %7833 }
0x1ca0   :  { %v14825_v12 = vadd.f32 %v7834_v53, %v7817_v17  ;;  %12758 = vmatprep.mubr.msk.f32.mxu0 %vm7426_vm5, %v14820_v2  ;;  %12769 = vmatprep.mubr.msk.f32.mxu1 %vm7426_vm5, %v14820_v2 }
0x1ca1   :  { %12759 = vmatmul.mubr.msk.f32.vlgmr.msra.gmra.mxu0 %vm7426_vm5, %v14822_v59  ;;  %12770 = vmatmul.mubr.msk.f32.vlgmr.msra.gmra.mxu1 %vm7426_vm5, %v14822_v59  ;;  %v7839_v51 = vpop.permute.xlu1 %7838 }
0x1ca2   :  { %v14835_v9 = vadd.f32 %v7839_v51, %v7818_v20  ;;  %12761 = vmatprep.mubr.msk.f32.mxu0 %vm7426_vm5, %v14825_v12  ;;  %12772 = vmatprep.mubr.msk.f32.mxu1 %vm7426_vm5, %v14825_v12 }
0x1ca4   :  { %v7813_v60 = vpop.permute.xlu0 %7812 }
0x1ca5   :  { %12762 = vmatmul.mubr.msk.f32.gmra.mxu0 %vm7426_vm5, %v14835_v9  ;;  %12773 = vmatmul.mubr.msk.f32.gmra.mxu1 %vm7426_vm5, %v14835_v9  ;;  %v7844_v35 = vpop.permute.xlu1 %7843  ;;  %v7820_v44 = vmul.f32 %v7813_v60, %v14711_v41  ;;  %v8422_v60 = vld [vmem:[#allocation19 + $0x68] sm:$0xff] }
0x1ca6   :  { %v14846_v22 = vadd.f32 %v7844_v35, %v7819_v8  ;;  %v8423_v35 = vld [vmem:[#allocation19 + $0x70] sm:$0xff] }
0x1ca8   :  { %12764 = vmatprep.mubr.msk.f32.mxu0 %vm7426_vm5, %v14846_v22  ;;  %12775 = vmatprep.mubr.msk.f32.mxu1 %vm7426_vm5, %v14846_v22 }
0x1ca9   :  { %v7849_v54 = vpop.permute.xlu1 %7848 }
0x1caa   :  { %v14853_v21 = vadd.f32 %v7849_v54, %v7820_v44  ;;  %v8424_v54 = vld [vmem:[#allocation19 + $0x78] sm:$0xff] }
0x1cac   :  { %12765 = vmatmul.mubr.msk.f32.gmra.mxu0 %vm7426_vm5, %v14853_v21  ;;  %12776 = vmatmul.mubr.msk.f32.gmra.mxu1 %vm7426_vm5, %v14853_v21 }
0x1cad   :  { %12790 = vmatprep.mubr.msk.f32.mxu0 %vm2398_vm3, %v8088_v25  ;;  %12811 = vmatprep.mubr.msk.f32.mxu1 %vm2398_vm3, %v7981_v48 }
0x1d61   :  { %v12760_v41 = vpop.f32.mrf.mxu0  ;;  %v12771_v5 = vpop.f32.mrf.mxu1 }
0x1d63   :  { %v7952_v7 = vpop.f32.mrf.mxu0  ;;  %v8058_v19 = vpop.f32.mrf.mxu1 }
0x1d65   :  { %v12763_v24 = vpop.f32.mrf.mxu0  ;;  %v12774_v37 = vpop.f32.mrf.mxu1 }
0x1d67   :  { %v7962_v33 = vpop.f32.mrf.mxu0  ;;  %v8068_v31 = vpop.f32.mrf.mxu1 }
0x1d6c   :  { %v12766_v23 = vpop.f32.mrf.mxu0  ;;  %v12777_v30 = vpop.f32.mrf.mxu1 }
0x1d6d   :  { %12778 = vmatprep.subr.mxu0 %v12777_v30  ;;  %12799 = vmatprep.subr.mxu1 %v12766_v23 }
0x1d6e   :  { %v7972_v27 = vpop.f32.mrf.mxu0  ;;  %v8078_v40 = vpop.f32.mrf.mxu1  ;;  %12779 = vmatpush3.msra.mxu0 %v12777_v30  ;;  %12800 = vmatpush3.msra.mxu1 %v12766_v23  ;;  %v8650_v23 = vld [vmem:[#allocation19 + $0xa8] sm:$0xff]  ;;  %v8651_v30 = vld [vmem:[#allocation19 + $0xb0] sm:$0xff] }
0x1d6f   :  { %12780 = vmatprep.subr.mxu0 %v8078_v40  ;;  %12801 = vmatprep.subr.mxu1 %v7972_v27 }
0x1d70   :  { %12781 = vmatpush3.msra.mxu0 %v8078_v40  ;;  %12802 = vmatpush3.msra.mxu1 %v7972_v27 }
0x1d71   :  { %12782 = vmatprep.subr.mxu0 %v12774_v37  ;;  %12803 = vmatprep.subr.mxu1 %v12763_v24 }
0x1d72   :  { %12783 = vmatpush3.msra.mxu0 %v12774_v37  ;;  %12804 = vmatpush3.msra.mxu1 %v12763_v24  ;;  %v8648_v24 = vld [vmem:[#allocation19 + $0x98] sm:$0xff]  ;;  %v8649_v37 = vld [vmem:[#allocation19 + $0xa0] sm:$0xff] }
0x1d73   :  { %12784 = vmatprep.subr.mxu0 %v8068_v31  ;;  %12805 = vmatprep.subr.mxu1 %v7962_v33 }
0x1d74   :  { %12785 = vmatpush3.msra.mxu0 %v8068_v31  ;;  %12806 = vmatpush3.msra.mxu1 %v7962_v33 }
0x1d75   :  { %12786 = vmatprep.subr.mxu0 %v12771_v5  ;;  %12807 = vmatprep.subr.mxu1 %v12760_v41 }
0x1d76   :  { %12787 = vmatpush3.msra.mxu0 %v12771_v5  ;;  %12808 = vmatpush3.msra.mxu1 %v12760_v41  ;;  %v8426_v41 = vld [vmem:[#allocation19 + $0x88] sm:$0xff]  ;;  %v8647_v5 = vld [vmem:[#allocation19 + $0x90] sm:$0xff] }
0x1d77   :  { %12788 = vmatprep.subr.mxu0 %v8058_v19  ;;  %12809 = vmatprep.subr.mxu1 %v7952_v7 }
0x1d78   :  { %12789 = vmatpush3.msra.mxu0 %v8058_v19  ;;  %12810 = vmatpush3.msra.mxu1 %v7952_v7 }
0x1d79   :  { %12791 = vmatmul.mubr.msk.f32.vlgmr.msra.gmra.mxu0 %vm2398_vm3, %v8089_v38  ;;  %12812 = vmatmul.mubr.msk.f32.vlgmr.msra.gmra.mxu1 %vm2398_vm3, %v7982_v32  ;;  %v8652_v38 = vld [vmem:[#allocation19 + $0xb8] sm:$0xff]  ;;  %v8873_v32 = vld [vmem:[#allocation19 + $0xc0] sm:$0xff] }
0x1d7a   :  { %12793 = vmatprep.mubr.msk.f32.mxu0 %vm2398_vm3, %v8090_v42  ;;  %12820 = vmatprep.subr.msk.mxu0 %vm7882_vm6, %v8321_v10 }
0x1d7b   :  { %12814 = vmatprep.mubr.msk.f32.mxu1 %vm2398_vm3, %v7983_v15  ;;  %12821 = vmatpush3.msk.msra.mxu0 %vm7882_vm6, %v8321_v10  ;;  %v8874_v15 = vld [vmem:[#allocation19 + $0xc8] sm:$0xff] }
0x1d7c   :  { %12852 = vmatprep.subr.msk.mxu0 %vm7882_vm6, %v8547_v55 }
0x1d7d   :  { %12794 = vmatmul.mubr.msk.f32.gmra.mxu0 %vm2398_vm3, %v8091_v58  ;;  %12815 = vmatmul.mubr.msk.f32.gmra.mxu1 %vm2398_vm3, %v7984_v13 }
0x1d7e   :  { %12796 = vmatprep.mubr.msk.f32.mxu0 %vm2398_vm3, %v8092_v6  ;;  %12817 = vmatprep.mubr.msk.f32.mxu1 %vm2398_vm3, %v7985_v29  ;;  %v8876_v6 = vld [vmem:[#allocation19 + $0xd8] sm:$0xff]  ;;  %v8877_v29 = vld [vmem:[#allocation19 + $0xe0] sm:$0xff] }
0x1d81   :  { %12797 = vmatmul.mubr.msk.f32.gmra.mxu0 %vm2398_vm3, %v8093_v46  ;;  %12818 = vmatmul.mubr.msk.f32.gmra.mxu1 %vm2398_vm3, %v7986_v14 }
0x1d82   :  { %12822 = vmatprep.mubr.msk.f32.mxu0 %vm7426_vm5, %v14820_v2  ;;  %12843 = vmatprep.mubr.msk.f32.mxu1 %vm2398_vm3, %v8421_v4  ;;  %v9101_v4 = vld [vmem:[#allocation19 + $0x100] sm:$0xff] }
0x1d85   :  { %12823 = vmatmul.mubr.msk.f32.vlgmr.msra.gmra.mxu0 %vm7426_vm5, %v14822_v59 }
0x1d86   :  { %12825 = vmatprep.mubr.msk.f32.mxu0 %vm7426_vm5, %v14825_v12  ;;  %12853 = vmatpush3.msk.msra.mxu0 %vm7882_vm6, %v8547_v55  ;;  %v8875_v55 = vld [vmem:[#allocation19 + $0xd0] sm:$0xff] }
0x1d87   :  { %12884 = vmatprep.subr.msk.mxu0 %vm7882_vm6, %v8773_v50 }
0x1d89   :  { %12826 = vmatmul.mubr.msk.f32.gmra.mxu0 %vm7426_vm5, %v14835_v9 }
0x1d8a   :  { %12828 = vmatprep.mubr.msk.f32.mxu0 %vm7426_vm5, %v14846_v22 }
0x1d8d   :  { %12829 = vmatmul.mubr.msk.f32.gmra.mxu0 %vm7426_vm5, %v14853_v21 }
0x1d8e   :  { %12854 = vmatprep.mubr.msk.f32.mxu0 %vm7426_vm5, %v14820_v2 }
0x1d91   :  { %12855 = vmatmul.mubr.msk.f32.vlgmr.msra.gmra.mxu0 %vm7426_vm5, %v14822_v59 }
0x1d92   :  { %12857 = vmatprep.mubr.msk.f32.mxu0 %vm7426_vm5, %v14825_v12  ;;  %12885 = vmatpush3.msk.msra.mxu0 %vm7882_vm6, %v8773_v50  ;;  %v8878_v50 = vld [vmem:[#allocation19 + $0xe8] sm:$0xff] }
0x1d93   :  { %12916 = vmatprep.subr.msk.mxu0 %vm7882_vm6, %v8999_v63 }
0x1d95   :  { %12858 = vmatmul.mubr.msk.f32.gmra.mxu0 %vm7426_vm5, %v14835_v9 }
0x1d96   :  { %12860 = vmatprep.mubr.msk.f32.mxu0 %vm7426_vm5, %v14846_v22 }
0x1d99   :  { %12861 = vmatmul.mubr.msk.f32.gmra.mxu0 %vm7426_vm5, %v14853_v21 }
0x1d9a   :  { %12886 = vmatprep.mubr.msk.f32.mxu0 %vm7426_vm5, %v14820_v2 }
0x1d9d   :  { %12887 = vmatmul.mubr.msk.f32.vlgmr.msra.gmra.mxu0 %vm7426_vm5, %v14822_v59 }
0x1d9e   :  { %12889 = vmatprep.mubr.msk.f32.mxu0 %vm7426_vm5, %v14825_v12  ;;  %12917 = vmatpush3.msk.msra.mxu0 %vm7882_vm6, %v8999_v63  ;;  %v9099_v63 = vld [vmem:[#allocation19 + $0xf0] sm:$0xff] }
0x1d9f   :  { %12948 = vmatprep.subr.msk.mxu0 %vm7882_vm6, %v9225_v11 }
0x1da1   :  { %12890 = vmatmul.mubr.msk.f32.gmra.mxu0 %vm7426_vm5, %v14835_v9 }
0x1da2   :  { %12892 = vmatprep.mubr.msk.f32.mxu0 %vm7426_vm5, %v14846_v22 }
0x1da5   :  { %12893 = vmatmul.mubr.msk.f32.gmra.mxu0 %vm7426_vm5, %v14853_v21 }
0x1da6   :  { %12918 = vmatprep.mubr.msk.f32.mxu0 %vm7426_vm5, %v14820_v2 }
0x1da9   :  { %12919 = vmatmul.mubr.msk.f32.vlgmr.msra.gmra.mxu0 %vm7426_vm5, %v14822_v59 }
0x1daa   :  { %12921 = vmatprep.mubr.msk.f32.mxu0 %vm7426_vm5, %v14825_v12  ;;  %12949 = vmatpush3.msk.msra.mxu0 %vm7882_vm6, %v9225_v11 }
0x1dab   :  { %12980 = vmatprep.subr.msk.mxu0 %vm7882_vm6, %v9451_v39 }
0x1dad   :  { %12922 = vmatmul.mubr.msk.f32.gmra.mxu0 %vm7426_vm5, %v14835_v9 }
0x1dae   :  { %12924 = vmatprep.mubr.msk.f32.mxu0 %vm7426_vm5, %v14846_v22 }
0x1db1   :  { %12925 = vmatmul.mubr.msk.f32.gmra.mxu0 %vm7426_vm5, %v14853_v21 }
0x1db2   :  { %12950 = vmatprep.mubr.msk.f32.mxu0 %vm7426_vm5, %v14820_v2 }
0x1db5   :  { %12951 = vmatmul.mubr.msk.f32.vlgmr.msra.gmra.mxu0 %vm7426_vm5, %v14822_v59 }
0x1db6   :  { %12953 = vmatprep.mubr.msk.f32.mxu0 %vm7426_vm5, %v14825_v12  ;;  %12981 = vmatpush3.msk.msra.mxu0 %vm7882_vm6, %v9451_v39 }
0x1db7   :  { %13012 = vmatprep.subr.msk.mxu0 %vm7882_vm6, %v9677_v3 }
0x1db9   :  { %12954 = vmatmul.mubr.msk.f32.gmra.mxu0 %vm7426_vm5, %v14835_v9 }
0x1dba   :  { %12956 = vmatprep.mubr.msk.f32.mxu0 %vm7426_vm5, %v14846_v22 }
0x1dbd   :  { %12957 = vmatmul.mubr.msk.f32.gmra.mxu0 %vm7426_vm5, %v14853_v21 }
0x1dbe   :  { %12982 = vmatprep.mubr.msk.f32.mxu0 %vm7426_vm5, %v14820_v2 }
0x1dc1   :  { %12983 = vmatmul.mubr.msk.f32.vlgmr.msra.gmra.mxu0 %vm7426_vm5, %v14822_v59 }
0x1dc2   :  { %12985 = vmatprep.mubr.msk.f32.mxu0 %vm7426_vm5, %v14825_v12  ;;  %13013 = vmatpush3.msk.msra.mxu0 %vm7882_vm6, %v9677_v3  ;;  %v9100_v3 = vld [vmem:[#allocation19 + $0xf8] sm:$0xff] }
0x1dc5   :  { %12986 = vmatmul.mubr.msk.f32.gmra.mxu0 %vm7426_vm5, %v14835_v9 }
0x1dc6   :  { %12988 = vmatprep.mubr.msk.f32.mxu0 %vm7426_vm5, %v14846_v22 }
0x1dc9   :  { %12989 = vmatmul.mubr.msk.f32.gmra.mxu0 %vm7426_vm5, %v14853_v21 }
0x1dca   :  { %13014 = vmatprep.mubr.msk.f32.mxu0 %vm7426_vm5, %v14820_v2 }
0x1dcd   :  { %13015 = vmatmul.mubr.msk.f32.vlgmr.msra.gmra.mxu0 %vm7426_vm5, %v14822_v59 }
0x1dce   :  { %13017 = vmatprep.mubr.msk.f32.mxu0 %vm7426_vm5, %v14825_v12 }
0x1dd1   :  { %13018 = vmatmul.mubr.msk.f32.gmra.mxu0 %vm7426_vm5, %v14835_v9 }
0x1dd2   :  { %13020 = vmatprep.mubr.msk.f32.mxu0 %vm7426_vm5, %v14846_v22 }
0x1dd5   :  { %13021 = vmatmul.mubr.msk.f32.gmra.mxu0 %vm7426_vm5, %v14853_v21  ;;  %v8425_v21 = vld [vmem:[#allocation19 + $0x80] sm:$0xff] }
0x1dd6   :  { %13056 = vmatprep.mubr.msk.f32.mxu0 %vm2398_vm3, %v14692_v28 }
0x1e39   :  { %v12792_v52 = vpop.f32.mrf.mxu0  ;;  %v12813_v36 = vpop.f32.mrf.mxu1 }
0x1e3a   :  { %v14972_v34 = vadd.f32 %v12813_v36, %v12792_v52 }
0x1e3b   :  { %v8178_v16 = vpop.f32.mrf.mxu0  ;;  %v8291_v56 = vpop.f32.mrf.mxu1 }
0x1e3c   :  { %v14974_v47 = vadd.f32 %v8291_v56, %v8178_v16  ;;  %v9102_v16 = vld [vmem:[#allocation19 + $0x108] sm:$0xff]  ;;  %v9103_v56 = vld [vmem:[#allocation19 + $0x110] sm:$0xff] }
0x1e3d   :  { %v12795_v43 = vpop.f32.mrf.mxu0  ;;  %v12816_v57 = vpop.f32.mrf.mxu1 }
0x1e3e   :  { %v14976_v49 = vadd.f32 %v12816_v57, %v12795_v43 }
0x1e3f   :  { %v8188_v62 = vpop.f32.mrf.mxu0  ;;  %v8301_v45 = vpop.f32.mrf.mxu1 }
0x1e40   :  { %v14978_v18 = vadd.f32 %v8301_v45, %v8188_v62  ;;  %v9104_v62 = vld [vmem:[#allocation19 + $0x118] sm:$0xff]  ;;  %v9325_v45 = vld [vmem:[#allocation19 + $0x120] sm:$0xff] }
0x1e41   :  { %v12798_v28 = vpop.f32.mrf.mxu0  ;;  %v12819_v1 = vpop.f32.mrf.mxu1 }
0x1e42   :  { %v14980_v0 = vadd.f32 %v12819_v1, %v12798_v28 }
0x1e43   :  { %v14982_v26 = vpop.f32.mrf.mxu0 }
0x1e45   :  { %v12824_v61 = vpop.f32.mrf.mxu0 }
0x1e47   :  { %v8391_v17 = vpop.f32.mrf.mxu0 }
0x1e49   :  { %v12827_v2 = vpop.f32.mrf.mxu0 }
0x1e4b   :  { %v8401_v59 = vpop.f32.mrf.mxu0 }
0x1e4d   :  { %v12830_v53 = vpop.f32.mrf.mxu0 }
0x1e4e   :  { %12831 = vmatprep.subr.mxu1 %v12830_v53 }
0x1e4f   :  { %v8411_v20 = vpop.f32.mrf.mxu0  ;;  %12832 = vmatpush3.msra.mxu1 %v12830_v53  ;;  %v9328_v53 = vld [vmem:[#allocation19 + $0x138] sm:$0xff] }
0x1e50   :  { %12833 = vmatprep.subr.mxu1 %v8411_v20 }
0x1e51   :  { %12834 = vmatpush3.msra.mxu1 %v8411_v20  ;;  %v12856_v12 = vpop.f32.mrf.mxu0  ;;  %v9329_v20 = vld [vmem:[#allocation19 + $0x140] sm:$0xff] }
0x1e52   :  { %12835 = vmatprep.subr.mxu1 %v12827_v2 }
0x1e53   :  { %12836 = vmatpush3.msra.mxu1 %v12827_v2  ;;  %v8617_v51 = vpop.f32.mrf.mxu0 }
0x1e54   :  { %12837 = vmatprep.subr.mxu1 %v8401_v59 }
0x1e55   :  { %12838 = vmatpush3.msra.mxu1 %v8401_v59  ;;  %v12859_v9 = vpop.f32.mrf.mxu0 }
0x1e56   :  { %12839 = vmatprep.subr.mxu1 %v12824_v61 }
0x1e57   :  { %12840 = vmatpush3.msra.mxu1 %v12824_v61  ;;  %v8627_v8 = vpop.f32.mrf.mxu0  ;;  %v9326_v61 = vld [vmem:[#allocation19 + $0x128] sm:$0xff] }
0x1e58   :  { %12841 = vmatprep.subr.mxu1 %v8391_v17 }
0x1e59   :  { %12842 = vmatpush3.msra.mxu1 %v8391_v17  ;;  %v12862_v22 = vpop.f32.mrf.mxu0  ;;  %v9327_v17 = vld [vmem:[#allocation19 + $0x130] sm:$0xff] }
0x1e5a   :  { %12844 = vmatmul.mubr.msk.f32.vlgmr.msra.gmra.mxu1 %vm2398_vm3, %v8422_v60  ;;  %12863 = vmatprep.subr.mxu1 %v12862_v22 }
0x1e5b   :  { %v8637_v44 = vpop.f32.mrf.mxu0  ;;  %12864 = vmatpush3.msra.mxu1 %v12862_v22  ;;  %12846 = vmatprep.mubr.msk.f32.mxu1 %vm2398_vm3, %v8423_v35  ;;  %v9552_v22 = vld [vmem:[#allocation19 + $0x158] sm:$0xff] }
0x1e5c   :  { %12865 = vmatprep.subr.mxu1 %v8637_v44 }
0x1e5d   :  { %12866 = vmatpush3.msra.mxu1 %v8637_v44  ;;  %v12888_v25 = vpop.f32.mrf.mxu0  ;;  %v9553_v44 = vld [vmem:[#allocation19 + $0x160] sm:$0xff] }
0x1e5e   :  { %12847 = vmatmul.mubr.msk.f32.gmra.mxu1 %vm2398_vm3, %v8424_v54  ;;  %12867 = vmatprep.subr.mxu1 %v12859_v9 }
0x1e5f   :  { %12868 = vmatpush3.msra.mxu1 %v12859_v9  ;;  %v8843_v48 = vpop.f32.mrf.mxu0  ;;  %12849 = vmatprep.mubr.msk.f32.mxu1 %vm2398_vm3, %v8425_v21  ;;  %v9330_v9 = vld [vmem:[#allocation19 + $0x148] sm:$0xff] }
0x1e60   :  { %12869 = vmatprep.subr.mxu1 %v8627_v8 }
0x1e61   :  { %12870 = vmatpush3.msra.mxu1 %v8627_v8  ;;  %v12891_v7 = vpop.f32.mrf.mxu0  ;;  %v9551_v8 = vld [vmem:[#allocation19 + $0x150] sm:$0xff] }
0x1e62   :  { %12850 = vmatmul.mubr.msk.f32.gmra.mxu1 %vm2398_vm3, %v8426_v41  ;;  %12871 = vmatprep.subr.mxu1 %v12856_v12  ;;  %v9556_v41 = vld [vmem:[#allocation19 + $0x178] sm:$0xff] }
0x1e63   :  { %12872 = vmatpush3.msra.mxu1 %v12856_v12  ;;  %v8853_v19 = vpop.f32.mrf.mxu0  ;;  %12875 = vmatprep.mubr.msk.f32.mxu1 %vm2398_vm3, %v8647_v5  ;;  %v9777_v5 = vld [vmem:[#allocation19 + $0x180] sm:$0xff] }
0x1e64   :  { %12873 = vmatprep.subr.mxu1 %v8617_v51 }
0x1e65   :  { %12874 = vmatpush3.msra.mxu1 %v8617_v51  ;;  %v12894_v33 = vpop.f32.mrf.mxu0 }
0x1e66   :  { %12876 = vmatmul.mubr.msk.f32.vlgmr.msra.gmra.mxu1 %vm2398_vm3, %v8648_v24  ;;  %12895 = vmatprep.subr.mxu1 %v12894_v33  ;;  %v9780_v24 = vld [vmem:[#allocation19 + $0x198] sm:$0xff] }
0x1e67   :  { %v8863_v31 = vpop.f32.mrf.mxu0  ;;  %12896 = vmatpush3.msra.mxu1 %v12894_v33  ;;  %12878 = vmatprep.mubr.msk.f32.mxu1 %vm2398_vm3, %v8649_v37  ;;  %v9781_v37 = vld [vmem:[#allocation19 + $0x1a0] sm:$0xff]  ;;  %v9782_v33 = vld [vmem:[#allocation19 + $0x1a8] sm:$0xff] }
0x1e68   :  { %12897 = vmatprep.subr.mxu1 %v8863_v31 }
0x1e69   :  { %12898 = vmatpush3.msra.mxu1 %v8863_v31  ;;  %v12920_v27 = vpop.f32.mrf.mxu0  ;;  %v13203_v31 = vld [vmem:[#allocation2] sm:$0xff] }
0x1e6a   :  { %12879 = vmatmul.mubr.msk.f32.gmra.mxu1 %vm2398_vm3, %v8650_v23  ;;  %12899 = vmatprep.subr.mxu1 %v12891_v7  ;;  %v8311_v23 = vpop.f32.mrf.mxu1 }
0x1e6b   :  { %12900 = vmatpush3.msra.mxu1 %v12891_v7  ;;  %v9069_v40 = vpop.f32.mrf.mxu0  ;;  %12881 = vmatprep.mubr.msk.f32.mxu1 %vm2398_vm3, %v8651_v30  ;;  %v9778_v7 = vld [vmem:[#allocation19 + $0x188] sm:$0xff] }
0x1e6c   :  { %12901 = vmatprep.subr.mxu1 %v8853_v19 }
0x1e6d   :  { %12902 = vmatpush3.msra.mxu1 %v8853_v19  ;;  %v12923_v42 = vpop.f32.mrf.mxu0  ;;  %v9779_v19 = vld [vmem:[#allocation19 + $0x190] sm:$0xff] }
0x1e6e   :  { %12882 = vmatmul.mubr.msk.f32.gmra.mxu1 %vm2398_vm3, %v8652_v38  ;;  %12903 = vmatprep.subr.mxu1 %v12888_v25 }
0x1e6f   :  { %12904 = vmatpush3.msra.mxu1 %v12888_v25  ;;  %v9079_v10 = vpop.f32.mrf.mxu0  ;;  %12907 = vmatprep.mubr.msk.f32.mxu1 %vm2398_vm3, %v8873_v32  ;;  %v9554_v25 = vld [vmem:[#allocation19 + $0x168] sm:$0xff] }
0x1e70   :  { %12905 = vmatprep.subr.mxu1 %v8843_v48 }
0x1e71   :  { %12906 = vmatpush3.msra.mxu1 %v8843_v48  ;;  %v12926_v58 = vpop.f32.mrf.mxu0  ;;  %v9555_v48 = vld [vmem:[#allocation19 + $0x170] sm:$0xff] }
0x1e72   :  { %12908 = vmatmul.mubr.msk.f32.vlgmr.msra.gmra.mxu1 %vm2398_vm3, %v8874_v15  ;;  %12927 = vmatprep.subr.mxu1 %v12926_v58 }
0x1e73   :  { %v9089_v13 = vpop.f32.mrf.mxu0  ;;  %12928 = vmatpush3.msra.mxu1 %v12926_v58  ;;  %12910 = vmatprep.mubr.msk.f32.mxu1 %vm2398_vm3, %v8875_v55 }
0x1e74   :  { %12929 = vmatprep.subr.mxu1 %v9089_v13 }
0x1e75   :  { %12930 = vmatpush3.msra.mxu1 %v9089_v13  ;;  %v12952_v46 = vpop.f32.mrf.mxu0 }
0x1e76   :  { %12911 = vmatmul.mubr.msk.f32.gmra.mxu1 %vm2398_vm3, %v8876_v6  ;;  %12931 = vmatprep.subr.mxu1 %v12923_v42 }
0x1e77   :  { %12932 = vmatpush3.msra.mxu1 %v12923_v42  ;;  %v9295_v14 = vpop.f32.mrf.mxu0  ;;  %12913 = vmatprep.mubr.msk.f32.mxu1 %vm2398_vm3, %v8877_v29 }
0x1e78   :  { %12933 = vmatprep.subr.mxu1 %v9079_v10 }
0x1e79   :  { %12934 = vmatpush3.msra.mxu1 %v9079_v10  ;;  %v12955_v11 = vpop.f32.mrf.mxu0 }
0x1e7a   :  { %12914 = vmatmul.mubr.msk.f32.gmra.mxu1 %vm2398_vm3, %v8878_v50  ;;  %12935 = vmatprep.subr.mxu1 %v12920_v27 }
0x1e7b   :  { %12936 = vmatpush3.msra.mxu1 %v12920_v27  ;;  %v9305_v39 = vpop.f32.mrf.mxu0  ;;  %12939 = vmatprep.mubr.msk.f32.mxu1 %vm2398_vm3, %v9099_v63 }
0x1e7c   :  { %12937 = vmatprep.subr.mxu1 %v9069_v40 }
0x1e7d   :  { %12938 = vmatpush3.msra.mxu1 %v9069_v40  ;;  %v12958_v52 = vpop.f32.mrf.mxu0 }
0x1e7e   :  { %12940 = vmatmul.mubr.msk.f32.vlgmr.msra.gmra.mxu1 %vm2398_vm3, %v9100_v3  ;;  %12959 = vmatprep.subr.mxu1 %v12958_v52 }
0x1e7f   :  { %v9315_v36 = vpop.f32.mrf.mxu0  ;;  %12960 = vmatpush3.msra.mxu1 %v12958_v52  ;;  %12942 = vmatprep.mubr.msk.f32.mxu1 %vm2398_vm3, %v9101_v4 }
0x1e80   :  { %12961 = vmatprep.subr.mxu1 %v9315_v36 }
0x1e81   :  { %12962 = vmatpush3.msra.mxu1 %v9315_v36  ;;  %v12984_v43 = vpop.f32.mrf.mxu0 }
0x1e82   :  { %12943 = vmatmul.mubr.msk.f32.gmra.mxu1 %vm2398_vm3, %v9102_v16  ;;  %12963 = vmatprep.subr.mxu1 %v12955_v11 }
0x1e83   :  { %12964 = vmatpush3.msra.mxu1 %v12955_v11  ;;  %v9521_v57 = vpop.f32.mrf.mxu0  ;;  %12945 = vmatprep.mubr.msk.f32.mxu1 %vm2398_vm3, %v9103_v56 }
0x1e84   :  { %12965 = vmatprep.subr.mxu1 %v9305_v39 }
0x1e85   :  { %12966 = vmatpush3.msra.mxu1 %v9305_v39  ;;  %v12987_v28 = vpop.f32.mrf.mxu0 }
0x1e86   :  { %12946 = vmatmul.mubr.msk.f32.gmra.mxu1 %vm2398_vm3, %v9104_v62  ;;  %12967 = vmatprep.subr.mxu1 %v12952_v46 }
0x1e87   :  { %12968 = vmatpush3.msra.mxu1 %v12952_v46  ;;  %v9531_v1 = vpop.f32.mrf.mxu0  ;;  %12971 = vmatprep.mubr.msk.f32.mxu1 %vm2398_vm3, %v9325_v45 }
0x1e88   :  { %12969 = vmatprep.subr.mxu1 %v9295_v14 }
0x1e89   :  { %12970 = vmatpush3.msra.mxu1 %v9295_v14  ;;  %v12990_v2 = vpop.f32.mrf.mxu0 }
0x1e8a   :  { %12972 = vmatmul.mubr.msk.f32.vlgmr.msra.gmra.mxu1 %vm2398_vm3, %v9326_v61  ;;  %12991 = vmatprep.subr.mxu1 %v12990_v2 }
0x1e8b   :  { %v9541_v59 = vpop.f32.mrf.mxu0  ;;  %12992 = vmatpush3.msra.mxu1 %v12990_v2  ;;  %12974 = vmatprep.mubr.msk.f32.mxu1 %vm2398_vm3, %v9327_v17 }
0x1e8c   :  { %12993 = vmatprep.subr.mxu1 %v9541_v59 }
0x1e8d   :  { %12994 = vmatpush3.msra.mxu1 %v9541_v59  ;;  %v13016_v12 = vpop.f32.mrf.mxu0 }
0x1e8e   :  { %12975 = vmatmul.mubr.msk.f32.gmra.mxu1 %vm2398_vm3, %v9328_v53  ;;  %12995 = vmatprep.subr.mxu1 %v12987_v28 }
0x1e8f   :  { %12996 = vmatpush3.msra.mxu1 %v12987_v28  ;;  %v9747_v51 = vpop.f32.mrf.mxu0  ;;  %12977 = vmatprep.mubr.msk.f32.mxu1 %vm2398_vm3, %v9329_v20 }
0x1e90   :  { %12997 = vmatprep.subr.mxu1 %v9531_v1 }
0x1e91   :  { %12998 = vmatpush3.msra.mxu1 %v9531_v1  ;;  %v13019_v60 = vpop.f32.mrf.mxu0 }
0x1e92   :  { %12978 = vmatmul.mubr.msk.f32.gmra.mxu1 %vm2398_vm3, %v9330_v9  ;;  %12999 = vmatprep.subr.mxu1 %v12984_v43 }
0x1e93   :  { %13000 = vmatpush3.msra.mxu1 %v12984_v43  ;;  %v9757_v35 = vpop.f32.mrf.mxu0  ;;  %13003 = vmatprep.mubr.msk.f32.mxu1 %vm2398_vm3, %v9551_v8 }
0x1e94   :  { %13001 = vmatprep.subr.mxu1 %v9521_v57 }
0x1e95   :  { %13002 = vmatpush3.msra.mxu1 %v9521_v57  ;;  %v13022_v54 = vpop.f32.mrf.mxu0 }
0x1e96   :  { %13004 = vmatmul.mubr.msk.f32.vlgmr.msra.gmra.mxu1 %vm2398_vm3, %v9552_v22  ;;  %13023 = vmatprep.subr.mxu1 %v13022_v54 }
0x1e97   :  { %v9767_v21 = vpop.f32.mrf.mxu0  ;;  %13024 = vmatpush3.msra.mxu1 %v13022_v54  ;;  %13006 = vmatprep.mubr.msk.f32.mxu1 %vm2398_vm3, %v9553_v44 }
0x1e98   :  { %13025 = vmatprep.subr.mxu1 %v9767_v21 }
0x1e99   :  { %13026 = vmatpush3.msra.mxu1 %v9767_v21 }
0x1e9a   :  { %13007 = vmatmul.mubr.msk.f32.gmra.mxu1 %vm2398_vm3, %v9554_v25  ;;  %13027 = vmatprep.subr.mxu1 %v13019_v60 }
0x1e9b   :  { %13028 = vmatpush3.msra.mxu1 %v13019_v60  ;;  %13009 = vmatprep.mubr.msk.f32.mxu1 %vm2398_vm3, %v9555_v48 }
0x1e9c   :  { %13029 = vmatprep.subr.mxu1 %v9757_v35 }
0x1e9d   :  { %13030 = vmatpush3.msra.mxu1 %v9757_v35 }
0x1e9e   :  { %13010 = vmatmul.mubr.msk.f32.gmra.mxu1 %vm2398_vm3, %v9556_v41  ;;  %13031 = vmatprep.subr.mxu1 %v13016_v12 }
0x1e9f   :  { %13032 = vmatpush3.msra.mxu1 %v13016_v12  ;;  %13035 = vmatprep.mubr.msk.f32.mxu1 %vm2398_vm3, %v9777_v5  ;;  %v8312_v12 = vadd.f32 %v8311_v23, %v14982_v26 }
0x1ea0   :  { %13033 = vmatprep.subr.mxu1 %v9747_v51 }
0x1ea1   :  { %13034 = vmatpush3.msra.mxu1 %v9747_v51 }
0x1ea2   :  { %13036 = vmatmul.mubr.msk.f32.vlgmr.msra.gmra.mxu1 %vm2398_vm3, %v9778_v7 }
0x1ea3   :  { %13038 = vmatprep.mubr.msk.f32.mxu1 %vm2398_vm3, %v9779_v19 }
0x1ea6   :  { %13039 = vmatmul.mubr.msk.f32.gmra.mxu1 %vm2398_vm3, %v9780_v24 }
0x1ea7   :  { %13041 = vmatprep.mubr.msk.f32.mxu1 %vm2398_vm3, %v9781_v37 }
0x1eaa   :  { %13042 = vmatmul.mubr.msk.f32.gmra.mxu1 %vm2398_vm3, %v9782_v33 }
0x1eab   :  { %13077 = vmatprep.mubr.msk.f32.mxu1 %vm2398_vm3, %v13203_v31 }
0x1f1a   :  { %v12845_v30 = vpop.f32.mrf.mxu1 }
0x1f1b   :  { %v8541_v27 = vadd.f32 %v12845_v30, %v14972_v34 }
0x1f1c   :  { %v8511_v40 = vpop.f32.mrf.mxu1 }
0x1f1d   :  { %v8540_v38 = vadd.f32 %v8511_v40, %v14974_v47 }
0x1f1e   :  { %v12848_v32 = vpop.f32.mrf.mxu1 }
0x1f1f   :  { %v8543_v42 = vadd.f32 %v12848_v32, %v14976_v49 }
0x1f20   :  { %v8521_v10 = vpop.f32.mrf.mxu1 }
0x1f21   :  { %v8542_v15 = vadd.f32 %v8521_v10, %v14978_v18 }
0x1f22   :  { %v12851_v55 = vpop.f32.mrf.mxu1 }
0x1f23   :  { %v8545_v51 = vadd.f32 %v12851_v55, %v14980_v0 }
0x1f24   :  { %v8531_v58 = vpop.f32.mrf.mxu1 }
0x1f25   :  { %v8544_v60 = vadd.f32 %v8531_v58, %v8312_v12 }
0x1f26   :  { %v12877_v13 = vpop.f32.mrf.mxu1 }
0x1f27   :  { %v8767_v6 = vadd.f32 %v12877_v13, %v8541_v27 }
0x1f28   :  { %v8737_v29 = vpop.f32.mrf.mxu1 }
0x1f29   :  { %v8766_v46 = vadd.f32 %v8737_v29, %v8540_v38  ;;  %v15034_v29 = vld [vmem:[#allocation21 + $0x28] sm:$0xff] }
0x1f2a   :  { %v12880_v14 = vpop.f32.mrf.mxu1 }
0x1f2b   :  { %v8769_v9 = vadd.f32 %v12880_v14, %v8543_v42 }
0x1f2c   :  { %v8747_v50 = vpop.f32.mrf.mxu1 }
0x1f2d   :  { %v8768_v35 = vadd.f32 %v8747_v50, %v8542_v15 }
0x1f2e   :  { %v12883_v63 = vpop.f32.mrf.mxu1 }
0x1f2f   :  { %v8771_v22 = vadd.f32 %v12883_v63, %v8545_v51 }
0x1f30   :  { %v8757_v11 = vpop.f32.mrf.mxu1 }
0x1f31   :  { %v8770_v21 = vadd.f32 %v8757_v11, %v8544_v60  ;;  %v13204_v60 = vld [vmem:[#allocation2 + $0x8] sm:$0xff] }
0x1f32   :  { %v12909_v34 = vpop.f32.mrf.mxu1 }
0x1f33   :  { %v8993_v5 = vadd.f32 %v12909_v34, %v8767_v6  ;;  %v15032_v6 = vld [vmem:[#allocation21 + $0x18] sm:$0xff] }
0x1f34   :  { %v8963_v39 = vpop.f32.mrf.mxu1 }
0x1f35   :  { %v8992_v26 = vadd.f32 %v8963_v39, %v8766_v46  ;;  %v15036_v39 = vld [vmem:[#allocation21 + $0x10] sm:$0xff] }
0x1f36   :  { %v12912_v3 = vpop.f32.mrf.mxu1 }
0x1f37   :  { %v8995_v44 = vadd.f32 %v12912_v3, %v8769_v9  ;;  %v15038_v3 = vld [vmem:[#allocation21 + $0x20] sm:$0xff] }
0x1f38   :  { %v8973_v47 = vpop.f32.mrf.mxu1 }
0x1f39   :  { %v8994_v25 = vadd.f32 %v8973_v47, %v8768_v35  ;;  %v13205_v35 = vld [vmem:[#allocation2 + $0x10] sm:$0xff] }
0x1f3a   :  { %v12915_v4 = vpop.f32.mrf.mxu1 }
0x1f3b   :  { %v8997_v48 = vadd.f32 %v12915_v4, %v8771_v22  ;;  %v13206_v22 = vld [vmem:[#allocation2 + $0x18] sm:$0xff] }
0x1f3c   :  { %v8983_v52 = vpop.f32.mrf.mxu1 }
0x1f3d   :  { %v8996_v19 = vadd.f32 %v8983_v52, %v8770_v21 }
0x1f3e   :  { %v12941_v49 = vpop.f32.mrf.mxu1 }
0x1f3f   :  { %v9219_v31 = vadd.f32 %v12941_v49, %v8993_v5 }
0x1f40   :  { %v9189_v36 = vpop.f32.mrf.mxu1 }
0x1f41   :  { %v9218_v38 = vadd.f32 %v9189_v36, %v8992_v26 }
0x1f42   :  { %v12944_v16 = vpop.f32.mrf.mxu1 }
0x1f43   :  { %v9221_v41 = vadd.f32 %v12944_v16, %v8995_v44  ;;  %v15042_v16 = vld [vmem:[#allocation21 + $0x8] sm:$0xff] }
0x1f44   :  { %v9199_v18 = vpop.f32.mrf.mxu1  ;;  %v13207_v44 = vld [vmem:[#allocation2 + $0x20] sm:$0xff] }
0x1f45   :  { %v9220_v24 = vadd.f32 %v9199_v18, %v8994_v25 }
0x1f46   :  { %v12947_v56 = vpop.f32.mrf.mxu1 }
0x1f47   :  { %v9223_v37 = vadd.f32 %v12947_v56, %v8997_v48 }
0x1f48   :  { %v9209_v43 = vpop.f32.mrf.mxu1 }
0x1f49   :  { %v9222_v23 = vadd.f32 %v9209_v43, %v8996_v19 }
0x1f4a   :  { %v12973_v57 = vpop.f32.mrf.mxu1 }
0x1f4b   :  { %v9445_v32 = vadd.f32 %v12973_v57, %v9219_v31 }
0x1f4c   :  { %v9415_v62 = vpop.f32.mrf.mxu1 }
0x1f4d   :  { %v9444_v13 = vadd.f32 %v9415_v62, %v9218_v38  ;;  %v15048_v62 = vld [vmem:[#allocation21] sm:$0xff] }
0x1f4e   :  { %v12976_v45 = vpop.f32.mrf.mxu1 }
0x1f4f   :  { %v9447_v33 = vadd.f32 %v12976_v45, %v9221_v41 }
0x1f50   :  { %v9425_v28 = vpop.f32.mrf.mxu1 }
0x1f51   :  { %v9446_v30 = vadd.f32 %v9425_v28, %v9220_v24 }
0x1f52   :  { %v12979_v1 = vpop.f32.mrf.mxu1 }
0x1f53   :  { %v9449_v27 = vadd.f32 %v12979_v1, %v9223_v37 }
0x1f54   :  { %v9435_v61 = vpop.f32.mrf.mxu1 }
0x1f55   :  { %v9448_v10 = vadd.f32 %v9435_v61, %v9222_v23 }
0x1f56   :  { %v13005_v17 = vpop.f32.mrf.mxu1 }
0x1f57   :  { %v9671_v46 = vadd.f32 %v13005_v17, %v9445_v32 }
0x1f58   :  { %v9641_v2 = vpop.f32.mrf.mxu1 }
0x1f59   :  { %v9670_v34 = vadd.f32 %v9641_v2, %v9444_v13 }
0x1f5a   :  { %v13008_v59 = vpop.f32.mrf.mxu1 }
0x1f5b   :  { %v9673_v40 = vadd.f32 %v13008_v59, %v9447_v33 }
0x1f5c   :  { %v9651_v53 = vpop.f32.mrf.mxu1 }
0x1f5d   :  { %v9672_v15 = vadd.f32 %v9651_v53, %v9446_v30 }
0x1f5e   :  { %v13011_v20 = vpop.f32.mrf.mxu1 }
0x1f5f   :  { %v9675_v55 = vadd.f32 %v13011_v20, %v9449_v27 }
0x1f60   :  { %v9661_v8 = vpop.f32.mrf.mxu1 }
0x1f61   :  { %v9674_v50 = vadd.f32 %v9661_v8, %v9448_v10 }
0x1f62   :  { %v13037_v54 = vpop.f32.mrf.mxu1 }
0x1f63   :  { %v9897_v4 = vadd.f32 %v13037_v54, %v9671_v46  ;;  %v13208_v54 = vld [vmem:[#allocation2 + $0x28] sm:$0xff] }
0x1f64   :  { %v9867_v7 = vpop.f32.mrf.mxu1 }
0x1f65   :  { %v9896_v18 = vadd.f32 %v9867_v7, %v9670_v34  ;;  %v9903_v45 = vadd.f32 %v9897_v4, %v15042_v16 }
0x1f66   :  { %v13040_v0 = vpop.f32.mrf.mxu1 }
0x1f67   :  { %v9899_v58 = vadd.f32 %v13040_v0, %v9673_v40  ;;  %v9902_v17 = vadd.f32 %v9896_v18, %v15048_v62  ;;  %v15066_v53 = vmax.f32 %v9903_v45, 0.0 }
0x1f68   :  { %v9877_v42 = vpop.f32.mrf.mxu1 }
0x1f69   :  { %v9898_v63 = vadd.f32 %v9877_v42, %v9672_v15  ;;  %v9905_v52 = vadd.f32 %v9899_v58, %v15032_v6  ;;  %v15072_v12 = vmax.f32 %v9902_v17, 0.0  ;;  %v9921_v9 = vmul.f32 %v15066_v53, %v15066_v53 }
0x1f6a   :  { %v13043_v14 = vpop.f32.mrf.mxu1 }
0x1f6b   :  { %v9901_v11 = vadd.f32 %v13043_v14, %v9675_v55  ;;  %v9904_v56 = vadd.f32 %v9898_v63, %v15036_v39  ;;  %v15051_v28 = vmax.f32 %v9905_v52, 0.0  ;;  %v9920_v8 = vmul.f32 %v15072_v12, %v15072_v12 }
0x1f6c   :  { %v9887_v47 = vpop.f32.mrf.mxu1 }
0x1f6d   :  { %v9907_v49 = vadd.f32 %v9901_v11, %v15034_v29  ;;  %v9900_v36 = vadd.f32 %v9887_v47, %v9674_v50  ;;  %v15060_v2 = vmax.f32 %v9904_v56, 0.0  ;;  %v9923_v20 = vmul.f32 %v15051_v28, %v15051_v28 }
0x1f6f   :  { %v15045_v43 = vmax.f32 %v9907_v49, 0.0  ;;  %v9906_v57 = vadd.f32 %v9900_v36, %v15038_v3  ;;  %v9922_v51 = vmul.f32 %v15060_v2, %v15060_v2 }
0x1f71   :  { %v15053_v1 = vmax.f32 %v9906_v57, 0.0  ;;  %13044 = vmatprep.subr.mxu0 %v15045_v43  ;;  %v9925_v61 = vmul.f32 %v15045_v43, %v15045_v43 }
0x1f72   :  { %13045 = vmatpush3.msra.mxu0 %v15045_v43 }
0x1f73   :  { %13046 = vmatprep.subr.mxu0 %v15053_v1  ;;  %13065 = vmatprep.subr.mxu1 %v9925_v61  ;;  %v9924_v59 = vmul.f32 %v15053_v1, %v15053_v1 }
0x1f74   :  { %13047 = vmatpush3.msra.mxu0 %v15053_v1  ;;  %13066 = vmatpush3.msra.mxu1 %v9925_v61 }
0x1f75   :  { %13048 = vmatprep.subr.mxu0 %v15051_v28  ;;  %13067 = vmatprep.subr.mxu1 %v9924_v59 }
0x1f76   :  { %13049 = vmatpush3.msra.mxu0 %v15051_v28  ;;  %13068 = vmatpush3.msra.mxu1 %v9924_v59 }
0x1f77   :  { %13050 = vmatprep.subr.mxu0 %v15060_v2  ;;  %13069 = vmatprep.subr.mxu1 %v9923_v20 }
0x1f78   :  { %13051 = vmatpush3.msra.mxu0 %v15060_v2  ;;  %13070 = vmatpush3.msra.mxu1 %v9923_v20 }
0x1f79   :  { %13052 = vmatprep.subr.mxu0 %v15066_v53  ;;  %13071 = vmatprep.subr.mxu1 %v9922_v51 }
0x1f7a   :  { %13053 = vmatpush3.msra.mxu0 %v15066_v53  ;;  %13072 = vmatpush3.msra.mxu1 %v9922_v51 }
0x1f7b   :  { %13054 = vmatprep.subr.mxu0 %v15072_v12  ;;  %13073 = vmatprep.subr.mxu1 %v9921_v9 }
0x1f7c   :  { %13055 = vmatpush3.msra.mxu0 %v15072_v12  ;;  %13074 = vmatpush3.msra.mxu1 %v9921_v9 }
0x1f7d   :  { %13057 = vmatmul.mubr.msk.f32.vlgmr.msra.gmra.mxu0 %vm2398_vm3, %v13204_v60  ;;  %13075 = vmatprep.subr.mxu1 %v9920_v8 }
0x1f7e   :  { %13076 = vmatpush3.msra.mxu1 %v9920_v8  ;;  %13059 = vmatprep.mubr.msk.f32.mxu0 %vm2398_vm3, %v13205_v35 }
0x1f7f   :  { %13078 = vmatmul.mubr.msk.f32.vlgmr.msra.gmra.mxu1 %vm2398_vm3, %v13204_v60 }
0x1f80   :  { %13080 = vmatprep.mubr.msk.f32.mxu1 %vm2398_vm3, %v13205_v35 }
0x1f81   :  { %13060 = vmatmul.mubr.msk.f32.gmra.mxu0 %vm2398_vm3, %v13206_v22 }
0x1f82   :  { %13062 = vmatprep.mubr.msk.f32.mxu0 %vm2398_vm3, %v13207_v44 }
0x1f83   :  { %13081 = vmatmul.mubr.msk.f32.gmra.mxu1 %vm2398_vm3, %v13206_v22 }
0x1f84   :  { %13083 = vmatprep.mubr.msk.f32.mxu1 %vm2398_vm3, %v13207_v44 }
0x1f85   :  { %13063 = vmatmul.mubr.msk.f32.gmra.mxu0 %vm2398_vm3, %v13208_v54 }
0x1f87   :  { %13084 = vmatmul.mubr.msk.f32.gmra.mxu1 %vm2398_vm3, %v13208_v54 }
0x203d   :  { %v13058_v21 = vpop.f32.mrf.mxu0 }
0x203e   :  { %v15096_v25 = vmul.f32 0.5, %v13058_v21 }
0x203f   :  { %v9998_v48 = vpop.f32.mrf.mxu0  ;;  %v13079_v41 = vpop.f32.mrf.mxu1 }
0x2040   :  { %v10135_v5 = vmul.f32 %v15096_v25, %v15096_v25  ;;  %v15100_v7 = vmul.f32 0.5, %v9998_v48  ;;  %v10129_v19 = vmul.f32 0.5, %v13079_v41 }
0x2041   :  { %v13061_v24 = vpop.f32.mrf.mxu0  ;;  %v10099_v37 = vpop.f32.mrf.mxu1 }
0x2042   :  { %v10134_v33 = vmul.f32 %v15100_v7, %v15100_v7  ;;  %v10141_v26 = vsub.f32 %v10129_v19, %v10135_v5  ;;  %v15104_v31 = vmul.f32 0.5, %v13061_v24  ;;  %v10128_v0 = vmul.f32 0.5, %v10099_v37 }
0x2043   :  { %v10008_v23 = vpop.f32.mrf.mxu0  ;;  %v13082_v30 = vpop.f32.mrf.mxu1 }
0x2044   :  { %v10147_v27 = vmax.f32 %v10141_v26, 0.0  ;;  %v10137_v40 = vmul.f32 %v15104_v31, %v15104_v31  ;;  %v10140_v38 = vsub.f32 %v10128_v0, %v10134_v33  ;;  %v15108_v32 = vmul.f32 0.5, %v10008_v23 }
0x2045   :  { %v10131_v42 = vmul.f32 0.5, %v13082_v30  ;;  %v13064_v10 = vpop.f32.mrf.mxu0  ;;  %v10109_v15 = vpop.f32.mrf.mxu1 }
0x2046   :  { %v10153_v55 = vadd.f32 1e-05, %v10147_v27  ;;  %v10146_v58 = vmax.f32 %v10140_v38, 0.0  ;;  %v10136_v13 = vmul.f32 %v15108_v32, %v15108_v32  ;;  %v15112_v14 = vmul.f32 0.5, %v13064_v10 }
0x2047   :  { %v10143_v46 = vsub.f32 %v10131_v42, %v10137_v40  ;;  %v10130_v50 = vmul.f32 0.5, %v10109_v15  ;;  %v10018_v63 = vpop.f32.mrf.mxu0  ;;  %v13085_v11 = vpop.f32.mrf.mxu1 }
0x2048   :  { %13171 = vrsqrt.f32 %v10153_v55  ;;  %v10152_v34 = vadd.f32 1e-05, %v10146_v58  ;;  %v10139_v47 = vmul.f32 %v15112_v14, %v15112_v14  ;;  %v15116_v4 = vmul.f32 0.5, %v10018_v63 }
0x2049   :  { %v10149_v52 = vmax.f32 %v10143_v46, 0.0  ;;  %v10142_v49 = vsub.f32 %v10130_v50, %v10136_v13  ;;  %v10133_v36 = vmul.f32 0.5, %v13085_v11  ;;  %v10119_v18 = vpop.f32.mrf.mxu1 }
0x204a   :  { %13173 = vrsqrt.f32 %v10152_v34  ;;  %v10138_v56 = vmul.f32 %v15116_v4, %v15116_v4  ;;  %v10132_v57 = vmul.f32 0.5, %v10119_v18 }
0x204b   :  { %v10155_v45 = vadd.f32 1e-05, %v10149_v52  ;;  %v10148_v61 = vmax.f32 %v10142_v49, 0.0  ;;  %v10145_v17 = vsub.f32 %v10133_v36, %v10139_v47 }
0x204c   :  { %v10144_v59 = vsub.f32 %v10132_v57, %v10138_v56 }
0x204d   :  { %13175 = vrsqrt.f32 %v10155_v45  ;;  %v10154_v20 = vadd.f32 1e-05, %v10148_v61  ;;  %v10151_v51 = vmax.f32 %v10145_v17, 0.0 }
0x204e   :  { %v10150_v9 = vmax.f32 %v10144_v59, 0.0 }
0x204f   :  { %13177 = vrsqrt.f32 %v10154_v20  ;;  %v10157_v8 = vadd.f32 1e-05, %v10151_v51 }
0x2050   :  { %v10156_v60 = vadd.f32 1e-05, %v10150_v9 }
0x2051   :  { %13179 = vrsqrt.f32 %v10157_v8 }
0x2052   :  { %13181 = vrsqrt.f32 %v10156_v60 }
0x2055   :  { %v13172_v35 = vpop.eup %13171 }
0x2056   :  { %10172 = vrot.lane.b32.xlu1 %v13172_v35, %s13501_s0 }
0x2057   :  { %v13174_v22 = vpop.eup %13173 }
0x2058   :  { %10170 = vrot.lane.b32.xlu0 %v13174_v22, %s13501_s0 }
0x205a   :  { %v13176_v44 = vpop.eup %13175 }
0x205b   :  { %10176 = vrot.lane.b32.xlu1 %v13176_v44, %s13501_s0 }
0x205c   :  { %v13178_v54 = vpop.eup %13177 }
0x205d   :  { %10174 = vrot.lane.b32.xlu0 %v13178_v54, %s13501_s0 }
0x205e   :  { %v13180_v21 = vpop.eup %13179 }
0x205f   :  { %v13182_v48 = vpop.eup %13181  ;;  %10180 = vrot.lane.b32.xlu1 %v13180_v21, %s13501_s0 }
0x2061   :  { %10178 = vrot.lane.b32.xlu0 %v13182_v48, %s13501_s0 }
0x20c8   :  { %v10173_v41 = vpop.permute.xlu1 %10172 }
0x20c9   :  { %v10189_v5 = vmul.f32 %v10173_v41, %v15042_v16 }
0x20ca   :  { %v10171_v19 = vpop.permute.xlu0 %10170 }
0x20cb   :  { %v10188_v24 = vmul.f32 %v10171_v19, %v15048_v62  ;;  %10202 = vrot.lane.b32.xlu1 %v10189_v5, %s13502_s23 }
0x20cd   :  { %v10177_v37 = vpop.permute.xlu1 %10176  ;;  %10200 = vrot.lane.b32.xlu0 %v10188_v24, %s13502_s23 }
0x20ce   :  { %v10191_v33 = vmul.f32 %v10177_v37, %v15032_v6 }
0x20cf   :  { %v10175_v26 = vpop.permute.xlu0 %10174 }
0x20d0   :  { %v10190_v0 = vmul.f32 %v10175_v26, %v15036_v39  ;;  %10206 = vrot.lane.b32.xlu1 %v10191_v33, %s13502_s23 }
0x20d1   :  { %v10181_v23 = vpop.permute.xlu1 %10180 }
0x20d2   :  { %v10193_v30 = vmul.f32 %v10181_v23, %v15034_v29  ;;  %10204 = vrot.lane.b32.xlu0 %v10190_v0, %s13502_s23 }
0x20d3   :  { %v10179_v27 = vpop.permute.xlu0 %10178 }
0x20d4   :  { %v10192_v40 = vmul.f32 %v10179_v27, %v15038_v3  ;;  %10210 = vrot.lane.b32.xlu1 %v10193_v30, %s13502_s23 }
0x20d6   :  { %10208 = vrot.lane.b32.xlu0 %v10192_v40, %s13502_s23 }
0x213d   :  { %v10203_v38 = vpop.permute.xlu1 %10202 }
0x213e   :  { %v10219_v42 = vmul.f32 %v10203_v38, %v15096_v25 }
0x213f   :  { %v10201_v10 = vpop.permute.xlu0 %10200 }
0x2140   :  { %v10218_v15 = vmul.f32 %v10201_v10, %v15100_v7  ;;  %10232 = vrot.lane.b32.xlu1 %v10219_v42, %s13504_s3  ;;  %v10254_v57 = vmul.f32 %v10201_v10, %v15072_v12 }
0x2142   :  { %v10207_v55 = vpop.permute.xlu1 %10206  ;;  %10230 = vrot.lane.b32.xlu0 %v10218_v15, %s13504_s3 }
0x2143   :  { %v10221_v58 = vmul.f32 %v10207_v55, %v15104_v31 }
0x2144   :  { %v10205_v13 = vpop.permute.xlu0 %10204 }
0x2145   :  { %v10220_v46 = vmul.f32 %v10205_v13, %v15108_v32  ;;  %10236 = vrot.lane.b32.xlu1 %v10221_v58, %s13504_s3 }
0x2146   :  { %v10211_v50 = vpop.permute.xlu1 %10210 }
0x2147   :  { %v10223_v63 = vmul.f32 %v10211_v50, %v15112_v14  ;;  %10234 = vrot.lane.b32.xlu0 %v10220_v46, %s13504_s3  ;;  %v10259_v17 = vmul.f32 %v10211_v50, %v15045_v43 }
0x2148   :  { %v10209_v25 = vpop.permute.xlu0 %10208 }
0x2149   :  { %v10222_v7 = vmul.f32 %v10209_v25, %v15116_v4  ;;  %10240 = vrot.lane.b32.xlu1 %v10223_v63, %s13504_s3 }
0x214b   :  { %10238 = vrot.lane.b32.xlu0 %v10222_v7, %s13504_s3 }
0x21b2   :  { %v10233_v11 = vpop.permute.xlu1 %10232 }
0x21b3   :  { %v10249_v31 = vsub.f32 %v15042_v16, %v10233_v11 }
0x21b4   :  { %v10231_v34 = vpop.permute.xlu0 %10230 }
0x21b5   :  { %v10248_v32 = vsub.f32 %v15048_v62, %v10231_v34  ;;  %10268 = vrot.lane.b32.xlu1 %v10249_v31, %s13506_s24  ;;  %v10255_v62 = vmul.f32 %v10203_v38, %v15066_v53  ;;  %v10256_v53 = vmul.f32 %v10205_v13, %v15060_v2 }
0x21b7   :  { %v10237_v47 = vpop.permute.xlu1 %10236  ;;  %10266 = vrot.lane.b32.xlu0 %v10248_v32, %s13506_s24 }
0x21b8   :  { %v10251_v14 = vsub.f32 %v15032_v6, %v10237_v47 }
0x21b9   :  { %v10235_v52 = vpop.permute.xlu0 %10234 }
0x21ba   :  { %v10250_v49 = vsub.f32 %v15036_v39, %v10235_v52  ;;  %10272 = vrot.lane.b32.xlu1 %v10251_v14, %s13506_s24  ;;  %v10257_v39 = vmul.f32 %v10207_v55, %v15051_v28  ;;  %v10258_v28 = vmul.f32 %v10209_v25, %v15053_v1 }
0x21bb   :  { %v10241_v4 = vpop.permute.xlu1 %10240 }
0x21bc   :  { %v10253_v36 = vsub.f32 %v15034_v29, %v10241_v4  ;;  %10270 = vrot.lane.b32.xlu0 %v10250_v49, %s13506_s24 }
0x21bd   :  { %v10239_v18 = vpop.permute.xlu0 %10238 }
0x21be   :  { %v10252_v16 = vsub.f32 %v15038_v3, %v10239_v18  ;;  %10276 = vrot.lane.b32.xlu1 %v10253_v36, %s13506_s24 }
0x21c0   :  { %10274 = vrot.lane.b32.xlu0 %v10252_v16, %s13506_s24 }
0x2227   :  { %v10269_v56 = vpop.permute.xlu1 %10268 }
0x2228   :  { %v10285_v6 = vadd.f32 %v10269_v56, %v10255_v62 }
0x2229   :  { %v10267_v45 = vpop.permute.xlu0 %10266 }
0x222a   :  { %10292 = vst.msk [vmem:[%s15200_s14 + $0x8] sm:$0xff] %vm10290_vm7, %v10285_v6  ;;  %v10284_v29 = vadd.f32 %v10267_v45, %v10254_v57 }
0x222c   :  { %10291 = vst.msk [vmem:[%s15200_s14] sm:$0xff] %vm10290_vm7, %v10284_v29  ;;  %v10273_v3 = vpop.permute.xlu1 %10272 }
0x222d   :  { %v10287_v61 = vadd.f32 %v10273_v3, %v10257_v39 }
0x222e   :  { %v10271_v12 = vpop.permute.xlu0 %10270 }
0x222f   :  { %10294 = vst.msk [vmem:[%s15200_s14 + $0x18] sm:$0xff] %vm10290_vm7, %v10287_v61  ;;  %v10286_v59 = vadd.f32 %v10271_v12, %v10256_v53 }
0x2230   :  { %v10277_v20 = vpop.permute.xlu1 %10276 }
0x2231   :  { %10293 = vst.msk [vmem:[%s15200_s14 + $0x10] sm:$0xff] %vm10290_vm7, %v10286_v59  ;;  %v10289_v51 = vadd.f32 %v10277_v20, %v10259_v17 }
0x2232   :  { %v10275_v2 = vpop.permute.xlu0 %10274 }
0x2233   :  { %10296 = vst.msk [vmem:[%s15200_s14 + $0x28] sm:$0xff] %vm10290_vm7, %v10289_v51  ;;  %v10288_v43 = vadd.f32 %v10275_v2, %v10258_v28 }
0x2235   :  { %10295 = vst.msk [vmem:[%s15200_s14 + $0x20] sm:$0xff] %vm10290_vm7, %v10288_v43 }
0x2236   :  { %10301 = vsyncpa [#allocation3], 1 }
0x2237   :  { %10302 = vsyncpa [#allocation5], 1 }
0x2238   :  { %10303 = vsyncpa [#allocation8], 1 }
0x2239   :  { %10304 = vsyncpa [#allocation11], 1 }
0x223a   :  { %10305 = vsyncpa [#allocation14], 1 }
0x223b   :  { %10306 = vsyncpa [#allocation17], 1 }
0x223c   :  { %10307 = vsyncpa [#allocation20], 1 }

</bundles_post_ra>
